<compile_context>
chip_gen: v6e
topology: v6e:2x2x1
jax: 0.10.0
libtpu: 0.0.40
codegen_flags: <defaults>
</compile_context>

<pallas_src>
import functools

import numpy as np
import jax
import jax.numpy as jnp
from jax import lax
from jax.experimental import pallas as pl
from jax.experimental.pallas import tpu as pltpu

LATENT = 32
EPS_BN = 1e-5


def _round_up(x, m):
    return (x + m - 1) // m * m


def _tile_m(M, row_bytes, *, min_split=256, max_block_bytes=4 << 20):
    """Adaptive, byte-aware row tiling.

    Small M: one full-array block (no padding, no slicing).  Larger M: >=2
    row tiles (8-aligned) so both v7x TensorCores get work via the
    "parallel" grid axis, with the per-buffer block footprint capped so the
    same code scales to large batch without VMEM OOM."""
    if M < min_split and M * row_bytes <= max_block_bytes:
        return M, M
    tm = min(512, _round_up(pl.cdiv(M, 2), 8))
    while tm > 8 and tm * row_bytes > max_block_bytes:
        tm = _round_up(tm // 2, 8)
    tm = max(tm, 8)
    return _round_up(M, tm), tm


# ------------------------------ Pallas kernel -------------------------------

def _fused_matmul_kernel(*refs, tm, m_valid, has_pre, has_bias,
                         want_stats, mask_rows):
    """o = [ReLU(a*scale+shift)] @ b (+bias); optionally emits per-tile
    (sum, sum_sq) rows used for the following BatchNorm statistics."""
    it = iter(refs)
    a_ref = next(it)
    b_ref = next(it)
    scale_ref = next(it) if has_pre else None
    shift_ref = next(it) if has_pre else None
    bias_ref = next(it) if has_bias else None
    o_ref = next(it)
    stats_ref = next(it) if want_stats else None

    a = a_ref[...]
    if has_pre:                       # previous layer's BN affine + ReLU
        a = jnp.maximum(a * scale_ref[...] + shift_ref[...], 0.0)
    y = jnp.dot(a.astype(jnp.bfloat16), b_ref[...],
                preferred_element_type=jnp.float32)
    if has_bias:
        y = y + bias_ref[...]
    o_ref[...] = y.astype(o_ref.dtype)

    if want_stats:                    # stats from the f32 y, pre-downcast
        ys = y
        if mask_rows:                 # exclude padded rows from batch stats
            rows = (lax.broadcasted_iota(jnp.int32, (tm, 1), 0)
                    + pl.program_id(0) * tm)
            ys = jnp.where(rows < m_valid, y, 0.0)
        s = jnp.sum(ys, axis=0, keepdims=True)
        ss = jnp.sum(ys * ys, axis=0, keepdims=True)
        stats_ref[...] = jnp.concatenate([s, ss], axis=0)[None]


# ------------------------------ Pallas wrapper -------------------------------

def fused_matmul(a, b_bf16, *, bias=None, pre=None, want_stats=False,
                 out_dtype=jnp.float32):
    """a:(M,K) @ b:(K,N) bf16 [+bias], optional fused input affine+ReLU and
    optional per-channel (sum, sum_sq) side output for the next BatchNorm."""
    M, K = a.shape
    N = b_bf16.shape[1]
    row_bytes = K * a.dtype.itemsize + N * np.dtype(out_dtype).itemsize
    Mp, TM = _tile_m(M, row_bytes)
    if Mp != M:
        a = jnp.pad(a, ((0, Mp - M), (0, 0)))
    grid = (Mp // TM,)

    inputs = [a, b_bf16]
    in_specs = [pl.BlockSpec((TM, K), lambda i: (i, 0)),
                pl.BlockSpec((K, N), lambda i: (0, 0))]
    if pre is not None:
        scale, shift = pre
        inputs += [scale.reshape(1, K).astype(jnp.float32),
                   shift.reshape(1, K).astype(jnp.float32)]
        in_specs += [pl.BlockSpec((1, K), lambda i: (0, 0)),
                     pl.BlockSpec((1, K), lambda i: (0, 0))]
    if bias is not None:
        inputs.append(bias.reshape(1, N).astype(jnp.float32))
        in_specs.append(pl.BlockSpec((1, N), lambda i: (0, 0)))

    out_shape = [jax.ShapeDtypeStruct((Mp, N), out_dtype)]
    out_specs = [pl.BlockSpec((TM, N), lambda i: (i, 0))]
    if want_stats:
        out_shape.append(jax.ShapeDtypeStruct((grid[0], 2, N), jnp.float32))
        out_specs.append(pl.BlockSpec((1, 2, N), lambda i: (i, 0, 0)))

    kern = functools.partial(
        _fused_matmul_kernel, tm=TM, m_valid=M,
        has_pre=pre is not None, has_bias=bias is not None,
        want_stats=want_stats,
        mask_rows=(Mp != M) and (pre is not None) and want_stats)

    res = pl.pallas_call(
        kern,
        grid=grid,
        in_specs=in_specs,
        out_specs=tuple(out_specs),
        out_shape=tuple(out_shape),
        compiler_params=pltpu.CompilerParams(
            dimension_semantics=("parallel",)),
    )(*inputs)

    y = res[0][:M] if Mp != M else res[0]
    if want_stats:
        st = res[1]
        return y, st[:, 0, :].sum(axis=0), st[:, 1, :].sum(axis=0)
    return y


# -------------------------------- glue layers --------------------------------

def _bn_coeffs(mean, var, gamma, beta):
    scale = gamma * lax.rsqrt(var + EPS_BN)
    return scale, beta - mean * scale


def _im2col_nhwc(x, k, stride):
    """(N,H,W,C) -> (N*Ho*Wo, k*k*C); patch column layout is (kh, kw, c)."""
    # TODO(synk): taps could become an 'arbitrary' grid axis with a VMEM
    # accumulator to avoid materializing the patch matrix in HBM.
    N, H, W, C = x.shape
    Ho = (H - k) // stride + 1
    Wo = (W - k) // stride + 1
    slabs = [x[:, i:i + stride * Ho:stride, j:j + stride * Wo:stride, :]
             for i in range(k) for j in range(k)]
    patches = jnp.stack(slabs, axis=3)                  # (N,Ho,Wo,k*k,C)
    return patches.reshape(N * Ho * Wo, k * k * C), N, Ho, Wo


def conv_bn(x_nhwc, w_mat, gamma, beta, pre, k=4):
    """Conv2d(k=4, s=2; bias cancels in BN) + training-mode BN statistics.
    Returns the RAW conv output (NHWC, bf16) plus the BN (scale, shift) that
    the NEXT fused matmul applies together with ReLU."""
    a, N, Ho, Wo = _im2col_nhwc(x_nhwc, k, 2)
    pre_cols = None
    if pre is not None:   # broadcast per-channel scale/shift to patch columns
        pre_cols = (jnp.tile(pre[0], k * k), jnp.tile(pre[1], k * k))
    y, s, ss = fused_matmul(a, w_mat, pre=pre_cols, want_stats=True,
                            out_dtype=jnp.bfloat16)
    M = a.shape[0]
    mean = s / M
    var = jnp.maximum(ss / M - mean * mean, 0.0)        # biased var (BN fwd)
    C_out = w_mat.shape[1]
    return y.reshape(N, Ho, Wo, C_out), _bn_coeffs(mean, var, gamma, beta)


def _col2im_parity(col, Ho, Wo):
    """Exact stride-2 / k=4 col2im without scatter: output pixels split into
    four (row%2, col%2) parity classes; each parity plane is a plain sum of
    four shifted slabs, then one interleaving reshape rebuilds the output."""
    N, H, W, k, _, C = col.shape
    Hp, Wp = H + 2, W + 2            # covers output_padding in {0, 1}
    cols = col.astype(jnp.float32)
    planes = []
    for p in range(2):
        row = []
        for q in range(2):
            acc = jnp.zeros((N, Hp, Wp, C), jnp.float32)
            for dh in range(2):
                for dw in range(2):
                    slab = cols[:, :, :, p + 2 * dh, q + 2 * dw, :]
                    acc = acc + jnp.pad(
                        slab, ((0, 0), (dh, Hp - H - dh),
                               (dw, Wp - W - dw), (0, 0)))
            row.append(acc)
        planes.append(row)
    inter = jnp.stack([jnp.stack(r, axis=3) for r in planes], axis=2)
    out = inter.reshape(N, 2 * Hp, 2 * Wp, C)           # out[2i+p, 2j+q]
    return out[:, :Ho, :Wo, :]


def deconv_bn(x_nhwc, w_mat, gamma, beta, pre, out_padding=0, k=4):
    """ConvTranspose2d(k=4, s=2, output_padding; bias cancels in BN) lowered
    as (x @ W) -> parity-class col2im (exact FLOPs, no zero-dilated input,
    no strided scatter-adds)."""
    N, H, W, C_in = x_nhwc.shape
    C_out = w_mat.shape[1] // (k * k)
    a = x_nhwc.reshape(N * H * W, C_in)
    col = fused_matmul(a, w_mat, pre=pre)
    col = col.reshape(N, H, W, k, k, C_out)
    Ho = (H - 1) * 2 + k + out_padding
    Wo = (W - 1) * 2 + k + out_padding
    out = _col2im_parity(col, Ho, Wo)
    # col2im sums overlap, so BN moments must be taken on the assembled
    # output; tensors here are tiny and this fuses into one XLA pass.
    mean = jnp.mean(out, axis=(0, 1, 2))
    var = jnp.var(out, axis=(0, 1, 2))
    return out, _bn_coeffs(mean, var, gamma, beta)


# -------------------------------- parameters ---------------------------------

def init_params(key, latent=LATENT):
    keys = jax.random.split(key, 11)

    def conv_block(k, cin, cout):
        kw, kb = jax.random.split(k)
        bound = (cin * 16) ** -0.5
        w = jax.random.uniform(kw, (cout, cin, 4, 4), jnp.float32, -bound, bound)
        b = jax.random.uniform(kb, (cout,), jnp.float32, -bound, bound)
        return (w, b, jnp.ones((cout,), jnp.float32), jnp.zeros((cout,), jnp.float32))

    def deconv_block(k, cin, cout):
        kw, kb = jax.random.split(k)
        bound = (cin * 16) ** -0.5
        w = jax.random.uniform(kw, (cin, cout, 4, 4), jnp.float32, -bound, bound)
        b = jax.random.uniform(kb, (cout,), jnp.float32, -bound, bound)
        return (w, b, jnp.ones((cout,), jnp.float32), jnp.zeros((cout,), jnp.float32))

    def lin(k, fin, fout):
        kw, kb = jax.random.split(k)
        bound = fin ** -0.5
        w = jax.random.uniform(kw, (fout, fin), jnp.float32, -bound, bound)
        b = jax.random.uniform(kb, (fout,), jnp.float32, -bound, bound)
        return (w, b)

    return {
        "enc": [conv_block(keys[0], 3, 32), conv_block(keys[1], 32, 32),
                conv_block(keys[2], 32, 64), conv_block(keys[3], 64, 64)],
        "fc_mu": lin(keys[4], 256, latent),
        "fc_var": lin(keys[5], 256, latent),
        "fc_z": lin(keys[6], latent, 256),
        "dec": [deconv_block(keys[7], 64, 64), deconv_block(keys[8], 64, 32),
                deconv_block(keys[9], 32, 32), deconv_block(keys[10], 32, 3)],
    }


def prepare_params(params):
    """One-time weight layout/cast prep (kept out of the per-call forward):
    matmul-ready (K,N) bf16 weights, fused fc_mu|fc_var, f32 biases.
    Conv/deconv biases are dropped — they cancel exactly in the following BN."""
    k = 4
    enc = []
    for (w, _b, g, be) in params["enc"]:
        c_out, c_in = w.shape[0], w.shape[1]
        w_mat = w.transpose(2, 3, 1, 0).reshape(k * k * c_in, c_out)
        enc.append((w_mat.astype(jnp.bfloat16), g, be))
    w_mu, b_mu = params["fc_mu"]
    w_var, b_var = params["fc_var"]
    w_cat = jnp.concatenate([w_mu.T, w_var.T], axis=1).astype(jnp.bfloat16)
    b_cat = jnp.concatenate([b_mu, b_var])
    w_z, b_z = params["fc_z"]
    dec = []
    for (w_t, _b, g, be) in params["dec"]:
        c_in, c_out = w_t.shape[0], w_t.shape[1]
        w_mat = w_t.transpose(0, 2, 3, 1).reshape(c_in, k * k * c_out)
        dec.append((w_mat.astype(jnp.bfloat16), g, be))
    return {"enc": enc, "fc_cat": (w_cat, b_cat),
            "fc_z": (w_z.T.astype(jnp.bfloat16), b_z), "dec": dec}


# ---------------------------------- forward ----------------------------------

def vae_forward(prepped, x_nchw, eps_key):
    N = x_nchw.shape[0]
    h = x_nchw.transpose(0, 2, 3, 1)                 # NCHW -> NHWC (once)

    # ---- encode ----
    pre = None
    for (w_mat, g, be) in prepped["enc"]:
        h, pre = conv_bn(h, w_mat, g, be, pre)

    # flatten in PyTorch .view(-1, 256) order (C, H, W)
    hw = h.shape[1] * h.shape[2]
    h_flat = h.transpose(0, 3, 1, 2).reshape(N, 256)
    pre_flat = (jnp.repeat(pre[0], hw), jnp.repeat(pre[1], hw))

    # fc_mu and fc_var fused into one matmul (N = 2*latent)
    w_cat, b_cat = prepped["fc_cat"]
    mu_logvar = fused_matmul(h_flat, w_cat, bias=b_cat, pre=pre_flat)
    mu, logvar = mu_logvar[:, :LATENT], mu_logvar[:, LATENT:]

    # ---- reparameterised sample ----
    std = jnp.exp(0.5 * logvar)
    eps = jax.random.normal(eps_key, std.shape, std.dtype)
    z = mu + eps * std

    # ---- decode ----
    w_z, b_z = prepped["fc_z"]
    d = fused_matmul(z, w_z, bias=b_z)                        # (N, 256)
    d = d.reshape(N, 64, 2, 2).transpose(0, 2, 3, 1)          # NHWC
    pre = None
    out_pads = (0, 0, 1, 0)
    for (w_mat, g, be), op in zip(prepped["dec"], out_pads):
        d, pre = deconv_bn(d, w_mat, g, be, pre, out_padding=op)

    # last block: BatchNorm affine + ReLU (from _deconv) then nn.Sigmoid,
    # fused by XLA into one elementwise pass over the (tiny) output.
    rx = jax.nn.sigmoid(jnp.maximum(d * pre[0] + pre[1], 0.0))
    return rx.transpose(0, 3, 1, 2), mu, logvar      # back to NCHW


if __name__ == "__main__":
    key = jax.random.PRNGKey(0)
    pkey, xkey, ekey = jax.random.split(key, 3)
    params = init_params(pkey)
    prepped = prepare_params(params)
    # Smallest input consistent with the module: the encoder must end at
    # 64 x 2 x 2 = 256 features, so x is (B, 3, 64, 64) NCHW with B = 2.
    x = jax.random.uniform(xkey, (2, 3, 64, 64), jnp.float32)

    fwd = jax.jit(vae_forward)
    rx, mu, logvar = fwd(prepped, x, ekey)
    jax.block_until_ready((rx, mu, logvar))

    assert rx.shape == (2, 3, 64, 64)
    assert mu.shape == (2, LATENT) and logvar.shape == (2, LATENT)
    assert bool(jnp.all(jnp.isfinite(rx))) and bool(jnp.all((rx >= 0) & (rx <= 1)))
    assert bool(jnp.all(jnp.isfinite(mu))) and bool(jnp.all(jnp.isfinite(logvar)))
    print("KERNEL_OK")
</pallas_src>

<mosaic_0001>
module attributes {stable_mosaic.version = 11 : i64} {
  func.func @_fused_matmul_kernel(%arg0: i32, %arg1: memref<512x48xf32, #tpu.memory_space<vmem>>, %arg2: memref<48x32xbf16, #tpu.memory_space<vmem>>, %arg3: memref<512x32xbf16, #tpu.memory_space<vmem>>, %arg4: memref<1x2x32xf32, #tpu.memory_space<vmem>>) attributes {dimension_semantics = [#tpu.dimension_semantics<parallel>], iteration_bounds = array<i64: 4>, scalar_prefetch = 0 : i64, scratch_operands = 0 : i64, tpu.core_type = #tpu.core_type<tc>, window_params = [{transform_indices = @transform_0, window_bounds = array<i64: 512, 48>}, {pipeline_mode = #tpu.pipeline_mode<synchronous>, transform_indices = @transform_1, window_bounds = array<i64: 48, 32>}, {transform_indices = @transform_2, window_bounds = array<i64: 512, 32>}, {transform_indices = @transform_3, window_bounds = array<i64: 1, 2, 32>}]} {
    %c0 = arith.constant 0 : index
    %c0_0 = arith.constant 0 : index
    %0 = vector.load %arg1[%c0, %c0_0] : memref<512x48xf32, #tpu.memory_space<vmem>>, vector<512x48xf32>
    %1 = arith.truncf %0 : vector<512x48xf32> to vector<512x48xbf16>
    %c0_1 = arith.constant 0 : index
    %c0_2 = arith.constant 0 : index
    %2 = vector.load %arg2[%c0_1, %c0_2] : memref<48x32xbf16, #tpu.memory_space<vmem>>, vector<48x32xbf16>
    %cst = arith.constant dense<0.000000e+00> : vector<512x32xf32>
    %3 = tpu.matmul %1, %2, %cst {dimension_numbers = #tpu.dot_dimension_numbers<[1], [0], [0], [1], [0, 0, 1, 1], [], []>} : vector<512x48xbf16>, vector<48x32xbf16>, vector<512x32xf32> -> vector<512x32xf32>
    %4 = arith.truncf %3 : vector<512x32xf32> to vector<512x32xbf16>
    %c0_3 = arith.constant 0 : index
    %c0_4 = arith.constant 0 : index
    %5 = vector.load %arg3[%c0_3, %c0_4] : memref<512x32xbf16, #tpu.memory_space<vmem>>, vector<512x32xbf16>
    tpu.vector_store %arg3[%c0_3, %c0_4], %4 {strides = array<i32>} : memref<512x32xbf16, #tpu.memory_space<vmem>>, vector<512x32xbf16>,
    %cst_5 = arith.constant dense<0.000000e+00> : vector<32xf32>
    %6 = vector.multi_reduction <add>, %3, %cst_5 [0] : vector<512x32xf32> to vector<32xf32>
    %7 = vector.shape_cast %6 : vector<32xf32> to vector<1x32xf32>
    %8 = arith.mulf %3, %3 : vector<512x32xf32>
    %cst_6 = arith.constant dense<0.000000e+00> : vector<32xf32>
    %9 = vector.multi_reduction <add>, %8, %cst_6 [0] : vector<512x32xf32> to vector<32xf32>
    %10 = vector.shape_cast %9 : vector<32xf32> to vector<1x32xf32>
    %11 = tpu.concatenate %7, %10 in 0 : vector<1x32xf32>, vector<1x32xf32> -> vector<2x32xf32>
    %12 = vector.shape_cast %11 : vector<2x32xf32> to vector<1x2x32xf32>
    %c0_7 = arith.constant 0 : index
    %c0_8 = arith.constant 0 : index
    %c0_9 = arith.constant 0 : index
    %13 = vector.load %arg4[%c0_7, %c0_8, %c0_9] : memref<1x2x32xf32, #tpu.memory_space<vmem>>, vector<1x2x32xf32>
    tpu.vector_store %arg4[%c0_7, %c0_8, %c0_9], %12 {strides = array<i32>} : memref<1x2x32xf32, #tpu.memory_space<vmem>>, vector<1x2x32xf32>,
    return
  }
  func.func @transform_0(%arg0: i32) -> (i32, i32) {
    %c0_i32 = arith.constant 0 : i32
    %c0_i32_0 = arith.constant 0 : i32
    return %arg0, %c0_i32 : i32, i32
  }
  func.func @transform_1(%arg0: i32) -> (i32, i32) {
    %c0_i32 = arith.constant 0 : i32
    %c0_i32_0 = arith.constant 0 : i32
    %c0_i32_1 = arith.constant 0 : i32
    return %c0_i32, %c0_i32_0 : i32, i32
  }
  func.func @transform_2(%arg0: i32) -> (i32, i32) {
    %c0_i32 = arith.constant 0 : i32
    %c0_i32_0 = arith.constant 0 : i32
    return %arg0, %c0_i32 : i32, i32
  }
  func.func @transform_3(%arg0: i32) -> (i32, i32, i32) {
    %c0_i32 = arith.constant 0 : i32
    %c0_i32_0 = arith.constant 0 : i32
    %c0_i32_1 = arith.constant 0 : i32
    return %arg0, %c0_i32, %c0_i32_0 : i32, i32, i32
  }
}

module attributes {stable_mosaic.version = 11 : i64} {
  func.func @_fused_matmul_kernel(%arg0: i32, %arg1: memref<200x512xbf16, #tpu.memory_space<vmem>>, %arg2: memref<512x32xbf16, #tpu.memory_space<vmem>>, %arg3: memref<1x512xf32, #tpu.memory_space<vmem>>, %arg4: memref<1x512xf32, #tpu.memory_space<vmem>>, %arg5: memref<200x32xbf16, #tpu.memory_space<vmem>>, %arg6: memref<1x2x32xf32, #tpu.memory_space<vmem>>) attributes {dimension_semantics = [#tpu.dimension_semantics<parallel>], iteration_bounds = array<i64: 2>, scalar_prefetch = 0 : i64, scratch_operands = 0 : i64, tpu.core_type = #tpu.core_type<tc>, window_params = [{transform_indices = @transform_0, window_bounds = array<i64: 200, 512>}, {pipeline_mode = #tpu.pipeline_mode<synchronous>, transform_indices = @transform_1, window_bounds = array<i64: 512, 32>}, {pipeline_mode = #tpu.pipeline_mode<synchronous>, transform_indices = @transform_2, window_bounds = array<i64: 1, 512>}, {pipeline_mode = #tpu.pipeline_mode<synchronous>, transform_indices = @transform_3, window_bounds = array<i64: 1, 512>}, {transform_indices = @transform_4, window_bounds = array<i64: 200, 32>}, {transform_indices = @transform_5, window_bounds = array<i64: 1, 2, 32>}]} {
    %c0 = arith.constant 0 : index
    %c0_0 = arith.constant 0 : index
    %0 = vector.load %arg1[%c0, %c0_0] : memref<200x512xbf16, #tpu.memory_space<vmem>>, vector<200x512xbf16>
    %c0_1 = arith.constant 0 : index
    %c0_2 = arith.constant 0 : index
    %1 = vector.load %arg3[%c0_1, %c0_2] : memref<1x512xf32, #tpu.memory_space<vmem>>, vector<1x512xf32>
    %2 = arith.extf %0 : vector<200x512xbf16> to vector<200x512xf32>
    %3 = vector.broadcast %1 : vector<1x512xf32> to vector<200x512xf32>
    %4 = arith.mulf %2, %3 : vector<200x512xf32>
    %c0_3 = arith.constant 0 : index
    %c0_4 = arith.constant 0 : index
    %5 = vector.load %arg4[%c0_3, %c0_4] : memref<1x512xf32, #tpu.memory_space<vmem>>, vector<1x512xf32>
    %6 = vector.broadcast %5 : vector<1x512xf32> to vector<200x512xf32>
    %7 = arith.addf %4, %6 : vector<200x512xf32>
    %cst = arith.constant 0.000000e+00 : f32
    %8 = vector.broadcast %cst : f32 to vector<200x512xf32>
    %9 = arith.maximumf %7, %8 : vector<200x512xf32>
    %10 = arith.truncf %9 : vector<200x512xf32> to vector<200x512xbf16>
    %c0_5 = arith.constant 0 : index
    %c0_6 = arith.constant 0 : index
    %11 = vector.load %arg2[%c0_5, %c0_6] : memref<512x32xbf16, #tpu.memory_space<vmem>>, vector<512x32xbf16>
    %cst_7 = arith.constant dense<0.000000e+00> : vector<200x32xf32>
    %12 = tpu.matmul %10, %11, %cst_7 {dimension_numbers = #tpu.dot_dimension_numbers<[1], [0], [0], [1], [0, 0, 1, 1], [], []>} : vector<200x512xbf16>, vector<512x32xbf16>, vector<200x32xf32> -> vector<200x32xf32>
    %13 = arith.truncf %12 : vector<200x32xf32> to vector<200x32xbf16>
    %c0_8 = arith.constant 0 : index
    %c0_9 = arith.constant 0 : index
    %14 = vector.load %arg5[%c0_8, %c0_9] : memref<200x32xbf16, #tpu.memory_space<vmem>>, vector<200x32xbf16>
    tpu.vector_store %arg5[%c0_8, %c0_9], %13 {strides = array<i32>} : memref<200x32xbf16, #tpu.memory_space<vmem>>, vector<200x32xbf16>,
    %15 = tpu.iota {dimensions = array<i32: 0>} : vector<200x1xi32>
    %c200_i32 = arith.constant 200 : i32
    %16 = arith.muli %arg0, %c200_i32 : i32
    %17 = vector.broadcast %16 : i32 to vector<200x1xi32>
    %18 = arith.addi %15, %17 : vector<200x1xi32>
    %c392_i32 = arith.constant 392 : i32
    %19 = vector.broadcast %c392_i32 : i32 to vector<200x1xi32>
    %20 = arith.cmpi slt, %18, %19 : vector<200x1xi32>
    %cst_10 = arith.constant 0.000000e+00 : f32
    %21 = vector.shape_cast %20 : vector<200x1xi1> to vector<200x1xi1>
    %22 = vector.broadcast %21 : vector<200x1xi1> to vector<200x32xi1>
    %23 = vector.broadcast %cst_10 : f32 to vector<200x32xf32>
    %24 = arith.select %22, %12, %23 : vector<200x32xi1>, vector<200x32xf32>
    %cst_11 = arith.constant dense<0.000000e+00> : vector<32xf32>
    %25 = vector.multi_reduction <add>, %24, %cst_11 [0] : vector<200x32xf32> to vector<32xf32>
    %26 = vector.shape_cast %25 : vector<32xf32> to vector<1x32xf32>
    %27 = arith.mulf %24, %24 : vector<200x32xf32>
    %cst_12 = arith.constant dense<0.000000e+00> : vector<32xf32>
    %28 = vector.multi_reduction <add>, %27, %cst_12 [0] : vector<200x32xf32> to vector<32xf32>
    %29 = vector.shape_cast %28 : vector<32xf32> to vector<1x32xf32>
    %30 = tpu.concatenate %26, %29 in 0 : vector<1x32xf32>, vector<1x32xf32> -> vector<2x32xf32>
    %31 = vector.shape_cast %30 : vector<2x32xf32> to vector<1x2x32xf32>
    %c0_13 = arith.constant 0 : index
    %c0_14 = arith.constant 0 : index
    %c0_15 = arith.constant 0 : index
    %32 = vector.load %arg6[%c0_13, %c0_14, %c0_15] : memref<1x2x32xf32, #tpu.memory_space<vmem>>, vector<1x2x32xf32>
    tpu.vector_store %arg6[%c0_13, %c0_14, %c0_15], %31 {strides = array<i32>} : memref<1x2x32xf32, #tpu.memory_space<vmem>>, vector<1x2x32xf32>,
    return
  }
  func.func @transform_0(%arg0: i32) -> (i32, i32) {
    %c0_i32 = arith.constant 0 : i32
    %c0_i32_0 = arith.constant 0 : i32
    return %arg0, %c0_i32 : i32, i32
  }
  func.func @transform_1(%arg0: i32) -> (i32, i32) {
    %c0_i32 = arith.constant 0 : i32
    %c0_i32_0 = arith.constant 0 : i32
    %c0_i32_1 = arith.constant 0 : i32
    return %c0_i32, %c0_i32_0 : i32, i32
  }
  func.func @transform_2(%arg0: i32) -> (i32, i32) {
    %c0_i32 = arith.constant 0 : i32
    %c0_i32_0 = arith.constant 0 : i32
    %c0_i32_1 = arith.constant 0 : i32
    return %c0_i32, %c0_i32_0 : i32, i32
  }
  func.func @transform_3(%arg0: i32) -> (i32, i32) {
    %c0_i32 = arith.constant 0 : i32
    %c0_i32_0 = arith.constant 0 : i32
    %c0_i32_1 = arith.constant 0 : i32
    return %c0_i32, %c0_i32_0 : i32, i32
  }
  func.func @transform_4(%arg0: i32) -> (i32, i32) {
    %c0_i32 = arith.constant 0 : i32
    %c0_i32_0 = arith.constant 0 : i32
    return %arg0, %c0_i32 : i32, i32
  }
  func.func @transform_5(%arg0: i32) -> (i32, i32, i32) {
    %c0_i32 = arith.constant 0 : i32
    %c0_i32_0 = arith.constant 0 : i32
    %c0_i32_1 = arith.constant 0 : i32
    return %arg0, %c0_i32, %c0_i32_0 : i32, i32, i32
  }
}

module attributes {stable_mosaic.version = 11 : i64} {
  func.func @_fused_matmul_kernel(%arg0: i32, %arg1: memref<72x512xbf16, #tpu.memory_space<vmem>>, %arg2: memref<512x64xbf16, #tpu.memory_space<vmem>>, %arg3: memref<1x512xf32, #tpu.memory_space<vmem>>, %arg4: memref<1x512xf32, #tpu.memory_space<vmem>>, %arg5: memref<72x64xbf16, #tpu.memory_space<vmem>>, %arg6: memref<1x2x64xf32, #tpu.memory_space<vmem>>) attributes {dimension_semantics = [#tpu.dimension_semantics<parallel>], iteration_bounds = array<i64: 1>, scalar_prefetch = 0 : i64, scratch_operands = 0 : i64, tpu.core_type = #tpu.core_type<tc>, window_params = [{transform_indices = @transform_0, window_bounds = array<i64: 72, 512>}, {pipeline_mode = #tpu.pipeline_mode<synchronous>, transform_indices = @transform_1, window_bounds = array<i64: 512, 64>}, {pipeline_mode = #tpu.pipeline_mode<synchronous>, transform_indices = @transform_2, window_bounds = array<i64: 1, 512>}, {pipeline_mode = #tpu.pipeline_mode<synchronous>, transform_indices = @transform_3, window_bounds = array<i64: 1, 512>}, {transform_indices = @transform_4, window_bounds = array<i64: 72, 64>}, {transform_indices = @transform_5, window_bounds = array<i64: 1, 2, 64>}]} {
    %c0 = arith.constant 0 : index
    %c0_0 = arith.constant 0 : index
    %0 = vector.load %arg1[%c0, %c0_0] : memref<72x512xbf16, #tpu.memory_space<vmem>>, vector<72x512xbf16>
    %c0_1 = arith.constant 0 : index
    %c0_2 = arith.constant 0 : index
    %1 = vector.load %arg3[%c0_1, %c0_2] : memref<1x512xf32, #tpu.memory_space<vmem>>, vector<1x512xf32>
    %2 = arith.extf %0 : vector<72x512xbf16> to vector<72x512xf32>
    %3 = vector.broadcast %1 : vector<1x512xf32> to vector<72x512xf32>
    %4 = arith.mulf %2, %3 : vector<72x512xf32>
    %c0_3 = arith.constant 0 : index
    %c0_4 = arith.constant 0 : index
    %5 = vector.load %arg4[%c0_3, %c0_4] : memref<1x512xf32, #tpu.memory_space<vmem>>, vector<1x512xf32>
    %6 = vector.broadcast %5 : vector<1x512xf32> to vector<72x512xf32>
    %7 = arith.addf %4, %6 : vector<72x512xf32>
    %cst = arith.constant 0.000000e+00 : f32
    %8 = vector.broadcast %cst : f32 to vector<72x512xf32>
    %9 = arith.maximumf %7, %8 : vector<72x512xf32>
    %10 = arith.truncf %9 : vector<72x512xf32> to vector<72x512xbf16>
    %c0_5 = arith.constant 0 : index
    %c0_6 = arith.constant 0 : index
    %11 = vector.load %arg2[%c0_5, %c0_6] : memref<512x64xbf16, #tpu.memory_space<vmem>>, vector<512x64xbf16>
    %cst_7 = arith.constant dense<0.000000e+00> : vector<72x64xf32>
    %12 = tpu.matmul %10, %11, %cst_7 {dimension_numbers = #tpu.dot_dimension_numbers<[1], [0], [0], [1], [0, 0, 1, 1], [], []>} : vector<72x512xbf16>, vector<512x64xbf16>, vector<72x64xf32> -> vector<72x64xf32>
    %13 = arith.truncf %12 : vector<72x64xf32> to vector<72x64xbf16>
    %c0_8 = arith.constant 0 : index
    %c0_9 = arith.constant 0 : index
    %14 = vector.load %arg5[%c0_8, %c0_9] : memref<72x64xbf16, #tpu.memory_space<vmem>>, vector<72x64xbf16>
    tpu.vector_store %arg5[%c0_8, %c0_9], %13 {strides = array<i32>} : memref<72x64xbf16, #tpu.memory_space<vmem>>, vector<72x64xbf16>,
    %cst_10 = arith.constant dense<0.000000e+00> : vector<64xf32>
    %15 = vector.multi_reduction <add>, %12, %cst_10 [0] : vector<72x64xf32> to vector<64xf32>
    %16 = vector.shape_cast %15 : vector<64xf32> to vector<1x64xf32>
    %17 = arith.mulf %12, %12 : vector<72x64xf32>
    %cst_11 = arith.constant dense<0.000000e+00> : vector<64xf32>
    %18 = vector.multi_reduction <add>, %17, %cst_11 [0] : vector<72x64xf32> to vector<64xf32>
    %19 = vector.shape_cast %18 : vector<64xf32> to vector<1x64xf32>
    %20 = tpu.concatenate %16, %19 in 0 : vector<1x64xf32>, vector<1x64xf32> -> vector<2x64xf32>
    %21 = vector.shape_cast %20 : vector<2x64xf32> to vector<1x2x64xf32>
    %c0_12 = arith.constant 0 : index
    %c0_13 = arith.constant 0 : index
    %c0_14 = arith.constant 0 : index
    %22 = vector.load %arg6[%c0_12, %c0_13, %c0_14] : memref<1x2x64xf32, #tpu.memory_space<vmem>>, vector<1x2x64xf32>
    tpu.vector_store %arg6[%c0_12, %c0_13, %c0_14], %21 {strides = array<i32>} : memref<1x2x64xf32, #tpu.memory_space<vmem>>, vector<1x2x64xf32>,
    return
  }
  func.func @transform_0(%arg0: i32) -> (i32, i32) {
    %c0_i32 = arith.constant 0 : i32
    %c0_i32_0 = arith.constant 0 : i32
    return %arg0, %c0_i32 : i32, i32
  }
  func.func @transform_1(%arg0: i32) -> (i32, i32) {
    %c0_i32 = arith.constant 0 : i32
    %c0_i32_0 = arith.constant 0 : i32
    %c0_i32_1 = arith.constant 0 : i32
    return %c0_i32, %c0_i32_0 : i32, i32
  }
  func.func @transform_2(%arg0: i32) -> (i32, i32) {
    %c0_i32 = arith.constant 0 : i32
    %c0_i32_0 = arith.constant 0 : i32
    %c0_i32_1 = arith.constant 0 : i32
    return %c0_i32, %c0_i32_0 : i32, i32
  }
  func.func @transform_3(%arg0: i32) -> (i32, i32) {
    %c0_i32 = arith.constant 0 : i32
    %c0_i32_0 = arith.constant 0 : i32
    %c0_i32_1 = arith.constant 0 : i32
    return %c0_i32, %c0_i32_0 : i32, i32
  }
  func.func @transform_4(%arg0: i32) -> (i32, i32) {
    %c0_i32 = arith.constant 0 : i32
    %c0_i32_0 = arith.constant 0 : i32
    return %arg0, %c0_i32 : i32, i32
  }
  func.func @transform_5(%arg0: i32) -> (i32, i32, i32) {
    %c0_i32 = arith.constant 0 : i32
    %c0_i32_0 = arith.constant 0 : i32
    %c0_i32_1 = arith.constant 0 : i32
    return %arg0, %c0_i32, %c0_i32_0 : i32, i32, i32
  }
}

module attributes {stable_mosaic.version = 11 : i64} {
  func.func @_fused_matmul_kernel(%arg0: i32, %arg1: memref<8x1024xbf16, #tpu.memory_space<vmem>>, %arg2: memref<1024x64xbf16, #tpu.memory_space<vmem>>, %arg3: memref<1x1024xf32, #tpu.memory_space<vmem>>, %arg4: memref<1x1024xf32, #tpu.memory_space<vmem>>, %arg5: memref<8x64xbf16, #tpu.memory_space<vmem>>, %arg6: memref<1x2x64xf32, #tpu.memory_space<vmem>>) attributes {dimension_semantics = [#tpu.dimension_semantics<parallel>], iteration_bounds = array<i64: 1>, scalar_prefetch = 0 : i64, scratch_operands = 0 : i64, tpu.core_type = #tpu.core_type<tc>, window_params = [{transform_indices = @transform_0, window_bounds = array<i64: 8, 1024>}, {pipeline_mode = #tpu.pipeline_mode<synchronous>, transform_indices = @transform_1, window_bounds = array<i64: 1024, 64>}, {pipeline_mode = #tpu.pipeline_mode<synchronous>, transform_indices = @transform_2, window_bounds = array<i64: 1, 1024>}, {pipeline_mode = #tpu.pipeline_mode<synchronous>, transform_indices = @transform_3, window_bounds = array<i64: 1, 1024>}, {transform_indices = @transform_4, window_bounds = array<i64: 8, 64>}, {transform_indices = @transform_5, window_bounds = array<i64: 1, 2, 64>}]} {
    %c0 = arith.constant 0 : index
    %c0_0 = arith.constant 0 : index
    %0 = vector.load %arg1[%c0, %c0_0] : memref<8x1024xbf16, #tpu.memory_space<vmem>>, vector<8x1024xbf16>
    %c0_1 = arith.constant 0 : index
    %c0_2 = arith.constant 0 : index
    %1 = vector.load %arg3[%c0_1, %c0_2] : memref<1x1024xf32, #tpu.memory_space<vmem>>, vector<1x1024xf32>
    %2 = arith.extf %0 : vector<8x1024xbf16> to vector<8x1024xf32>
    %3 = vector.broadcast %1 : vector<1x1024xf32> to vector<8x1024xf32>
    %4 = arith.mulf %2, %3 : vector<8x1024xf32>
    %c0_3 = arith.constant 0 : index
    %c0_4 = arith.constant 0 : index
    %5 = vector.load %arg4[%c0_3, %c0_4] : memref<1x1024xf32, #tpu.memory_space<vmem>>, vector<1x1024xf32>
    %6 = vector.broadcast %5 : vector<1x1024xf32> to vector<8x1024xf32>
    %7 = arith.addf %4, %6 : vector<8x1024xf32>
    %cst = arith.constant 0.000000e+00 : f32
    %8 = vector.broadcast %cst : f32 to vector<8x1024xf32>
    %9 = arith.maximumf %7, %8 : vector<8x1024xf32>
    %10 = arith.truncf %9 : vector<8x1024xf32> to vector<8x1024xbf16>
    %c0_5 = arith.constant 0 : index
    %c0_6 = arith.constant 0 : index
    %11 = vector.load %arg2[%c0_5, %c0_6] : memref<1024x64xbf16, #tpu.memory_space<vmem>>, vector<1024x64xbf16>
    %cst_7 = arith.constant dense<0.000000e+00> : vector<8x64xf32>
    %12 = tpu.matmul %10, %11, %cst_7 {dimension_numbers = #tpu.dot_dimension_numbers<[1], [0], [0], [1], [0, 0, 1, 1], [], []>} : vector<8x1024xbf16>, vector<1024x64xbf16>, vector<8x64xf32> -> vector<8x64xf32>
    %13 = arith.truncf %12 : vector<8x64xf32> to vector<8x64xbf16>
    %c0_8 = arith.constant 0 : index
    %c0_9 = arith.constant 0 : index
    %14 = vector.load %arg5[%c0_8, %c0_9] : memref<8x64xbf16, #tpu.memory_space<vmem>>, vector<8x64xbf16>
    tpu.vector_store %arg5[%c0_8, %c0_9], %13 {strides = array<i32>} : memref<8x64xbf16, #tpu.memory_space<vmem>>, vector<8x64xbf16>,
    %cst_10 = arith.constant dense<0.000000e+00> : vector<64xf32>
    %15 = vector.multi_reduction <add>, %12, %cst_10 [0] : vector<8x64xf32> to vector<64xf32>
    %16 = vector.shape_cast %15 : vector<64xf32> to vector<1x64xf32>
    %17 = arith.mulf %12, %12 : vector<8x64xf32>
    %cst_11 = arith.constant dense<0.000000e+00> : vector<64xf32>
    %18 = vector.multi_reduction <add>, %17, %cst_11 [0] : vector<8x64xf32> to vector<64xf32>
    %19 = vector.shape_cast %18 : vector<64xf32> to vector<1x64xf32>
    %20 = tpu.concatenate %16, %19 in 0 : vector<1x64xf32>, vector<1x64xf32> -> vector<2x64xf32>
    %21 = vector.shape_cast %20 : vector<2x64xf32> to vector<1x2x64xf32>
    %c0_12 = arith.constant 0 : index
    %c0_13 = arith.constant 0 : index
    %c0_14 = arith.constant 0 : index
    %22 = vector.load %arg6[%c0_12, %c0_13, %c0_14] : memref<1x2x64xf32, #tpu.memory_space<vmem>>, vector<1x2x64xf32>
    tpu.vector_store %arg6[%c0_12, %c0_13, %c0_14], %21 {strides = array<i32>} : memref<1x2x64xf32, #tpu.memory_space<vmem>>, vector<1x2x64xf32>,
    return
  }
  func.func @transform_0(%arg0: i32) -> (i32, i32) {
    %c0_i32 = arith.constant 0 : i32
    %c0_i32_0 = arith.constant 0 : i32
    return %arg0, %c0_i32 : i32, i32
  }
  func.func @transform_1(%arg0: i32) -> (i32, i32) {
    %c0_i32 = arith.constant 0 : i32
    %c0_i32_0 = arith.constant 0 : i32
    %c0_i32_1 = arith.constant 0 : i32
    return %c0_i32, %c0_i32_0 : i32, i32
  }
  func.func @transform_2(%arg0: i32) -> (i32, i32) {
    %c0_i32 = arith.constant 0 : i32
    %c0_i32_0 = arith.constant 0 : i32
    %c0_i32_1 = arith.constant 0 : i32
    return %c0_i32, %c0_i32_0 : i32, i32
  }
  func.func @transform_3(%arg0: i32) -> (i32, i32) {
    %c0_i32 = arith.constant 0 : i32
    %c0_i32_0 = arith.constant 0 : i32
    %c0_i32_1 = arith.constant 0 : i32
    return %c0_i32, %c0_i32_0 : i32, i32
  }
  func.func @transform_4(%arg0: i32) -> (i32, i32) {
    %c0_i32 = arith.constant 0 : i32
    %c0_i32_0 = arith.constant 0 : i32
    return %arg0, %c0_i32 : i32, i32
  }
  func.func @transform_5(%arg0: i32) -> (i32, i32, i32) {
    %c0_i32 = arith.constant 0 : i32
    %c0_i32_0 = arith.constant 0 : i32
    %c0_i32_1 = arith.constant 0 : i32
    return %arg0, %c0_i32, %c0_i32_0 : i32, i32, i32
  }
}

module attributes {stable_mosaic.version = 11 : i64} {
  func.func @_fused_matmul_kernel(%arg0: i32, %arg1: memref<2x256xbf16, #tpu.memory_space<vmem>>, %arg2: memref<256x64xbf16, #tpu.memory_space<vmem>>, %arg3: memref<1x256xf32, #tpu.memory_space<vmem>>, %arg4: memref<1x256xf32, #tpu.memory_space<vmem>>, %arg5: memref<1x64xf32, #tpu.memory_space<vmem>>, %arg6: memref<2x64xf32, #tpu.memory_space<vmem>>) attributes {dimension_semantics = [#tpu.dimension_semantics<parallel>], iteration_bounds = array<i64: 1>, scalar_prefetch = 0 : i64, scratch_operands = 0 : i64, tpu.core_type = #tpu.core_type<tc>, window_params = [{transform_indices = @transform_0, window_bounds = array<i64: 2, 256>}, {pipeline_mode = #tpu.pipeline_mode<synchronous>, transform_indices = @transform_1, window_bounds = array<i64: 256, 64>}, {pipeline_mode = #tpu.pipeline_mode<synchronous>, transform_indices = @transform_2, window_bounds = array<i64: 1, 256>}, {pipeline_mode = #tpu.pipeline_mode<synchronous>, transform_indices = @transform_3, window_bounds = array<i64: 1, 256>}, {pipeline_mode = #tpu.pipeline_mode<synchronous>, transform_indices = @transform_4, window_bounds = array<i64: 1, 64>}, {transform_indices = @transform_5, window_bounds = array<i64: 2, 64>}]} {
    %c0 = arith.constant 0 : index
    %c0_0 = arith.constant 0 : index
    %0 = vector.load %arg1[%c0, %c0_0] : memref<2x256xbf16, #tpu.memory_space<vmem>>, vector<2x256xbf16>
    %c0_1 = arith.constant 0 : index
    %c0_2 = arith.constant 0 : index
    %1 = vector.load %arg3[%c0_1, %c0_2] : memref<1x256xf32, #tpu.memory_space<vmem>>, vector<1x256xf32>
    %2 = arith.extf %0 : vector<2x256xbf16> to vector<2x256xf32>
    %3 = vector.broadcast %1 : vector<1x256xf32> to vector<2x256xf32>
    %4 = arith.mulf %2, %3 : vector<2x256xf32>
    %c0_3 = arith.constant 0 : index
    %c0_4 = arith.constant 0 : index
    %5 = vector.load %arg4[%c0_3, %c0_4] : memref<1x256xf32, #tpu.memory_space<vmem>>, vector<1x256xf32>
    %6 = vector.broadcast %5 : vector<1x256xf32> to vector<2x256xf32>
    %7 = arith.addf %4, %6 : vector<2x256xf32>
    %cst = arith.constant 0.000000e+00 : f32
    %8 = vector.broadcast %cst : f32 to vector<2x256xf32>
    %9 = arith.maximumf %7, %8 : vector<2x256xf32>
    %10 = arith.truncf %9 : vector<2x256xf32> to vector<2x256xbf16>
    %c0_5 = arith.constant 0 : index
    %c0_6 = arith.constant 0 : index
    %11 = vector.load %arg2[%c0_5, %c0_6] : memref<256x64xbf16, #tpu.memory_space<vmem>>, vector<256x64xbf16>
    %cst_7 = arith.constant dense<0.000000e+00> : vector<2x64xf32>
    %12 = tpu.matmul %10, %11, %cst_7 {dimension_numbers = #tpu.dot_dimension_numbers<[1], [0], [0], [1], [0, 0, 1, 1], [], []>} : vector<2x256xbf16>, vector<256x64xbf16>, vector<2x64xf32> -> vector<2x64xf32>
    %c0_8 = arith.constant 0 : index
    %c0_9 = arith.constant 0 : index
    %13 = vector.load %arg5[%c0_8, %c0_9] : memref<1x64xf32, #tpu.memory_space<vmem>>, vector<1x64xf32>
    %14 = vector.broadcast %13 : vector<1x64xf32> to vector<2x64xf32>
    %15 = arith.addf %12, %14 : vector<2x64xf32>
    %c0_10 = arith.constant 0 : index
    %c0_11 = arith.constant 0 : index
    %16 = vector.load %arg6[%c0_10, %c0_11] : memref<2x64xf32, #tpu.memory_space<vmem>>, vector<2x64xf32>
    tpu.vector_store %arg6[%c0_10, %c0_11], %15 {strides = array<i32>} : memref<2x64xf32, #tpu.memory_space<vmem>>, vector<2x64xf32>,
    return
  }
  func.func @transform_0(%arg0: i32) -> (i32, i32) {
    %c0_i32 = arith.constant 0 : i32
    %c0_i32_0 = arith.constant 0 : i32
    return %arg0, %c0_i32 : i32, i32
  }
  func.func @transform_1(%arg0: i32) -> (i32, i32) {
    %c0_i32 = arith.constant 0 : i32
    %c0_i32_0 = arith.constant 0 : i32
    %c0_i32_1 = arith.constant 0 : i32
    return %c0_i32, %c0_i32_0 : i32, i32
  }
  func.func @transform_2(%arg0: i32) -> (i32, i32) {
    %c0_i32 = arith.constant 0 : i32
    %c0_i32_0 = arith.constant 0 : i32
    %c0_i32_1 = arith.constant 0 : i32
    return %c0_i32, %c0_i32_0 : i32, i32
  }
  func.func @transform_3(%arg0: i32) -> (i32, i32) {
    %c0_i32 = arith.constant 0 : i32
    %c0_i32_0 = arith.constant 0 : i32
    %c0_i32_1 = arith.constant 0 : i32
    return %c0_i32, %c0_i32_0 : i32, i32
  }
  func.func @transform_4(%arg0: i32) -> (i32, i32) {
    %c0_i32 = arith.constant 0 : i32
    %c0_i32_0 = arith.constant 0 : i32
    %c0_i32_1 = arith.constant 0 : i32
    return %c0_i32, %c0_i32_0 : i32, i32
  }
  func.func @transform_5(%arg0: i32) -> (i32, i32) {
    %c0_i32 = arith.constant 0 : i32
    %c0_i32_0 = arith.constant 0 : i32
    return %arg0, %c0_i32 : i32, i32
  }
}

module attributes {stable_mosaic.version = 11 : i64} {
  func.func @_fused_matmul_kernel(%arg0: i32, %arg1: memref<2x32xf32, #tpu.memory_space<vmem>>, %arg2: memref<32x256xbf16, #tpu.memory_space<vmem>>, %arg3: memref<1x256xf32, #tpu.memory_space<vmem>>, %arg4: memref<2x256xf32, #tpu.memory_space<vmem>>) attributes {dimension_semantics = [#tpu.dimension_semantics<parallel>], iteration_bounds = array<i64: 1>, scalar_prefetch = 0 : i64, scratch_operands = 0 : i64, tpu.core_type = #tpu.core_type<tc>, window_params = [{transform_indices = @transform_0, window_bounds = array<i64: 2, 32>}, {pipeline_mode = #tpu.pipeline_mode<synchronous>, transform_indices = @transform_1, window_bounds = array<i64: 32, 256>}, {pipeline_mode = #tpu.pipeline_mode<synchronous>, transform_indices = @transform_2, window_bounds = array<i64: 1, 256>}, {transform_indices = @transform_3, window_bounds = array<i64: 2, 256>}]} {
    %c0 = arith.constant 0 : index
    %c0_0 = arith.constant 0 : index
    %0 = vector.load %arg1[%c0, %c0_0] : memref<2x32xf32, #tpu.memory_space<vmem>>, vector<2x32xf32>
    %1 = arith.truncf %0 : vector<2x32xf32> to vector<2x32xbf16>
    %c0_1 = arith.constant 0 : index
    %c0_2 = arith.constant 0 : index
    %2 = vector.load %arg2[%c0_1, %c0_2] : memref<32x256xbf16, #tpu.memory_space<vmem>>, vector<32x256xbf16>
    %cst = arith.constant dense<0.000000e+00> : vector<2x256xf32>
    %3 = tpu.matmul %1, %2, %cst {dimension_numbers = #tpu.dot_dimension_numbers<[1], [0], [0], [1], [0, 0, 1, 1], [], []>} : vector<2x32xbf16>, vector<32x256xbf16>, vector<2x256xf32> -> vector<2x256xf32>
    %c0_3 = arith.constant 0 : index
    %c0_4 = arith.constant 0 : index
    %4 = vector.load %arg3[%c0_3, %c0_4] : memref<1x256xf32, #tpu.memory_space<vmem>>, vector<1x256xf32>
    %5 = vector.broadcast %4 : vector<1x256xf32> to vector<2x256xf32>
    %6 = arith.addf %3, %5 : vector<2x256xf32>
    %c0_5 = arith.constant 0 : index
    %c0_6 = arith.constant 0 : index
    %7 = vector.load %arg4[%c0_5, %c0_6] : memref<2x256xf32, #tpu.memory_space<vmem>>, vector<2x256xf32>
    tpu.vector_store %arg4[%c0_5, %c0_6], %6 {strides = array<i32>} : memref<2x256xf32, #tpu.memory_space<vmem>>, vector<2x256xf32>,
    return
  }
  func.func @transform_0(%arg0: i32) -> (i32, i32) {
    %c0_i32 = arith.constant 0 : i32
    %c0_i32_0 = arith.constant 0 : i32
    return %arg0, %c0_i32 : i32, i32
  }
  func.func @transform_1(%arg0: i32) -> (i32, i32) {
    %c0_i32 = arith.constant 0 : i32
    %c0_i32_0 = arith.constant 0 : i32
    %c0_i32_1 = arith.constant 0 : i32
    return %c0_i32, %c0_i32_0 : i32, i32
  }
  func.func @transform_2(%arg0: i32) -> (i32, i32) {
    %c0_i32 = arith.constant 0 : i32
    %c0_i32_0 = arith.constant 0 : i32
    %c0_i32_1 = arith.constant 0 : i32
    return %c0_i32, %c0_i32_0 : i32, i32
  }
  func.func @transform_3(%arg0: i32) -> (i32, i32) {
    %c0_i32 = arith.constant 0 : i32
    %c0_i32_0 = arith.constant 0 : i32
    return %arg0, %c0_i32 : i32, i32
  }
}

module attributes {stable_mosaic.version = 11 : i64} {
  func.func @_fused_matmul_kernel(%arg0: i32, %arg1: memref<8x64xf32, #tpu.memory_space<vmem>>, %arg2: memref<64x1024xbf16, #tpu.memory_space<vmem>>, %arg3: memref<8x1024xf32, #tpu.memory_space<vmem>>) attributes {dimension_semantics = [#tpu.dimension_semantics<parallel>], iteration_bounds = array<i64: 1>, scalar_prefetch = 0 : i64, scratch_operands = 0 : i64, tpu.core_type = #tpu.core_type<tc>, window_params = [{transform_indices = @transform_0, window_bounds = array<i64: 8, 64>}, {pipeline_mode = #tpu.pipeline_mode<synchronous>, transform_indices = @transform_1, window_bounds = array<i64: 64, 1024>}, {transform_indices = @transform_2, window_bounds = array<i64: 8, 1024>}]} {
    %c0 = arith.constant 0 : index
    %c0_0 = arith.constant 0 : index
    %0 = vector.load %arg1[%c0, %c0_0] : memref<8x64xf32, #tpu.memory_space<vmem>>, vector<8x64xf32>
    %1 = arith.truncf %0 : vector<8x64xf32> to vector<8x64xbf16>
    %c0_1 = arith.constant 0 : index
    %c0_2 = arith.constant 0 : index
    %2 = vector.load %arg2[%c0_1, %c0_2] : memref<64x1024xbf16, #tpu.memory_space<vmem>>, vector<64x1024xbf16>
    %cst = arith.constant dense<0.000000e+00> : vector<8x1024xf32>
    %3 = tpu.matmul %1, %2, %cst {dimension_numbers = #tpu.dot_dimension_numbers<[1], [0], [0], [1], [0, 0, 1, 1], [], []>} : vector<8x64xbf16>, vector<64x1024xbf16>, vector<8x1024xf32> -> vector<8x1024xf32>
    %c0_3 = arith.constant 0 : index
    %c0_4 = arith.constant 0 : index
    %4 = vector.load %arg3[%c0_3, %c0_4] : memref<8x1024xf32, #tpu.memory_space<vmem>>, vector<8x1024xf32>
    tpu.vector_store %arg3[%c0_3, %c0_4], %3 {strides = array<i32>} : memref<8x1024xf32, #tpu.memory_space<vmem>>, vector<8x1024xf32>,
    return
  }
  func.func @transform_0(%arg0: i32) -> (i32, i32) {
    %c0_i32 = arith.constant 0 : i32
    %c0_i32_0 = arith.constant 0 : i32
    return %arg0, %c0_i32 : i32, i32
  }
  func.func @transform_1(%arg0: i32) -> (i32, i32) {
    %c0_i32 = arith.constant 0 : i32
    %c0_i32_0 = arith.constant 0 : i32
    %c0_i32_1 = arith.constant 0 : i32
    return %c0_i32, %c0_i32_0 : i32, i32
  }
  func.func @transform_2(%arg0: i32) -> (i32, i32) {
    %c0_i32 = arith.constant 0 : i32
    %c0_i32_0 = arith.constant 0 : i32
    return %arg0, %c0_i32 : i32, i32
  }
}

module attributes {stable_mosaic.version = 11 : i64} {
  func.func @_fused_matmul_kernel(%arg0: i32, %arg1: memref<72x64xf32, #tpu.memory_space<vmem>>, %arg2: memref<64x512xbf16, #tpu.memory_space<vmem>>, %arg3: memref<1x64xf32, #tpu.memory_space<vmem>>, %arg4: memref<1x64xf32, #tpu.memory_space<vmem>>, %arg5: memref<72x512xf32, #tpu.memory_space<vmem>>) attributes {dimension_semantics = [#tpu.dimension_semantics<parallel>], iteration_bounds = array<i64: 1>, scalar_prefetch = 0 : i64, scratch_operands = 0 : i64, tpu.core_type = #tpu.core_type<tc>, window_params = [{transform_indices = @transform_0, window_bounds = array<i64: 72, 64>}, {pipeline_mode = #tpu.pipeline_mode<synchronous>, transform_indices = @transform_1, window_bounds = array<i64: 64, 512>}, {pipeline_mode = #tpu.pipeline_mode<synchronous>, transform_indices = @transform_2, window_bounds = array<i64: 1, 64>}, {pipeline_mode = #tpu.pipeline_mode<synchronous>, transform_indices = @transform_3, window_bounds = array<i64: 1, 64>}, {transform_indices = @transform_4, window_bounds = array<i64: 72, 512>}]} {
    %c0 = arith.constant 0 : index
    %c0_0 = arith.constant 0 : index
    %0 = vector.load %arg1[%c0, %c0_0] : memref<72x64xf32, #tpu.memory_space<vmem>>, vector<72x64xf32>
    %c0_1 = arith.constant 0 : index
    %c0_2 = arith.constant 0 : index
    %1 = vector.load %arg3[%c0_1, %c0_2] : memref<1x64xf32, #tpu.memory_space<vmem>>, vector<1x64xf32>
    %2 = vector.broadcast %1 : vector<1x64xf32> to vector<72x64xf32>
    %3 = arith.mulf %0, %2 : vector<72x64xf32>
    %c0_3 = arith.constant 0 : index
    %c0_4 = arith.constant 0 : index
    %4 = vector.load %arg4[%c0_3, %c0_4] : memref<1x64xf32, #tpu.memory_space<vmem>>, vector<1x64xf32>
    %5 = vector.broadcast %4 : vector<1x64xf32> to vector<72x64xf32>
    %6 = arith.addf %3, %5 : vector<72x64xf32>
    %cst = arith.constant 0.000000e+00 : f32
    %7 = vector.broadcast %cst : f32 to vector<72x64xf32>
    %8 = arith.maximumf %6, %7 : vector<72x64xf32>
    %9 = arith.truncf %8 : vector<72x64xf32> to vector<72x64xbf16>
    %c0_5 = arith.constant 0 : index
    %c0_6 = arith.constant 0 : index
    %10 = vector.load %arg2[%c0_5, %c0_6] : memref<64x512xbf16, #tpu.memory_space<vmem>>, vector<64x512xbf16>
    %cst_7 = arith.constant dense<0.000000e+00> : vector<72x512xf32>
    %11 = tpu.matmul %9, %10, %cst_7 {dimension_numbers = #tpu.dot_dimension_numbers<[1], [0], [0], [1], [0, 0, 1, 1], [], []>} : vector<72x64xbf16>, vector<64x512xbf16>, vector<72x512xf32> -> vector<72x512xf32>
    %c0_8 = arith.constant 0 : index
    %c0_9 = arith.constant 0 : index
    %12 = vector.load %arg5[%c0_8, %c0_9] : memref<72x512xf32, #tpu.memory_space<vmem>>, vector<72x512xf32>
    tpu.vector_store %arg5[%c0_8, %c0_9], %11 {strides = array<i32>} : memref<72x512xf32, #tpu.memory_space<vmem>>, vector<72x512xf32>,
    return
  }
  func.func @transform_0(%arg0: i32) -> (i32, i32) {
    %c0_i32 = arith.constant 0 : i32
    %c0_i32_0 = arith.constant 0 : i32
    return %arg0, %c0_i32 : i32, i32
  }
  func.func @transform_1(%arg0: i32) -> (i32, i32) {
    %c0_i32 = arith.constant 0 : i32
    %c0_i32_0 = arith.constant 0 : i32
    %c0_i32_1 = arith.constant 0 : i32
    return %c0_i32, %c0_i32_0 : i32, i32
  }
  func.func @transform_2(%arg0: i32) -> (i32, i32) {
    %c0_i32 = arith.constant 0 : i32
    %c0_i32_0 = arith.constant 0 : i32
    %c0_i32_1 = arith.constant 0 : i32
    return %c0_i32, %c0_i32_0 : i32, i32
  }
  func.func @transform_3(%arg0: i32) -> (i32, i32) {
    %c0_i32 = arith.constant 0 : i32
    %c0_i32_0 = arith.constant 0 : i32
    %c0_i32_1 = arith.constant 0 : i32
    return %c0_i32, %c0_i32_0 : i32, i32
  }
  func.func @transform_4(%arg0: i32) -> (i32, i32) {
    %c0_i32 = arith.constant 0 : i32
    %c0_i32_0 = arith.constant 0 : i32
    return %arg0, %c0_i32 : i32, i32
  }
}

module attributes {stable_mosaic.version = 11 : i64} {
  func.func @_fused_matmul_kernel(%arg0: i32, %arg1: memref<200x32xf32, #tpu.memory_space<vmem>>, %arg2: memref<32x512xbf16, #tpu.memory_space<vmem>>, %arg3: memref<1x32xf32, #tpu.memory_space<vmem>>, %arg4: memref<1x32xf32, #tpu.memory_space<vmem>>, %arg5: memref<200x512xf32, #tpu.memory_space<vmem>>) attributes {dimension_semantics = [#tpu.dimension_semantics<parallel>], iteration_bounds = array<i64: 2>, scalar_prefetch = 0 : i64, scratch_operands = 0 : i64, tpu.core_type = #tpu.core_type<tc>, window_params = [{transform_indices = @transform_0, window_bounds = array<i64: 200, 32>}, {pipeline_mode = #tpu.pipeline_mode<synchronous>, transform_indices = @transform_1, window_bounds = array<i64: 32, 512>}, {pipeline_mode = #tpu.pipeline_mode<synchronous>, transform_indices = @transform_2, window_bounds = array<i64: 1, 32>}, {pipeline_mode = #tpu.pipeline_mode<synchronous>, transform_indices = @transform_3, window_bounds = array<i64: 1, 32>}, {transform_indices = @transform_4, window_bounds = array<i64: 200, 512>}]} {
    %c0 = arith.constant 0 : index
    %c0_0 = arith.constant 0 : index
    %0 = vector.load %arg1[%c0, %c0_0] : memref<200x32xf32, #tpu.memory_space<vmem>>, vector<200x32xf32>
    %c0_1 = arith.constant 0 : index
    %c0_2 = arith.constant 0 : index
    %1 = vector.load %arg3[%c0_1, %c0_2] : memref<1x32xf32, #tpu.memory_space<vmem>>, vector<1x32xf32>
    %2 = vector.broadcast %1 : vector<1x32xf32> to vector<200x32xf32>
    %3 = arith.mulf %0, %2 : vector<200x32xf32>
    %c0_3 = arith.constant 0 : index
    %c0_4 = arith.constant 0 : index
    %4 = vector.load %arg4[%c0_3, %c0_4] : memref<1x32xf32, #tpu.memory_space<vmem>>, vector<1x32xf32>
    %5 = vector.broadcast %4 : vector<1x32xf32> to vector<200x32xf32>
    %6 = arith.addf %3, %5 : vector<200x32xf32>
    %cst = arith.constant 0.000000e+00 : f32
    %7 = vector.broadcast %cst : f32 to vector<200x32xf32>
    %8 = arith.maximumf %6, %7 : vector<200x32xf32>
    %9 = arith.truncf %8 : vector<200x32xf32> to vector<200x32xbf16>
    %c0_5 = arith.constant 0 : index
    %c0_6 = arith.constant 0 : index
    %10 = vector.load %arg2[%c0_5, %c0_6] : memref<32x512xbf16, #tpu.memory_space<vmem>>, vector<32x512xbf16>
    %cst_7 = arith.constant dense<0.000000e+00> : vector<200x512xf32>
    %11 = tpu.matmul %9, %10, %cst_7 {dimension_numbers = #tpu.dot_dimension_numbers<[1], [0], [0], [1], [0, 0, 1, 1], [], []>} : vector<200x32xbf16>, vector<32x512xbf16>, vector<200x512xf32> -> vector<200x512xf32>
    %c0_8 = arith.constant 0 : index
    %c0_9 = arith.constant 0 : index
    %12 = vector.load %arg5[%c0_8, %c0_9] : memref<200x512xf32, #tpu.memory_space<vmem>>, vector<200x512xf32>
    tpu.vector_store %arg5[%c0_8, %c0_9], %11 {strides = array<i32>} : memref<200x512xf32, #tpu.memory_space<vmem>>, vector<200x512xf32>,
    return
  }
  func.func @transform_0(%arg0: i32) -> (i32, i32) {
    %c0_i32 = arith.constant 0 : i32
    %c0_i32_0 = arith.constant 0 : i32
    return %arg0, %c0_i32 : i32, i32
  }
  func.func @transform_1(%arg0: i32) -> (i32, i32) {
    %c0_i32 = arith.constant 0 : i32
    %c0_i32_0 = arith.constant 0 : i32
    %c0_i32_1 = arith.constant 0 : i32
    return %c0_i32, %c0_i32_0 : i32, i32
  }
  func.func @transform_2(%arg0: i32) -> (i32, i32) {
    %c0_i32 = arith.constant 0 : i32
    %c0_i32_0 = arith.constant 0 : i32
    %c0_i32_1 = arith.constant 0 : i32
    return %c0_i32, %c0_i32_0 : i32, i32
  }
  func.func @transform_3(%arg0: i32) -> (i32, i32) {
    %c0_i32 = arith.constant 0 : i32
    %c0_i32_0 = arith.constant 0 : i32
    %c0_i32_1 = arith.constant 0 : i32
    return %c0_i32, %c0_i32_0 : i32, i32
  }
  func.func @transform_4(%arg0: i32) -> (i32, i32) {
    %c0_i32 = arith.constant 0 : i32
    %c0_i32_0 = arith.constant 0 : i32
    return %arg0, %c0_i32 : i32, i32
  }
}

module attributes {stable_mosaic.version = 11 : i64} {
  func.func @_fused_matmul_kernel(%arg0: i32, %arg1: memref<512x32xf32, #tpu.memory_space<vmem>>, %arg2: memref<32x48xbf16, #tpu.memory_space<vmem>>, %arg3: memref<1x32xf32, #tpu.memory_space<vmem>>, %arg4: memref<1x32xf32, #tpu.memory_space<vmem>>, %arg5: memref<512x48xf32, #tpu.memory_space<vmem>>) attributes {dimension_semantics = [#tpu.dimension_semantics<parallel>], iteration_bounds = array<i64: 4>, scalar_prefetch = 0 : i64, scratch_operands = 0 : i64, tpu.core_type = #tpu.core_type<tc>, window_params = [{transform_indices = @transform_0, window_bounds = array<i64: 512, 32>}, {pipeline_mode = #tpu.pipeline_mode<synchronous>, transform_indices = @transform_1, window_bounds = array<i64: 32, 48>}, {pipeline_mode = #tpu.pipeline_mode<synchronous>, transform_indices = @transform_2, window_bounds = array<i64: 1, 32>}, {pipeline_mode = #tpu.pipeline_mode<synchronous>, transform_indices = @transform_3, window_bounds = array<i64: 1, 32>}, {transform_indices = @transform_4, window_bounds = array<i64: 512, 48>}]} {
    %c0 = arith.constant 0 : index
    %c0_0 = arith.constant 0 : index
    %0 = vector.load %arg1[%c0, %c0_0] : memref<512x32xf32, #tpu.memory_space<vmem>>, vector<512x32xf32>
    %c0_1 = arith.constant 0 : index
    %c0_2 = arith.constant 0 : index
    %1 = vector.load %arg3[%c0_1, %c0_2] : memref<1x32xf32, #tpu.memory_space<vmem>>, vector<1x32xf32>
    %2 = vector.broadcast %1 : vector<1x32xf32> to vector<512x32xf32>
    %3 = arith.mulf %0, %2 : vector<512x32xf32>
    %c0_3 = arith.constant 0 : index
    %c0_4 = arith.constant 0 : index
    %4 = vector.load %arg4[%c0_3, %c0_4] : memref<1x32xf32, #tpu.memory_space<vmem>>, vector<1x32xf32>
    %5 = vector.broadcast %4 : vector<1x32xf32> to vector<512x32xf32>
    %6 = arith.addf %3, %5 : vector<512x32xf32>
    %cst = arith.constant 0.000000e+00 : f32
    %7 = vector.broadcast %cst : f32 to vector<512x32xf32>
    %8 = arith.maximumf %6, %7 : vector<512x32xf32>
    %9 = arith.truncf %8 : vector<512x32xf32> to vector<512x32xbf16>
    %c0_5 = arith.constant 0 : index
    %c0_6 = arith.constant 0 : index
    %10 = vector.load %arg2[%c0_5, %c0_6] : memref<32x48xbf16, #tpu.memory_space<vmem>>, vector<32x48xbf16>
    %cst_7 = arith.constant dense<0.000000e+00> : vector<512x48xf32>
    %11 = tpu.matmul %9, %10, %cst_7 {dimension_numbers = #tpu.dot_dimension_numbers<[1], [0], [0], [1], [0, 0, 1, 1], [], []>} : vector<512x32xbf16>, vector<32x48xbf16>, vector<512x48xf32> -> vector<512x48xf32>
    %c0_8 = arith.constant 0 : index
    %c0_9 = arith.constant 0 : index
    %12 = vector.load %arg5[%c0_8, %c0_9] : memref<512x48xf32, #tpu.memory_space<vmem>>, vector<512x48xf32>
    tpu.vector_store %arg5[%c0_8, %c0_9], %11 {strides = array<i32>} : memref<512x48xf32, #tpu.memory_space<vmem>>, vector<512x48xf32>,
    return
  }
  func.func @transform_0(%arg0: i32) -> (i32, i32) {
    %c0_i32 = arith.constant 0 : i32
    %c0_i32_0 = arith.constant 0 : i32
    return %arg0, %c0_i32 : i32, i32
  }
  func.func @transform_1(%arg0: i32) -> (i32, i32) {
    %c0_i32 = arith.constant 0 : i32
    %c0_i32_0 = arith.constant 0 : i32
    %c0_i32_1 = arith.constant 0 : i32
    return %c0_i32, %c0_i32_0 : i32, i32
  }
  func.func @transform_2(%arg0: i32) -> (i32, i32) {
    %c0_i32 = arith.constant 0 : i32
    %c0_i32_0 = arith.constant 0 : i32
    %c0_i32_1 = arith.constant 0 : i32
    return %c0_i32, %c0_i32_0 : i32, i32
  }
  func.func @transform_3(%arg0: i32) -> (i32, i32) {
    %c0_i32 = arith.constant 0 : i32
    %c0_i32_0 = arith.constant 0 : i32
    %c0_i32_1 = arith.constant 0 : i32
    return %c0_i32, %c0_i32_0 : i32, i32
  }
  func.func @transform_4(%arg0: i32) -> (i32, i32) {
    %c0_i32 = arith.constant 0 : i32
    %c0_i32_0 = arith.constant 0 : i32
    return %arg0, %c0_i32 : i32, i32
  }
}

</mosaic_0001>

<bundles_post_ra>
// kernel: tile.37
= control target key start
LH: loop header
LB: loop body
LE: loop exit
PB: predicated region body
PF: predicated region fallthrough
CT: control target
= control target key end

     0   :  { %s28_s0 = inlined_call_operand.vmem [shape: f32[32], index: 0, kind: input, shape index: {}]   ;;  %s29_s1 = inlined_call_operand.vmem [shape: f32[16,32], index: 1, kind: output, shape index: {}]  }
   0x1   :  { %v4_v0 = vld [vmem:[%s28_s0] ss:$0 sm:$0xff] }
   0x2   :  { %5 = vst [vmem:[%s29_s1] sm:$0xff] %v4_v0  ;;  %8 = vst [vmem:[%s29_s1 + $0x8] sm:$0xff] %v4_v0 }

// kernel: tile.39
= control target key start
LH: loop header
LB: loop body
LE: loop exit
PB: predicated region body
PF: predicated region fallthrough
CT: control target
= control target key end

     0   :  { %s62_s8 = smov 96   ;;  %vm3_vm0 = vcmask 261120   ;;  %s64_s15 = smov 64   ;;  %vm9_vm1 = vcmask 1048320   ;;  %vm15_vm2 = vcmask 785920   ;;  %vm21_vm3 = vcmask 523520   ;;  %s99_s0 = inlined_call_operand.vmem [shape: f32[16,32], index: 0, kind: input, shape index: {}]   ;;  %s100_s1 = inlined_call_operand.vmem [shape: f32[1,512], index: 1, kind: output, shape index: {}]  }
   0x1   :  { %v53_v0 = vld [vmem:[%s99_s0 + $0x3] ss:$4 sm:$0xf]   ;;  %v54_v1 = vld [vmem:[%s99_s0 + $0x2] ss:$4 sm:$0xf]  }
   0x2   :  { %7 = vrot.lane.b32.xlu0 %v53_v0, %s62_s8  ;;  %v55_v2 = vld [vmem:[%s99_s0 + $0x1] ss:$4 sm:$0xf]   ;;  %v2_v3 = vld [vmem:[%s99_s0] ss:$4 sm:$0xf]  }
   0x3   :  { %s63_s0 = smov 32   ;;  %4 = vst.msk [vmem:[#allocation0] ss:$8 sm:$0xf] %vm3_vm0, %v2_v3  }
   0x4   :  { %19 = vrot.lane.b32.xlu1 %v55_v2, %s63_s0 }
   0x6   :  { %13 = vrot.lane.b32.xlu0 %v54_v1, %s64_s15 }
  0x74   :  { %v8_v4 = vpop.permute.xlu0 %7  }
  0x75   :  { %10 = vst.msk [vmem:[#allocation0] ss:$8 sm:$0xf] %vm9_vm1, %v8_v4  }
  0x76   :  { %v20_v5 = vpop.permute.xlu1 %19  }
  0x78   :  { %v14_v6 = vpop.permute.xlu0 %13  }
  0x79   :  { %16 = vst.msk [vmem:[#allocation0] ss:$8 sm:$0xf] %vm15_vm2, %v14_v6  }
  0x7a   :  { %22 = vst.msk [vmem:[#allocation0] ss:$8 sm:$0xf] %vm21_vm3, %v20_v5  }
  0x81   :  { %v27_v7 = vld [vmem:[#allocation0] sm:$0x1]  ;;  %v32_v8 = vld [vmem:[#allocation0 + $0x8] sm:$0x1]  ;;  %v38_v9 = vld [vmem:[#allocation0 + $0x10] sm:$0x1] }
  0x82   :  { %30 = vst [vmem:[%s100_s1] sm:$0x1] %v27_v7  ;;  %56 = vst [vmem:[%s100_s1 + $0x1] sm:$0x1] %v32_v8  ;;  %v45_v10 = vld [vmem:[#allocation0 + $0x18] sm:$0x1] }
  0x83   :  { %57 = vst [vmem:[%s100_s1 + $0x2] sm:$0x1] %v38_v9  ;;  %58 = vst [vmem:[%s100_s1 + $0x3] sm:$0x1] %v45_v10 }

// kernel: vae_forward.10
= control target key start
LH: loop header
LB: loop body
LE: loop exit
PB: predicated region body
PF: predicated region fallthrough
CT: control target
= control target key end

     0   :  { %s1760_s12 = smov 0   ;;  %s2378_s0 = inlined_call_operand.vmem [shape: f32[2048,48], index: 0, kind: input, shape index: {}]   ;;  %s2379_s1 = inlined_call_operand.vmem [shape: bf16[48,32], index: 1, kind: input, shape index: {}]   ;;  %s2380_s2 = inlined_call_operand.vmem [shape: bf16[2048,32], index: 2, kind: output, shape index: {0}]   ;;  %s2381_s3 = inlined_call_operand.vmem [shape: f32[4,2,32], index: 3, kind: output, shape index: {1}]  }
   0x1 LB: > { %s1766_s13 = sadd.s32 4294967295, %s1738_s12   ;;  %p1439_p0 = scmp.ge.s32.totalorder %s1738_s12, 1  ;;  %s1738_s12 = sphi %s1760_s12, %s14_s12  }
   0x2   : > { %p141_p1 = scmp.lt.s32.totalorder %s1738_s12, 5 }
   0x4   : > { %p142_p2 = pnand %p1439_p0, %p141_p1 }
   0x5   : > { %s1440_s16 = sshll.u32 (!%p142_p2), %s1766_s13, 6  ;;  %p181_p4 = scmp.lt.s32.totalorder (!%p142_p2), %s1766_s13, 3 }
   0x6   : > { %145 = sbr.rel (%p142_p2) target bundleno = 366 (0x16e), region = 28  ;;  %p170_p3 = scmp.lt.s32.totalorder (!%p142_p2), %s1440_s16, 255 }
   0xb   : > { %v1729_v0 = vld [vmem:[%s2379_s1 + $0x10] sm:$0xff]   ;;  %v1730_v1 = vld [vmem:[%s2379_s1 + $0x8] sm:$0xff]   ;;  %s2383_s16 = smov (!%p170_p3, %s1440_s16), 255  ;;  %v1731_v2 = vld [vmem:[%s2379_s1] sm:$0xff]   ;;  %vm306_vm0 = vcmask 392192   ;;  %vm948_vm1 = vcmask 257024  }
   0xc   : > { %1645 = vmatprep.subr.bf16.mxu0 %v1729_v0  ;;  %1715 = vmatprep.subr.bf16.mxu1 %v1729_v0  ;;  %s1441_s21 = sshll.u32 %s2383_s16, 3  ;;  %s1443_s25 = sshll.u32 %s2383_s16, 2  ;;  %vm1013_vm2 = vcmask 261120   ;;  %vm1344_vm3 = vcmask 1040384   ;;  %vm1346_vm4 = vcmask 254976  }
   0xd   : > { %1646 = vmatpush3.bf16.msra.mxu0 %v1729_v0  ;;  %1718 = vmatpush3.bf16.msra.mxu1 %v1729_v0  ;;  %s1786_s24 = scalar_lea.vmem %s2378_s0, %s1441_s21  ;;  %s1888_s28 = scalar_lea.vmem %s2380_s2, %s1443_s25 }
   0xe   : > { %1647 = vmatprep.subr.bf16.mxu0 %v1730_v1  ;;  %1716 = vmatprep.subr.bf16.mxu1 %v1730_v1  ;;  %v186_v3 = vld [vmem:[%s1786_s24] sm:$0xff]  ;;  %v187_v4 = vld [vmem:[%s1786_s24 + $0x8] sm:$0xff]  ;;  %v188_v5 = vld [vmem:[%s1786_s24 + $0x10] sm:$0xff]  ;;  %s2385_s13 = smov (!%p181_p4, %s1766_s13), 3 }
   0xf   : > { %v250_v6 = vpack.c.bf16 %v187_v4, %v186_v3  ;;  %v189_v7 = vld [vmem:[%s1786_s24 + $0x18] sm:$0xff]  ;;  %v190_v8 = vld [vmem:[%s1786_s24 + $0x20] sm:$0xff]  ;;  %v191_v9 = vld [vmem:[%s1786_s24 + $0x28] sm:$0xff]  ;;  %s1444_s29 = sshll.u32 %s2385_s13, 1 }
  0x10   : > { %v251_v10 = vpack.c.bf16 %v189_v7, %v188_v5  ;;  %v252_v11 = vpack.c.bf16 %v191_v9, %v190_v8  ;;  %v192_v12 = vld [vmem:[%s1786_s24 + $0x30] sm:$0xff]  ;;  %v193_v13 = vld [vmem:[%s1786_s24 + $0x38] sm:$0xff]  ;;  %v194_v14 = vld [vmem:[%s1786_s24 + $0x40] sm:$0xff]  ;;  %s184_s5 = scalar_lea.vmem %s2381_s3, %s1444_s29 }
  0x11   : > { %1648 = vmatpush3.bf16.msra.mxu0 %v1730_v1  ;;  %1719 = vmatpush3.bf16.msra.mxu1 %v1730_v1  ;;  %v195_v15 = vld [vmem:[%s1786_s24 + $0x48] sm:$0xff]  ;;  %v218_v16 = vld [vmem:[%s1786_s24 + $0x100] sm:$0xff]  ;;  %v253_v17 = vpack.c.bf16 %v193_v13, %v192_v12  ;;  %v220_v19 = vld [vmem:[%s1786_s24 + $0x110] sm:$0xff] }
  0x12   : > { %1649 = vmatprep.subr.bf16.mxu0 %v1731_v2  ;;  %1717 = vmatprep.subr.bf16.mxu1 %v1731_v2  ;;  %v219_v18 = vld [vmem:[%s1786_s24 + $0x108] sm:$0xff]  ;;  %v221_v20 = vld [vmem:[%s1786_s24 + $0x118] sm:$0xff]  ;;  %v254_v21 = vpack.c.bf16 %v195_v15, %v194_v14  ;;  %v222_v24 = vld [vmem:[%s1786_s24 + $0x120] sm:$0xff] }
  0x13   : > { %1651 = vmatprep.mubr.msk.bf16.mxu0 %vm306_vm0, %v250_v6  ;;  %v266_v22 = vpack.c.bf16 %v219_v18, %v218_v16  ;;  %v267_v23 = vpack.c.bf16 %v221_v20, %v220_v19  ;;  %v223_v25 = vld [vmem:[%s1786_s24 + $0x128] sm:$0xff]  ;;  %v196_v27 = vld [vmem:[%s1786_s24 + $0x50] sm:$0xff]  ;;  %v197_v28 = vld [vmem:[%s1786_s24 + $0x58] sm:$0xff] }
  0x14   : > { %v268_v26 = vpack.c.bf16 %v223_v25, %v222_v24  ;;  %v198_v29 = vld [vmem:[%s1786_s24 + $0x60] sm:$0xff]  ;;  %v224_v30 = vld [vmem:[%s1786_s24 + $0x130] sm:$0xff]  ;;  %v225_v31 = vld [vmem:[%s1786_s24 + $0x138] sm:$0xff]  ;;  %v255_v35 = vpack.c.bf16 %v197_v28, %v196_v27 }
  0x15   : > { %1650 = vmatpush3.bf16.msra.mxu0 %v1731_v2  ;;  %1720 = vmatpush3.bf16.msra.mxu1 %v1731_v2  ;;  %v199_v32 = vld [vmem:[%s1786_s24 + $0x68] sm:$0xff]  ;;  %v226_v33 = vld [vmem:[%s1786_s24 + $0x140] sm:$0xff]  ;;  %v269_v36 = vpack.c.bf16 %v225_v31, %v224_v30  ;;  %v200_v39 = vld [vmem:[%s1786_s24 + $0x70] sm:$0xff] }
  0x16   : > { %1683 = vmatprep.mubr.msk.bf16.mxu1 %vm306_vm0, %v266_v22  ;;  %v227_v34 = vld [vmem:[%s1786_s24 + $0x148] sm:$0xff]  ;;  %v256_v37 = vpack.c.bf16 %v199_v32, %v198_v29  ;;  %v201_v40 = vld [vmem:[%s1786_s24 + $0x78] sm:$0xff]  ;;  %v202_v41 = vld [vmem:[%s1786_s24 + $0x80] sm:$0xff] }
  0x17   : > { %v270_v38 = vpack.c.bf16 %v227_v34, %v226_v33  ;;  %v228_v42 = vld [vmem:[%s1786_s24 + $0x150] sm:$0xff]  ;;  %v229_v43 = vld [vmem:[%s1786_s24 + $0x158] sm:$0xff]  ;;  %v203_v44 = vld [vmem:[%s1786_s24 + $0x88] sm:$0xff]  ;;  %v257_v47 = vpack.c.bf16 %v201_v40, %v200_v39 }
  0x18   : > { %1652 = vmatmul.mubr.msk.bf16.vlgmr.msra.gmra.mxu0 %vm306_vm0, %v251_v10  ;;  %1684 = vmatmul.mubr.msk.bf16.vlgmr.msra.gmra.mxu1 %vm306_vm0, %v267_v23  ;;  %v230_v45 = vld [vmem:[%s1786_s24 + $0x160] sm:$0xff]  ;;  %v231_v46 = vld [vmem:[%s1786_s24 + $0x168] sm:$0xff]  ;;  %v271_v48 = vpack.c.bf16 %v229_v43, %v228_v42  ;;  %v258_v49 = vpack.c.bf16 %v203_v44, %v202_v41  ;;  %v204_v51 = vld [vmem:[%s1786_s24 + $0x90] sm:$0xff] }
  0x19   : > { %1655 = vmatprep.mubr.msk.bf16.mxu0 %vm306_vm0, %v252_v11  ;;  %1687 = vmatprep.mubr.msk.bf16.mxu1 %vm306_vm0, %v268_v26  ;;  %v272_v50 = vpack.c.bf16 %v231_v46, %v230_v45  ;;  %v205_v52 = vld [vmem:[%s1786_s24 + $0x98] sm:$0xff]  ;;  %v206_v53 = vld [vmem:[%s1786_s24 + $0xa0] sm:$0xff]  ;;  %v232_v54 = vld [vmem:[%s1786_s24 + $0x170] sm:$0xff] }
  0x1a   : > { %v233_v55 = vld [vmem:[%s1786_s24 + $0x178] sm:$0xff]  ;;  %v207_v56 = vld [vmem:[%s1786_s24 + $0xa8] sm:$0xff]  ;;  %v234_v57 = vld [vmem:[%s1786_s24 + $0x180] sm:$0xff]  ;;  %v259_v59 = vpack.c.bf16 %v205_v52, %v204_v51 }
  0x1b   : > { %v235_v58 = vld [vmem:[%s1786_s24 + $0x188] sm:$0xff]  ;;  %v273_v60 = vpack.c.bf16 %v233_v55, %v232_v54  ;;  %v260_v61 = vpack.c.bf16 %v207_v56, %v206_v53  ;;  %v208_v63 = vld [vmem:[%s1786_s24 + $0xb0] sm:$0xff]  ;;  %v209_v0 = vld [vmem:[%s1786_s24 + $0xb8] sm:$0xff] }
  0x1c   : > { %v274_v62 = vpack.c.bf16 %v235_v58, %v234_v57  ;;  %v210_v1 = vld [vmem:[%s1786_s24 + $0xc0] sm:$0xff]  ;;  %v236_v2 = vld [vmem:[%s1786_s24 + $0x190] sm:$0xff]  ;;  %v237_v3 = vld [vmem:[%s1786_s24 + $0x198] sm:$0xff]  ;;  %v261_v7 = vpack.c.bf16 %v209_v0, %v208_v63 }
  0x1d   : > { %v211_v4 = vld [vmem:[%s1786_s24 + $0xc8] sm:$0xff]  ;;  %v238_v5 = vld [vmem:[%s1786_s24 + $0x1a0] sm:$0xff]  ;;  %v275_v8 = vpack.c.bf16 %v237_v3, %v236_v2  ;;  %v212_v11 = vld [vmem:[%s1786_s24 + $0xd0] sm:$0xff] }
  0x1e   : > { %v239_v6 = vld [vmem:[%s1786_s24 + $0x1a8] sm:$0xff]  ;;  %v262_v9 = vpack.c.bf16 %v211_v4, %v210_v1  ;;  %v213_v12 = vld [vmem:[%s1786_s24 + $0xd8] sm:$0xff]  ;;  %v214_v13 = vld [vmem:[%s1786_s24 + $0xe0] sm:$0xff] }
  0x1f   : > { %v276_v10 = vpack.c.bf16 %v239_v6, %v238_v5  ;;  %v240_v14 = vld [vmem:[%s1786_s24 + $0x1b0] sm:$0xff]  ;;  %v241_v15 = vld [vmem:[%s1786_s24 + $0x1b8] sm:$0xff]  ;;  %v215_v16 = vld [vmem:[%s1786_s24 + $0xe8] sm:$0xff]  ;;  %v263_v19 = vpack.c.bf16 %v213_v12, %v212_v11 }
  0x20   : > { %1656 = vmatmul.mubr.msk.bf16.gmra.mxu0 %vm306_vm0, %v253_v17  ;;  %1688 = vmatmul.mubr.msk.bf16.gmra.mxu1 %vm306_vm0, %v269_v36  ;;  %v242_v17 = vld [vmem:[%s1786_s24 + $0x1c0] sm:$0xff]  ;;  %v243_v18 = vld [vmem:[%s1786_s24 + $0x1c8] sm:$0xff]  ;;  %v277_v20 = vpack.c.bf16 %v241_v15, %v240_v14  ;;  %v216_v23 = vld [vmem:[%s1786_s24 + $0xf0] sm:$0xff] }
  0x21   : > { %1659 = vmatprep.mubr.msk.bf16.mxu0 %vm306_vm0, %v254_v21  ;;  %1691 = vmatprep.mubr.msk.bf16.mxu1 %vm306_vm0, %v270_v38  ;;  %v264_v21 = vpack.c.bf16 %v215_v16, %v214_v13  ;;  %v278_v22 = vpack.c.bf16 %v243_v18, %v242_v17  ;;  %v217_v24 = vld [vmem:[%s1786_s24 + $0xf8] sm:$0xff]  ;;  %v244_v25 = vld [vmem:[%s1786_s24 + $0x1d0] sm:$0xff]  ;;  %v246_v27 = vld [vmem:[%s1786_s24 + $0x1e0] sm:$0xff] }
  0x22   : > { %v245_v26 = vld [vmem:[%s1786_s24 + $0x1d8] sm:$0xff]  ;;  %v247_v28 = vld [vmem:[%s1786_s24 + $0x1e8] sm:$0xff]  ;;  %v265_v29 = vpack.c.bf16 %v217_v24, %v216_v23  ;;  %v248_v32 = vld [vmem:[%s1786_s24 + $0x1f0] sm:$0xff] }
  0x23   : > { %v279_v30 = vpack.c.bf16 %v245_v26, %v244_v25  ;;  %v280_v31 = vpack.c.bf16 %v247_v28, %v246_v27  ;;  %v249_v33 = vld [vmem:[%s1786_s24 + $0x1f8] sm:$0xff] }
  0x24   : > { %v281_v34 = vpack.c.bf16 %v249_v33, %v248_v32 }
  0x28   : > { %1660 = vmatmul.mubr.msk.bf16.gmra.mxu0 %vm306_vm0, %v255_v35  ;;  %1692 = vmatmul.mubr.msk.bf16.gmra.mxu1 %vm306_vm0, %v271_v48 }
  0x29   : > { %1663 = vmatprep.mubr.msk.bf16.mxu0 %vm306_vm0, %v256_v37  ;;  %1695 = vmatprep.mubr.msk.bf16.mxu1 %vm306_vm0, %v272_v50 }
  0x30   : > { %1664 = vmatmul.mubr.msk.bf16.gmra.mxu0 %vm306_vm0, %v257_v47  ;;  %1696 = vmatmul.mubr.msk.bf16.gmra.mxu1 %vm306_vm0, %v273_v60 }
  0x31   : > { %1667 = vmatprep.mubr.msk.bf16.mxu0 %vm306_vm0, %v258_v49  ;;  %1699 = vmatprep.mubr.msk.bf16.mxu1 %vm306_vm0, %v274_v62 }
  0x38   : > { %1668 = vmatmul.mubr.msk.bf16.gmra.mxu0 %vm306_vm0, %v259_v59  ;;  %1700 = vmatmul.mubr.msk.bf16.gmra.mxu1 %vm306_vm0, %v275_v8 }
  0x39   : > { %1671 = vmatprep.mubr.msk.bf16.mxu0 %vm306_vm0, %v260_v61  ;;  %1703 = vmatprep.mubr.msk.bf16.mxu1 %vm306_vm0, %v276_v10 }
  0x40   : > { %1672 = vmatmul.mubr.msk.bf16.gmra.mxu0 %vm306_vm0, %v261_v7  ;;  %1704 = vmatmul.mubr.msk.bf16.gmra.mxu1 %vm306_vm0, %v277_v20 }
  0x41   : > { %1675 = vmatprep.mubr.msk.bf16.mxu0 %vm306_vm0, %v262_v9  ;;  %1707 = vmatprep.mubr.msk.bf16.mxu1 %vm306_vm0, %v278_v22 }
  0x48   : > { %1676 = vmatmul.mubr.msk.bf16.gmra.mxu0 %vm306_vm0, %v263_v19  ;;  %1708 = vmatmul.mubr.msk.bf16.gmra.mxu1 %vm306_vm0, %v279_v30 }
  0x49   : > { %1679 = vmatprep.mubr.msk.bf16.mxu0 %vm306_vm0, %v264_v21  ;;  %1711 = vmatprep.mubr.msk.bf16.mxu1 %vm306_vm0, %v280_v31 }
  0x50   : > { %1680 = vmatmul.mubr.msk.bf16.gmra.mxu0 %vm306_vm0, %v265_v29  ;;  %1712 = vmatmul.mubr.msk.bf16.gmra.mxu1 %vm306_vm0, %v281_v34 }
  0xd8   : > { %v1653_v35 = vpop.f32.mrf.mxu0  ;;  %v1899_v51 = vpop.f32.mrf.mxu1 }
  0xd9   : > { %v1548_v36 = vpack.c.bf16 %v1653_v35, %v1653_v35  ;;  %v1149_v42 = vmul.f32 %v1653_v35, %v1653_v35  ;;  %v1017_v48 = vsel %vm1013_vm2, %v1653_v35, 0.0  ;;  %v1580_v59 = vpack.c.bf16 %v1899_v51, %v1899_v51 }
  0xda   : > { %v437_v37 = vpop.f32.mrf.mxu0  ;;  %v1907_v60 = vpop.f32.mrf.mxu1 }
  0xdb   : > { %951 = vst.msk [vmem:[%s1888_s28 + $0x8] sm:$0xf] %vm948_vm1, %v1548_v36  ;;  %v1546_v38 = vpack.c.bf16 %v437_v37, %v437_v37  ;;  %v1147_v40 = vmul.f32 %v437_v37, %v437_v37  ;;  %v1014_v44 = vsel %vm1013_vm2, %v437_v37, 0.0  ;;  %v1214_v61 = vsel %vm1013_vm2, %v1149_v42, 0.0  ;;  %983 = vst.msk [vmem:[%s1888_s28 + $0x88] sm:$0xf] %vm948_vm1, %v1580_v59 }
  0xdc   : > { %v1654_v39 = vpop.f32.mrf.mxu0  ;;  %v1578_v4 = vpack.c.bf16 %v1907_v60, %v1907_v60  ;;  %v1917_v5 = vpop.f32.mrf.mxu1 }
  0xdd   : > { %949 = vst.msk [vmem:[%s1888_s28] sm:$0xf] %vm948_vm1, %v1546_v38  ;;  %v1549_v41 = vpack.c.bf16 %v1654_v39, %v1654_v39  ;;  %v1211_v52 = vsel %vm1013_vm2, %v1147_v40, 0.0  ;;  %v1150_v53 = vmul.f32 %v1654_v39, %v1654_v39  ;;  %v1019_v62 = vsel %vm1013_vm2, %v1654_v39, 0.0 }
  0xde   : > { %v440_v43 = vpop.f32.mrf.mxu0  ;;  %981 = vst.msk [vmem:[%s1888_s28 + $0x80] sm:$0xf] %vm948_vm1, %v1578_v4  ;;  %v1925_v13 = vpop.f32.mrf.mxu1  ;;  %v1581_v21 = vpack.c.bf16 %v1917_v5, %v1917_v5 }
  0xdf   : > { %952 = vst.msk [vmem:[%s1888_s28 + $0xc] sm:$0xf] %vm948_vm1, %v1549_v41  ;;  %v1547_v45 = vpack.c.bf16 %v440_v43, %v440_v43  ;;  %v1015_v46 = vsel %vm1013_vm2, %v440_v43, 0.0  ;;  %v1148_v47 = vmul.f32 %v440_v43, %v440_v43  ;;  %v1216_v6 = vsel %vm1013_vm2, %v1150_v53, 0.0 }
  0xe0   : > { %v1016_v49 = vadd.f32 %v1015_v46, %v1014_v44  ;;  %v1657_v50 = vpop.f32.mrf.mxu0  ;;  %v1933_v22 = vpop.f32.mrf.mxu1  ;;  %984 = vst.msk [vmem:[%s1888_s28 + $0x8c] sm:$0xf] %vm948_vm1, %v1581_v21  ;;  %v1579_v38 = vpack.c.bf16 %v1925_v13, %v1925_v13 }
  0xe1   : > { %950 = vst.msk [vmem:[%s1888_s28 + $0x4] sm:$0xf] %vm948_vm1, %v1547_v45  ;;  %v1212_v54 = vsel %vm1013_vm2, %v1148_v47, 0.0  ;;  %v1552_v55 = vpack.c.bf16 %v1657_v50, %v1657_v50  ;;  %v1153_v9 = vmul.f32 %v1657_v50, %v1657_v50  ;;  %v1025_v23 = vsel %vm1013_vm2, %v1657_v50, 0.0 }
  0xe2   : > { %v1018_v56 = vadd.f32 %v1017_v48, %v1016_v49  ;;  %v1213_v57 = vadd.f32 %v1212_v54, %v1211_v52  ;;  %v453_v58 = vpop.f32.mrf.mxu0  ;;  %v1941_v30 = vpop.f32.mrf.mxu1  ;;  %982 = vst.msk [vmem:[%s1888_s28 + $0x84] sm:$0xf] %vm948_vm1, %v1579_v38 }
  0xe3   : > { %955 = vst.msk [vmem:[%s1888_s28 + $0x18] sm:$0xf] %vm948_vm1, %v1552_v55  ;;  %v1550_v63 = vpack.c.bf16 %v453_v58, %v453_v58  ;;  %v1151_v0 = vmul.f32 %v453_v58, %v453_v58  ;;  %v1021_v7 = vsel %vm1013_vm2, %v453_v58, 0.0  ;;  %v1222_v31 = vsel %vm1013_vm2, %v1153_v9, 0.0 }
  0xe4   : > { %v1215_v1 = vadd.f32 %v1214_v61, %v1213_v57  ;;  %v1020_v2 = vadd.f32 %v1019_v62, %v1018_v56  ;;  %v1658_v3 = vpop.f32.mrf.mxu0  ;;  %v1949_v39 = vpop.f32.mrf.mxu1  ;;  %v1584_v56 = vpack.c.bf16 %v1933_v22, %v1933_v22 }
  0xe5   : > { %953 = vst.msk [vmem:[%s1888_s28 + $0x10] sm:$0xf] %vm948_vm1, %v1550_v63  ;;  %v1553_v8 = vpack.c.bf16 %v1658_v3, %v1658_v3  ;;  %v1218_v14 = vsel %vm1013_vm2, %v1151_v0, 0.0  ;;  %v1154_v24 = vmul.f32 %v1658_v3, %v1658_v3  ;;  %v1027_v32 = vsel %vm1013_vm2, %v1658_v3, 0.0 }
  0xe6   : > { %v1022_v10 = vadd.f32 %v1021_v7, %v1020_v2  ;;  %v1217_v11 = vadd.f32 %v1216_v6, %v1215_v1  ;;  %v456_v12 = vpop.f32.mrf.mxu0  ;;  %v1957_v47 = vpop.f32.mrf.mxu1  ;;  %987 = vst.msk [vmem:[%s1888_s28 + $0x98] sm:$0xf] %vm948_vm1, %v1584_v56 }
  0xe7   : > { %956 = vst.msk [vmem:[%s1888_s28 + $0x1c] sm:$0xf] %vm948_vm1, %v1553_v8  ;;  %v1551_v15 = vpack.c.bf16 %v456_v12, %v456_v12  ;;  %v1023_v16 = vsel %vm1013_vm2, %v456_v12, 0.0  ;;  %v1152_v17 = vmul.f32 %v456_v12, %v456_v12  ;;  %v1224_v40 = vsel %vm1013_vm2, %v1154_v24, 0.0 }
  0xe8   : > { %v1219_v18 = vadd.f32 %v1218_v14, %v1217_v11  ;;  %v1024_v19 = vadd.f32 %v1023_v16, %v1022_v10  ;;  %v1661_v20 = vpop.f32.mrf.mxu0  ;;  %v1965_v57 = vpop.f32.mrf.mxu1  ;;  %v1582_v11 = vpack.c.bf16 %v1941_v30, %v1941_v30 }
  0xe9   : > { %954 = vst.msk [vmem:[%s1888_s28 + $0x14] sm:$0xf] %vm948_vm1, %v1551_v15  ;;  %v1220_v25 = vsel %vm1013_vm2, %v1152_v17, 0.0  ;;  %v1556_v26 = vpack.c.bf16 %v1661_v20, %v1661_v20  ;;  %v1157_v43 = vmul.f32 %v1661_v20, %v1661_v20  ;;  %v1033_v58 = vsel %vm1013_vm2, %v1661_v20, 0.0 }
  0xea   : > { %v1026_v27 = vadd.f32 %v1025_v23, %v1024_v19  ;;  %v1221_v28 = vadd.f32 %v1220_v25, %v1219_v18  ;;  %v469_v29 = vpop.f32.mrf.mxu0  ;;  %v1973_v2 = vpop.f32.mrf.mxu1  ;;  %985 = vst.msk [vmem:[%s1888_s28 + $0x90] sm:$0xf] %vm948_vm1, %v1582_v11 }
  0xeb   : > { %959 = vst.msk [vmem:[%s1888_s28 + $0x28] sm:$0xf] %vm948_vm1, %v1556_v26  ;;  %v1554_v33 = vpack.c.bf16 %v469_v29, %v469_v29  ;;  %v1155_v34 = vmul.f32 %v469_v29, %v469_v29  ;;  %v1029_v41 = vsel %vm1013_vm2, %v469_v29, 0.0  ;;  %v1230_v3 = vsel %vm1013_vm2, %v1157_v43, 0.0 }
  0xec   : > { %v1223_v35 = vadd.f32 %v1222_v31, %v1221_v28  ;;  %v1028_v36 = vadd.f32 %v1027_v32, %v1026_v27  ;;  %v1662_v37 = vpop.f32.mrf.mxu0  ;;  %v1981_v12 = vpop.f32.mrf.mxu1  ;;  %v1585_v31 = vpack.c.bf16 %v1949_v39, %v1949_v39 }
  0xed   : > { %957 = vst.msk [vmem:[%s1888_s28 + $0x20] sm:$0xf] %vm948_vm1, %v1554_v33  ;;  %v1557_v42 = vpack.c.bf16 %v1662_v37, %v1662_v37  ;;  %v1226_v48 = vsel %vm1013_vm2, %v1155_v34, 0.0  ;;  %v1158_v59 = vmul.f32 %v1662_v37, %v1662_v37  ;;  %v1035_v4 = vsel %vm1013_vm2, %v1662_v37, 0.0 }
  0xee   : > { %v1030_v44 = vadd.f32 %v1029_v41, %v1028_v36  ;;  %v1225_v45 = vadd.f32 %v1224_v40, %v1223_v35  ;;  %v472_v46 = vpop.f32.mrf.mxu0  ;;  %v1989_v21 = vpop.f32.mrf.mxu1  ;;  %988 = vst.msk [vmem:[%s1888_s28 + $0x9c] sm:$0xf] %vm948_vm1, %v1585_v31 }
  0xef   : > { %960 = vst.msk [vmem:[%s1888_s28 + $0x2c] sm:$0xf] %vm948_vm1, %v1557_v42  ;;  %v1555_v49 = vpack.c.bf16 %v472_v46, %v472_v46  ;;  %v1031_v50 = vsel %vm1013_vm2, %v472_v46, 0.0  ;;  %v1156_v52 = vmul.f32 %v472_v46, %v472_v46  ;;  %v1232_v14 = vsel %vm1013_vm2, %v1158_v59, 0.0 }
  0xf0   : > { %v1227_v53 = vadd.f32 %v1226_v48, %v1225_v45  ;;  %v1032_v54 = vadd.f32 %v1031_v50, %v1030_v44  ;;  %v1665_v55 = vpop.f32.mrf.mxu0  ;;  %v1997_v32 = vpop.f32.mrf.mxu1  ;;  %v1583_v50 = vpack.c.bf16 %v1957_v47, %v1957_v47 }
  0xf1   : > { %958 = vst.msk [vmem:[%s1888_s28 + $0x24] sm:$0xf] %vm948_vm1, %v1555_v49  ;;  %v1228_v61 = vsel %vm1013_vm2, %v1156_v52, 0.0  ;;  %v1560_v62 = vpack.c.bf16 %v1665_v55, %v1665_v55  ;;  %v1161_v17 = vmul.f32 %v1665_v55, %v1665_v55  ;;  %v1041_v33 = vsel %vm1013_vm2, %v1665_v55, 0.0 }
  0xf2   : > { %v1034_v63 = vadd.f32 %v1033_v58, %v1032_v54  ;;  %v1229_v0 = vadd.f32 %v1228_v61, %v1227_v53  ;;  %v485_v1 = vpop.f32.mrf.mxu0  ;;  %v2005_v41 = vpop.f32.mrf.mxu1  ;;  %986 = vst.msk [vmem:[%s1888_s28 + $0x94] sm:$0xf] %vm948_vm1, %v1583_v50 }
  0xf3   : > { %963 = vst.msk [vmem:[%s1888_s28 + $0x38] sm:$0xf] %vm948_vm1, %v1560_v62  ;;  %v1558_v6 = vpack.c.bf16 %v485_v1, %v485_v1  ;;  %v1159_v7 = vmul.f32 %v485_v1, %v485_v1  ;;  %v1037_v15 = vsel %vm1013_vm2, %v485_v1, 0.0  ;;  %v1238_v42 = vsel %vm1013_vm2, %v1161_v17, 0.0 }
  0xf4   : > { %v1231_v8 = vadd.f32 %v1230_v3, %v1229_v0  ;;  %v1036_v9 = vadd.f32 %v1035_v4, %v1034_v63  ;;  %v1666_v10 = vpop.f32.mrf.mxu0  ;;  %v2013_v52 = vpop.f32.mrf.mxu1 }
  0xf5   : > { %961 = vst.msk [vmem:[%s1888_s28 + $0x30] sm:$0xf] %vm948_vm1, %v1558_v6  ;;  %v1561_v16 = vpack.c.bf16 %v1666_v10, %v1666_v10  ;;  %v1234_v23 = vsel %vm1013_vm2, %v1159_v7, 0.0  ;;  %v1162_v34 = vmul.f32 %v1666_v10, %v1666_v10  ;;  %v1043_v43 = vsel %vm1013_vm2, %v1666_v10, 0.0 }
  0xf6   : > { %v1038_v18 = vadd.f32 %v1037_v15, %v1036_v9  ;;  %v1233_v19 = vadd.f32 %v1232_v14, %v1231_v8  ;;  %v488_v20 = vpop.f32.mrf.mxu0  ;;  %v2021_v62 = vpop.f32.mrf.mxu1  ;;  %v1588_v8 = vpack.c.bf16 %v1965_v57, %v1965_v57 }
  0xf7   : > { %964 = vst.msk [vmem:[%s1888_s28 + $0x3c] sm:$0xf] %vm948_vm1, %v1561_v16  ;;  %v1559_v24 = vpack.c.bf16 %v488_v20, %v488_v20  ;;  %v1039_v25 = vsel %vm1013_vm2, %v488_v20, 0.0  ;;  %v1160_v26 = vmul.f32 %v488_v20, %v488_v20  ;;  %v1240_v53 = vsel %vm1013_vm2, %v1162_v34, 0.0 }
  0xf8   : > { %v1235_v27 = vadd.f32 %v1234_v23, %v1233_v19  ;;  %v1040_v28 = vadd.f32 %v1039_v25, %v1038_v18  ;;  %v1669_v29 = vpop.f32.mrf.mxu0  ;;  %v2029_v9 = vpop.f32.mrf.mxu1  ;;  %991 = vst.msk [vmem:[%s1888_s28 + $0xa8] sm:$0xf] %vm948_vm1, %v1588_v8 }
  0xf9   : > { %962 = vst.msk [vmem:[%s1888_s28 + $0x34] sm:$0xf] %vm948_vm1, %v1559_v24  ;;  %v1236_v35 = vsel %vm1013_vm2, %v1160_v26, 0.0  ;;  %v1564_v36 = vpack.c.bf16 %v1669_v29, %v1669_v29  ;;  %v1165_v56 = vmul.f32 %v1669_v29, %v1669_v29  ;;  %v1049_v10 = vsel %vm1013_vm2, %v1669_v29, 0.0 }
  0xfa   : > { %v1042_v37 = vadd.f32 %v1041_v33, %v1040_v28  ;;  %v1237_v38 = vadd.f32 %v1236_v35, %v1235_v27  ;;  %v501_v40 = vpop.f32.mrf.mxu0  ;;  %v2037_v19 = vpop.f32.mrf.mxu1  ;;  %v1586_v29 = vpack.c.bf16 %v1973_v2, %v1973_v2 }
  0xfb   : > { %967 = vst.msk [vmem:[%s1888_s28 + $0x48] sm:$0xf] %vm948_vm1, %v1564_v36  ;;  %v1562_v44 = vpack.c.bf16 %v501_v40, %v501_v40  ;;  %v1163_v45 = vmul.f32 %v501_v40, %v501_v40  ;;  %v1045_v54 = vsel %vm1013_vm2, %v501_v40, 0.0  ;;  %v1246_v20 = vsel %vm1013_vm2, %v1165_v56, 0.0 }
  0xfc   : > { %v1239_v46 = vadd.f32 %v1238_v42, %v1237_v38  ;;  %v1044_v48 = vadd.f32 %v1043_v43, %v1042_v37  ;;  %v1670_v49 = vpop.f32.mrf.mxu0  ;;  %v2045_v31 = vpop.f32.mrf.mxu1  ;;  %989 = vst.msk [vmem:[%s1888_s28 + $0xa0] sm:$0xf] %vm948_vm1, %v1586_v29 }
  0xfd   : > { %965 = vst.msk [vmem:[%s1888_s28 + $0x40] sm:$0xf] %vm948_vm1, %v1562_v44  ;;  %v1565_v55 = vpack.c.bf16 %v1670_v49, %v1670_v49  ;;  %v1242_v63 = vsel %vm1013_vm2, %v1163_v45, 0.0  ;;  %v1166_v11 = vmul.f32 %v1670_v49, %v1670_v49  ;;  %v1051_v23 = vsel %vm1013_vm2, %v1670_v49, 0.0 }
  0xfe   : > { %v1046_v58 = vadd.f32 %v1045_v54, %v1044_v48  ;;  %v1241_v59 = vadd.f32 %v1240_v53, %v1239_v46  ;;  %v504_v61 = vpop.f32.mrf.mxu0  ;;  %v2053_v42 = vpop.f32.mrf.mxu1  ;;  %v1589_v53 = vpack.c.bf16 %v1981_v12, %v1981_v12 }
  0xff   : > { %968 = vst.msk [vmem:[%s1888_s28 + $0x4c] sm:$0xf] %vm948_vm1, %v1565_v55  ;;  %v1563_v0 = vpack.c.bf16 %v504_v61, %v504_v61  ;;  %v1047_v1 = vsel %vm1013_vm2, %v504_v61, 0.0  ;;  %v1164_v3 = vmul.f32 %v504_v61, %v504_v61  ;;  %v1248_v33 = vsel %vm1013_vm2, %v1166_v11, 0.0 }
 0x100   : > { %v1243_v4 = vadd.f32 %v1242_v63, %v1241_v59  ;;  %v1048_v6 = vadd.f32 %v1047_v1, %v1046_v58  ;;  %v1673_v7 = vpop.f32.mrf.mxu0  ;;  %v2061_v54 = vpop.f32.mrf.mxu1  ;;  %992 = vst.msk [vmem:[%s1888_s28 + $0xac] sm:$0xf] %vm948_vm1, %v1589_v53 }
 0x101   : > { %966 = vst.msk [vmem:[%s1888_s28 + $0x44] sm:$0xf] %vm948_vm1, %v1563_v0  ;;  %v1244_v14 = vsel %vm1013_vm2, %v1164_v3, 0.0  ;;  %v1568_v15 = vpack.c.bf16 %v1673_v7, %v1673_v7  ;;  %v1169_v36 = vmul.f32 %v1673_v7, %v1673_v7  ;;  %v1057_v55 = vsel %vm1013_vm2, %v1673_v7, 0.0 }
 0x102   : > { %v1050_v16 = vadd.f32 %v1049_v10, %v1048_v6  ;;  %v1245_v17 = vadd.f32 %v1244_v14, %v1243_v4  ;;  %v517_v18 = vpop.f32.mrf.mxu0  ;;  %v2069_v1 = vpop.f32.mrf.mxu1  ;;  %v1587_v14 = vpack.c.bf16 %v1989_v21, %v1989_v21 }
 0x103   : > { %971 = vst.msk [vmem:[%s1888_s28 + $0x58] sm:$0xf] %vm948_vm1, %v1568_v15  ;;  %v1566_v24 = vpack.c.bf16 %v517_v18, %v517_v18  ;;  %v1167_v25 = vmul.f32 %v517_v18, %v517_v18  ;;  %v1053_v34 = vsel %vm1013_vm2, %v517_v18, 0.0  ;;  %v1254_v3 = vsel %vm1013_vm2, %v1169_v36, 0.0 }
 0x104   : > { %v1247_v26 = vadd.f32 %v1246_v20, %v1245_v17  ;;  %v1052_v27 = vadd.f32 %v1051_v23, %v1050_v16  ;;  %v1674_v28 = vpop.f32.mrf.mxu0  ;;  %v2077_v15 = vpop.f32.mrf.mxu1  ;;  %990 = vst.msk [vmem:[%s1888_s28 + $0xa4] sm:$0xf] %vm948_vm1, %v1587_v14 }
 0x105   : > { %969 = vst.msk [vmem:[%s1888_s28 + $0x50] sm:$0xf] %vm948_vm1, %v1566_v24  ;;  %v1569_v35 = vpack.c.bf16 %v1674_v28, %v1674_v28  ;;  %v1250_v43 = vsel %vm1013_vm2, %v1167_v25, 0.0  ;;  %v1170_v56 = vmul.f32 %v1674_v28, %v1674_v28  ;;  %v1059_v4 = vsel %vm1013_vm2, %v1674_v28, 0.0 }
 0x106   : > { %v1054_v37 = vadd.f32 %v1053_v34, %v1052_v27  ;;  %v1249_v38 = vadd.f32 %v1248_v33, %v1247_v26  ;;  %v520_v40 = vpop.f32.mrf.mxu0  ;;  %v2085_v26 = vpop.f32.mrf.mxu1 }
 0x107   : > { %972 = vst.msk [vmem:[%s1888_s28 + $0x5c] sm:$0xf] %vm948_vm1, %v1569_v35  ;;  %v1567_v44 = vpack.c.bf16 %v520_v40, %v520_v40  ;;  %v1055_v45 = vsel %vm1013_vm2, %v520_v40, 0.0  ;;  %v1168_v46 = vmul.f32 %v520_v40, %v520_v40  ;;  %v1256_v16 = vsel %vm1013_vm2, %v1170_v56, 0.0 }
 0x108   : > { %v1251_v48 = vadd.f32 %v1250_v43, %v1249_v38  ;;  %v1056_v49 = vadd.f32 %v1055_v45, %v1054_v37  ;;  %v1677_v50 = vpop.f32.mrf.mxu0  ;;  %v1592_v37 = vpack.c.bf16 %v1997_v32, %v1997_v32  ;;  %v2093_v38 = vpop.f32.mrf.mxu1 }
 0x109   : > { %970 = vst.msk [vmem:[%s1888_s28 + $0x54] sm:$0xf] %vm948_vm1, %v1567_v44  ;;  %v1252_v58 = vsel %vm1013_vm2, %v1168_v46, 0.0  ;;  %v1572_v59 = vpack.c.bf16 %v1677_v50, %v1677_v50  ;;  %v1173_v20 = vmul.f32 %v1677_v50, %v1677_v50  ;;  %v1065_v40 = vsel %vm1013_vm2, %v1677_v50, 0.0 }
 0x10a   : > { %v1058_v61 = vadd.f32 %v1057_v55, %v1056_v49  ;;  %v1253_v63 = vadd.f32 %v1252_v58, %v1251_v48  ;;  %v533_v0 = vpop.f32.mrf.mxu0  ;;  %995 = vst.msk [vmem:[%s1888_s28 + $0xb8] sm:$0xf] %vm948_vm1, %v1592_v37 }
 0x10b   : > { %975 = vst.msk [vmem:[%s1888_s28 + $0x68] sm:$0xf] %vm948_vm1, %v1572_v59  ;;  %v1570_v6 = vpack.c.bf16 %v533_v0, %v533_v0  ;;  %v1171_v7 = vmul.f32 %v533_v0, %v533_v0  ;;  %v1061_v17 = vsel %vm1013_vm2, %v533_v0, 0.0  ;;  %v1262_v53 = vsel %vm1013_vm2, %v1173_v20, 0.0  ;;  %v2107_v0 = vpop.f32.mrf.mxu1 }
 0x10c   : > { %v1255_v8 = vadd.f32 %v1254_v3, %v1253_v63  ;;  %v1060_v10 = vadd.f32 %v1059_v4, %v1058_v61  ;;  %v1678_v11 = vpop.f32.mrf.mxu0  ;;  %v1590_v63 = vpack.c.bf16 %v2005_v41, %v2005_v41 }
 0x10d   : > { %973 = vst.msk [vmem:[%s1888_s28 + $0x60] sm:$0xf] %vm948_vm1, %v1570_v6  ;;  %v1573_v18 = vpack.c.bf16 %v1678_v11, %v1678_v11  ;;  %v1258_v27 = vsel %vm1013_vm2, %v1171_v7, 0.0  ;;  %v1174_v43 = vmul.f32 %v1678_v11, %v1678_v11  ;;  %v1067_v55 = vsel %vm1013_vm2, %v1678_v11, 0.0 }
 0x10e   : > { %v1062_v23 = vadd.f32 %v1061_v17, %v1060_v10  ;;  %v1257_v24 = vadd.f32 %v1256_v16, %v1255_v8  ;;  %v536_v25 = vpop.f32.mrf.mxu0  ;;  %993 = vst.msk [vmem:[%s1888_s28 + $0xb0] sm:$0xf] %vm948_vm1, %v1590_v63  ;;  %v1595_v63 = vpack.c.bf16 %v2053_v42, %v2053_v42 }
 0x10f   : > { %976 = vst.msk [vmem:[%s1888_s28 + $0x6c] sm:$0xf] %vm948_vm1, %v1573_v18  ;;  %v1571_v28 = vpack.c.bf16 %v536_v25, %v536_v25  ;;  %v1063_v29 = vsel %vm1013_vm2, %v536_v25, 0.0  ;;  %v1172_v33 = vmul.f32 %v536_v25, %v536_v25  ;;  %v1264_v3 = vsel %vm1013_vm2, %v1174_v43, 0.0  ;;  %v2121_v25 = vpop.f32.mrf.mxu1 }
 0x110   : > { %v1259_v34 = vadd.f32 %v1258_v27, %v1257_v24  ;;  %v1064_v35 = vadd.f32 %v1063_v29, %v1062_v23  ;;  %v1681_v36 = vpop.f32.mrf.mxu0  ;;  %v1593_v24 = vpack.c.bf16 %v2013_v52, %v2013_v52  ;;  %v1596_v43 = vpack.c.bf16 %v2029_v9, %v2029_v9  ;;  %998 = vst.msk [vmem:[%s1888_s28 + $0xc4] sm:$0xf] %vm948_vm1, %v1595_v63 }
 0x111   : > { %974 = vst.msk [vmem:[%s1888_s28 + $0x64] sm:$0xf] %vm948_vm1, %v1571_v28  ;;  %v1260_v44 = vsel %vm1013_vm2, %v1172_v33, 0.0  ;;  %v1576_v45 = vpack.c.bf16 %v1681_v36, %v1681_v36  ;;  %v1177_v7 = vmul.f32 %v1681_v36, %v1681_v36  ;;  %v1073_v27 = vsel %vm1013_vm2, %v1681_v36, 0.0 }
 0x112   : > { %v1066_v46 = vadd.f32 %v1065_v40, %v1064_v35  ;;  %v1261_v48 = vadd.f32 %v1260_v44, %v1259_v34  ;;  %v549_v49 = vpop.f32.mrf.mxu0  ;;  %v1591_v33 = vpack.c.bf16 %v2021_v62, %v2021_v62  ;;  %996 = vst.msk [vmem:[%s1888_s28 + $0xbc] sm:$0xf] %vm948_vm1, %v1593_v24  ;;  %v1179_v36 = vmul.f32 %v1907_v60, %v1907_v60 }
 0x113   : > { %979 = vst.msk [vmem:[%s1888_s28 + $0x78] sm:$0xf] %vm948_vm1, %v1576_v45  ;;  %v1574_v50 = vpack.c.bf16 %v549_v49, %v549_v49  ;;  %v1175_v56 = vmul.f32 %v549_v49, %v549_v49  ;;  %v1069_v4 = vsel %vm1013_vm2, %v549_v49, 0.0  ;;  %v1270_v37 = vsel %vm1013_vm2, %v1177_v7, 0.0  ;;  %999 = vst.msk [vmem:[%s1888_s28 + $0xc8] sm:$0xf] %vm948_vm1, %v1596_v43 }
 0x114   : > { %v1263_v58 = vadd.f32 %v1262_v53, %v1261_v48  ;;  %v1068_v59 = vadd.f32 %v1067_v55, %v1066_v46  ;;  %v1682_v61 = vpop.f32.mrf.mxu0  ;;  %994 = vst.msk [vmem:[%s1888_s28 + $0xb4] sm:$0xf] %vm948_vm1, %v1591_v33  ;;  %v1594_v46 = vpack.c.bf16 %v2037_v19, %v2037_v19  ;;  %v2141_v48 = vpop.f32.mrf.mxu1  ;;  %v1077_v53 = vsel %vm1013_vm2, %v1907_v60, 0.0 }
 0x115   : > { %977 = vst.msk [vmem:[%s1888_s28 + $0x70] sm:$0xf] %vm948_vm1, %v1574_v50  ;;  %v1577_v6 = vpack.c.bf16 %v1682_v61, %v1682_v61  ;;  %v1266_v14 = vsel %vm1013_vm2, %v1175_v56, 0.0  ;;  %v1178_v28 = vmul.f32 %v1682_v61, %v1682_v61  ;;  %v1075_v40 = vsel %vm1013_vm2, %v1682_v61, 0.0 }
 0x116   : > { %v1070_v8 = vadd.f32 %v1069_v4, %v1068_v59  ;;  %v1265_v10 = vadd.f32 %v1264_v3, %v1263_v58  ;;  %v552_v11 = vpop.f32.mrf.mxu0  ;;  %v1180_v55 = vmul.f32 %v1925_v13, %v1925_v13  ;;  %v1597_v50 = vpack.c.bf16 %v2045_v31, %v2045_v31  ;;  %997 = vst.msk [vmem:[%s1888_s28 + $0xc0] sm:$0xf] %vm948_vm1, %v1594_v46  ;;  %v2165_v7 = vpop.f32.mrf.mxu1 }
 0x117   : > { %980 = vst.msk [vmem:[%s1888_s28 + $0x7c] sm:$0xf] %vm948_vm1, %v1577_v6  ;;  %v1575_v16 = vpack.c.bf16 %v552_v11, %v552_v11  ;;  %v1071_v17 = vsel %vm1013_vm2, %v552_v11, 0.0  ;;  %v1176_v18 = vmul.f32 %v552_v11, %v552_v11  ;;  %v1272_v49 = vsel %vm1013_vm2, %v1178_v28, 0.0 }
 0x118   : > { %v1267_v20 = vadd.f32 %v1266_v14, %v1265_v10  ;;  %v1072_v23 = vadd.f32 %v1071_v17, %v1070_v8  ;;  %v1181_v59 = vmul.f32 %v1899_v51, %v1899_v51  ;;  %v1274_v61 = vsel %vm1013_vm2, %v1179_v36, 0.0  ;;  %1000 = vst.msk [vmem:[%s1888_s28 + $0xcc] sm:$0xf] %vm948_vm1, %v1597_v50  ;;  %v2189_v28 = vpop.f32.mrf.mxu1 }
 0x119   : > { %978 = vst.msk [vmem:[%s1888_s28 + $0x74] sm:$0xf] %vm948_vm1, %v1575_v16  ;;  %v1268_v29 = vsel %vm1013_vm2, %v1176_v18, 0.0  ;;  %v1079_v60 = vsel %vm1013_vm2, %v1925_v13, 0.0  ;;  %v1600_v6 = vpack.c.bf16 %v2061_v54, %v2061_v54  ;;  %v1081_v8 = vsel %vm1013_vm2, %v1899_v51, 0.0 }
 0x11a   : > { %v1074_v34 = vadd.f32 %v1073_v27, %v1072_v23  ;;  %v1269_v35 = vadd.f32 %v1268_v29, %v1267_v20  ;;  %v1182_v10 = vmul.f32 %v1917_v5, %v1917_v5  ;;  %v1276_v13 = vsel %vm1013_vm2, %v1180_v55, 0.0 }
 0x11b   : > { %v1598_v11 = vpack.c.bf16 %v2069_v1, %v2069_v1  ;;  %1003 = vst.msk [vmem:[%s1888_s28 + $0xd8] sm:$0xf] %vm948_vm1, %v1600_v6  ;;  %v1278_v17 = vsel %vm1013_vm2, %v1181_v59, 0.0  ;;  %v1083_v51 = vsel %vm1013_vm2, %v1917_v5, 0.0  ;;  %v1183_v18 = vmul.f32 %v1941_v30, %v1941_v30 }
 0x11c   : > { %v1076_v44 = vadd.f32 %v1075_v40, %v1074_v34  ;;  %v1271_v45 = vadd.f32 %v1270_v37, %v1269_v35  ;;  %v1601_v20 = vpack.c.bf16 %v2077_v15, %v2077_v15  ;;  %v1599_v27 = vpack.c.bf16 %v2085_v26, %v2085_v26 }
 0x11d   : > { %1001 = vst.msk [vmem:[%s1888_s28 + $0xd0] sm:$0xf] %vm948_vm1, %v1598_v11  ;;  %v1280_v29 = vsel %vm1013_vm2, %v1182_v10, 0.0  ;;  %v1085_v5 = vsel %vm1013_vm2, %v1941_v30, 0.0  ;;  %v1184_v33 = vmul.f32 %v1957_v47, %v1957_v47  ;;  %v1604_v34 = vpack.c.bf16 %v2093_v38, %v2093_v38 }
 0x11e   : > { %v1273_v56 = vadd.f32 %v1272_v49, %v1271_v45  ;;  %v1078_v58 = vadd.f32 %v1077_v53, %v1076_v44  ;;  %1004 = vst.msk [vmem:[%s1888_s28 + $0xdc] sm:$0xf] %vm948_vm1, %v1601_v20  ;;  %1002 = vst.msk [vmem:[%s1888_s28 + $0xd4] sm:$0xf] %vm948_vm1, %v1599_v27  ;;  %v1185_v40 = vmul.f32 %v1933_v22, %v1933_v22  ;;  %v1282_v36 = vsel %vm1013_vm2, %v1183_v18, 0.0  ;;  %v2213_v49 = vpop.f32.mrf.mxu1 }
 0x11f   : > { %v1087_v30 = vsel %vm1013_vm2, %v1957_v47, 0.0  ;;  %1007 = vst.msk [vmem:[%s1888_s28 + $0xe8] sm:$0xf] %vm948_vm1, %v1604_v34  ;;  %v1602_v43 = vpack.c.bf16 %v2107_v0, %v2107_v0  ;;  %v1605_v46 = vpack.c.bf16 %v2121_v25, %v2121_v25  ;;  %v1089_v53 = vsel %vm1013_vm2, %v1933_v22, 0.0 }
 0x120   : > { %v1080_v3 = vadd.f32 %v1079_v60, %v1078_v58  ;;  %v1275_v4 = vadd.f32 %v1274_v61, %v1273_v56  ;;  %v1186_v55 = vmul.f32 %v1949_v39, %v1949_v39  ;;  %v1284_v47 = vsel %vm1013_vm2, %v1184_v33, 0.0  ;;  %v2237_v6 = vpop.f32.mrf.mxu1 }
 0x121   : > { %1005 = vst.msk [vmem:[%s1888_s28 + $0xe0] sm:$0xf] %vm948_vm1, %v1602_v43  ;;  %v1603_v50 = vpack.c.bf16 %v2141_v48, %v2141_v48  ;;  %1008 = vst.msk [vmem:[%s1888_s28 + $0xec] sm:$0xf] %vm948_vm1, %v1605_v46  ;;  %v1286_v59 = vsel %vm1013_vm2, %v1185_v40, 0.0  ;;  %v1091_v22 = vsel %vm1013_vm2, %v1949_v39, 0.0  ;;  %v1187_v61 = vmul.f32 %v1973_v2, %v1973_v2 }
 0x122   : > { %v1082_v14 = vadd.f32 %v1081_v8, %v1080_v3  ;;  %v1277_v16 = vadd.f32 %v1276_v13, %v1275_v4  ;;  %v1608_v60 = vpack.c.bf16 %v2165_v7, %v2165_v7  ;;  %v1606_v4 = vpack.c.bf16 %v2189_v28, %v2189_v28 }
 0x123   : > { %1006 = vst.msk [vmem:[%s1888_s28 + $0xe4] sm:$0xf] %vm948_vm1, %v1603_v50  ;;  %v1288_v8 = vsel %vm1013_vm2, %v1186_v55, 0.0  ;;  %v1093_v39 = vsel %vm1013_vm2, %v1973_v2, 0.0  ;;  %v1188_v10 = vmul.f32 %v1989_v21, %v1989_v21  ;;  %v1609_v13 = vpack.c.bf16 %v2213_v49, %v2213_v49 }
 0x124   : > { %v1279_v23 = vadd.f32 %v1278_v17, %v1277_v16  ;;  %v1084_v24 = vadd.f32 %v1083_v51, %v1082_v14  ;;  %1011 = vst.msk [vmem:[%s1888_s28 + $0xf8] sm:$0xf] %vm948_vm1, %v1608_v60  ;;  %1009 = vst.msk [vmem:[%s1888_s28 + $0xf0] sm:$0xf] %vm948_vm1, %v1606_v4  ;;  %v1189_v16 = vmul.f32 %v1965_v57, %v1965_v57  ;;  %v1290_v17 = vsel %vm1013_vm2, %v1187_v61, 0.0 }
 0x125   : > { %v1095_v2 = vsel %vm1013_vm2, %v1989_v21, 0.0  ;;  %1012 = vst.msk [vmem:[%s1888_s28 + $0xfc] sm:$0xf] %vm948_vm1, %v1609_v13  ;;  %v1607_v51 = vpack.c.bf16 %v2237_v6, %v2237_v6  ;;  %v1292_v27 = vsel %vm1013_vm2, %v1188_v10, 0.0  ;;  %v1099_v33 = vsel %vm1013_vm2, %v1981_v12, 0.0 }
 0x126   : > { %v1086_v35 = vadd.f32 %v1085_v5, %v1084_v24  ;;  %v1281_v37 = vadd.f32 %v1280_v29, %v1279_v23  ;;  %v1097_v23 = vsel %vm1013_vm2, %v1965_v57, 0.0  ;;  %v1190_v24 = vmul.f32 %v1981_v12, %v1981_v12 }
 0x127   : > { %1010 = vst.msk [vmem:[%s1888_s28 + $0xf4] sm:$0xf] %vm948_vm1, %v1607_v51  ;;  %v1294_v21 = vsel %vm1013_vm2, %v1189_v16, 0.0  ;;  %v1191_v34 = vmul.f32 %v2005_v41, %v2005_v41  ;;  %v1101_v40 = vsel %vm1013_vm2, %v2005_v41, 0.0  ;;  %v1105_v55 = vsel %vm1013_vm2, %v1997_v32, 0.0 }
 0x128   : > { %v1283_v44 = vadd.f32 %v1282_v36, %v1281_v37  ;;  %v1088_v45 = vadd.f32 %v1087_v30, %v1086_v35  ;;  %v1296_v57 = vsel %vm1013_vm2, %v1190_v24, 0.0  ;;  %v1192_v36 = vmul.f32 %v2021_v62, %v2021_v62 }
 0x129   : > { %v1298_v12 = vsel %vm1013_vm2, %v1191_v34, 0.0  ;;  %v1194_v41 = vmul.f32 %v2013_v52, %v2013_v52  ;;  %v1115_v51 = vsel %vm1013_vm2, %v2045_v31, 0.0  ;;  %v1200_v24 = vmul.f32 %v2085_v26, %v2085_v26 }
 0x12a   : > { %v1090_v56 = vadd.f32 %v1089_v53, %v1088_v45  ;;  %v1285_v58 = vadd.f32 %v1284_v47, %v1283_v44  ;;  %v1193_v44 = vmul.f32 %v1997_v32, %v1997_v32  ;;  %v1103_v45 = vsel %vm1013_vm2, %v2021_v62, 0.0 }
 0x12b   : > { %v1300_v47 = vsel %vm1013_vm2, %v1192_v36, 0.0  ;;  %v1195_v62 = vmul.f32 %v2037_v19, %v2037_v19  ;;  %v1304_v60 = vsel %vm1013_vm2, %v1194_v41, 0.0  ;;  %v1109_v32 = vsel %vm1013_vm2, %v2037_v19, 0.0 }
 0x12c   : > { %v1287_v63 = vadd.f32 %v1286_v59, %v1285_v58  ;;  %v1092_v3 = vadd.f32 %v1091_v22, %v1090_v56  ;;  %v1302_v58 = vsel %vm1013_vm2, %v1193_v44, 0.0  ;;  %v1107_v59 = vsel %vm1013_vm2, %v2013_v52, 0.0 }
 0x12d   : > { %v1306_v52 = vsel %vm1013_vm2, %v1195_v62, 0.0  ;;  %v1198_v19 = vmul.f32 %v2045_v31, %v2045_v31  ;;  %v1127_v41 = vsel %vm1013_vm2, %v2141_v48, 0.0 }
 0x12e   : > { %v1094_v11 = vadd.f32 %v1093_v39, %v1092_v3  ;;  %v1289_v14 = vadd.f32 %v1288_v8, %v1287_v63  ;;  %v1196_v63 = vmul.f32 %v2053_v42, %v2053_v42  ;;  %v1197_v8 = vmul.f32 %v2029_v9, %v2029_v9 }
 0x12f   : > { %v1111_v39 = vsel %vm1013_vm2, %v2053_v42, 0.0  ;;  %v1199_v42 = vmul.f32 %v2069_v1, %v2069_v1 }
 0x130   : > { %v1291_v18 = vadd.f32 %v1290_v17, %v1289_v14  ;;  %v1096_v20 = vadd.f32 %v1095_v2, %v1094_v11  ;;  %v1113_v11 = vsel %vm1013_vm2, %v2029_v9, 0.0  ;;  %v1308_v14 = vsel %vm1013_vm2, %v1196_v63, 0.0 }
 0x131   : > { %v1310_v2 = vsel %vm1013_vm2, %v1197_v8, 0.0  ;;  %v1117_v9 = vsel %vm1013_vm2, %v2069_v1, 0.0  ;;  %v1314_v31 = vsel %vm1013_vm2, %v1199_v42, 0.0  ;;  %v1202_v1 = vmul.f32 %v2077_v15, %v2077_v15 }
 0x132   : > { %v1098_v29 = vadd.f32 %v1097_v23, %v1096_v20  ;;  %v1293_v5 = vadd.f32 %v1292_v27, %v1291_v18  ;;  %v1312_v23 = vsel %vm1013_vm2, %v1198_v19, 0.0 }
 0x134   : > { %v1295_v35 = vadd.f32 %v1294_v21, %v1293_v5  ;;  %v1100_v37 = vadd.f32 %v1099_v33, %v1098_v29  ;;  %v1201_v5 = vmul.f32 %v2061_v54, %v2061_v54  ;;  %v1119_v21 = vsel %vm1013_vm2, %v2085_v26, 0.0 }
 0x135   : > { %v1203_v26 = vmul.f32 %v2107_v0, %v2107_v0 }
 0x136   : > { %v1102_v30 = vadd.f32 %v1101_v40, %v1100_v37  ;;  %v1297_v43 = vadd.f32 %v1296_v57, %v1295_v35  ;;  %v1121_v35 = vsel %vm1013_vm2, %v2061_v54, 0.0  ;;  %v1316_v37 = vsel %vm1013_vm2, %v1200_v24, 0.0 }
 0x137   : > { %v1318_v36 = vsel %vm1013_vm2, %v1201_v5, 0.0  ;;  %v1125_v54 = vsel %vm1013_vm2, %v2107_v0, 0.0  ;;  %v1206_v0 = vmul.f32 %v2121_v25, %v2121_v25 }
 0x138   : > { %v1299_v46 = vadd.f32 %v1298_v12, %v1297_v43  ;;  %v1104_v53 = vadd.f32 %v1103_v45, %v1102_v30  ;;  %v1123_v30 = vsel %vm1013_vm2, %v2077_v15, 0.0  ;;  %v1320_v12 = vsel %vm1013_vm2, %v1202_v1, 0.0 }
 0x139   : > { %v1204_v45 = vmul.f32 %v2141_v48, %v2141_v48  ;;  %v1322_v15 = vsel %vm1013_vm2, %v1203_v26, 0.0  ;;  %v1207_v48 = vmul.f32 %v2189_v28, %v2189_v28  ;;  %v1328_v63 = vsel %vm1013_vm2, %v1206_v0, 0.0 }
 0x13a   : > { %v1106_v50 = vadd.f32 %v1105_v55, %v1104_v53  ;;  %v1301_v56 = vadd.f32 %v1300_v47, %v1299_v46  ;;  %v1205_v55 = vmul.f32 %v2093_v38, %v2093_v38 }
 0x13c   : > { %v1303_v22 = vadd.f32 %v1302_v58, %v1301_v56  ;;  %v1108_v61 = vadd.f32 %v1107_v59, %v1106_v50  ;;  %v1129_v56 = vsel %vm1013_vm2, %v2093_v38, 0.0  ;;  %v1324_v58 = vsel %vm1013_vm2, %v1204_v45, 0.0 }
 0x13d   : > { %v1133_v38 = vsel %vm1013_vm2, %v2189_v28, 0.0  ;;  %v1210_v28 = vmul.f32 %v2213_v49, %v2213_v49 }
 0x13e   : > { %v1110_v3 = vadd.f32 %v1109_v32, %v1108_v61  ;;  %v1305_v4 = vadd.f32 %v1304_v60, %v1303_v22  ;;  %v1326_v22 = vsel %vm1013_vm2, %v1205_v55, 0.0  ;;  %v1131_v61 = vsel %vm1013_vm2, %v2121_v25, 0.0 }
 0x13f   : > { %v1330_v25 = vsel %vm1013_vm2, %v1207_v48, 0.0  ;;  %v1336_v42 = vsel %vm1013_vm2, %v1210_v28, 0.0 }
 0x140   : > { %v1307_v10 = vadd.f32 %v1306_v52, %v1305_v4  ;;  %v1112_v13 = vadd.f32 %v1111_v39, %v1110_v3  ;;  %v1208_v3 = vmul.f32 %v2237_v6, %v2237_v6  ;;  %v1209_v52 = vmul.f32 %v2165_v7, %v2165_v7 }
 0x141   : > { %v1135_v39 = vsel %vm1013_vm2, %v2237_v6, 0.0 }
 0x142   : > { %v1114_v16 = vadd.f32 %v1113_v11, %v1112_v13  ;;  %v1309_v17 = vadd.f32 %v1308_v14, %v1307_v10  ;;  %v1137_v11 = vsel %vm1013_vm2, %v2165_v7, 0.0  ;;  %v1332_v19 = vsel %vm1013_vm2, %v1208_v3, 0.0 }
 0x144   : > { %v1311_v18 = vadd.f32 %v1310_v2, %v1309_v17  ;;  %v1116_v20 = vadd.f32 %v1115_v51, %v1114_v16  ;;  %v1334_v17 = vsel %vm1013_vm2, %v1209_v52, 0.0  ;;  %v1139_v2 = vsel %vm1013_vm2, %v2213_v49, 0.0 }
 0x146   : > { %v1118_v27 = vadd.f32 %v1117_v9, %v1116_v20  ;;  %v1313_v29 = vadd.f32 %v1312_v23, %v1311_v18 }
 0x148   : > { %v1315_v33 = vadd.f32 %v1314_v31, %v1313_v29  ;;  %v1120_v34 = vadd.f32 %v1119_v21, %v1118_v27 }
 0x14a   : > { %v1122_v57 = vadd.f32 %v1121_v35, %v1120_v34  ;;  %v1317_v40 = vadd.f32 %v1316_v37, %v1315_v33 }
 0x14c   : > { %v1319_v43 = vadd.f32 %v1318_v36, %v1317_v40  ;;  %v1124_v44 = vadd.f32 %v1123_v30, %v1122_v57 }
 0x14e   : > { %v1126_v46 = vadd.f32 %v1125_v54, %v1124_v44  ;;  %v1321_v53 = vadd.f32 %v1320_v12, %v1319_v43 }
 0x150   : > { %v1323_v47 = vadd.f32 %v1322_v15, %v1321_v53  ;;  %v1128_v50 = vadd.f32 %v1127_v41, %v1126_v46 }
 0x152   : > { %v1130_v59 = vadd.f32 %v1129_v56, %v1128_v50  ;;  %v1325_v62 = vadd.f32 %v1324_v58, %v1323_v47 }
 0x154   : > { %v1327_v60 = vadd.f32 %v1326_v22, %v1325_v62  ;;  %v1132_v32 = vadd.f32 %v1131_v61, %v1130_v59 }
 0x156   : > { %v1134_v4 = vadd.f32 %v1133_v38, %v1132_v32  ;;  %v1329_v8 = vadd.f32 %v1328_v63, %v1327_v60 }
 0x158   : > { %v1331_v10 = vadd.f32 %v1330_v25, %v1329_v8  ;;  %v1136_v13 = vadd.f32 %v1135_v39, %v1134_v4 }
 0x15a   : > { %v1138_v14 = vadd.f32 %v1137_v11, %v1136_v13  ;;  %v1333_v16 = vadd.f32 %v1332_v19, %v1331_v10 }
 0x15c   : > { %v1140_v51 = vadd.f32 %v1139_v2, %v1138_v14  ;;  %v1335_v6 = vadd.f32 %v1334_v17, %v1333_v16 }
 0x15e   : > { %v1141_v18 = vrot.slane %v1140_v51, 4  ;;  %v1337_v20 = vadd.f32 %v1336_v42, %v1335_v6 }
 0x160   : > { %v1142_v7 = vadd.f32 %v1141_v18, %v1140_v51  ;;  %v1338_v23 = vrot.slane %v1337_v20, 4 }
 0x162   : > { %v1143_v9 = vrot.slane %v1142_v7, 2  ;;  %v1339_v24 = vadd.f32 %v1338_v23, %v1337_v20 }
 0x164   : > { %v1144_v27 = vadd.f32 %v1143_v9, %v1142_v7  ;;  %v1340_v29 = vrot.slane %v1339_v24, 2 }
 0x166   : > { %v1145_v5 = vrot.slane %v1144_v27, 1  ;;  %v1341_v31 = vadd.f32 %v1340_v29, %v1339_v24 }
 0x168   : > { %v1342_v21 = vrot.slane %v1341_v31, 1  ;;  %v1146_v49 = vadd.f32 %v1145_v5, %v1144_v27 }
 0x16a   : > { %v1343_v33 = vadd.f32 %v1342_v21, %v1341_v31 }
 0x16c   : > { %v1345_v34 = vsel %vm1344_vm3, %v1146_v49, %v1343_v33 }
 0x16d   : > { %1347 = vst.msk [vmem:[%s184_s5] sm:$0x3] %vm1346_vm4, %v1345_v34 }
 0x16e PF: > { %s14_s12 = sadd.s32 1, %s1738_s12  }
 0x16f   : > { %p11_p5 = scmp.ge.s32.totalorder %s14_s12, 6  }
 0x171   :  { %13 = sbr.rel (!%p11_p5) target bundleno = 1 (0x1), region = 70 }

// kernel: vae_forward.11
= control target key start
LH: loop header
LB: loop body
LE: loop exit
PB: predicated region body
PF: predicated region fallthrough
CT: control target
= control target key end

     0   :  { %s2184_s18 = smov 0   ;;  %s2930_s0 = inlined_call_operand.vmem [shape: bf16[400,512], index: 0, kind: input, shape index: {}]   ;;  %s2931_s1 = inlined_call_operand.vmem [shape: bf16[512,32], index: 1, kind: input, shape index: {}]   ;;  %s2932_s2 = inlined_call_operand.vmem [shape: f32[1,512], index: 2, kind: input, shape index: {}]   ;;  %s2933_s3 = inlined_call_operand.vmem [shape: f32[1,512], index: 3, kind: input, shape index: {}]   ;;  %s2934_s4 = inlined_call_operand.vmem [shape: bf16[400,32], index: 4, kind: output, shape index: {0}]   ;;  %s2935_s5 = inlined_call_operand.vmem [shape: f32[2,2,32], index: 5, kind: output, shape index: {1}]  }
   0x1 LB: > { %s2190_s19 = sadd.s32 4294967295, %s2152_s18   ;;  %p1828_p0 = scmp.ge.s32.totalorder %s2152_s18, 1  ;;  %s2152_s18 = sphi %s2184_s18, %s16_s18  }
   0x2   : > { %p192_p1 = scmp.lt.s32.totalorder %s2152_s18, 3 }
   0x4   : > { %p193_p2 = pnand %p1828_p0, %p192_p1 }
   0x5   : > { %s225_s27 = smul.u32 (!%p193_p2), 25, %s2190_s19  ;;  %p238_p4 = scmp.lt.s32.totalorder (!%p193_p2), %s2190_s19, 1 }
   0x6   : > { %196 = sbr.rel (%p193_p2) target bundleno = 365 (0x16d), region = 36 }
   0x7   : > { %p226_p3 = scmp.lt.s32.totalorder (!%p193_p2), %s225_s27, 49 }
   0xb   : > { %v2114_v0 = vld [vmem:[%s2931_s1 + $0x78] sm:$0xff]   ;;  %v2118_v4 = vld [vmem:[%s2931_s1 + $0x70] sm:$0xff]   ;;  %v2122_v8 = vld [vmem:[%s2931_s1 + $0x68] sm:$0xff]   ;;  %v395_v22 = vlaneseq  ;;  %s2937_s27 = smov (!%p226_p3, %s225_s27), 49  ;;  %vm1418_vm0 = vcmask 257024   ;;  %vm1597_vm4 = vcmask 261120  }
   0xc   : > { %v2115_v1 = vld [vmem:[%s2931_s1 + $0xf8] sm:$0xff]   ;;  %1918 = vmatprep.subr.bf16.mxu0 %v2114_v0  ;;  %v2119_v5 = vld [vmem:[%s2931_s1 + $0xf0] sm:$0xff]   ;;  %v2123_v9 = vld [vmem:[%s2931_s1 + $0xe8] sm:$0xff]   ;;  %s1892_s30 = sshll.u32 %s2937_s27, 4  ;;  %s1831_s25 = sshll.u32 %s2937_s27, 2 }
   0xd   : > { %v2116_v2 = vld [vmem:[%s2931_s1 + $0x38] sm:$0xff]   ;;  %2012 = vmatprep.subr.bf16.mxu1 %v2115_v1  ;;  %v2120_v6 = vld [vmem:[%s2931_s1 + $0x30] sm:$0xff]   ;;  %v2124_v10 = vld [vmem:[%s2931_s1 + $0x28] sm:$0xff]   ;;  %v2275_v27 = vshrl.u32 %v395_v22, 7  ;;  %s2293_s14 = scalar_lea.vmem %s2930_s0, %s1892_s30  ;;  %s2583_s29 = scalar_lea.vmem %s2934_s4, %s1831_s25 }
   0xe   : > { %v2117_v3 = vld [vmem:[%s2931_s1 + $0xb8] sm:$0xff]   ;;  %1919 = vmatpush3.bf16.msra.mxu0 %v2116_v2  ;;  %v2121_v7 = vld [vmem:[%s2931_s1 + $0xb0] sm:$0xff]   ;;  %v2125_v11 = vld [vmem:[%s2931_s1 + $0xa8] sm:$0xff]   ;;  %s1470_s27 = smul.u32 200, %s2190_s19  ;;  %s2939_s19 = smov (!%p238_p4, %s2190_s19), 1 }
   0xf   : > { %2013 = vmatpush3.bf16.msra.mxu1 %v2117_v3  ;;  %1920 = vmatprep.subr.bf16.mxu0 %v2118_v4  ;;  %v2126_v12 = vld [vmem:[%s2931_s1 + $0x60] sm:$0xff]   ;;  %v2130_v16 = vld [vmem:[%s2931_s1 + $0x58] sm:$0xff]   ;;  %v2134_v20 = vld [vmem:[%s2931_s1 + $0x50] sm:$0xff]   ;;  %v401_v33 = vsub.s32 1, %v2275_v27  ;;  %v409_v35 = vsub.s32 3, %v2275_v27  ;;  %v397_v39 = vsub.s32 0, %v2275_v27 }
  0x10   : > { %2014 = vmatprep.subr.bf16.mxu1 %v2119_v5  ;;  %v2127_v13 = vld [vmem:[%s2931_s1 + $0xe0] sm:$0xff]   ;;  %v2131_v17 = vld [vmem:[%s2931_s1 + $0xd8] sm:$0xff]   ;;  %v2135_v21 = vld [vmem:[%s2931_s1 + $0xd0] sm:$0xff]   ;;  %v405_v40 = vsub.s32 2, %v2275_v27  ;;  %s1832_s30 = sshll.u32 %s2939_s19, 1 }
  0x11   : > { %v2128_v14 = vld [vmem:[%s2931_s1 + $0x20] sm:$0xff]   ;;  %v2132_v18 = vld [vmem:[%s2931_s1 + $0x18] sm:$0xff]   ;;  %v2136_v23 = vld [vmem:[%s2931_s1 + $0x10] sm:$0xff]   ;;  %s241_s8 = scalar_lea.vmem %s2935_s5, %s1832_s30 }
  0x12   : > { %1921 = vmatpush3.bf16.msra.mxu0 %v2120_v6  ;;  %v2129_v15 = vld [vmem:[%s2931_s1 + $0xa0] sm:$0xff]   ;;  %v2133_v19 = vld [vmem:[%s2931_s1 + $0x98] sm:$0xff]   ;;  %v2137_v24 = vld [vmem:[%s2931_s1 + $0x90] sm:$0xff]  }
  0x13   : > { %2015 = vmatpush3.bf16.msra.mxu1 %v2121_v7  ;;  %1922 = vmatprep.subr.bf16.mxu0 %v2122_v8  ;;  %v2138_v25 = vld [vmem:[%s2931_s1 + $0x48] sm:$0xff]   ;;  %v2142_v30 = vld [vmem:[%s2931_s1 + $0x40] sm:$0xff]   ;;  %v245_v37 = vld [vmem:[%s2293_s14 + $0x10] sm:$0xff] }
  0x14   : > { %2016 = vmatprep.subr.bf16.mxu1 %v2123_v9  ;;  %v2139_v26 = vld [vmem:[%s2931_s1 + $0xc8] sm:$0xff]   ;;  %v2143_v31 = vld [vmem:[%s2931_s1 + $0xc0] sm:$0xff]   ;;  %v298_v43 = vunpack.c.l.bf16 %v245_v37  ;;  %v299_v44 = vunpack.c.h.bf16 %v245_v37  ;;  %v246_v47 = vld [vmem:[%s2293_s14 + $0x18] sm:$0xff] }
  0x15   : > { %v2140_v28 = vld [vmem:[%s2931_s1 + $0x8] sm:$0xff]   ;;  %v2144_v32 = vld [vmem:[%s2931_s1] sm:$0xff]   ;;  %v300_v52 = vunpack.c.l.bf16 %v246_v47  ;;  %v301_v53 = vunpack.c.h.bf16 %v246_v47 }
  0x16   : > { %1923 = vmatpush3.bf16.msra.mxu0 %v2124_v10  ;;  %v2141_v29 = vld [vmem:[%s2931_s1 + $0x88] sm:$0xff]   ;;  %v2145_v34 = vld [vmem:[%s2931_s1 + $0x80] sm:$0xff]  }
  0x17   : > { %2017 = vmatpush3.bf16.msra.mxu1 %v2125_v11  ;;  %1924 = vmatprep.subr.bf16.mxu0 %v2126_v12  ;;  %v243_v36 = vld [vmem:[%s2293_s14] sm:$0xff]  ;;  %v244_v46 = vld [vmem:[%s2293_s14 + $0x8] sm:$0xff] }
  0x18   : > { %2018 = vmatprep.subr.bf16.mxu1 %v2127_v13  ;;  %v293_v38 = vld [vmem:[%s2932_s2] sm:$0xf]  ;;  %v294_v41 = vunpack.c.l.bf16 %v243_v36  ;;  %v295_v42 = vunpack.c.h.bf16 %v243_v36  ;;  %v296_v50 = vunpack.c.l.bf16 %v244_v46  ;;  %v297_v51 = vunpack.c.h.bf16 %v244_v46  ;;  %v249_v13 = vld [vmem:[%s2293_s14 + $0x30] sm:$0xff] }
  0x19   : > { %v515_v45 = vld [vmem:[%s2933_s3] sm:$0xf]  ;;  %v2315_v48 = vrot.slane %v293_v38, %v401_v33  ;;  %v2319_v54 = vrot.slane %v293_v38, %v409_v35  ;;  %v2325_v58 = vrot.slane %v293_v38, %v397_v39  ;;  %v2331_v62 = vrot.slane %v293_v38, %v405_v40 }
  0x1a   : > { %1925 = vmatpush3.bf16.msra.mxu0 %v2128_v14  ;;  %v2317_v49 = vrot.slane %v515_v45, %v401_v33  ;;  %v2321_v55 = vrot.slane %v515_v45, %v409_v35  ;;  %v2327_v59 = vrot.slane %v515_v45, %v397_v39  ;;  %v2333_v63 = vrot.slane %v515_v45, %v405_v40  ;;  %v247_v8 = vld [vmem:[%s2293_s14 + $0x20] sm:$0xff] }
  0x1b   : > { %2019 = vmatpush3.bf16.msra.mxu1 %v2129_v15  ;;  %1926 = vmatprep.subr.bf16.mxu0 %v2130_v16  ;;  %v416_v56 = vmul.f32 %v2315_v48, %v295_v42  ;;  %v420_v57 = vmul.f32 %v2315_v48, %v299_v44  ;;  %v418_v60 = vmul.f32 %v2319_v54, %v297_v51  ;;  %v302_v35 = vunpack.c.l.bf16 %v247_v8  ;;  %v251_v45 = vld [vmem:[%s2293_s14 + $0x40] sm:$0xff] }
  0x1c   : > { %2020 = vmatprep.subr.bf16.mxu1 %v2131_v17  ;;  %v422_v61 = vmul.f32 %v2319_v54, %v301_v53  ;;  %v415_v2 = vmul.f32 %v2325_v58, %v294_v41  ;;  %v419_v3 = vmul.f32 %v2325_v58, %v298_v43  ;;  %v417_v6 = vmul.f32 %v2331_v62, %v296_v50 }
  0x1d   : > { %v538_v0 = vadd.f32 %v2317_v49, %v416_v56  ;;  %v542_v1 = vadd.f32 %v2317_v49, %v420_v57  ;;  %v540_v4 = vadd.f32 %v2321_v55, %v418_v60  ;;  %v421_v7 = vmul.f32 %v2331_v62, %v300_v52  ;;  %v253_v60 = vld [vmem:[%s2293_s14 + $0x50] sm:$0xff] }
  0x1e   : > { %1927 = vmatpush3.bf16.msra.mxu0 %v2132_v18  ;;  %v544_v5 = vadd.f32 %v2321_v55, %v422_v61  ;;  %v537_v11 = vadd.f32 %v2327_v59, %v415_v2  ;;  %v541_v12 = vadd.f32 %v2327_v59, %v419_v3  ;;  %v539_v16 = vadd.f32 %v2333_v63, %v417_v6  ;;  %v248_v18 = vld [vmem:[%s2293_s14 + $0x28] sm:$0xff] }
  0x1f   : > { %2021 = vmatpush3.bf16.msra.mxu1 %v2133_v19  ;;  %1928 = vmatprep.subr.bf16.mxu0 %v2134_v20  ;;  %v638_v9 = vmax.f32 %v538_v0, 0.0  ;;  %v642_v10 = vmax.f32 %v542_v1, 0.0  ;;  %v640_v14 = vmax.f32 %v540_v4, 0.0  ;;  %v543_v17 = vadd.f32 %v2333_v63, %v421_v7  ;;  %v250_v19 = vld [vmem:[%s2293_s14 + $0x38] sm:$0xff]  ;;  %v252_v3 = vld [vmem:[%s2293_s14 + $0x48] sm:$0xff] }
  0x20   : > { %2022 = vmatprep.subr.bf16.mxu1 %v2135_v21  ;;  %v644_v15 = vmax.f32 %v544_v5, 0.0  ;;  %v637_v21 = vmax.f32 %v537_v11, 0.0  ;;  %v641_v22 = vmax.f32 %v541_v12, 0.0  ;;  %v306_v36 = vunpack.c.l.bf16 %v249_v13  ;;  %v254_v4 = vld [vmem:[%s2293_s14 + $0x58] sm:$0xff] }
  0x21   : > { %v738_v20 = vpack.c.bf16 %v642_v10, %v638_v9  ;;  %v304_v40 = vunpack.c.l.bf16 %v248_v18  ;;  %v423_v42 = vmul.f32 %v2325_v58, %v302_v35  ;;  %v308_v44 = vunpack.c.l.bf16 %v250_v19  ;;  %v257_v35 = vld [vmem:[%s2293_s14 + $0x70] sm:$0xff] }
  0x22   : > { %1929 = vmatpush3.bf16.msra.mxu0 %v2136_v23  ;;  %v303_v23 = vunpack.c.h.bf16 %v247_v8  ;;  %v427_v43 = vmul.f32 %v2325_v58, %v306_v36  ;;  %v311_v2 = vunpack.c.h.bf16 %v251_v45  ;;  %v315_v11 = vunpack.c.h.bf16 %v253_v60 }
  0x23   : > { %2023 = vmatpush3.bf16.msra.mxu1 %v2137_v24  ;;  %1930 = vmatprep.subr.bf16.mxu0 %v2138_v25  ;;  %v740_v24 = vpack.c.bf16 %v644_v15, %v640_v14  ;;  %v639_v25 = vmax.f32 %v539_v16, 0.0  ;;  %v425_v51 = vmul.f32 %v2331_v62, %v304_v40  ;;  %v545_v53 = vadd.f32 %v2327_v59, %v423_v42 }
  0x24   : > { %2024 = vmatprep.subr.bf16.mxu1 %v2139_v26  ;;  %v643_v26 = vmax.f32 %v543_v17, 0.0  ;;  %1077 = vmatprep.mubr.bf16.mxu0 %v738_v20  ;;  %v549_v56 = vadd.f32 %v2327_v59, %v427_v43  ;;  %v429_v57 = vmul.f32 %v2331_v62, %v308_v44  ;;  %v432_v12 = vmul.f32 %v2315_v48, %v311_v2  ;;  %v256_v44 = vld [vmem:[%s2293_s14 + $0x68] sm:$0xff] }
  0x25   : > { %1213 = vmatprep.mubr.bf16.mxu1 %v740_v24  ;;  %v547_v1 = vadd.f32 %v2333_v63, %v425_v51  ;;  %v645_v6 = vmax.f32 %v545_v53, 0.0  ;;  %v313_v15 = vunpack.c.h.bf16 %v252_v3  ;;  %v317_v16 = vunpack.c.h.bf16 %v254_v4 }
  0x26   : > { %1931 = vmatpush3.bf16.msra.mxu0 %v2140_v28  ;;  %v307_v28 = vunpack.c.h.bf16 %v249_v13  ;;  %v739_v33 = vpack.c.bf16 %v643_v26, %v639_v25  ;;  %v649_v7 = vmax.f32 %v549_v56, 0.0  ;;  %v551_v8 = vadd.f32 %v2333_v63, %v429_v57  ;;  %v255_v25 = vld [vmem:[%s2293_s14 + $0x60] sm:$0xff] }
  0x27   : > { %2025 = vmatpush3.bf16.msra.mxu1 %v2141_v29  ;;  %1932 = vmatprep.subr.bf16.mxu0 %v2142_v30  ;;  %v737_v29 = vpack.c.bf16 %v641_v22, %v637_v21  ;;  %v424_v30 = vmul.f32 %v2315_v48, %v303_v23  ;;  %v647_v10 = vmax.f32 %v547_v1, 0.0  ;;  %v436_v17 = vmul.f32 %v2315_v48, %v315_v11 }
  0x28   : > { %2026 = vmatprep.subr.bf16.mxu1 %v2143_v31  ;;  %v305_v31 = vunpack.c.h.bf16 %v248_v18  ;;  %v741_v13 = vpack.c.bf16 %v649_v7, %v645_v6  ;;  %v651_v14 = vmax.f32 %v551_v8, 0.0  ;;  %v554_v18 = vadd.f32 %v2317_v49, %v432_v12 }
  0x29   : > { %v546_v37 = vadd.f32 %v2317_v49, %v424_v30  ;;  %v314_v20 = vunpack.c.l.bf16 %v253_v60  ;;  %v434_v22 = vmul.f32 %v2319_v54, %v313_v15  ;;  %v438_v23 = vmul.f32 %v2319_v54, %v317_v16 }
  0x2a   : > { %1933 = vmatpush3.bf16.msra.mxu0 %v2144_v32  ;;  %v309_v32 = vunpack.c.h.bf16 %v250_v19  ;;  %v426_v38 = vmul.f32 %v2319_v54, %v305_v31  ;;  %v310_v19 = vunpack.c.l.bf16 %v251_v45  ;;  %v743_v21 = vpack.c.bf16 %v651_v14, %v647_v10  ;;  %v258_v45 = vld [vmem:[%s2293_s14 + $0x78] sm:$0xff]  ;;  %v259_v10 = vld [vmem:[%s2293_s14 + $0x80] sm:$0xff] }
  0x2b   : > { %2027 = vmatpush3.bf16.msra.mxu1 %v2145_v34  ;;  %v428_v34 = vmul.f32 %v2315_v48, %v307_v28  ;;  %v646_v46 = vmax.f32 %v546_v37, 0.0  ;;  %v312_v24 = vunpack.c.l.bf16 %v252_v3  ;;  %v558_v26 = vadd.f32 %v2317_v49, %v436_v17 }
  0x2c   : > { %v430_v39 = vmul.f32 %v2319_v54, %v309_v32  ;;  %v548_v47 = vadd.f32 %v2321_v55, %v426_v38  ;;  %v654_v28 = vmax.f32 %v554_v18, 0.0  ;;  %v435_v30 = vmul.f32 %v2325_v58, %v314_v20 }
  0x2d   : > { %1078 = vmatmul.mubr.bf16.vlgmr.msra.gmra.mxu0 %v737_v29  ;;  %v550_v41 = vadd.f32 %v2317_v49, %v428_v34  ;;  %v431_v29 = vmul.f32 %v2325_v58, %v310_v19  ;;  %v556_v31 = vadd.f32 %v2321_v55, %v434_v22  ;;  %v560_v32 = vadd.f32 %v2321_v55, %v438_v23  ;;  %v261_v19 = vld [vmem:[%s2293_s14 + $0x90] sm:$0xff] }
  0x2e   : > { %1214 = vmatmul.mubr.bf16.vlgmr.msra.gmra.mxu1 %v739_v33  ;;  %v552_v50 = vadd.f32 %v2321_v55, %v430_v39  ;;  %v648_v61 = vmax.f32 %v548_v47, 0.0  ;;  %v316_v33 = vunpack.c.l.bf16 %v254_v4  ;;  %v433_v34 = vmul.f32 %v2331_v62, %v312_v24  ;;  %v260_v24 = vld [vmem:[%s2293_s14 + $0x88] sm:$0xff] }
  0x2f   : > { %v650_v52 = vmax.f32 %v550_v41, 0.0  ;;  %v658_v36 = vmax.f32 %v558_v26, 0.0  ;;  %v553_v37 = vadd.f32 %v2327_v59, %v431_v29  ;;  %v557_v38 = vadd.f32 %v2327_v59, %v435_v30  ;;  %v262_v30 = vld [vmem:[%s2293_s14 + $0x98] sm:$0xff] }
  0x30   : > { %v652_v0 = vmax.f32 %v552_v50, 0.0  ;;  %v319_v39 = vunpack.c.h.bf16 %v255_v25  ;;  %v656_v40 = vmax.f32 %v556_v31, 0.0  ;;  %v660_v41 = vmax.f32 %v560_v32, 0.0 }
  0x31   : > { %v742_v5 = vpack.c.bf16 %v650_v52, %v646_v46  ;;  %v437_v42 = vmul.f32 %v2331_v62, %v316_v33  ;;  %v555_v43 = vadd.f32 %v2333_v63, %v433_v34  ;;  %v746_v46 = vpack.c.bf16 %v658_v36, %v654_v28 }
  0x32   : > { %v744_v9 = vpack.c.bf16 %v652_v0, %v648_v61  ;;  %v653_v47 = vmax.f32 %v553_v37, 0.0  ;;  %v657_v50 = vmax.f32 %v557_v38, 0.0  ;;  %v323_v51 = vunpack.c.h.bf16 %v257_v35 }
  0x33   : > { %1085 = vmatprep.mubr.bf16.mxu0 %v742_v5  ;;  %v748_v52 = vpack.c.bf16 %v660_v41, %v656_v40  ;;  %v559_v53 = vadd.f32 %v2333_v63, %v437_v42  ;;  %v655_v56 = vmax.f32 %v555_v43, 0.0  ;;  %v440_v57 = vmul.f32 %v2315_v48, %v319_v39 }
  0x34   : > { %1221 = vmatprep.mubr.bf16.mxu1 %v744_v9  ;;  %v745_v60 = vpack.c.bf16 %v657_v50, %v653_v47  ;;  %v444_v61 = vmul.f32 %v2315_v48, %v323_v51  ;;  %v321_v0 = vunpack.c.h.bf16 %v256_v44  ;;  %v325_v1 = vunpack.c.h.bf16 %v258_v45 }
  0x35   : > { %1086 = vmatmul.mubr.bf16.gmra.mxu0 %v741_v13  ;;  %v659_v2 = vmax.f32 %v559_v53, 0.0  ;;  %v562_v3 = vadd.f32 %v2317_v49, %v440_v57  ;;  %v318_v4 = vunpack.c.l.bf16 %v255_v25  ;;  %v322_v5 = vunpack.c.l.bf16 %v257_v35  ;;  %v263_v53 = vld [vmem:[%s2293_s14 + $0xa0] sm:$0xff] }
  0x36   : > { %1222 = vmatmul.mubr.bf16.gmra.mxu1 %v743_v21  ;;  %1093 = vmatprep.mubr.bf16.mxu0 %v746_v46  ;;  %v566_v6 = vadd.f32 %v2317_v49, %v444_v61  ;;  %v442_v7 = vmul.f32 %v2319_v54, %v321_v0  ;;  %v446_v8 = vmul.f32 %v2319_v54, %v325_v1  ;;  %v320_v9 = vunpack.c.l.bf16 %v256_v44 }
  0x37   : > { %1229 = vmatprep.mubr.bf16.mxu1 %v748_v52  ;;  %v747_v11 = vpack.c.bf16 %v659_v2, %v655_v56  ;;  %v662_v12 = vmax.f32 %v562_v3, 0.0  ;;  %v439_v13 = vmul.f32 %v2325_v58, %v318_v4  ;;  %v443_v14 = vmul.f32 %v2325_v58, %v322_v5  ;;  %v265_v4 = vld [vmem:[%s2293_s14 + $0xb0] sm:$0xff] }
  0x38   : > { %v666_v15 = vmax.f32 %v566_v6, 0.0  ;;  %v564_v16 = vadd.f32 %v2321_v55, %v442_v7  ;;  %v568_v17 = vadd.f32 %v2321_v55, %v446_v8  ;;  %v324_v18 = vunpack.c.l.bf16 %v258_v45 }
  0x39   : > { %v561_v20 = vadd.f32 %v2327_v59, %v439_v13  ;;  %v565_v21 = vadd.f32 %v2327_v59, %v443_v14  ;;  %v441_v22 = vmul.f32 %v2331_v62, %v320_v9  ;;  %v327_v23 = vunpack.c.h.bf16 %v259_v10  ;;  %v264_v9 = vld [vmem:[%s2293_s14 + $0xa8] sm:$0xff]  ;;  %v266_v14 = vld [vmem:[%s2293_s14 + $0xb8] sm:$0xff] }
  0x3a   : > { %v750_v25 = vpack.c.bf16 %v666_v15, %v662_v12  ;;  %v664_v26 = vmax.f32 %v564_v16, 0.0  ;;  %v668_v28 = vmax.f32 %v568_v17, 0.0  ;;  %v445_v29 = vmul.f32 %v2331_v62, %v324_v18 }
  0x3b   : > { %v661_v31 = vmax.f32 %v561_v20, 0.0  ;;  %v665_v32 = vmax.f32 %v565_v21, 0.0  ;;  %v563_v33 = vadd.f32 %v2333_v63, %v441_v22  ;;  %v331_v34 = vunpack.c.h.bf16 %v261_v19 }
  0x3c   : > { %v752_v35 = vpack.c.bf16 %v668_v28, %v664_v26  ;;  %v567_v36 = vadd.f32 %v2333_v63, %v445_v29  ;;  %v448_v37 = vmul.f32 %v2315_v48, %v327_v23  ;;  %v329_v38 = vunpack.c.h.bf16 %v260_v24 }
  0x3d   : > { %1094 = vmatmul.mubr.bf16.gmra.mxu0 %v745_v60  ;;  %v749_v39 = vpack.c.bf16 %v665_v32, %v661_v31  ;;  %v663_v40 = vmax.f32 %v563_v33, 0.0  ;;  %v452_v41 = vmul.f32 %v2315_v48, %v331_v34  ;;  %v333_v42 = vunpack.c.h.bf16 %v262_v30 }
  0x3e   : > { %1230 = vmatmul.mubr.bf16.gmra.mxu1 %v747_v11  ;;  %1101 = vmatprep.mubr.bf16.mxu0 %v750_v25  ;;  %v667_v43 = vmax.f32 %v567_v36, 0.0  ;;  %v570_v44 = vadd.f32 %v2317_v49, %v448_v37  ;;  %v450_v45 = vmul.f32 %v2319_v54, %v329_v38  ;;  %v326_v46 = vunpack.c.l.bf16 %v259_v10  ;;  %v267_v36 = vld [vmem:[%s2293_s14 + $0xc0] sm:$0xff] }
  0x3f   : > { %1237 = vmatprep.mubr.bf16.mxu1 %v752_v35  ;;  %v574_v47 = vadd.f32 %v2317_v49, %v452_v41  ;;  %v454_v50 = vmul.f32 %v2319_v54, %v333_v42  ;;  %v330_v51 = vunpack.c.l.bf16 %v261_v19  ;;  %v328_v52 = vunpack.c.l.bf16 %v260_v24 }
  0x40   : > { %v751_v56 = vpack.c.bf16 %v667_v43, %v663_v40  ;;  %v670_v57 = vmax.f32 %v570_v44, 0.0  ;;  %v572_v60 = vadd.f32 %v2321_v55, %v450_v45  ;;  %v447_v61 = vmul.f32 %v2325_v58, %v326_v46  ;;  %v269_v45 = vld [vmem:[%s2293_s14 + $0xd0] sm:$0xff] }
  0x41   : > { %v674_v0 = vmax.f32 %v574_v47, 0.0  ;;  %v576_v1 = vadd.f32 %v2321_v55, %v454_v50  ;;  %v451_v2 = vmul.f32 %v2325_v58, %v330_v51  ;;  %v332_v3 = vunpack.c.l.bf16 %v262_v30 }
  0x42   : > { %v672_v5 = vmax.f32 %v572_v60, 0.0  ;;  %v569_v6 = vadd.f32 %v2327_v59, %v447_v61  ;;  %v449_v7 = vmul.f32 %v2331_v62, %v328_v52  ;;  %v335_v8 = vunpack.c.h.bf16 %v263_v53  ;;  %v268_v52 = vld [vmem:[%s2293_s14 + $0xc8] sm:$0xff]  ;;  %v270_v61 = vld [vmem:[%s2293_s14 + $0xd8] sm:$0xff] }
  0x43   : > { %v754_v10 = vpack.c.bf16 %v674_v0, %v670_v57  ;;  %v676_v11 = vmax.f32 %v576_v1, 0.0  ;;  %v573_v12 = vadd.f32 %v2327_v59, %v451_v2  ;;  %v453_v13 = vmul.f32 %v2331_v62, %v332_v3 }
  0x44   : > { %v669_v15 = vmax.f32 %v569_v6, 0.0  ;;  %v571_v16 = vadd.f32 %v2333_v63, %v449_v7  ;;  %v339_v17 = vunpack.c.h.bf16 %v265_v4  ;;  %v456_v18 = vmul.f32 %v2315_v48, %v335_v8 }
  0x45   : > { %1102 = vmatmul.mubr.bf16.gmra.mxu0 %v749_v39  ;;  %v756_v19 = vpack.c.bf16 %v676_v11, %v672_v5  ;;  %v673_v20 = vmax.f32 %v573_v12, 0.0  ;;  %v575_v21 = vadd.f32 %v2333_v63, %v453_v13  ;;  %v337_v22 = vunpack.c.h.bf16 %v264_v9 }
  0x46   : > { %1238 = vmatmul.mubr.bf16.gmra.mxu1 %v751_v56  ;;  %1109 = vmatprep.mubr.bf16.mxu0 %v754_v10  ;;  %v671_v23 = vmax.f32 %v571_v16, 0.0  ;;  %v460_v24 = vmul.f32 %v2315_v48, %v339_v17  ;;  %v578_v25 = vadd.f32 %v2317_v49, %v456_v18  ;;  %v341_v26 = vunpack.c.h.bf16 %v266_v14 }
  0x47   : > { %1245 = vmatprep.mubr.bf16.mxu1 %v756_v19  ;;  %v753_v28 = vpack.c.bf16 %v673_v20, %v669_v15  ;;  %v675_v29 = vmax.f32 %v575_v21, 0.0  ;;  %v458_v30 = vmul.f32 %v2319_v54, %v337_v22  ;;  %v334_v31 = vunpack.c.l.bf16 %v263_v53  ;;  %v271_v20 = vld [vmem:[%s2293_s14 + $0xe0] sm:$0xff] }
  0x48   : > { %v582_v32 = vadd.f32 %v2317_v49, %v460_v24  ;;  %v678_v33 = vmax.f32 %v578_v25, 0.0  ;;  %v462_v34 = vmul.f32 %v2319_v54, %v341_v26  ;;  %v338_v35 = vunpack.c.l.bf16 %v265_v4 }
  0x49   : > { %v755_v37 = vpack.c.bf16 %v675_v29, %v671_v23  ;;  %v580_v38 = vadd.f32 %v2321_v55, %v458_v30  ;;  %v455_v39 = vmul.f32 %v2325_v58, %v334_v31  ;;  %v336_v40 = vunpack.c.l.bf16 %v264_v9  ;;  %v273_v30 = vld [vmem:[%s2293_s14 + $0xf0] sm:$0xff] }
  0x4a   : > { %v682_v41 = vmax.f32 %v582_v32, 0.0  ;;  %v584_v42 = vadd.f32 %v2321_v55, %v462_v34  ;;  %v459_v43 = vmul.f32 %v2325_v58, %v338_v35  ;;  %v340_v44 = vunpack.c.l.bf16 %v266_v14  ;;  %v272_v35 = vld [vmem:[%s2293_s14 + $0xe8] sm:$0xff] }
  0x4b   : > { %v680_v46 = vmax.f32 %v580_v38, 0.0  ;;  %v577_v47 = vadd.f32 %v2327_v59, %v455_v39  ;;  %v457_v50 = vmul.f32 %v2331_v62, %v336_v40  ;;  %v343_v51 = vunpack.c.h.bf16 %v267_v36  ;;  %v274_v40 = vld [vmem:[%s2293_s14 + $0xf8] sm:$0xff] }
  0x4c   : > { %v758_v53 = vpack.c.bf16 %v682_v41, %v678_v33  ;;  %v684_v56 = vmax.f32 %v584_v42, 0.0  ;;  %v581_v57 = vadd.f32 %v2327_v59, %v459_v43  ;;  %v461_v60 = vmul.f32 %v2331_v62, %v340_v44 }
  0x4d   : > { %1110 = vmatmul.mubr.bf16.gmra.mxu0 %v753_v28  ;;  %v677_v0 = vmax.f32 %v577_v47, 0.0  ;;  %v579_v1 = vadd.f32 %v2333_v63, %v457_v50  ;;  %v347_v2 = vunpack.c.h.bf16 %v269_v45  ;;  %v464_v3 = vmul.f32 %v2315_v48, %v343_v51 }
  0x4e   : > { %1246 = vmatmul.mubr.bf16.gmra.mxu1 %v755_v37  ;;  %1117 = vmatprep.mubr.bf16.mxu0 %v758_v53  ;;  %v760_v4 = vpack.c.bf16 %v684_v56, %v680_v46  ;;  %v681_v5 = vmax.f32 %v581_v57, 0.0  ;;  %v583_v6 = vadd.f32 %v2333_v63, %v461_v60  ;;  %v345_v7 = vunpack.c.h.bf16 %v268_v52 }
  0x4f   : > { %v679_v8 = vmax.f32 %v579_v1, 0.0  ;;  %v468_v9 = vmul.f32 %v2315_v48, %v347_v2  ;;  %v586_v10 = vadd.f32 %v2317_v49, %v464_v3  ;;  %v349_v11 = vunpack.c.h.bf16 %v270_v61 }
  0x50   : > { %1253 = vmatprep.mubr.bf16.mxu1 %v760_v4  ;;  %v757_v12 = vpack.c.bf16 %v681_v5, %v677_v0  ;;  %v683_v13 = vmax.f32 %v583_v6, 0.0  ;;  %v466_v14 = vmul.f32 %v2319_v54, %v345_v7  ;;  %v342_v15 = vunpack.c.l.bf16 %v267_v36  ;;  %v275_v5 = vld [vmem:[%s2293_s14 + $0x100] sm:$0xff] }
  0x51   : > { %v590_v16 = vadd.f32 %v2317_v49, %v468_v9  ;;  %v686_v17 = vmax.f32 %v586_v10, 0.0  ;;  %v470_v18 = vmul.f32 %v2319_v54, %v349_v11  ;;  %v346_v19 = vunpack.c.l.bf16 %v269_v45 }
  0x52   : > { %v759_v21 = vpack.c.bf16 %v683_v13, %v679_v8  ;;  %v588_v22 = vadd.f32 %v2321_v55, %v466_v14  ;;  %v463_v23 = vmul.f32 %v2325_v58, %v342_v15  ;;  %v344_v24 = vunpack.c.l.bf16 %v268_v52  ;;  %v277_v14 = vld [vmem:[%s2293_s14 + $0x110] sm:$0xff] }
  0x53   : > { %v690_v25 = vmax.f32 %v590_v16, 0.0  ;;  %v592_v26 = vadd.f32 %v2321_v55, %v470_v18  ;;  %v467_v28 = vmul.f32 %v2325_v58, %v346_v19  ;;  %v348_v29 = vunpack.c.l.bf16 %v270_v61  ;;  %v276_v19 = vld [vmem:[%s2293_s14 + $0x108] sm:$0xff] }
  0x54   : > { %v688_v31 = vmax.f32 %v588_v22, 0.0  ;;  %v585_v32 = vadd.f32 %v2327_v59, %v463_v23  ;;  %v465_v33 = vmul.f32 %v2331_v62, %v344_v24  ;;  %v351_v34 = vunpack.c.h.bf16 %v271_v20  ;;  %v278_v24 = vld [vmem:[%s2293_s14 + $0x118] sm:$0xff] }
  0x55   : > { %1118 = vmatmul.mubr.bf16.gmra.mxu0 %v757_v12  ;;  %v762_v36 = vpack.c.bf16 %v690_v25, %v686_v17  ;;  %v692_v37 = vmax.f32 %v592_v26, 0.0  ;;  %v589_v38 = vadd.f32 %v2327_v59, %v467_v28  ;;  %v469_v39 = vmul.f32 %v2331_v62, %v348_v29 }
  0x56   : > { %1254 = vmatmul.mubr.bf16.gmra.mxu1 %v759_v21  ;;  %v685_v41 = vmax.f32 %v585_v32, 0.0  ;;  %v587_v42 = vadd.f32 %v2333_v63, %v465_v33  ;;  %v355_v43 = vunpack.c.h.bf16 %v273_v30  ;;  %v472_v44 = vmul.f32 %v2315_v48, %v351_v34 }
  0x57   : > { %1125 = vmatprep.mubr.bf16.mxu0 %v762_v36  ;;  %v764_v45 = vpack.c.bf16 %v692_v37, %v688_v31  ;;  %v689_v46 = vmax.f32 %v589_v38, 0.0  ;;  %v591_v47 = vadd.f32 %v2333_v63, %v469_v39  ;;  %v353_v50 = vunpack.c.h.bf16 %v272_v35 }
  0x58   : > { %v687_v51 = vmax.f32 %v587_v42, 0.0  ;;  %v476_v52 = vmul.f32 %v2315_v48, %v355_v43  ;;  %v594_v53 = vadd.f32 %v2317_v49, %v472_v44  ;;  %v357_v56 = vunpack.c.h.bf16 %v274_v40 }
  0x59   : > { %1261 = vmatprep.mubr.bf16.mxu1 %v764_v45  ;;  %v761_v57 = vpack.c.bf16 %v689_v46, %v685_v41  ;;  %v691_v60 = vmax.f32 %v591_v47, 0.0  ;;  %v474_v61 = vmul.f32 %v2319_v54, %v353_v50  ;;  %v350_v0 = vunpack.c.l.bf16 %v271_v20  ;;  %v279_v46 = vld [vmem:[%s2293_s14 + $0x120] sm:$0xff] }
  0x5a   : > { %v598_v1 = vadd.f32 %v2317_v49, %v476_v52  ;;  %v694_v2 = vmax.f32 %v594_v53, 0.0  ;;  %v478_v3 = vmul.f32 %v2319_v54, %v357_v56  ;;  %v354_v4 = vunpack.c.l.bf16 %v273_v30 }
  0x5b   : > { %v763_v6 = vpack.c.bf16 %v691_v60, %v687_v51  ;;  %v596_v7 = vadd.f32 %v2321_v55, %v474_v61  ;;  %v471_v8 = vmul.f32 %v2325_v58, %v350_v0  ;;  %v352_v9 = vunpack.c.l.bf16 %v272_v35  ;;  %v281_v61 = vld [vmem:[%s2293_s14 + $0x130] sm:$0xff] }
  0x5c   : > { %v698_v10 = vmax.f32 %v598_v1, 0.0  ;;  %v600_v11 = vadd.f32 %v2321_v55, %v478_v3  ;;  %v475_v12 = vmul.f32 %v2325_v58, %v354_v4  ;;  %v356_v13 = vunpack.c.l.bf16 %v274_v40  ;;  %v280_v4 = vld [vmem:[%s2293_s14 + $0x128] sm:$0xff] }
  0x5d   : > { %1126 = vmatmul.mubr.bf16.gmra.mxu0 %v761_v57  ;;  %v696_v15 = vmax.f32 %v596_v7, 0.0  ;;  %v593_v16 = vadd.f32 %v2327_v59, %v471_v8  ;;  %v473_v17 = vmul.f32 %v2331_v62, %v352_v9  ;;  %v359_v18 = vunpack.c.h.bf16 %v275_v5  ;;  %v282_v9 = vld [vmem:[%s2293_s14 + $0x138] sm:$0xff] }
  0x5e   : > { %1262 = vmatmul.mubr.bf16.gmra.mxu1 %v763_v6  ;;  %v766_v20 = vpack.c.bf16 %v698_v10, %v694_v2  ;;  %v700_v21 = vmax.f32 %v600_v11, 0.0  ;;  %v597_v22 = vadd.f32 %v2327_v59, %v475_v12  ;;  %v477_v23 = vmul.f32 %v2331_v62, %v356_v13 }
  0x5f   : > { %v693_v25 = vmax.f32 %v593_v16, 0.0  ;;  %v595_v26 = vadd.f32 %v2333_v63, %v473_v17  ;;  %v363_v28 = vunpack.c.h.bf16 %v277_v14  ;;  %v480_v29 = vmul.f32 %v2315_v48, %v359_v18 }
  0x60   : > { %1133 = vmatprep.mubr.bf16.mxu0 %v766_v20  ;;  %v768_v30 = vpack.c.bf16 %v700_v21, %v696_v15  ;;  %v697_v31 = vmax.f32 %v597_v22, 0.0  ;;  %v599_v32 = vadd.f32 %v2333_v63, %v477_v23  ;;  %v361_v33 = vunpack.c.h.bf16 %v276_v19 }
  0x61   : > { %v695_v34 = vmax.f32 %v595_v26, 0.0  ;;  %v484_v35 = vmul.f32 %v2315_v48, %v363_v28  ;;  %v602_v36 = vadd.f32 %v2317_v49, %v480_v29  ;;  %v365_v37 = vunpack.c.h.bf16 %v278_v24 }
  0x62   : > { %1269 = vmatprep.mubr.bf16.mxu1 %v768_v30  ;;  %v765_v38 = vpack.c.bf16 %v697_v31, %v693_v25  ;;  %v699_v39 = vmax.f32 %v599_v32, 0.0  ;;  %v482_v40 = vmul.f32 %v2319_v54, %v361_v33  ;;  %v358_v41 = vunpack.c.l.bf16 %v275_v5  ;;  %v283_v31 = vld [vmem:[%s2293_s14 + $0x140] sm:$0xff] }
  0x63   : > { %v606_v42 = vadd.f32 %v2317_v49, %v484_v35  ;;  %v702_v43 = vmax.f32 %v602_v36, 0.0  ;;  %v486_v44 = vmul.f32 %v2319_v54, %v365_v37  ;;  %v362_v45 = vunpack.c.l.bf16 %v277_v14 }
  0x64   : > { %v767_v47 = vpack.c.bf16 %v699_v39, %v695_v34  ;;  %v604_v50 = vadd.f32 %v2321_v55, %v482_v40  ;;  %v479_v51 = vmul.f32 %v2325_v58, %v358_v41  ;;  %v360_v52 = vunpack.c.l.bf16 %v276_v19  ;;  %v285_v40 = vld [vmem:[%s2293_s14 + $0x150] sm:$0xff] }
  0x65   : > { %1134 = vmatmul.mubr.bf16.gmra.mxu0 %v765_v38  ;;  %v706_v53 = vmax.f32 %v606_v42, 0.0  ;;  %v608_v56 = vadd.f32 %v2321_v55, %v486_v44  ;;  %v483_v57 = vmul.f32 %v2325_v58, %v362_v45  ;;  %v364_v60 = vunpack.c.l.bf16 %v278_v24  ;;  %v284_v45 = vld [vmem:[%s2293_s14 + $0x148] sm:$0xff] }
  0x66   : > { %1270 = vmatmul.mubr.bf16.gmra.mxu1 %v767_v47  ;;  %v704_v0 = vmax.f32 %v604_v50, 0.0  ;;  %v601_v1 = vadd.f32 %v2327_v59, %v479_v51  ;;  %v481_v2 = vmul.f32 %v2331_v62, %v360_v52  ;;  %v367_v3 = vunpack.c.h.bf16 %v279_v46  ;;  %v286_v52 = vld [vmem:[%s2293_s14 + $0x158] sm:$0xff] }
  0x67   : > { %v770_v5 = vpack.c.bf16 %v706_v53, %v702_v43  ;;  %v708_v6 = vmax.f32 %v608_v56, 0.0  ;;  %v605_v7 = vadd.f32 %v2327_v59, %v483_v57  ;;  %v485_v8 = vmul.f32 %v2331_v62, %v364_v60 }
  0x68   : > { %v701_v10 = vmax.f32 %v601_v1, 0.0  ;;  %v603_v11 = vadd.f32 %v2333_v63, %v481_v2  ;;  %v371_v12 = vunpack.c.h.bf16 %v281_v61  ;;  %v488_v13 = vmul.f32 %v2315_v48, %v367_v3 }
  0x69   : > { %1141 = vmatprep.mubr.bf16.mxu0 %v770_v5  ;;  %v772_v14 = vpack.c.bf16 %v708_v6, %v704_v0  ;;  %v705_v15 = vmax.f32 %v605_v7, 0.0  ;;  %v607_v16 = vadd.f32 %v2333_v63, %v485_v8  ;;  %v369_v17 = vunpack.c.h.bf16 %v280_v4 }
  0x6a   : > { %v703_v18 = vmax.f32 %v603_v11, 0.0  ;;  %v492_v19 = vmul.f32 %v2315_v48, %v371_v12  ;;  %v610_v20 = vadd.f32 %v2317_v49, %v488_v13  ;;  %v373_v21 = vunpack.c.h.bf16 %v282_v9 }
  0x6b   : > { %1277 = vmatprep.mubr.bf16.mxu1 %v772_v14  ;;  %v769_v22 = vpack.c.bf16 %v705_v15, %v701_v10  ;;  %v707_v23 = vmax.f32 %v607_v16, 0.0  ;;  %v490_v24 = vmul.f32 %v2319_v54, %v369_v17  ;;  %v366_v25 = vunpack.c.l.bf16 %v279_v46  ;;  %v287_v15 = vld [vmem:[%s2293_s14 + $0x160] sm:$0xff] }
  0x6c   : > { %v614_v26 = vadd.f32 %v2317_v49, %v492_v19  ;;  %v710_v28 = vmax.f32 %v610_v20, 0.0  ;;  %v494_v29 = vmul.f32 %v2319_v54, %v373_v21  ;;  %v370_v30 = vunpack.c.l.bf16 %v281_v61 }
  0x6d   : > { %1142 = vmatmul.mubr.bf16.gmra.mxu0 %v769_v22  ;;  %v771_v32 = vpack.c.bf16 %v707_v23, %v703_v18  ;;  %v612_v33 = vadd.f32 %v2321_v55, %v490_v24  ;;  %v487_v34 = vmul.f32 %v2325_v58, %v366_v25  ;;  %v368_v35 = vunpack.c.l.bf16 %v280_v4  ;;  %v289_v24 = vld [vmem:[%s2293_s14 + $0x170] sm:$0xff] }
  0x6e   : > { %v714_v36 = vmax.f32 %v614_v26, 0.0  ;;  %v616_v37 = vadd.f32 %v2321_v55, %v494_v29  ;;  %v491_v38 = vmul.f32 %v2325_v58, %v370_v30  ;;  %v372_v39 = vunpack.c.l.bf16 %v282_v9  ;;  %v288_v30 = vld [vmem:[%s2293_s14 + $0x168] sm:$0xff] }
  0x6f   : > { %1278 = vmatmul.mubr.bf16.gmra.mxu1 %v771_v32  ;;  %v712_v41 = vmax.f32 %v612_v33, 0.0  ;;  %v609_v42 = vadd.f32 %v2327_v59, %v487_v34  ;;  %v489_v43 = vmul.f32 %v2331_v62, %v368_v35  ;;  %v375_v44 = vunpack.c.h.bf16 %v283_v31  ;;  %v290_v35 = vld [vmem:[%s2293_s14 + $0x178] sm:$0xff] }
  0x70   : > { %v774_v46 = vpack.c.bf16 %v714_v36, %v710_v28  ;;  %v716_v47 = vmax.f32 %v616_v37, 0.0  ;;  %v613_v50 = vadd.f32 %v2327_v59, %v491_v38  ;;  %v493_v51 = vmul.f32 %v2331_v62, %v372_v39 }
  0x71   : > { %v709_v53 = vmax.f32 %v609_v42, 0.0  ;;  %v611_v56 = vadd.f32 %v2333_v63, %v489_v43  ;;  %v379_v57 = vunpack.c.h.bf16 %v285_v40  ;;  %v496_v60 = vmul.f32 %v2315_v48, %v375_v44 }
  0x72   : > { %1149 = vmatprep.mubr.bf16.mxu0 %v774_v46  ;;  %v776_v61 = vpack.c.bf16 %v716_v47, %v712_v41  ;;  %v713_v0 = vmax.f32 %v613_v50, 0.0  ;;  %v615_v1 = vadd.f32 %v2333_v63, %v493_v51  ;;  %v377_v2 = vunpack.c.h.bf16 %v284_v45 }
  0x73   : > { %v711_v3 = vmax.f32 %v611_v56, 0.0  ;;  %v500_v4 = vmul.f32 %v2315_v48, %v379_v57  ;;  %v618_v5 = vadd.f32 %v2317_v49, %v496_v60  ;;  %v381_v6 = vunpack.c.h.bf16 %v286_v52 }
  0x74   : > { %1285 = vmatprep.mubr.bf16.mxu1 %v776_v61  ;;  %v773_v7 = vpack.c.bf16 %v713_v0, %v709_v53  ;;  %v715_v8 = vmax.f32 %v615_v1, 0.0  ;;  %v498_v9 = vmul.f32 %v2319_v54, %v377_v2  ;;  %v374_v10 = vunpack.c.l.bf16 %v283_v31  ;;  %v291_v0 = vld [vmem:[%s2293_s14 + $0x180] sm:$0xff] }
  0x75   : > { %v622_v11 = vadd.f32 %v2317_v49, %v500_v4  ;;  %v718_v12 = vmax.f32 %v618_v5, 0.0  ;;  %v502_v13 = vmul.f32 %v2319_v54, %v381_v6  ;;  %v378_v14 = vunpack.c.l.bf16 %v285_v40 }
  0x76   : > { %1150 = vmatmul.mubr.bf16.gmra.mxu0 %v773_v7  ;;  %v775_v16 = vpack.c.bf16 %v715_v8, %v711_v3  ;;  %v620_v17 = vadd.f32 %v2321_v55, %v498_v9  ;;  %v495_v18 = vmul.f32 %v2325_v58, %v374_v10  ;;  %v376_v19 = vunpack.c.l.bf16 %v284_v45  ;;  %v292_v9 = vld [vmem:[%s2293_s14 + $0x188] sm:$0xff] }
  0x77   : > { %v722_v20 = vmax.f32 %v622_v11, 0.0  ;;  %v624_v21 = vadd.f32 %v2321_v55, %v502_v13  ;;  %v499_v22 = vmul.f32 %v2325_v58, %v378_v14  ;;  %v380_v23 = vunpack.c.l.bf16 %v286_v52 }
  0x78   : > { %1286 = vmatmul.mubr.bf16.gmra.mxu1 %v775_v16  ;;  %v720_v25 = vmax.f32 %v620_v17, 0.0  ;;  %v617_v26 = vadd.f32 %v2327_v59, %v495_v18  ;;  %v497_v28 = vmul.f32 %v2331_v62, %v376_v19  ;;  %v383_v29 = vunpack.c.h.bf16 %v287_v15 }
  0x79   : > { %v778_v31 = vpack.c.bf16 %v722_v20, %v718_v12  ;;  %v724_v32 = vmax.f32 %v624_v21, 0.0  ;;  %v621_v33 = vadd.f32 %v2327_v59, %v499_v22  ;;  %v501_v34 = vmul.f32 %v2331_v62, %v380_v23 }
  0x7a   : > { %v717_v36 = vmax.f32 %v617_v26, 0.0  ;;  %v619_v37 = vadd.f32 %v2333_v63, %v497_v28  ;;  %v387_v38 = vunpack.c.h.bf16 %v289_v24  ;;  %v504_v39 = vmul.f32 %v2315_v48, %v383_v29 }
  0x7b   : > { %1157 = vmatprep.mubr.bf16.mxu0 %v778_v31  ;;  %v780_v40 = vpack.c.bf16 %v724_v32, %v720_v25  ;;  %v721_v41 = vmax.f32 %v621_v33, 0.0  ;;  %v623_v42 = vadd.f32 %v2333_v63, %v501_v34  ;;  %v385_v43 = vunpack.c.h.bf16 %v288_v30 }
  0x7c   : > { %v719_v44 = vmax.f32 %v619_v37, 0.0  ;;  %v508_v45 = vmul.f32 %v2315_v48, %v387_v38  ;;  %v626_v46 = vadd.f32 %v2317_v49, %v504_v39  ;;  %v389_v47 = vunpack.c.h.bf16 %v290_v35 }
  0x7d   : > { %1293 = vmatprep.mubr.bf16.mxu1 %v780_v40  ;;  %v777_v50 = vpack.c.bf16 %v721_v41, %v717_v36  ;;  %v723_v51 = vmax.f32 %v623_v42, 0.0  ;;  %v506_v52 = vmul.f32 %v2319_v54, %v385_v43  ;;  %v382_v53 = vunpack.c.l.bf16 %v287_v15 }
  0x7e   : > { %v630_v56 = vadd.f32 %v2317_v49, %v508_v45  ;;  %v726_v57 = vmax.f32 %v626_v46, 0.0  ;;  %v510_v60 = vmul.f32 %v2319_v54, %v389_v47  ;;  %v386_v61 = vunpack.c.l.bf16 %v289_v24 }
  0x7f   : > { %1158 = vmatmul.mubr.bf16.gmra.mxu0 %v777_v50  ;;  %v779_v1 = vpack.c.bf16 %v723_v51, %v719_v44  ;;  %v628_v2 = vadd.f32 %v2321_v55, %v506_v52  ;;  %v503_v3 = vmul.f32 %v2325_v58, %v382_v53  ;;  %v384_v4 = vunpack.c.l.bf16 %v288_v30 }
  0x80   : > { %v730_v5 = vmax.f32 %v630_v56, 0.0  ;;  %v632_v6 = vadd.f32 %v2321_v55, %v510_v60  ;;  %v507_v7 = vmul.f32 %v2325_v58, %v386_v61  ;;  %v388_v8 = vunpack.c.l.bf16 %v290_v35 }
  0x81   : > { %1294 = vmatmul.mubr.bf16.gmra.mxu1 %v779_v1  ;;  %v728_v10 = vmax.f32 %v628_v2, 0.0  ;;  %v625_v11 = vadd.f32 %v2327_v59, %v503_v3  ;;  %v505_v12 = vmul.f32 %v2331_v62, %v384_v4  ;;  %v391_v13 = vunpack.c.h.bf16 %v291_v0 }
  0x82   : > { %v782_v14 = vpack.c.bf16 %v730_v5, %v726_v57  ;;  %v732_v15 = vmax.f32 %v632_v6, 0.0  ;;  %v629_v16 = vadd.f32 %v2327_v59, %v507_v7  ;;  %v509_v17 = vmul.f32 %v2331_v62, %v388_v8 }
  0x83   : > { %v725_v18 = vmax.f32 %v625_v11, 0.0  ;;  %v627_v19 = vadd.f32 %v2333_v63, %v505_v12  ;;  %v512_v20 = vmul.f32 %v2315_v48, %v391_v13  ;;  %v393_v21 = vunpack.c.h.bf16 %v292_v9 }
  0x84   : > { %1165 = vmatprep.mubr.bf16.mxu0 %v782_v14  ;;  %v784_v22 = vpack.c.bf16 %v732_v15, %v728_v10  ;;  %v729_v23 = vmax.f32 %v629_v16, 0.0  ;;  %v631_v24 = vadd.f32 %v2333_v63, %v509_v17  ;;  %v390_v25 = vunpack.c.l.bf16 %v291_v0 }
  0x85   : > { %v727_v26 = vmax.f32 %v627_v19, 0.0  ;;  %v634_v28 = vadd.f32 %v2317_v49, %v512_v20  ;;  %v514_v29 = vmul.f32 %v2319_v54, %v393_v21  ;;  %v392_v30 = vunpack.c.l.bf16 %v292_v9 }
  0x86   : > { %1301 = vmatprep.mubr.bf16.mxu1 %v784_v22  ;;  %v781_v31 = vpack.c.bf16 %v729_v23, %v725_v18  ;;  %v731_v32 = vmax.f32 %v631_v24, 0.0  ;;  %v511_v33 = vmul.f32 %v2325_v58, %v390_v25 }
  0x87   : > { %v734_v34 = vmax.f32 %v634_v28, 0.0  ;;  %v636_v48 = vadd.f32 %v2321_v55, %v514_v29  ;;  %v513_v35 = vmul.f32 %v2331_v62, %v392_v30 }
  0x88   : > { %1166 = vmatmul.mubr.bf16.gmra.mxu0 %v781_v31  ;;  %v783_v36 = vpack.c.bf16 %v731_v32, %v727_v26  ;;  %v633_v37 = vadd.f32 %v2327_v59, %v511_v33 }
  0x89   : > { %v786_v38 = vpack.c.bf16 %v734_v34, %v734_v34  ;;  %v736_v39 = vmax.f32 %v636_v48, 0.0  ;;  %v635_v49 = vadd.f32 %v2333_v63, %v513_v35 }
  0x8a   : > { %1302 = vmatmul.mubr.bf16.gmra.mxu1 %v783_v36  ;;  %v733_v54 = vmax.f32 %v633_v37, 0.0 }
  0x8b   : > { %1173 = vmatprep.mubr.bf16.mxu0 %v786_v38  ;;  %v788_v40 = vpack.c.bf16 %v736_v39, %v736_v39  ;;  %v735_v41 = vmax.f32 %v635_v49, 0.0 }
  0x8c   : > { %v785_v58 = vpack.c.bf16 %v733_v54, %v733_v54 }
  0x8d   : > { %1309 = vmatprep.mubr.bf16.mxu1 %v788_v40  ;;  %v787_v42 = vpack.c.bf16 %v735_v41, %v735_v41 }
  0x90   : > { %1174 = vmatmul.mubr.bf16.gmra.mxu0 %v785_v58 }
  0x92   : > { %1310 = vmatmul.mubr.bf16.gmra.mxu1 %v787_v42 }
  0xed   : > { %v1934_v55 = vpop.f32.mrf.mxu0 }
  0xee   : > { %v2028_v62 = vpop.f32.mrf.mxu1 }
  0xef   : > { %v1935_v43 = vpop.f32.mrf.mxu0 }
  0xf0   : > { %v1936_v44 = vadd.f32 %v1935_v43, %v1934_v55  ;;  %v2029_v59 = vpop.f32.mrf.mxu1 }
  0xf1   : > { %v2030_v45 = vadd.f32 %v2029_v59, %v2028_v62  ;;  %v1937_v46 = vpop.f32.mrf.mxu0 }
  0xf2   : > { %v2031_v63 = vpop.f32.mrf.mxu1 }
  0xf3   : > { %v2578_v47 = vadd.f32 %v2030_v45, %v1936_v44  ;;  %v1938_v50 = vpop.f32.mrf.mxu0 }
  0xf4   : > { %v1939_v51 = vadd.f32 %v1938_v50, %v1937_v46  ;;  %v2032_v52 = vpop.f32.mrf.mxu1 }
  0xf5   : > { %v1893_v53 = vpack.c.bf16 %v2578_v47, %v2578_v47  ;;  %v2033_v56 = vadd.f32 %v2032_v52, %v2031_v63  ;;  %v1940_v57 = vpop.f32.mrf.mxu0 }
  0xf6   : > { %v2034_v61 = vpop.f32.mrf.mxu1 }
  0xf7   : > { %1419 = vst.msk [vmem:[%s2583_s29] sm:$0xf] %vm1418_vm0, %v1893_v53  ;;  %v2589_v60 = vadd.f32 %v2033_v56, %v1939_v51  ;;  %v1941_v0 = vpop.f32.mrf.mxu0 }
  0xf8   : > { %v1942_v2 = vadd.f32 %v1941_v0, %v1940_v57  ;;  %v2035_v3 = vpop.f32.mrf.mxu1 }
  0xf9   : > { %v1894_v1 = vpack.c.bf16 %v2589_v60, %v2589_v60  ;;  %v1943_v4 = vpop.f32.mrf.mxu0  ;;  %v2036_v5 = vadd.f32 %v2035_v3, %v2034_v61 }
  0xfa   : > { %v2037_v6 = vpop.f32.mrf.mxu1 }
  0xfb   : > { %1420 = vst.msk [vmem:[%s2583_s29 + $0x4] sm:$0xf] %vm1418_vm0, %v1894_v1  ;;  %v1944_v7 = vpop.f32.mrf.mxu0  ;;  %v2595_v8 = vadd.f32 %v2036_v5, %v1942_v2  ;;  %v1446_v1 = vadd.s32 8, %v2275_v27  ;;  %v1447_v2 = vadd.s32 16, %v2275_v27 }
  0xfc   : > { %v1945_v9 = vadd.f32 %v1944_v7, %v1943_v4  ;;  %v2038_v10 = vpop.f32.mrf.mxu1  ;;  %v1448_v7 = vadd.s32 24, %v2275_v27 }
  0xfd   : > { %v1895_v11 = vpack.c.bf16 %v2595_v8, %v2595_v8  ;;  %v2039_v12 = vadd.f32 %v2038_v10, %v2037_v6  ;;  %v1946_v13 = vpop.f32.mrf.mxu0  ;;  %v2642_v6 = vstv %s1470_s27  ;;  %v1449_v10 = vadd.s32 32, %v2275_v27 }
  0xfe   : > { %v2040_v16 = vpop.f32.mrf.mxu1 }
  0xff   : > { %1421 = vst.msk [vmem:[%s2583_s29 + $0x8] sm:$0xf] %vm1418_vm0, %v1895_v11  ;;  %v2601_v14 = vadd.f32 %v2039_v12, %v1945_v9  ;;  %v1947_v15 = vpop.f32.mrf.mxu0  ;;  %v1450_v11 = vadd.s32 40, %v2275_v27 }
 0x100   : > { %v1948_v18 = vadd.f32 %v1947_v15, %v1946_v13  ;;  %v2041_v20 = vpop.f32.mrf.mxu1 }
 0x101   : > { %v1896_v17 = vpack.c.bf16 %v2601_v14, %v2601_v14  ;;  %v1949_v19 = vpop.f32.mrf.mxu0  ;;  %v2042_v21 = vadd.f32 %v2041_v20, %v2040_v16  ;;  %v1451_v20 = vadd.s32 48, %v2275_v27 }
 0x102   : > { %v2043_v23 = vpop.f32.mrf.mxu1 }
 0x103   : > { %1422 = vst.msk [vmem:[%s2583_s29 + $0xc] sm:$0xf] %vm1418_vm0, %v1896_v17  ;;  %v1950_v22 = vpop.f32.mrf.mxu0  ;;  %v2607_v24 = vadd.f32 %v2042_v21, %v1948_v18  ;;  %v1472_v17 = vadd.s32 %v2642_v6, %v2275_v27  ;;  %v1473_v18 = vadd.s32 %v2642_v6, %v1446_v1 }
 0x104   : > { %v1951_v25 = vadd.f32 %v1950_v22, %v1949_v19  ;;  %v2044_v26 = vpop.f32.mrf.mxu1  ;;  %v1474_v19 = vadd.s32 %v2642_v6, %v1447_v2 }
 0x105   : > { %v1952_v28 = vpop.f32.mrf.mxu0  ;;  %v1897_v29 = vpack.c.bf16 %v2607_v24, %v2607_v24  ;;  %v2045_v30 = vadd.f32 %v2044_v26, %v2043_v23  ;;  %v1475_v23 = vadd.s32 %v2642_v6, %v1448_v7  ;;  %vm1497_vm1 = vcmp.lt.s32.totalorder %v1472_v17, 392 }
 0x106   : > { %v2046_v33 = vpop.f32.mrf.mxu1  ;;  %vm1498_vm2 = vcmp.lt.s32.totalorder %v1473_v18, 392  ;;  %vm1499_vm3 = vcmp.lt.s32.totalorder %v1474_v19, 392  ;;  %v1572_v1 = vsel %vm1497_vm1, %v2578_v47, 0.0 }
 0x107   : > { %v1953_v31 = vpop.f32.mrf.mxu0  ;;  %1423 = vst.msk [vmem:[%s2583_s29 + $0x10] sm:$0xf] %vm1418_vm0, %v1897_v29  ;;  %v2613_v32 = vadd.f32 %v2045_v30, %v1951_v25  ;;  %v2663_v29 = vadd.s32 %v2642_v6, %v1450_v11  ;;  %v1452_v30 = vadd.s32 56, %v2275_v27  ;;  %vm1500_vm5 = vcmp.lt.s32.totalorder %v1475_v23, 392 }
 0x108   : > { %v1954_v34 = vadd.f32 %v1953_v31, %v1952_v28  ;;  %v2047_v36 = vpop.f32.mrf.mxu1  ;;  %v2660_v28 = vadd.s32 %v2642_v6, %v1449_v10  ;;  %v1653_v17 = vmul.f32 %v1572_v1, %v1572_v1  ;;  %v1575_v18 = vsel %vm1500_vm5, %v2601_v14, 0.0 }
 0x109   : > { %v1955_v48 = vpop.f32.mrf.mxu0  ;;  %v1898_v35 = vpack.c.bf16 %v2613_v32, %v2613_v32  ;;  %v2048_v37 = vadd.f32 %v2047_v36, %v2046_v33  ;;  %v1453_v33 = vadd.s32 64, %v2275_v27  ;;  %v2670_v36 = vadd.s32 %v2642_v6, %v1451_v20 }
 0x10a   : > { %v2049_v39 = vpop.f32.mrf.mxu1  ;;  %vm1501_vm6 = vcmp.lt.s32.totalorder %v2660_v28, 392  ;;  %vm1502_vm7 = vcmp.lt.s32.totalorder %v2663_v29, 392  ;;  %v1463_v14 = vadd.s32 144, %v2275_v27 }
 0x10b   : > { %v1956_v38 = vpop.f32.mrf.mxu0  ;;  %1424 = vst.msk [vmem:[%s2583_s29 + $0x14] sm:$0xf] %vm1418_vm0, %v1898_v35  ;;  %v2619_v49 = vadd.f32 %v2048_v37, %v1954_v34  ;;  %v1454_v37 = vadd.s32 72, %v2275_v27  ;;  %vm1503_vm8 = vcmp.lt.s32.totalorder %v2670_v36, 392 }
 0x10c   : > { %v1957_v54 = vadd.f32 %v1956_v38, %v1955_v48  ;;  %v2050_v40 = vpop.f32.mrf.mxu1  ;;  %v1455_v38 = vadd.s32 80, %v2275_v27 }
 0x10d   : > { %v1899_v41 = vpack.c.bf16 %v2619_v49, %v2619_v49  ;;  %v2051_v58 = vadd.f32 %v2050_v40, %v2049_v39  ;;  %v1958_v42 = vpop.f32.mrf.mxu0 }
 0x10e   : > { %v2052_v62 = vpop.f32.mrf.mxu1 }
 0x10f   : > { %1425 = vst.msk [vmem:[%s2583_s29 + $0x18] sm:$0xf] %vm1418_vm0, %v1899_v41  ;;  %v2625_v55 = vadd.f32 %v2051_v58, %v1957_v54  ;;  %v1959_v43 = vpop.f32.mrf.mxu0  ;;  %v2681_v41 = vadd.s32 %v2642_v6, %v1452_v30 }
 0x110   : > { %v1960_v44 = vadd.f32 %v1959_v43, %v1958_v42  ;;  %v2053_v45 = vpop.f32.mrf.mxu1  ;;  %v2684_v42 = vadd.s32 %v2642_v6, %v1453_v33  ;;  %v1456_v43 = vadd.s32 88, %v2275_v27 }
 0x111   : > { %v1900_v59 = vpack.c.bf16 %v2625_v55, %v2625_v55  ;;  %v1961_v46 = vpop.f32.mrf.mxu0  ;;  %v2054_v63 = vadd.f32 %v2053_v45, %v2052_v62  ;;  %vm1504_vm9 = vcmp.lt.s32.totalorder %v2681_v41, 392 }
 0x112   : > { %v2055_v50 = vpop.f32.mrf.mxu1  ;;  %v2714_v10 = vadd.s32 %v2642_v6, %v1456_v43  ;;  %vm1505_vm10 = vcmp.lt.s32.totalorder %v2684_v42, 392 }
 0x113   : > { %1426 = vst.msk [vmem:[%s2583_s29 + $0x1c] sm:$0xf] %vm1418_vm0, %v1900_v59  ;;  %v1962_v51 = vpop.f32.mrf.mxu0  ;;  %v2631_v52 = vadd.f32 %v2054_v63, %v1960_v44  ;;  %v1457_v59 = vadd.s32 96, %v2275_v27 }
 0x114   : > { %v1963_v53 = vadd.f32 %v1962_v51, %v1961_v46  ;;  %v2056_v56 = vpop.f32.mrf.mxu1  ;;  %v1573_v46 = vsel %vm1498_vm2, %v2589_v60, 0.0  ;;  %v1459_v51 = vadd.s32 112, %v2275_v27  ;;  %v1461_v60 = vadd.s32 128, %v2275_v27 }
 0x115   : > { %v1901_v57 = vpack.c.bf16 %v2631_v52, %v2631_v52  ;;  %v2057_v61 = vadd.f32 %v2056_v56, %v2055_v50  ;;  %v1964_v0 = vpop.f32.mrf.mxu0  ;;  %v1458_v50 = vadd.s32 104, %v2275_v27  ;;  %v2699_v56 = vadd.s32 %v2642_v6, %v1455_v38 }
 0x116   : > { %v2058_v4 = vpop.f32.mrf.mxu1  ;;  %v1654_v7 = vmul.f32 %v1573_v46, %v1573_v46  ;;  %v2717_v11 = vadd.s32 %v2642_v6, %v1457_v59  ;;  %v2734_v20 = vadd.s32 %v2642_v6, %v1461_v60  ;;  %v1599_v23 = vsel %vm1597_vm4, %v1573_v46, 0.0 }
 0x117   : > { %1427 = vst.msk [vmem:[%s2583_s29 + $0x20] sm:$0xf] %vm1418_vm0, %v1901_v57  ;;  %v2640_v3 = vadd.f32 %v2057_v61, %v1963_v53  ;;  %v1965_v5 = vpop.f32.mrf.mxu0  ;;  %v2696_v53 = vadd.s32 %v2642_v6, %v1454_v37  ;;  %v1656_v37 = vmul.f32 %v1575_v18, %v1575_v18  ;;  %vm1507_vm12 = vcmp.lt.s32.totalorder %v2699_v56, 392 }
 0x118   : > { %v1966_v9 = vadd.f32 %v1965_v5, %v1964_v0  ;;  %v2059_v13 = vpop.f32.mrf.mxu1  ;;  %v1460_v0 = vadd.s32 120, %v2275_v27  ;;  %v1462_v5 = vadd.s32 136, %v2275_v27  ;;  %v1679_v33 = vsel %vm1597_vm4, %v1654_v7, 0.0 }
 0x119   : > { %v1902_v12 = vpack.c.bf16 %v2640_v3, %v2640_v3  ;;  %v1967_v15 = vpop.f32.mrf.mxu0  ;;  %v2060_v16 = vadd.f32 %v2059_v13, %v2058_v4  ;;  %vm1506_vm11 = vcmp.lt.s32.totalorder %v2696_v53, 392  ;;  %vm1508_vm13 = vcmp.lt.s32.totalorder %v2714_v10, 392 }
 0x11a   : > { %v2061_v21 = vpop.f32.mrf.mxu1  ;;  %v2731_v19 = vadd.s32 %v2642_v6, %v1460_v0  ;;  %v1683_v0 = vsel %vm1597_vm4, %v1656_v37, 0.0  ;;  %vm1509_vm14 = vcmp.lt.s32.totalorder %v2717_v11, 392 }
 0x11b   : > { %1428 = vst.msk [vmem:[%s2583_s29 + $0x24] sm:$0xf] %vm1418_vm0, %v1902_v12  ;;  %v1968_v22 = vpop.f32.mrf.mxu0  ;;  %v2657_v25 = vadd.f32 %v2060_v16, %v1966_v9  ;;  %v1574_v9 = vsel %vm1499_vm3, %v2595_v8, 0.0  ;;  %v2725_v8 = vadd.s32 %v2642_v6, %v1459_v51  ;;  %v1603_v51 = vsel %vm1597_vm4, %v1575_v18, 0.0 }
 0x11c   : > { %v1969_v26 = vadd.f32 %v1968_v22, %v1967_v15  ;;  %v2062_v31 = vpop.f32.mrf.mxu1  ;;  %v2722_v15 = vadd.s32 %v2642_v6, %v1458_v50  ;;  %v1601_v43 = vsel %vm1597_vm4, %v1574_v9, 0.0  ;;  %vm1512_vm2 = vcmp.lt.s32.totalorder %v2731_v19, 392 }
 0x11d   : > { %v1903_v34 = vpack.c.bf16 %v2657_v25, %v2657_v25  ;;  %v2063_v48 = vadd.f32 %v2062_v31, %v2061_v21  ;;  %v1970_v35 = vpop.f32.mrf.mxu0  ;;  %v1655_v21 = vmul.f32 %v1574_v9, %v1574_v9  ;;  %v2741_v31 = vadd.s32 %v2642_v6, %v1462_v5 }
 0x11e   : > { %v2064_v54 = vpop.f32.mrf.mxu1  ;;  %vm1510_vm15 = vcmp.lt.s32.totalorder %v2722_v15, 392  ;;  %vm1511_vm1 = vcmp.lt.s32.totalorder %v2725_v8, 392  ;;  %vm1513_vm3 = vcmp.lt.s32.totalorder %v2734_v20, 392 }
 0x11f   : > { %1429 = vst.msk [vmem:[%s2583_s29 + $0x28] sm:$0xf] %vm1418_vm0, %v1903_v34  ;;  %v2676_v39 = vadd.f32 %v2063_v48, %v1969_v26  ;;  %v1971_v40 = vpop.f32.mrf.mxu0  ;;  %v1576_v34 = vsel %vm1501_vm6, %v2607_v24, 0.0  ;;  %v1577_v24 = vsel %vm1502_vm7, %v2613_v32, 0.0  ;;  %vm1514_vm5 = vcmp.lt.s32.totalorder %v2741_v31, 392 }
 0x120   : > { %v1972_v58 = vadd.f32 %v1971_v40, %v1970_v35  ;;  %v2065_v44 = vpop.f32.mrf.mxu1  ;;  %v1598_v35 = vsel %vm1597_vm4, %v1572_v1, 0.0  ;;  %v1657_v46 = vmul.f32 %v1576_v34, %v1576_v34  ;;  %v1658_v60 = vmul.f32 %v1577_v24, %v1577_v24 }
 0x121   : > { %v1904_v62 = vpack.c.bf16 %v2676_v39, %v2676_v39  ;;  %v1973_v45 = vpop.f32.mrf.mxu0  ;;  %v2066_v63 = vadd.f32 %v2065_v44, %v2064_v54  ;;  %v1600_v44 = vadd.f32 %v1599_v23, %v1598_v35  ;;  %v1605_v7 = vsel %vm1597_vm4, %v1576_v34, 0.0 }
 0x122   : > { %v2067_v57 = vpop.f32.mrf.mxu1  ;;  %v1607_v18 = vsel %vm1597_vm4, %v1577_v24, 0.0 }
 0x123   : > { %1430 = vst.msk [vmem:[%s2583_s29 + $0x2c] sm:$0xf] %vm1418_vm0, %v1904_v62  ;;  %v1974_v61 = vpop.f32.mrf.mxu0  ;;  %v2707_v2 = vadd.f32 %v2066_v63, %v1972_v58  ;;  %v1464_v58 = vadd.s32 152, %v2275_v27  ;;  %v1678_v62 = vsel %vm1597_vm4, %v1653_v17, 0.0 }
 0x124   : > { %v1975_v4 = vadd.f32 %v1974_v61, %v1973_v45  ;;  %v2068_v12 = vpop.f32.mrf.mxu1  ;;  %v1680_v59 = vadd.f32 %v1679_v33, %v1678_v62  ;;  %v1681_v45 = vsel %vm1597_vm4, %v1655_v21, 0.0  ;;  %v1602_v61 = vadd.f32 %v1601_v43, %v1600_v44 }
 0x125   : > { %v1905_v47 = vpack.c.bf16 %v2707_v2, %v2707_v2  ;;  %v2069_v13 = vadd.f32 %v2068_v12, %v2067_v57  ;;  %v1976_v16 = vpop.f32.mrf.mxu0  ;;  %v1578_v57 = vsel %vm1503_vm8, %v2619_v49, 0.0  ;;  %v1687_v33 = vsel %vm1597_vm4, %v1658_v60, 0.0 }
 0x126   : > { %v2070_v26 = vpop.f32.mrf.mxu1  ;;  %v1682_v5 = vadd.f32 %v1681_v45, %v1680_v59  ;;  %v1604_v12 = vadd.f32 %v1603_v51, %v1602_v61  ;;  %v1465_v59 = vadd.s32 160, %v2275_v27 }
 0x127   : > { %1431 = vst.msk [vmem:[%s2583_s29 + $0x30] sm:$0xf] %vm1418_vm0, %v1905_v47  ;;  %v2738_v22 = vadd.f32 %v2069_v13, %v1975_v4  ;;  %v1977_v30 = vpop.f32.mrf.mxu0  ;;  %v2772_v4 = vadd.s32 %v2642_v6, %v1463_v14  ;;  %v1685_v47 = vsel %vm1597_vm4, %v1657_v46, 0.0  ;;  %v1659_v13 = vmul.f32 %v1578_v57, %v1578_v57 }
 0x128   : > { %v1978_v48 = vadd.f32 %v1977_v30, %v1976_v16  ;;  %v2071_v54 = vpop.f32.mrf.mxu1  ;;  %v1579_v16 = vsel %vm1504_vm9, %v2625_v55, 0.0  ;;  %v1684_v17 = vadd.f32 %v1683_v0, %v1682_v5  ;;  %v2789_v14 = vadd.s32 %v2642_v6, %v1464_v58 }
 0x129   : > { %v1906_v38 = vpack.c.bf16 %v2738_v22, %v2738_v22  ;;  %v1979_v40 = vpop.f32.mrf.mxu0  ;;  %v2072_v28 = vadd.f32 %v2071_v54, %v2070_v26  ;;  %v1606_v23 = vadd.f32 %v1605_v7, %v1604_v12  ;;  %v1580_v55 = vsel %vm1505_vm10, %v2631_v52, 0.0 }
 0x12a   : > { %v2073_v63 = vpop.f32.mrf.mxu1  ;;  %v1686_v34 = vadd.f32 %v1685_v47, %v1684_v17  ;;  %v1660_v35 = vmul.f32 %v1579_v16, %v1579_v16  ;;  %v1689_v58 = vsel %vm1597_vm4, %v1659_v13, 0.0  ;;  %v1581_v52 = vsel %vm1506_vm11, %v2640_v3, 0.0 }
 0x12b   : > { %1432 = vst.msk [vmem:[%s2583_s29 + $0x34] sm:$0xf] %vm1418_vm0, %v1906_v38  ;;  %v1980_v50 = vpop.f32.mrf.mxu0  ;;  %v2768_v32 = vadd.f32 %v2072_v28, %v1978_v48  ;;  %v1609_v48 = vsel %vm1597_vm4, %v1578_v57, 0.0  ;;  %v1611_v43 = vsel %vm1597_vm4, %v1579_v16, 0.0  ;;  %v1661_v24 = vmul.f32 %v1580_v55, %v1580_v55 }
 0x12c   : > { %v1981_v29 = vadd.f32 %v1980_v50, %v1979_v40  ;;  %v2074_v1 = vpop.f32.mrf.mxu1  ;;  %v1608_v40 = vadd.f32 %v1607_v18, %v1606_v23  ;;  %v1688_v62 = vadd.f32 %v1687_v33, %v1686_v34  ;;  %v1582_v46 = vsel %vm1507_vm12, %v2657_v25, 0.0 }
 0x12d   : > { %v1907_v49 = vpack.c.bf16 %v2768_v32, %v2768_v32  ;;  %v2075_v36 = vadd.f32 %v2074_v1, %v2073_v63  ;;  %v1982_v9 = vpop.f32.mrf.mxu0  ;;  %v1691_v50 = vsel %vm1597_vm4, %v1660_v35, 0.0  ;;  %v1613_v51 = vsel %vm1597_vm4, %v1580_v55, 0.0 }
 0x12e   : > { %v1610_v45 = vadd.f32 %v1609_v48, %v1608_v40  ;;  %v1690_v3 = vadd.f32 %v1689_v58, %v1688_v62  ;;  %v1662_v57 = vmul.f32 %v1581_v52, %v1581_v52  ;;  %v1583_v0 = vsel %vm1508_vm13, %v2676_v39, 0.0 }
 0x12f   : > { %1433 = vst.msk [vmem:[%s2583_s29 + $0x38] sm:$0xf] %vm1418_vm0, %v1907_v49  ;;  %v2786_v21 = vadd.f32 %v2075_v36, %v1981_v29  ;;  %v2076_v26 = vpop.f32.mrf.mxu1  ;;  %v1983_v30 = vpop.f32.mrf.mxu0  ;;  %v1693_v1 = vsel %vm1597_vm4, %v1661_v24, 0.0  ;;  %v1615_v5 = vsel %vm1597_vm4, %v1581_v52, 0.0  ;;  %v1663_v7 = vmul.f32 %v1582_v46, %v1582_v46 }
 0x130   : > { %v1984_v41 = vadd.f32 %v1983_v30, %v1982_v9  ;;  %v1612_v61 = vadd.f32 %v1611_v43, %v1610_v45  ;;  %v2824_v49 = vadd.s32 %v2642_v6, %v1465_v59  ;;  %v1692_v36 = vadd.f32 %v1691_v50, %v1690_v3 }
 0x131   : > { %v1908_v37 = vpack.c.bf16 %v2786_v21, %v2786_v21  ;;  %v2077_v38 = vpop.f32.mrf.mxu1  ;;  %v1985_v54 = vpop.f32.mrf.mxu0  ;;  %v1584_v39 = vsel %vm1509_vm14, %v2707_v2, 0.0  ;;  %v1695_v13 = vsel %vm1597_vm4, %v1662_v57, 0.0  ;;  %v1617_v16 = vsel %vm1597_vm4, %v1582_v46, 0.0 }
 0x132   : > { %v2078_v42 = vadd.f32 %v2077_v38, %v2076_v26  ;;  %v1614_v9 = vadd.f32 %v1613_v51, %v1612_v61  ;;  %v1664_v17 = vmul.f32 %v1583_v0, %v1583_v0  ;;  %v1694_v26 = vadd.f32 %v1693_v1, %v1692_v36 }
 0x133   : > { %1434 = vst.msk [vmem:[%s2583_s29 + $0x3c] sm:$0xf] %vm1418_vm0, %v1908_v37  ;;  %v2079_v28 = vpop.f32.mrf.mxu1  ;;  %v1986_v44 = vpop.f32.mrf.mxu0  ;;  %v1585_v2 = vsel %vm1510_vm15, %v2738_v22, 0.0  ;;  %vm1515_vm6 = vcmp.lt.s32.totalorder %v2772_v4, 392  ;;  %v1697_v55 = vsel %vm1597_vm4, %v1663_v7, 0.0  ;;  %v1665_v34 = vmul.f32 %v1584_v39, %v1584_v39 }
 0x134   : > { %v2810_v63 = vadd.f32 %v2078_v42, %v1984_v41  ;;  %v1987_v53 = vadd.f32 %v1986_v44, %v1985_v54  ;;  %v1616_v30 = vadd.f32 %v1615_v5, %v1614_v9  ;;  %v1619_v41 = vsel %vm1597_vm4, %v1583_v0, 0.0 }
 0x135   : > { %v2080_v29 = vpop.f32.mrf.mxu1  ;;  %v1696_v35 = vadd.f32 %v1695_v13, %v1694_v26  ;;  %v1586_v15 = vsel %vm1511_vm1, %v2768_v32, 0.0  ;;  %v1466_v54 = vadd.s32 168, %v2275_v27  ;;  %v1699_v40 = vsel %vm1597_vm4, %v1664_v17, 0.0 }
 0x136   : > { %v1909_v25 = vpack.c.bf16 %v2810_v63, %v2810_v63  ;;  %v2081_v56 = vadd.f32 %v2080_v29, %v2079_v28  ;;  %v1988_v60 = vpop.f32.mrf.mxu0  ;;  %v1618_v37 = vadd.f32 %v1617_v16, %v1616_v30  ;;  %v1666_v58 = vmul.f32 %v1585_v2, %v1585_v2 }
 0x137   : > { %v1698_v62 = vadd.f32 %v1697_v55, %v1696_v35  ;;  %v1621_v24 = vsel %vm1597_vm4, %v1584_v39, 0.0  ;;  %vm1516_vm7 = vcmp.lt.s32.totalorder %v2789_v14, 392  ;;  %v1701_v8 = vsel %vm1597_vm4, %v1665_v34, 0.0 }
 0x138   : > { %1435 = vst.msk [vmem:[%s2583_s29 + $0x40] sm:$0xf] %vm1418_vm0, %v1909_v25  ;;  %v2831_v10 = vadd.f32 %v2081_v56, %v1987_v53  ;;  %v2082_v12 = vpop.f32.mrf.mxu1  ;;  %v1989_v47 = vpop.f32.mrf.mxu0  ;;  %v1620_v43 = vadd.f32 %v1619_v41, %v1618_v37  ;;  %v1667_v32 = vmul.f32 %v1586_v15, %v1586_v15  ;;  %vm1517_vm8 = vcmp.lt.s32.totalorder %v2824_v49, 392 }
 0x139   : > { %v1990_v18 = vadd.f32 %v1989_v47, %v1988_v60  ;;  %v1700_v46 = vadd.f32 %v1699_v40, %v1698_v62  ;;  %v1623_v53 = vsel %vm1597_vm4, %v1585_v2, 0.0  ;;  %v1587_v3 = vsel %vm1512_vm2, %v2786_v21, 0.0 }
 0x13a   : > { %v1910_v11 = vpack.c.bf16 %v2831_v10, %v2831_v10  ;;  %v2083_v23 = vpop.f32.mrf.mxu1  ;;  %v1991_v33 = vpop.f32.mrf.mxu0  ;;  %v2860_v50 = vadd.s32 %v2642_v6, %v1466_v54  ;;  %v1622_v51 = vadd.f32 %v1621_v24, %v1620_v43  ;;  %v1703_v57 = vsel %vm1597_vm4, %v1666_v58, 0.0 }
 0x13b   : > { %v2084_v48 = vadd.f32 %v2083_v23, %v2082_v12  ;;  %v1467_v25 = vadd.s32 176, %v2275_v27  ;;  %v1702_v56 = vadd.f32 %v1701_v8, %v1700_v46  ;;  %v1625_v60 = vsel %vm1597_vm4, %v1586_v15, 0.0 }
 0x13c   : > { %1436 = vst.msk [vmem:[%s2583_s29 + $0x44] sm:$0xf] %vm1418_vm0, %v1910_v11  ;;  %v2085_v22 = vpop.f32.mrf.mxu1  ;;  %v1992_v38 = vpop.f32.mrf.mxu0  ;;  %v1588_v19 = vsel %vm1513_vm3, %v2810_v63, 0.0  ;;  %v1624_v1 = vadd.f32 %v1623_v53, %v1622_v51  ;;  %v1705_v5 = vsel %vm1597_vm4, %v1667_v32, 0.0  ;;  %v1668_v7 = vmul.f32 %v1587_v3, %v1587_v3 }
 0x13d   : > { %v1288_v52 = vadd.f32 %v2084_v48, %v1990_v18  ;;  %v1993_v42 = vadd.f32 %v1992_v38, %v1991_v33  ;;  %v1704_v12 = vadd.f32 %v1703_v57, %v1702_v56  ;;  %v1627_v47 = vsel %vm1597_vm4, %v1587_v3, 0.0 }
 0x13e   : > { %v2086_v28 = vpop.f32.mrf.mxu1  ;;  %v1589_v13 = vsel %vm1514_vm5, %v2831_v10, 0.0  ;;  %v1626_v17 = vadd.f32 %v1625_v60, %v1624_v1  ;;  %v1669_v20 = vmul.f32 %v1588_v19, %v1588_v19  ;;  %v1468_v30 = vadd.s32 184, %v2275_v27 }
 0x13f   : > { %v1911_v44 = vpack.c.bf16 %v1288_v52, %v1288_v52  ;;  %v2087_v59 = vadd.f32 %v2086_v28, %v2085_v22  ;;  %v1994_v45 = vpop.f32.mrf.mxu0  ;;  %v1590_v63 = vsel %vm1515_vm6, %v1288_v52, 0.0  ;;  %v1706_v2 = vadd.f32 %v1705_v5, %v1704_v12 }
 0x140   : > { %vm1518_vm9 = vcmp.lt.s32.totalorder %v2860_v50, 392  ;;  %v1628_v33 = vadd.f32 %v1627_v47, %v1626_v17  ;;  %v1707_v31 = vsel %vm1597_vm4, %v1668_v7, 0.0  ;;  %v1629_v10 = vsel %vm1597_vm4, %v1588_v19, 0.0 }
 0x141   : > { %1437 = vst.msk [vmem:[%s2583_s29 + $0x48] sm:$0xf] %vm1418_vm0, %v1911_v44  ;;  %v1291_v29 = vadd.f32 %v2087_v59, %v1993_v42  ;;  %v2088_v61 = vpop.f32.mrf.mxu1  ;;  %v1995_v0 = vpop.f32.mrf.mxu0  ;;  %v1670_v55 = vmul.f32 %v1589_v13, %v1589_v13  ;;  %v1671_v41 = vmul.f32 %v1590_v63, %v1590_v63  ;;  %v1709_v15 = vsel %vm1597_vm4, %v1669_v20, 0.0 }
 0x142   : > { %v1996_v21 = vadd.f32 %v1995_v0, %v1994_v45  ;;  %v1631_v22 = vsel %vm1597_vm4, %v1589_v13, 0.0  ;;  %v1494_v38 = vadd.s32 %v2642_v6, %v1467_v25  ;;  %v1495_v54 = vadd.s32 %v2642_v6, %v1468_v30 }
 0x143   : > { %v1912_v36 = vpack.c.bf16 %v1291_v29, %v1291_v29  ;;  %v2089_v9 = vpop.f32.mrf.mxu1  ;;  %v1997_v39 = vpop.f32.mrf.mxu0  ;;  %v1591_v34 = vsel %vm1516_vm7, %v1291_v29, 0.0  ;;  %v1708_v40 = vadd.f32 %v1707_v31, %v1706_v2  ;;  %v1630_v58 = vadd.f32 %v1629_v10, %v1628_v33 }
 0x144   : > { %v2090_v16 = vadd.f32 %v2089_v9, %v2088_v61  ;;  %v1711_v43 = vsel %vm1597_vm4, %v1670_v55, 0.0  ;;  %v1633_v24 = vsel %vm1597_vm4, %v1590_v63, 0.0  ;;  %v1672_v28 = vmul.f32 %v1591_v34, %v1591_v34 }
 0x145   : > { %1438 = vst.msk [vmem:[%s2583_s29 + $0x4c] sm:$0xf] %vm1418_vm0, %v1912_v36  ;;  %v2091_v18 = vpop.f32.mrf.mxu1  ;;  %v1998_v26 = vpop.f32.mrf.mxu0  ;;  %v1710_v32 = vadd.f32 %v1709_v15, %v1708_v40  ;;  %v1632_v44 = vadd.f32 %v1631_v22, %v1630_v58  ;;  %v1713_v59 = vsel %vm1597_vm4, %v1671_v41, 0.0  ;;  %v1635_v49 = vsel %vm1597_vm4, %v1591_v34, 0.0 }
 0x146   : > { %v1296_v11 = vadd.f32 %v2090_v16, %v1996_v21  ;;  %v1999_v23 = vadd.f32 %v1998_v26, %v1997_v39  ;;  %vm1519_vm10 = vcmp.lt.s32.totalorder %v1494_v38, 392  ;;  %v1469_v56 = vadd.s32 192, %v2275_v27 }
 0x147   : > { %v2092_v4 = vpop.f32.mrf.mxu1  ;;  %v1712_v29 = vadd.f32 %v1711_v43, %v1710_v32  ;;  %v1634_v61 = vadd.f32 %v1633_v24, %v1632_v44  ;;  %v1715_v60 = vsel %vm1597_vm4, %v1672_v28, 0.0  ;;  %vm1520_vm11 = vcmp.lt.s32.totalorder %v1495_v54, 392 }
 0x148   : > { %v1913_v48 = vpack.c.bf16 %v1296_v11, %v1296_v11  ;;  %v2093_v35 = vadd.f32 %v2092_v4, %v2091_v18  ;;  %v2000_v37 = vpop.f32.mrf.mxu0  ;;  %v1592_v52 = vsel %vm1517_vm8, %v1296_v11, 0.0  ;;  %v1496_v18 = vadd.s32 %v2642_v6, %v1469_v56 }
 0x149   : > { %v1673_v3 = vmul.f32 %v1592_v52, %v1592_v52  ;;  %v1714_v1 = vadd.f32 %v1713_v59, %v1712_v29  ;;  %v1636_v5 = vadd.f32 %v1635_v49, %v1634_v61  ;;  %v1637_v50 = vsel %vm1597_vm4, %v1592_v52, 0.0 }
 0x14a   : > { %1439 = vst.msk [vmem:[%s2583_s29 + $0x50] sm:$0xf] %vm1418_vm0, %v1913_v48  ;;  %v1299_v14 = vadd.f32 %v2093_v35, %v1999_v23  ;;  %v2094_v42 = vpop.f32.mrf.mxu1  ;;  %v2001_v62 = vpop.f32.mrf.mxu0  ;;  %vm1521_vm12 = vcmp.lt.s32.totalorder %v1496_v18, 392  ;;  %vm1733_vm13 = vcmask 1040384  }
 0x14b   : > { %v2002_v8 = vadd.f32 %v2001_v62, %v2000_v37  ;;  %v1717_v39 = vsel %vm1597_vm4, %v1673_v3, 0.0  ;;  %v1716_v27 = vadd.f32 %v1715_v60, %v1714_v1  ;;  %v1638_v26 = vadd.f32 %v1637_v50, %v1636_v5 }
 0x14c   : > { %v1914_v45 = vpack.c.bf16 %v1299_v14, %v1299_v14  ;;  %v2095_v46 = vpop.f32.mrf.mxu1  ;;  %v2003_v53 = vpop.f32.mrf.mxu0  ;;  %v1593_v51 = vsel %vm1518_vm9, %v1299_v14, 0.0 }
 0x14d   : > { %v2096_v57 = vadd.f32 %v2095_v46, %v2094_v42  ;;  %v1674_v7 = vmul.f32 %v1593_v51, %v1593_v51  ;;  %v1639_v16 = vsel %vm1597_vm4, %v1593_v51, 0.0  ;;  %v1718_v11 = vadd.f32 %v1717_v39, %v1716_v27 }
 0x14e   : > { %1440 = vst.msk [vmem:[%s2583_s29 + $0x54] sm:$0xf] %vm1418_vm0, %v1914_v45  ;;  %v2097_v0 = vpop.f32.mrf.mxu1  ;;  %v2004_v25 = vpop.f32.mrf.mxu0  ;;  %v1640_v55 = vadd.f32 %v1639_v16, %v1638_v26 }
 0x14f   : > { %v1304_v19 = vadd.f32 %v2096_v57, %v2002_v8  ;;  %v2005_v21 = vadd.f32 %v2004_v25, %v2003_v53  ;;  %v1719_v23 = vsel %vm1597_vm4, %v1674_v7, 0.0 }
 0x150   : > { %v2098_v36 = vpop.f32.mrf.mxu1  ;;  %v2006_v9 = vpop.f32.mrf.mxu0  ;;  %v1720_v22 = vadd.f32 %v1719_v23, %v1718_v11 }
 0x151   : > { %v1915_v12 = vpack.c.bf16 %v1304_v19, %v1304_v19  ;;  %v1594_v47 = vsel %vm1519_vm10, %v1304_v19, 0.0  ;;  %v2099_v13 = vadd.f32 %v2098_v36, %v2097_v0 }
 0x152   : > { %v1675_v17 = vmul.f32 %v1594_v47, %v1594_v47  ;;  %v2100_v20 = vpop.f32.mrf.mxu1  ;;  %v2007_v63 = vpop.f32.mrf.mxu0  ;;  %v1641_v33 = vsel %vm1597_vm4, %v1594_v47, 0.0 }
 0x153   : > { %1441 = vst.msk [vmem:[%s2583_s29 + $0x58] sm:$0xf] %vm1418_vm0, %v1915_v12  ;;  %v1307_v30 = vadd.f32 %v2099_v13, %v2005_v21  ;;  %v2008_v2 = vadd.f32 %v2007_v63, %v2006_v9  ;;  %v1642_v38 = vadd.f32 %v1641_v33, %v1640_v55 }
 0x154   : > { %v2101_v31 = vpop.f32.mrf.mxu1  ;;  %v2009_v10 = vpop.f32.mrf.mxu0  ;;  %v1721_v6 = vsel %vm1597_vm4, %v1675_v17, 0.0 }
 0x155   : > { %v1916_v4 = vpack.c.bf16 %v1307_v30, %v1307_v30  ;;  %v1595_v41 = vsel %vm1520_vm11, %v1307_v30, 0.0  ;;  %v2102_v34 = vadd.f32 %v2101_v31, %v2100_v20  ;;  %v1722_v52 = vadd.f32 %v1721_v6, %v1720_v22 }
 0x156   : > { %v1643_v48 = vsel %vm1597_vm4, %v1595_v41, 0.0  ;;  %v1676_v35 = vmul.f32 %v1595_v41, %v1595_v41  ;;  %v2103_v37 = vpop.f32.mrf.mxu1  ;;  %v2010_v15 = vpop.f32.mrf.mxu0 }
 0x157   : > { %1442 = vst.msk [vmem:[%s2583_s29 + $0x5c] sm:$0xf] %vm1418_vm0, %v1916_v4  ;;  %v1312_v40 = vadd.f32 %v2102_v34, %v2008_v2  ;;  %v1644_v14 = vadd.f32 %v1643_v48, %v1642_v38 }
 0x158   : > { %v1723_v58 = vsel %vm1597_vm4, %v1676_v35, 0.0  ;;  %v2104_v54 = vpop.f32.mrf.mxu1 }
 0x159   : > { %v1917_v42 = vpack.c.bf16 %v1312_v40, %v1312_v40  ;;  %v1596_v62 = vsel %vm1521_vm12, %v1312_v40, 0.0  ;;  %v1724_v28 = vadd.f32 %v1723_v58, %v1722_v52 }
 0x15a   : > { %v1645_v43 = vsel %vm1597_vm4, %v1596_v62, 0.0  ;;  %v1677_v24 = vmul.f32 %v1596_v62, %v1596_v62 }
 0x15b   : > { %1443 = vst.msk [vmem:[%s2583_s29 + $0x60] sm:$0xf] %vm1418_vm0, %v1917_v42  ;;  %v1646_v8 = vadd.f32 %v1645_v43, %v1644_v14  ;;  %vm1735_vm0 = vcmask 254976  }
 0x15c   : > { %v1725_v32 = vsel %vm1597_vm4, %v1677_v24, 0.0 }
 0x15d   : > { %v1647_v44 = vrot.slane %v1646_v8, 4  ;;  %v1726_v59 = vadd.f32 %v1725_v32, %v1724_v28 }
 0x15f   : > { %v1648_v45 = vadd.f32 %v1647_v44, %v1646_v8  ;;  %v1727_v46 = vrot.slane %v1726_v59, 4 }
 0x161   : > { %v1649_v53 = vrot.slane %v1648_v45, 2  ;;  %v1728_v49 = vadd.f32 %v1727_v46, %v1726_v59 }
 0x163   : > { %v1650_v3 = vadd.f32 %v1649_v53, %v1648_v45  ;;  %v1729_v51 = vrot.slane %v1728_v49, 2 }
 0x165   : > { %v1651_v57 = vrot.slane %v1650_v3, 1  ;;  %v1730_v29 = vadd.f32 %v1729_v51, %v1728_v49 }
 0x167   : > { %v1731_v61 = vrot.slane %v1730_v29, 1  ;;  %v1652_v0 = vadd.f32 %v1651_v57, %v1650_v3 }
 0x169   : > { %v1732_v25 = vadd.f32 %v1731_v61, %v1730_v29 }
 0x16b   : > { %v1734_v56 = vsel %vm1733_vm13, %v1652_v0, %v1732_v25 }
 0x16c   : > { %1736 = vst.msk [vmem:[%s241_s8] sm:$0x3] %vm1735_vm0, %v1734_v56 }
 0x16d PF: > { %s16_s18 = sadd.s32 1, %s2152_s18  }
 0x16e   : > { %p13_p5 = scmp.ge.s32.totalorder %s16_s18, 4  }
 0x170   :  { %15 = sbr.rel (!%p13_p5) target bundleno = 1 (0x1), region = 78 }

// kernel: vae_forward.12
= control target key start
LH: loop header
LB: loop body
LE: loop exit
PB: predicated region body
PF: predicated region fallthrough
CT: control target
= control target key end

     0   :  { %v76_v23 = vlaneseq  ;;  %vm683_vm0 = vcmask 519168   ;;  %vm693_vm1 = vcmask 523264   ;;  %vm749_vm2 = vcmask 1040384   ;;  %s1266_s1 = inlined_call_operand.vmem [shape: bf16[512,64], index: 1, kind: input, shape index: {}]   ;;  %s1267_s0 = inlined_call_operand.vmem [shape: bf16[72,512], index: 0, kind: input, shape index: {}]   ;;  %s1268_s2 = inlined_call_operand.vmem [shape: f32[1,512], index: 2, kind: input, shape index: {}]   ;;  %s1269_s3 = inlined_call_operand.vmem [shape: f32[1,512], index: 3, kind: input, shape index: {}]   ;;  %s1270_s4 = inlined_call_operand.vmem [shape: bf16[72,64], index: 4, kind: output, shape index: {0}]   ;;  %s1271_s5 = inlined_call_operand.vmem [shape: f32[1,2,64], index: 5, kind: output, shape index: {1}]  }
   0x1   :  { %v903_v0 = vld [vmem:[%s1266_s1 + $0x78] sm:$0xff]   ;;  %v907_v4 = vld [vmem:[%s1266_s1 + $0x70] sm:$0xff]   ;;  %v911_v8 = vld [vmem:[%s1266_s1 + $0x68] sm:$0xff]   ;;  %vm751_vm3 = vcmask 517120  }
   0x2   :  { %v904_v1 = vld [vmem:[%s1266_s1 + $0xf8] sm:$0xff]   ;;  %811 = vmatprep.subr.bf16.mxu0 %v903_v0  ;;  %v908_v5 = vld [vmem:[%s1266_s1 + $0xf0] sm:$0xff]   ;;  %v912_v9 = vld [vmem:[%s1266_s1 + $0xe8] sm:$0xff]   ;;  %v77_v28 = vshrl.u32 %v76_v23, 7 }
   0x3   :  { %v905_v2 = vld [vmem:[%s1266_s1 + $0x38] sm:$0xff]   ;;  %857 = vmatprep.subr.bf16.mxu1 %v904_v1  ;;  %v909_v6 = vld [vmem:[%s1266_s1 + $0x30] sm:$0xff]   ;;  %v913_v10 = vld [vmem:[%s1266_s1 + $0x28] sm:$0xff]  }
   0x4   :  { %v906_v3 = vld [vmem:[%s1266_s1 + $0xb8] sm:$0xff]   ;;  %812 = vmatpush3.bf16.msra.mxu0 %v905_v2  ;;  %v910_v7 = vld [vmem:[%s1266_s1 + $0xb0] sm:$0xff]   ;;  %v914_v11 = vld [vmem:[%s1266_s1 + $0xa8] sm:$0xff]   ;;  %v82_v33 = vsub.s32 1, %v77_v28  ;;  %v90_v35 = vsub.s32 3, %v77_v28  ;;  %v78_v39 = vsub.s32 0, %v77_v28 }
   0x5   :  { %858 = vmatpush3.bf16.msra.mxu1 %v906_v3  ;;  %813 = vmatprep.subr.bf16.mxu0 %v907_v4  ;;  %v915_v12 = vld [vmem:[%s1266_s1 + $0x60] sm:$0xff]   ;;  %v919_v16 = vld [vmem:[%s1266_s1 + $0x58] sm:$0xff]   ;;  %v923_v20 = vld [vmem:[%s1266_s1 + $0x50] sm:$0xff]   ;;  %v86_v40 = vsub.s32 2, %v77_v28 }
   0x6   :  { %859 = vmatprep.subr.bf16.mxu1 %v908_v5  ;;  %v916_v13 = vld [vmem:[%s1266_s1 + $0xe0] sm:$0xff]   ;;  %v920_v17 = vld [vmem:[%s1266_s1 + $0xd8] sm:$0xff]   ;;  %v924_v21 = vld [vmem:[%s1266_s1 + $0xd0] sm:$0xff]  }
   0x7   :  { %v917_v14 = vld [vmem:[%s1266_s1 + $0x20] sm:$0xff]   ;;  %v921_v18 = vld [vmem:[%s1266_s1 + $0x18] sm:$0xff]   ;;  %v925_v22 = vld [vmem:[%s1266_s1 + $0x10] sm:$0xff]  }
   0x8   :  { %814 = vmatpush3.bf16.msra.mxu0 %v909_v6  ;;  %v918_v15 = vld [vmem:[%s1266_s1 + $0xa0] sm:$0xff]   ;;  %v922_v19 = vld [vmem:[%s1266_s1 + $0x98] sm:$0xff]   ;;  %v926_v24 = vld [vmem:[%s1266_s1 + $0x90] sm:$0xff]  }
   0x9   :  { %860 = vmatpush3.bf16.msra.mxu1 %v910_v7  ;;  %815 = vmatprep.subr.bf16.mxu0 %v911_v8  ;;  %v927_v25 = vld [vmem:[%s1266_s1 + $0x48] sm:$0xff]   ;;  %v931_v30 = vld [vmem:[%s1266_s1 + $0x40] sm:$0xff]   ;;  %v22_v37 = vld [vmem:[%s1267_s0 + $0x10] sm:$0xff] }
   0xa   :  { %861 = vmatprep.subr.bf16.mxu1 %v912_v9  ;;  %v928_v26 = vld [vmem:[%s1266_s1 + $0xc8] sm:$0xff]   ;;  %v932_v31 = vld [vmem:[%s1266_s1 + $0xc0] sm:$0xff]   ;;  %v43_v43 = vunpack.c.l.bf16 %v22_v37  ;;  %v44_v44 = vunpack.c.h.bf16 %v22_v37  ;;  %v23_v47 = vld [vmem:[%s1267_s0 + $0x18] sm:$0xff] }
   0xb   :  { %v929_v27 = vld [vmem:[%s1266_s1 + $0x8] sm:$0xff]   ;;  %v933_v32 = vld [vmem:[%s1266_s1] sm:$0xff]   ;;  %v45_v52 = vunpack.c.l.bf16 %v23_v47  ;;  %v46_v53 = vunpack.c.h.bf16 %v23_v47 }
   0xc   :  { %816 = vmatpush3.bf16.msra.mxu0 %v913_v10  ;;  %v930_v29 = vld [vmem:[%s1266_s1 + $0x88] sm:$0xff]   ;;  %v934_v34 = vld [vmem:[%s1266_s1 + $0x80] sm:$0xff]  }
   0xd   :  { %862 = vmatpush3.bf16.msra.mxu1 %v914_v11  ;;  %817 = vmatprep.subr.bf16.mxu0 %v915_v12  ;;  %v20_v36 = vld [vmem:[%s1267_s0] sm:$0xff]  ;;  %v21_v46 = vld [vmem:[%s1267_s0 + $0x8] sm:$0xff] }
   0xe   :  { %863 = vmatprep.subr.bf16.mxu1 %v916_v13  ;;  %v38_v38 = vld [vmem:[%s1268_s2] sm:$0xf]  ;;  %v39_v41 = vunpack.c.l.bf16 %v20_v36  ;;  %v40_v42 = vunpack.c.h.bf16 %v20_v36  ;;  %v41_v50 = vunpack.c.l.bf16 %v21_v46  ;;  %v42_v51 = vunpack.c.h.bf16 %v21_v46  ;;  %v26_v13 = vld [vmem:[%s1267_s0 + $0x30] sm:$0xff] }
   0xf   :  { %v132_v45 = vld [vmem:[%s1269_s3] sm:$0xf]  ;;  %v1079_v48 = vrot.slane %v38_v38, %v82_v33  ;;  %v1083_v54 = vrot.slane %v38_v38, %v90_v35  ;;  %v1089_v58 = vrot.slane %v38_v38, %v78_v39  ;;  %v1095_v62 = vrot.slane %v38_v38, %v86_v40 }
  0x10   :  { %818 = vmatpush3.bf16.msra.mxu0 %v917_v14  ;;  %v1081_v49 = vrot.slane %v132_v45, %v82_v33  ;;  %v1085_v55 = vrot.slane %v132_v45, %v90_v35  ;;  %v1091_v59 = vrot.slane %v132_v45, %v78_v39  ;;  %v1097_v63 = vrot.slane %v132_v45, %v86_v40  ;;  %v24_v8 = vld [vmem:[%s1267_s0 + $0x20] sm:$0xff] }
  0x11   :  { %864 = vmatpush3.bf16.msra.mxu1 %v918_v15  ;;  %819 = vmatprep.subr.bf16.mxu0 %v919_v16  ;;  %v97_v56 = vmul.f32 %v1079_v48, %v40_v42  ;;  %v101_v57 = vmul.f32 %v1079_v48, %v44_v44  ;;  %v99_v60 = vmul.f32 %v1083_v54, %v42_v51  ;;  %v48_v23 = vunpack.c.h.bf16 %v24_v8  ;;  %v28_v44 = vld [vmem:[%s1267_s0 + $0x40] sm:$0xff] }
  0x12   :  { %865 = vmatprep.subr.bf16.mxu1 %v920_v17  ;;  %v103_v61 = vmul.f32 %v1083_v54, %v46_v53  ;;  %v96_v2 = vmul.f32 %v1089_v58, %v39_v41  ;;  %v100_v3 = vmul.f32 %v1089_v58, %v43_v43  ;;  %v98_v6 = vmul.f32 %v1095_v62, %v41_v50 }
  0x13   :  { %v155_v0 = vadd.f32 %v1081_v49, %v97_v56  ;;  %v159_v1 = vadd.f32 %v1081_v49, %v101_v57  ;;  %v157_v4 = vadd.f32 %v1085_v55, %v99_v60  ;;  %v102_v7 = vmul.f32 %v1095_v62, %v45_v52  ;;  %v30_v57 = vld [vmem:[%s1267_s0 + $0x50] sm:$0xff] }
  0x14   :  { %820 = vmatpush3.bf16.msra.mxu0 %v921_v18  ;;  %v161_v5 = vadd.f32 %v1085_v55, %v103_v61  ;;  %v154_v11 = vadd.f32 %v1091_v59, %v96_v2  ;;  %v158_v12 = vadd.f32 %v1091_v59, %v100_v3  ;;  %v156_v16 = vadd.f32 %v1097_v63, %v98_v6  ;;  %v25_v18 = vld [vmem:[%s1267_s0 + $0x28] sm:$0xff]  ;;  %v31_v3 = vld [vmem:[%s1267_s0 + $0x58] sm:$0xff] }
  0x15   :  { %866 = vmatpush3.bf16.msra.mxu1 %v922_v19  ;;  %821 = vmatprep.subr.bf16.mxu0 %v923_v20  ;;  %v191_v9 = vmax.f32 %v155_v0, 0.0  ;;  %v195_v10 = vmax.f32 %v159_v1, 0.0  ;;  %v193_v14 = vmax.f32 %v157_v4, 0.0  ;;  %v160_v17 = vadd.f32 %v1097_v63, %v102_v7  ;;  %v27_v19 = vld [vmem:[%s1267_s0 + $0x38] sm:$0xff]  ;;  %v29_v2 = vld [vmem:[%s1267_s0 + $0x48] sm:$0xff] }
  0x16   :  { %867 = vmatprep.subr.bf16.mxu1 %v924_v21  ;;  %v197_v15 = vmax.f32 %v161_v5, 0.0  ;;  %v190_v21 = vmax.f32 %v154_v11, 0.0  ;;  %v51_v35 = vunpack.c.l.bf16 %v26_v13  ;;  %v49_v39 = vunpack.c.l.bf16 %v25_v18 }
  0x17   :  { %v227_v20 = vpack.c.bf16 %v195_v10, %v191_v9  ;;  %v53_v43 = vunpack.c.l.bf16 %v27_v19  ;;  %v56_v1 = vunpack.c.h.bf16 %v28_v44  ;;  %v60_v10 = vunpack.c.h.bf16 %v30_v57 }
  0x18   :  { %822 = vmatpush3.bf16.msra.mxu0 %v925_v22  ;;  %v194_v22 = vmax.f32 %v158_v12, 0.0  ;;  %v108_v42 = vmul.f32 %v1089_v58, %v51_v35  ;;  %v106_v50 = vmul.f32 %v1095_v62, %v49_v39 }
  0x19   :  { %868 = vmatpush3.bf16.msra.mxu1 %v926_v24  ;;  %823 = vmatprep.subr.bf16.mxu0 %v927_v25  ;;  %v229_v24 = vpack.c.bf16 %v197_v15, %v193_v14  ;;  %v192_v25 = vmax.f32 %v156_v16, 0.0  ;;  %v110_v56 = vmul.f32 %v1095_v62, %v53_v43  ;;  %v113_v11 = vmul.f32 %v1079_v48, %v56_v1  ;;  %v35_v43 = vld [vmem:[%s1267_s0 + $0x78] sm:$0xff] }
  0x1a   :  { %869 = vmatprep.subr.bf16.mxu1 %v928_v26  ;;  %v196_v26 = vmax.f32 %v160_v17, 0.0  ;;  %534 = vmatprep.mubr.bf16.mxu0 %v227_v20  ;;  %v226_v28 = vpack.c.bf16 %v194_v22, %v190_v21  ;;  %v166_v53 = vadd.f32 %v1091_v59, %v108_v42  ;;  %v164_v0 = vadd.f32 %v1097_v63, %v106_v50  ;;  %v33_v42 = vld [vmem:[%s1267_s0 + $0x68] sm:$0xff] }
  0x1b   :  { %606 = vmatprep.mubr.bf16.mxu1 %v229_v24  ;;  %v168_v7 = vadd.f32 %v1097_v63, %v110_v56  ;;  %v58_v14 = vunpack.c.h.bf16 %v29_v2  ;;  %v62_v15 = vunpack.c.h.bf16 %v31_v3  ;;  %v117_v16 = vmul.f32 %v1079_v48, %v60_v10  ;;  %v32_v24 = vld [vmem:[%s1267_s0 + $0x60] sm:$0xff] }
  0x1c   :  { %824 = vmatpush3.bf16.msra.mxu0 %v929_v27  ;;  %v52_v27 = vunpack.c.h.bf16 %v26_v13  ;;  %v202_v6 = vmax.f32 %v166_v53, 0.0  ;;  %v200_v9 = vmax.f32 %v164_v0, 0.0  ;;  %v171_v17 = vadd.f32 %v1081_v49, %v113_v11 }
  0x1d   :  { %870 = vmatpush3.bf16.msra.mxu1 %v930_v29  ;;  %825 = vmatprep.subr.bf16.mxu0 %v931_v30  ;;  %v105_v29 = vmul.f32 %v1079_v48, %v48_v23  ;;  %v50_v30 = vunpack.c.h.bf16 %v25_v18  ;;  %v204_v13 = vmax.f32 %v168_v7, 0.0  ;;  %v55_v18 = vunpack.c.l.bf16 %v28_v44 }
  0x1e   :  { %871 = vmatprep.subr.bf16.mxu1 %v932_v31  ;;  %v54_v31 = vunpack.c.h.bf16 %v27_v19  ;;  %v109_v33 = vmul.f32 %v1079_v48, %v52_v27  ;;  %v59_v19 = vunpack.c.l.bf16 %v30_v57  ;;  %v115_v21 = vmul.f32 %v1083_v54, %v58_v14 }
  0x1f   :  { %v163_v36 = vadd.f32 %v1081_v49, %v105_v29  ;;  %v107_v37 = vmul.f32 %v1083_v54, %v50_v30  ;;  %v232_v20 = vpack.c.bf16 %v204_v13, %v200_v9  ;;  %v119_v22 = vmul.f32 %v1083_v54, %v62_v15 }
  0x20   :  { %826 = vmatpush3.bf16.msra.mxu0 %v933_v32  ;;  %v228_v32 = vpack.c.bf16 %v196_v26, %v192_v25  ;;  %v111_v38 = vmul.f32 %v1083_v54, %v54_v31  ;;  %v167_v40 = vadd.f32 %v1081_v49, %v109_v33  ;;  %v57_v23 = vunpack.c.l.bf16 %v29_v2  ;;  %v34_v33 = vld [vmem:[%s1267_s0 + $0x70] sm:$0xff] }
  0x21   :  { %872 = vmatpush3.bf16.msra.mxu1 %v934_v34  ;;  %v47_v34 = vunpack.c.l.bf16 %v24_v8  ;;  %v199_v45 = vmax.f32 %v163_v36, 0.0  ;;  %v165_v46 = vadd.f32 %v1085_v55, %v107_v37  ;;  %v175_v25 = vadd.f32 %v1081_v49, %v117_v16 }
  0x22   :  { %v169_v47 = vadd.f32 %v1085_v55, %v111_v38  ;;  %v203_v51 = vmax.f32 %v167_v40, 0.0  ;;  %v207_v26 = vmax.f32 %v171_v17, 0.0  ;;  %v112_v27 = vmul.f32 %v1089_v58, %v55_v18 }
  0x23   :  { %535 = vmatmul.mubr.bf16.vlgmr.msra.gmra.mxu0 %v226_v28  ;;  %v104_v41 = vmul.f32 %v1089_v58, %v47_v34  ;;  %v201_v60 = vmax.f32 %v165_v46, 0.0  ;;  %v116_v28 = vmul.f32 %v1089_v58, %v59_v19  ;;  %v173_v29 = vadd.f32 %v1085_v55, %v115_v21  ;;  %v37_v21 = vld [vmem:[%s1267_s0 + $0x88] sm:$0xff] }
  0x24   :  { %607 = vmatmul.mubr.bf16.vlgmr.msra.gmra.mxu1 %v228_v32  ;;  %v205_v61 = vmax.f32 %v169_v47, 0.0  ;;  %v231_v4 = vpack.c.bf16 %v203_v51, %v199_v45  ;;  %v177_v30 = vadd.f32 %v1085_v55, %v119_v22  ;;  %v61_v31 = vunpack.c.l.bf16 %v31_v3 }
  0x25   :  { %v162_v52 = vadd.f32 %v1091_v59, %v104_v41  ;;  %v114_v32 = vmul.f32 %v1095_v62, %v57_v23  ;;  %v211_v34 = vmax.f32 %v175_v25, 0.0  ;;  %v170_v35 = vadd.f32 %v1091_v59, %v112_v27 }
  0x26   :  { %v233_v8 = vpack.c.bf16 %v205_v61, %v201_v60  ;;  %542 = vmatprep.mubr.bf16.mxu0 %v231_v4  ;;  %v174_v36 = vadd.f32 %v1091_v59, %v116_v28  ;;  %v64_v37 = vunpack.c.h.bf16 %v32_v24  ;;  %v209_v38 = vmax.f32 %v173_v29, 0.0 }
  0x27   :  { %v198_v5 = vmax.f32 %v162_v52, 0.0  ;;  %v213_v39 = vmax.f32 %v177_v30, 0.0  ;;  %v118_v40 = vmul.f32 %v1095_v62, %v61_v31  ;;  %v172_v41 = vadd.f32 %v1097_v63, %v114_v32 }
  0x28   :  { %614 = vmatprep.mubr.bf16.mxu1 %v233_v8  ;;  %v235_v44 = vpack.c.bf16 %v211_v34, %v207_v26  ;;  %v206_v45 = vmax.f32 %v170_v35, 0.0  ;;  %v210_v46 = vmax.f32 %v174_v36, 0.0  ;;  %v68_v47 = vunpack.c.h.bf16 %v34_v33  ;;  %v36_v8 = vld [vmem:[%s1267_s0 + $0x80] sm:$0xff] }
  0x29   :  { %v230_v12 = vpack.c.bf16 %v202_v6, %v198_v5  ;;  %v237_v50 = vpack.c.bf16 %v213_v39, %v209_v38  ;;  %v176_v51 = vadd.f32 %v1097_v63, %v118_v40  ;;  %v208_v52 = vmax.f32 %v172_v41, 0.0 }
  0x2a   :  { %v121_v53 = vmul.f32 %v1079_v48, %v64_v37  ;;  %v234_v56 = vpack.c.bf16 %v210_v46, %v206_v45  ;;  %v125_v57 = vmul.f32 %v1079_v48, %v68_v47  ;;  %v66_v60 = vunpack.c.h.bf16 %v33_v42 }
  0x2b   :  { %543 = vmatmul.mubr.bf16.gmra.mxu0 %v230_v12  ;;  %v70_v61 = vunpack.c.h.bf16 %v35_v43  ;;  %v212_v0 = vmax.f32 %v176_v51, 0.0  ;;  %v63_v2 = vunpack.c.l.bf16 %v32_v24  ;;  %v67_v3 = vunpack.c.l.bf16 %v34_v33 }
  0x2c   :  { %615 = vmatmul.mubr.bf16.gmra.mxu1 %v232_v20  ;;  %550 = vmatprep.mubr.bf16.mxu0 %v235_v44  ;;  %v179_v1 = vadd.f32 %v1081_v49, %v121_v53  ;;  %v183_v4 = vadd.f32 %v1081_v49, %v125_v57  ;;  %v123_v5 = vmul.f32 %v1083_v54, %v66_v60  ;;  %v65_v7 = vunpack.c.l.bf16 %v33_v42 }
  0x2d   :  { %622 = vmatprep.mubr.bf16.mxu1 %v237_v50  ;;  %v127_v6 = vmul.f32 %v1083_v54, %v70_v61  ;;  %v236_v9 = vpack.c.bf16 %v212_v0, %v208_v52  ;;  %v120_v11 = vmul.f32 %v1089_v58, %v63_v2  ;;  %v124_v12 = vmul.f32 %v1089_v58, %v67_v3 }
  0x2e   :  { %v215_v10 = vmax.f32 %v179_v1, 0.0  ;;  %v219_v13 = vmax.f32 %v183_v4, 0.0  ;;  %v181_v14 = vadd.f32 %v1085_v55, %v123_v5  ;;  %v69_v16 = vunpack.c.l.bf16 %v35_v43 }
  0x2f   :  { %v185_v15 = vadd.f32 %v1085_v55, %v127_v6  ;;  %v178_v17 = vadd.f32 %v1091_v59, %v120_v11  ;;  %v182_v18 = vadd.f32 %v1091_v59, %v124_v12  ;;  %v122_v19 = vmul.f32 %v1095_v62, %v65_v7 }
  0x30   :  { %v72_v20 = vunpack.c.h.bf16 %v36_v8  ;;  %v239_v22 = vpack.c.bf16 %v219_v13, %v215_v10  ;;  %v217_v23 = vmax.f32 %v181_v14, 0.0  ;;  %v126_v25 = vmul.f32 %v1095_v62, %v69_v16 }
  0x31   :  { %v221_v24 = vmax.f32 %v185_v15, 0.0  ;;  %v214_v26 = vmax.f32 %v178_v17, 0.0  ;;  %v218_v27 = vmax.f32 %v182_v18, 0.0  ;;  %v180_v28 = vadd.f32 %v1097_v63, %v122_v19 }
  0x32   :  { %v129_v29 = vmul.f32 %v1079_v48, %v72_v20  ;;  %v184_v31 = vadd.f32 %v1097_v63, %v126_v25  ;;  %v74_v32 = vunpack.c.h.bf16 %v37_v21  ;;  %v71_v33 = vunpack.c.l.bf16 %v36_v8 }
  0x33   :  { %551 = vmatmul.mubr.bf16.gmra.mxu0 %v234_v56  ;;  %v241_v30 = vpack.c.bf16 %v221_v24, %v217_v23  ;;  %v238_v34 = vpack.c.bf16 %v218_v27, %v214_v26  ;;  %v216_v35 = vmax.f32 %v180_v28, 0.0  ;;  %v73_v37 = vunpack.c.l.bf16 %v37_v21 }
  0x34   :  { %623 = vmatmul.mubr.bf16.gmra.mxu1 %v236_v9  ;;  %558 = vmatprep.mubr.bf16.mxu0 %v239_v22  ;;  %v187_v36 = vadd.f32 %v1081_v49, %v129_v29  ;;  %v220_v38 = vmax.f32 %v184_v31, 0.0  ;;  %v131_v39 = vmul.f32 %v1083_v54, %v74_v32  ;;  %v128_v40 = vmul.f32 %v1089_v58, %v71_v33 }
  0x35   :  { %630 = vmatprep.mubr.bf16.mxu1 %v241_v30  ;;  %v130_v48 = vmul.f32 %v1095_v62, %v73_v37 }
  0x36   :  { %v223_v41 = vmax.f32 %v187_v36, 0.0  ;;  %v240_v42 = vpack.c.bf16 %v220_v38, %v216_v35  ;;  %v189_v43 = vadd.f32 %v1085_v55, %v131_v39  ;;  %v186_v44 = vadd.f32 %v1091_v59, %v128_v40 }
  0x37   :  { %v188_v46 = vadd.f32 %v1097_v63, %v130_v48 }
  0x38   :  { %v243_v45 = vpack.c.bf16 %v223_v41, %v223_v41  ;;  %v225_v49 = vmax.f32 %v189_v43, 0.0  ;;  %v222_v47 = vmax.f32 %v186_v44, 0.0 }
  0x39   :  { %v224_v50 = vmax.f32 %v188_v46, 0.0 }
  0x3a   :  { %v245_v54 = vpack.c.bf16 %v225_v49, %v225_v49  ;;  %v242_v51 = vpack.c.bf16 %v222_v47, %v222_v47 }
  0x3b   :  { %559 = vmatmul.mubr.bf16.gmra.mxu0 %v238_v34  ;;  %v244_v58 = vpack.c.bf16 %v224_v50, %v224_v50 }
  0x3c   :  { %631 = vmatmul.mubr.bf16.gmra.mxu1 %v240_v42  ;;  %566 = vmatprep.mubr.bf16.mxu0 %v243_v45 }
  0x3d   :  { %638 = vmatprep.mubr.bf16.mxu1 %v245_v54 }
  0x43   :  { %567 = vmatmul.mubr.bf16.gmra.mxu0 %v242_v51 }
  0x44   :  { %639 = vmatmul.mubr.bf16.gmra.mxu1 %v244_v58 }
  0xe3   :  { %v827_v62 = vpop.f32.mrf.mxu0 }
  0xe4   :  { %v873_v52 = vpop.f32.mrf.mxu1 }
  0xe5   :  { %v828_v53 = vpop.f32.mrf.mxu0 }
  0xe6   :  { %v829_v55 = vadd.f32 %v828_v53, %v827_v62  ;;  %v874_v56 = vpop.f32.mrf.mxu1 }
  0xe7   :  { %v875_v59 = vadd.f32 %v874_v56, %v873_v52  ;;  %v830_v57 = vpop.f32.mrf.mxu0 }
  0xe8   :  { %v876_v60 = vpop.f32.mrf.mxu1 }
  0xe9   :  { %v609_v63 = vadd.f32 %v875_v59, %v829_v55  ;;  %v831_v61 = vpop.f32.mrf.mxu0 }
  0xea   :  { %v832_v0 = vadd.f32 %v831_v61, %v830_v57  ;;  %v877_v1 = vpop.f32.mrf.mxu1 }
  0xeb   :  { %v802_v2 = vpack.c.bf16 %v609_v63, %v609_v63  ;;  %v878_v3 = vadd.f32 %v877_v1, %v876_v60  ;;  %v833_v4 = vpop.f32.mrf.mxu0  ;;  %v717_v38 = vmul.f32 %v609_v63, %v609_v63  ;;  %v694_v44 = vsel %vm693_vm1, %v609_v63, 0.0 }
  0xec   :  { %v879_v6 = vpop.f32.mrf.mxu1 }
  0xed   :  { %684 = vst.msk [vmem:[%s1270_s4] sm:$0xf] %vm683_vm0, %v802_v2  ;;  %v612_v5 = vadd.f32 %v878_v3, %v832_v0  ;;  %v834_v7 = vpop.f32.mrf.mxu0  ;;  %v726_v62 = vsel %vm693_vm1, %v717_v38, 0.0 }
  0xee   :  { %v835_v9 = vadd.f32 %v834_v7, %v833_v4  ;;  %v880_v10 = vpop.f32.mrf.mxu1 }
  0xef   :  { %v803_v8 = vpack.c.bf16 %v612_v5, %v612_v5  ;;  %v836_v11 = vpop.f32.mrf.mxu0  ;;  %v881_v12 = vadd.f32 %v880_v10, %v879_v6  ;;  %v718_v33 = vmul.f32 %v612_v5, %v612_v5  ;;  %v695_v39 = vsel %vm693_vm1, %v612_v5, 0.0 }
  0xf0   :  { %v882_v13 = vpop.f32.mrf.mxu1  ;;  %v696_v50 = vadd.f32 %v695_v39, %v694_v44 }
  0xf1   :  { %685 = vst.msk [vmem:[%s1270_s4 + $0x4] sm:$0xf] %vm683_vm0, %v803_v8  ;;  %v837_v14 = vpop.f32.mrf.mxu0  ;;  %v617_v15 = vadd.f32 %v881_v12, %v835_v9  ;;  %v727_v45 = vsel %vm693_vm1, %v718_v33, 0.0 }
  0xf2   :  { %v838_v16 = vadd.f32 %v837_v14, %v836_v11  ;;  %v883_v17 = vpop.f32.mrf.mxu1  ;;  %v728_v59 = vadd.f32 %v727_v45, %v726_v62 }
  0xf3   :  { %v804_v18 = vpack.c.bf16 %v617_v15, %v617_v15  ;;  %v884_v19 = vadd.f32 %v883_v17, %v882_v13  ;;  %v839_v20 = vpop.f32.mrf.mxu0  ;;  %v719_v40 = vmul.f32 %v617_v15, %v617_v15  ;;  %v697_v46 = vsel %vm693_vm1, %v617_v15, 0.0 }
  0xf4   :  { %v885_v23 = vpop.f32.mrf.mxu1  ;;  %v698_v57 = vadd.f32 %v697_v46, %v696_v50 }
  0xf5   :  { %686 = vst.msk [vmem:[%s1270_s4 + $0x8] sm:$0xf] %vm683_vm0, %v804_v18  ;;  %v620_v21 = vadd.f32 %v884_v19, %v838_v16  ;;  %v840_v22 = vpop.f32.mrf.mxu0  ;;  %v729_v52 = vsel %vm693_vm1, %v719_v40, 0.0 }
  0xf6   :  { %v841_v25 = vadd.f32 %v840_v22, %v839_v20  ;;  %v886_v27 = vpop.f32.mrf.mxu1  ;;  %v730_v4 = vadd.f32 %v729_v52, %v728_v59 }
  0xf7   :  { %v805_v24 = vpack.c.bf16 %v620_v21, %v620_v21  ;;  %v842_v26 = vpop.f32.mrf.mxu0  ;;  %v887_v28 = vadd.f32 %v886_v27, %v885_v23  ;;  %v720_v48 = vmul.f32 %v620_v21, %v620_v21  ;;  %v699_v53 = vsel %vm693_vm1, %v620_v21, 0.0 }
  0xf8   :  { %v888_v30 = vpop.f32.mrf.mxu1  ;;  %v700_v5 = vadd.f32 %v699_v53, %v698_v57 }
  0xf9   :  { %687 = vst.msk [vmem:[%s1270_s4 + $0xc] sm:$0xf] %vm683_vm0, %v805_v24  ;;  %v843_v29 = vpop.f32.mrf.mxu0  ;;  %v625_v31 = vadd.f32 %v887_v28, %v841_v25  ;;  %v731_v60 = vsel %vm693_vm1, %v720_v48, 0.0 }
  0xfa   :  { %v844_v32 = vadd.f32 %v843_v29, %v842_v26  ;;  %v889_v34 = vpop.f32.mrf.mxu1  ;;  %v732_v13 = vadd.f32 %v731_v60, %v730_v4 }
  0xfb   :  { %v845_v35 = vpop.f32.mrf.mxu0  ;;  %v806_v36 = vpack.c.bf16 %v625_v31, %v625_v31  ;;  %v890_v37 = vadd.f32 %v889_v34, %v888_v30  ;;  %v721_v54 = vmul.f32 %v625_v31, %v625_v31  ;;  %v701_v61 = vsel %vm693_vm1, %v625_v31, 0.0 }
  0xfc   :  { %v891_v43 = vpop.f32.mrf.mxu1  ;;  %v702_v14 = vadd.f32 %v701_v61, %v700_v5 }
  0xfd   :  { %v846_v41 = vpop.f32.mrf.mxu0  ;;  %688 = vst.msk [vmem:[%s1270_s4 + $0x10] sm:$0xf] %vm683_vm0, %v806_v36  ;;  %v628_v42 = vadd.f32 %v890_v37, %v844_v32  ;;  %v733_v6 = vsel %vm693_vm1, %v721_v54, 0.0 }
  0xfe   :  { %v847_v49 = vadd.f32 %v846_v41, %v845_v35  ;;  %v892_v58 = vpop.f32.mrf.mxu1  ;;  %v734_v21 = vadd.f32 %v733_v6, %v732_v13 }
  0xff   :  { %v848_v47 = vpop.f32.mrf.mxu0  ;;  %v807_v51 = vpack.c.bf16 %v628_v42, %v628_v42  ;;  %v893_v55 = vadd.f32 %v892_v58, %v891_v43  ;;  %v722_v0 = vmul.f32 %v628_v42, %v628_v42  ;;  %v703_v8 = vsel %vm693_vm1, %v628_v42, 0.0 }
 0x100   :  { %v894_v63 = vpop.f32.mrf.mxu1  ;;  %v704_v22 = vadd.f32 %v703_v8, %v702_v14 }
 0x101   :  { %v849_v56 = vpop.f32.mrf.mxu0  ;;  %689 = vst.msk [vmem:[%s1270_s4 + $0x14] sm:$0xf] %vm683_vm0, %v807_v51  ;;  %v633_v1 = vadd.f32 %v893_v55, %v847_v49  ;;  %v735_v16 = vsel %vm693_vm1, %v722_v0, 0.0 }
 0x102   :  { %v850_v2 = vadd.f32 %v849_v56, %v848_v47  ;;  %v895_v7 = vpop.f32.mrf.mxu1  ;;  %v736_v30 = vadd.f32 %v735_v16, %v734_v21 }
 0x103   :  { %v851_v3 = vpop.f32.mrf.mxu0  ;;  %v808_v9 = vpack.c.bf16 %v633_v1, %v633_v1  ;;  %v723_v10 = vmul.f32 %v633_v1, %v633_v1  ;;  %v896_v11 = vadd.f32 %v895_v7, %v894_v63  ;;  %v705_v17 = vsel %vm693_vm1, %v633_v1, 0.0 }
 0x104   :  { %v897_v15 = vpop.f32.mrf.mxu1  ;;  %v706_v31 = vadd.f32 %v705_v17, %v704_v22 }
 0x105   :  { %v852_v12 = vpop.f32.mrf.mxu0  ;;  %690 = vst.msk [vmem:[%s1270_s4 + $0x18] sm:$0xf] %vm683_vm0, %v808_v9  ;;  %v636_v18 = vadd.f32 %v896_v11, %v850_v2  ;;  %v737_v23 = vsel %vm693_vm1, %v723_v10, 0.0 }
 0x106   :  { %v853_v19 = vadd.f32 %v852_v12, %v851_v3  ;;  %v898_v24 = vpop.f32.mrf.mxu1  ;;  %v738_v35 = vadd.f32 %v737_v23, %v736_v30 }
 0x107   :  { %v854_v20 = vpop.f32.mrf.mxu0  ;;  %v809_v25 = vpack.c.bf16 %v636_v18, %v636_v18  ;;  %v707_v26 = vsel %vm693_vm1, %v636_v18, 0.0  ;;  %v724_v27 = vmul.f32 %v636_v18, %v636_v18  ;;  %v899_v28 = vadd.f32 %v898_v24, %v897_v15 }
 0x108   :  { %v900_v32 = vpop.f32.mrf.mxu1  ;;  %v708_v36 = vadd.f32 %v707_v26, %v706_v31 }
 0x109   :  { %v855_v29 = vpop.f32.mrf.mxu0  ;;  %691 = vst.msk [vmem:[%s1270_s4 + $0x1c] sm:$0xf] %vm683_vm0, %v809_v25  ;;  %v739_v33 = vsel %vm693_vm1, %v724_v27, 0.0  ;;  %v641_v34 = vadd.f32 %v899_v28, %v853_v19 }
 0x10a   :  { %v901_v37 = vpop.f32.mrf.mxu1  ;;  %v740_v41 = vadd.f32 %v739_v33, %v738_v35 }
 0x10b   :  { %v810_v38 = vpack.c.bf16 %v641_v34, %v641_v34  ;;  %v709_v39 = vsel %vm693_vm1, %v641_v34, 0.0  ;;  %v725_v40 = vmul.f32 %v641_v34, %v641_v34 }
 0x10c   :  { %v710_v48 = vadd.f32 %v709_v39, %v708_v36 }
 0x10d   :  { %692 = vst.msk [vmem:[%s1270_s4 + $0x20] sm:$0xf] %vm683_vm0, %v810_v38  ;;  %v741_v42 = vsel %vm693_vm1, %v725_v40, 0.0 }
 0x10e   :  { %v711_v43 = vrot.slane %v710_v48, 4  ;;  %v742_v44 = vadd.f32 %v741_v42, %v740_v41 }
 0x110   :  { %v712_v45 = vadd.f32 %v711_v43, %v710_v48  ;;  %v743_v46 = vrot.slane %v742_v44, 4 }
 0x112   :  { %v713_v49 = vrot.slane %v712_v45, 2  ;;  %v744_v47 = vadd.f32 %v743_v46, %v742_v44 }
 0x114   :  { %v714_v50 = vadd.f32 %v713_v49, %v712_v45  ;;  %v745_v54 = vrot.slane %v744_v47, 2 }
 0x116   :  { %v715_v51 = vrot.slane %v714_v50, 1  ;;  %v746_v58 = vadd.f32 %v745_v54, %v744_v47 }
 0x118   :  { %v747_v62 = vrot.slane %v746_v58, 1  ;;  %v716_v52 = vadd.f32 %v715_v51, %v714_v50 }
 0x11a   :  { %v748_v53 = vadd.f32 %v747_v62, %v746_v58 }
 0x11c   :  { %v750_v55 = vsel %vm749_vm2, %v716_v52, %v748_v53 }
 0x11d   :  { %752 = vst.msk [vmem:[%s1271_s5] sm:$0x3] %vm751_vm3, %v750_v55 }

// kernel: tile.57
= control target key start
LH: loop header
LB: loop body
LE: loop exit
PB: predicated region body
PF: predicated region fallthrough
CT: control target
= control target key end

     0   :  { %s28_s0 = inlined_call_operand.vmem [shape: f32[64], index: 0, kind: input, shape index: {}]   ;;  %s29_s1 = inlined_call_operand.vmem [shape: f32[16,64], index: 1, kind: output, shape index: {}]  }
   0x1   :  { %v4_v0 = vld [vmem:[%s28_s0] ss:$0 sm:$0xff] }
   0x2   :  { %5 = vst [vmem:[%s29_s1] sm:$0xff] %v4_v0  ;;  %8 = vst [vmem:[%s29_s1 + $0x8] sm:$0xff] %v4_v0 }

// kernel: tile.59
= control target key start
LH: loop header
LB: loop body
LE: loop exit
PB: predicated region body
PF: predicated region fallthrough
CT: control target
= control target key end

     0   :  { %vm3_vm0 = vcmask 523264   ;;  %vm10_vm1 = vcmask 1048064   ;;  %s125_s0 = inlined_call_operand.vmem [shape: f32[16,64], index: 0, kind: input, shape index: {}]   ;;  %s126_s1 = inlined_call_operand.vmem [shape: f32[1,1024], index: 1, kind: output, shape index: {}]  }
   0x1   :  { %v75_v0 = vld [vmem:[%s125_s0 + $0x1] ss:$2 sm:$0xff]   ;;  %v2_v1 = vld [vmem:[%s125_s0] ss:$2 sm:$0xff]   ;;  %s84_s0 = smov 64  }
   0x2   :  { %8 = vrot.lane.b32.xlu0 %v75_v0, %s84_s0  ;;  %4 = vst.msk [vmem:[#allocation0] ss:$8 sm:$0xf] %vm3_vm0, %v2_v1   ;;  %5 = vst.msk [vmem:[#allocation0] ss:$8 sm:$0xf0] %vm3_vm0, %v2_v1  }
  0x74   :  { %v9_v2 = vpop.permute.xlu0 %8  }
  0x75   :  { %11 = vst.msk [vmem:[#allocation0] ss:$8 sm:$0xf] %vm10_vm1, %v9_v2   ;;  %12 = vst.msk [vmem:[#allocation0] ss:$8 sm:$0xf0] %vm10_vm1, %v9_v2  }
  0x7c   :  { %v17_v3 = vld [vmem:[#allocation0] sm:$0x1]  ;;  %v22_v4 = vld [vmem:[#allocation0 + $0x8] sm:$0x1]  ;;  %v28_v5 = vld [vmem:[#allocation0 + $0x10] sm:$0x1] }
  0x7d   :  { %20 = vst [vmem:[%s126_s1] sm:$0x1] %v17_v3  ;;  %76 = vst [vmem:[%s126_s1 + $0x1] sm:$0x1] %v22_v4  ;;  %v35_v6 = vld [vmem:[#allocation0 + $0x18] sm:$0x1] }
  0x7e   :  { %77 = vst [vmem:[%s126_s1 + $0x2] sm:$0x1] %v28_v5  ;;  %v42_v7 = vld [vmem:[#allocation0 + $0x20] sm:$0x1]  ;;  %v49_v8 = vld [vmem:[#allocation0 + $0x28] sm:$0x1] }
  0x7f   :  { %78 = vst [vmem:[%s126_s1 + $0x3] sm:$0x1] %v35_v6  ;;  %79 = vst [vmem:[%s126_s1 + $0x4] sm:$0x1] %v42_v7  ;;  %v56_v9 = vld [vmem:[#allocation0 + $0x30] sm:$0x1] }
  0x80   :  { %80 = vst [vmem:[%s126_s1 + $0x5] sm:$0x1] %v49_v8  ;;  %v63_v10 = vld [vmem:[#allocation0 + $0x38] sm:$0x1]  ;;  %81 = vst [vmem:[%s126_s1 + $0x6] sm:$0x1] %v56_v9 }
  0x81   :  { %82 = vst [vmem:[%s126_s1 + $0x7] sm:$0x1] %v63_v10 }

// kernel: vae_forward.13
= control target key start
LH: loop header
LB: loop body
LE: loop exit
PB: predicated region body
PF: predicated region fallthrough
CT: control target
= control target key end

     0   :  { %v34_v21 = vlaneseq  ;;  %vm823_vm0 = vcmask 523264   ;;  %vm821_vm1 = vcmask 519168   ;;  %vm839_vm2 = vcmask 1040384   ;;  %s1343_s1 = inlined_call_operand.vmem [shape: bf16[1024,64], index: 1, kind: input, shape index: {}]   ;;  %s1344_s0 = inlined_call_operand.vmem [shape: bf16[8,1024], index: 0, kind: input, shape index: {}]   ;;  %s1345_s2 = inlined_call_operand.vmem [shape: f32[1,1024], index: 2, kind: input, shape index: {}]   ;;  %s1346_s3 = inlined_call_operand.vmem [shape: f32[1,1024], index: 3, kind: input, shape index: {}]   ;;  %s1347_s4 = inlined_call_operand.vmem [shape: bf16[8,64], index: 4, kind: output, shape index: {0}]   ;;  %s1348_s5 = inlined_call_operand.vmem [shape: f32[1,2,64], index: 5, kind: output, shape index: {1}]  }
   0x1   :  { %v1003_v0 = vld [vmem:[%s1343_s1 + $0x78] sm:$0xff]   ;;  %v1007_v4 = vld [vmem:[%s1343_s1 + $0x70] sm:$0xff]   ;;  %v1011_v8 = vld [vmem:[%s1343_s1 + $0x68] sm:$0xff]   ;;  %vm841_vm3 = vcmask 517120  }
   0x2   :  { %v1004_v1 = vld [vmem:[%s1343_s1 + $0xf8] sm:$0xff]   ;;  %915 = vmatprep.subr.bf16.mxu0 %v1003_v0  ;;  %v1008_v5 = vld [vmem:[%s1343_s1 + $0xf0] sm:$0xff]   ;;  %v1012_v9 = vld [vmem:[%s1343_s1 + $0xe8] sm:$0xff]   ;;  %v1172_v26 = vshrl.u32 %v34_v21, 7 }
   0x3   :  { %v1005_v2 = vld [vmem:[%s1343_s1 + $0x38] sm:$0xff]   ;;  %937 = vmatprep.subr.bf16.mxu1 %v1004_v1  ;;  %v1009_v6 = vld [vmem:[%s1343_s1 + $0x30] sm:$0xff]   ;;  %v1013_v10 = vld [vmem:[%s1343_s1 + $0x28] sm:$0xff]  }
   0x4   :  { %v1006_v3 = vld [vmem:[%s1343_s1 + $0xb8] sm:$0xff]   ;;  %916 = vmatpush3.bf16.msra.mxu0 %v1005_v2  ;;  %v1010_v7 = vld [vmem:[%s1343_s1 + $0xb0] sm:$0xff]   ;;  %v1014_v11 = vld [vmem:[%s1343_s1 + $0xa8] sm:$0xff]   ;;  %v40_v31 = vsub.s32 1, %v1172_v26  ;;  %v48_v33 = vsub.s32 3, %v1172_v26  ;;  %v36_v35 = vsub.s32 0, %v1172_v26 }
   0x5   :  { %938 = vmatpush3.bf16.msra.mxu1 %v1006_v3  ;;  %917 = vmatprep.subr.bf16.mxu0 %v1007_v4  ;;  %v1015_v12 = vld [vmem:[%s1343_s1 + $0x60] sm:$0xff]   ;;  %v1019_v16 = vld [vmem:[%s1343_s1 + $0x58] sm:$0xff]   ;;  %v1023_v20 = vld [vmem:[%s1343_s1 + $0x50] sm:$0xff]   ;;  %v44_v37 = vsub.s32 2, %v1172_v26 }
   0x6   :  { %939 = vmatprep.subr.bf16.mxu1 %v1008_v5  ;;  %v1016_v13 = vld [vmem:[%s1343_s1 + $0xe0] sm:$0xff]   ;;  %v1020_v17 = vld [vmem:[%s1343_s1 + $0xd8] sm:$0xff]   ;;  %v1024_v22 = vld [vmem:[%s1343_s1 + $0xd0] sm:$0xff]  }
   0x7   :  { %v1017_v14 = vld [vmem:[%s1343_s1 + $0x20] sm:$0xff]   ;;  %v1021_v18 = vld [vmem:[%s1343_s1 + $0x18] sm:$0xff]   ;;  %v1025_v23 = vld [vmem:[%s1343_s1 + $0x10] sm:$0xff]  }
   0x8   :  { %918 = vmatpush3.bf16.msra.mxu0 %v1009_v6  ;;  %v1018_v15 = vld [vmem:[%s1343_s1 + $0xa0] sm:$0xff]   ;;  %v1022_v19 = vld [vmem:[%s1343_s1 + $0x98] sm:$0xff]   ;;  %v1026_v24 = vld [vmem:[%s1343_s1 + $0x90] sm:$0xff]  }
   0x9   :  { %940 = vmatpush3.bf16.msra.mxu1 %v1010_v7  ;;  %919 = vmatprep.subr.bf16.mxu0 %v1011_v8  ;;  %v1027_v25 = vld [vmem:[%s1343_s1 + $0x48] sm:$0xff]   ;;  %v1031_v30 = vld [vmem:[%s1343_s1 + $0x40] sm:$0xff]   ;;  %v1035_v50 = vld [vmem:[%s1343_s1 + $0x178] sm:$0xff]  }
   0xa   :  { %941 = vmatprep.subr.bf16.mxu1 %v1012_v9  ;;  %v1028_v27 = vld [vmem:[%s1343_s1 + $0xc8] sm:$0xff]   ;;  %v1032_v32 = vld [vmem:[%s1343_s1 + $0xc0] sm:$0xff]   ;;  %v1036_v55 = vld [vmem:[%s1343_s1 + $0x1f8] sm:$0xff]  }
   0xb   :  { %v1029_v28 = vld [vmem:[%s1343_s1 + $0x8] sm:$0xff]   ;;  %v1033_v34 = vld [vmem:[%s1343_s1] sm:$0xff]   ;;  %v1037_v2 = vld [vmem:[%s1343_s1 + $0x138] sm:$0xff]  }
   0xc   :  { %920 = vmatpush3.bf16.msra.mxu0 %v1013_v10  ;;  %v1030_v29 = vld [vmem:[%s1343_s1 + $0x88] sm:$0xff]   ;;  %v1034_v36 = vld [vmem:[%s1343_s1 + $0x80] sm:$0xff]   ;;  %v1038_v6 = vld [vmem:[%s1343_s1 + $0x1b8] sm:$0xff]  }
   0xd   :  { %942 = vmatpush3.bf16.msra.mxu1 %v1014_v11  ;;  %921 = vmatprep.subr.bf16.mxu0 %v1015_v12  ;;  %v20_v38 = vld [vmem:[%s1344_s0] sm:$0xff]  ;;  %v21_v45 = vld [vmem:[%s1344_s0 + $0x8] sm:$0xff]  ;;  %v1039_v7 = vld [vmem:[%s1343_s1 + $0x170] sm:$0xff]  }
   0xe   :  { %943 = vmatprep.subr.bf16.mxu1 %v1016_v13  ;;  %v1205_v39 = vld [vmem:[%s1345_s2] sm:$0xff]  ;;  %v25_v41 = vunpack.c.l.bf16 %v20_v38  ;;  %v26_v42 = vunpack.c.h.bf16 %v20_v38  ;;  %v27_v46 = vunpack.c.l.bf16 %v21_v45  ;;  %v28_v47 = vunpack.c.h.bf16 %v21_v45  ;;  %v1040_v11 = vld [vmem:[%s1343_s1 + $0x1f0] sm:$0xff]  }
   0xf   :  { %v1210_v40 = vld [vmem:[%s1346_s3] sm:$0xff]  ;;  %v41_v43 = vrot.slane %v1205_v39, %v40_v31  ;;  %v49_v48 = vrot.slane %v1205_v39, %v48_v33  ;;  %v37_v52 = vrot.slane %v1205_v39, %v36_v35  ;;  %v45_v54 = vrot.slane %v1205_v39, %v44_v37  ;;  %v1041_v12 = vld [vmem:[%s1343_s1 + $0x130] sm:$0xff]  }
  0x10   :  { %922 = vmatpush3.bf16.msra.mxu0 %v1017_v14  ;;  %v91_v44 = vrot.slane %v1210_v40, %v40_v31  ;;  %v99_v49 = vrot.slane %v1210_v40, %v48_v33  ;;  %v87_v53 = vrot.slane %v1210_v40, %v36_v35  ;;  %v95_v57 = vrot.slane %v1210_v40, %v44_v37  ;;  %v1042_v13 = vld [vmem:[%s1343_s1 + $0x1b0] sm:$0xff]   ;;  %v1043_v14 = vld [vmem:[%s1343_s1 + $0x168] sm:$0xff]   ;;  %v1050_v21 = vld [vmem:[%s1343_s1 + $0x1a0] sm:$0xff]  }
  0x11   :  { %944 = vmatpush3.bf16.msra.mxu1 %v1018_v15  ;;  %923 = vmatprep.subr.bf16.mxu0 %v1019_v16  ;;  %v75_v51 = vmul.f32 %v41_v43, %v26_v42  ;;  %v77_v56 = vmul.f32 %v49_v48, %v28_v47  ;;  %v74_v59 = vmul.f32 %v37_v52, %v25_v41  ;;  %v1044_v15 = vld [vmem:[%s1343_s1 + $0x1e8] sm:$0xff]   ;;  %v52_v31 = vsub.s32 4, %v1172_v26  ;;  %v22_v42 = vld [vmem:[%s1344_s0 + $0x10] sm:$0xff]  ;;  %v1063_v52 = vld [vmem:[%s1343_s1 + $0x140] sm:$0xff]  }
  0x12   :  { %945 = vmatprep.subr.bf16.mxu1 %v1020_v17  ;;  %v76_v60 = vmul.f32 %v45_v54, %v27_v46  ;;  %v1045_v16 = vld [vmem:[%s1343_s1 + $0x128] sm:$0xff]   ;;  %v60_v33 = vsub.s32 6, %v1172_v26  ;;  %v29_v48 = vunpack.c.l.bf16 %v22_v42 }
  0x13   :  { %v125_v58 = vadd.f32 %v91_v44, %v75_v51  ;;  %v127_v61 = vadd.f32 %v99_v49, %v77_v56  ;;  %v124_v63 = vadd.f32 %v87_v53, %v74_v59  ;;  %v1046_v17 = vld [vmem:[%s1343_s1 + $0x1a8] sm:$0xff]   ;;  %v53_v38 = vrot.slane %v1205_v39, %v52_v31  ;;  %v23_v44 = vld [vmem:[%s1344_s0 + $0x18] sm:$0xff]  ;;  %v1064_v53 = vld [vmem:[%s1343_s1 + $0x1c0] sm:$0xff]  }
  0x14   :  { %924 = vmatpush3.bf16.msra.mxu0 %v1021_v18  ;;  %v126_v0 = vadd.f32 %v95_v57, %v76_v60  ;;  %v1047_v18 = vld [vmem:[%s1343_s1 + $0x160] sm:$0xff]   ;;  %v1059_v35 = vld [vmem:[%s1343_s1 + $0x148] sm:$0xff]   ;;  %v61_v41 = vrot.slane %v1205_v39, %v60_v33  ;;  %v103_v46 = vrot.slane %v1210_v40, %v52_v31  ;;  %v30_v49 = vunpack.c.h.bf16 %v22_v42 }
  0x15   :  { %946 = vmatpush3.bf16.msra.mxu1 %v1022_v19  ;;  %925 = vmatprep.subr.bf16.mxu0 %v1023_v20  ;;  %v133_v62 = vmax.f32 %v125_v58, 0.0  ;;  %v135_v1 = vmax.f32 %v127_v61, 0.0  ;;  %v132_v4 = vmax.f32 %v124_v63, 0.0  ;;  %v1048_v19 = vld [vmem:[%s1343_s1 + $0x1e0] sm:$0xff]   ;;  %v1062_v47 = vld [vmem:[%s1343_s1 + $0x188] sm:$0xff]   ;;  %v32_v51 = vunpack.c.h.bf16 %v23_v44 }
  0x16   :  { %947 = vmatprep.subr.bf16.mxu1 %v1024_v22  ;;  %v134_v5 = vmax.f32 %v126_v0, 0.0  ;;  %v1049_v20 = vld [vmem:[%s1343_s1 + $0x120] sm:$0xff]   ;;  %v1051_v22 = vld [vmem:[%s1343_s1 + $0x158] sm:$0xff]   ;;  %v111_v54 = vrot.slane %v1210_v40, %v60_v33  ;;  %v78_v57 = vmul.f32 %v53_v38, %v29_v48 }
  0x17   :  { %v141_v3 = vpack.c.bf16 %v133_v62, %v133_v62  ;;  %v143_v8 = vpack.c.bf16 %v135_v1, %v135_v1  ;;  %v140_v9 = vpack.c.bf16 %v132_v4, %v132_v4  ;;  %v1065_v59 = vld [vmem:[%s1343_s1 + $0x100] sm:$0xff]  }
  0x18   :  { %926 = vmatpush3.bf16.msra.mxu0 %v1025_v23  ;;  %v142_v10 = vpack.c.bf16 %v134_v5, %v134_v5  ;;  %v1052_v23 = vld [vmem:[%s1343_s1 + $0x1d8] sm:$0xff]   ;;  %v1066_v60 = vld [vmem:[%s1343_s1 + $0x180] sm:$0xff]   ;;  %v128_v63 = vadd.f32 %v103_v46, %v78_v57 }
  0x19   :  { %948 = vmatpush3.bf16.msra.mxu1 %v1026_v24  ;;  %927 = vmatprep.subr.bf16.mxu0 %v1027_v25  ;;  %v1053_v24 = vld [vmem:[%s1343_s1 + $0x118] sm:$0xff]  }
  0x1a   :  { %949 = vmatprep.subr.bf16.mxu1 %v1028_v27  ;;  %692 = vmatprep.mubr.bf16.mxu0 %v141_v3  ;;  %v1054_v25 = vld [vmem:[%s1343_s1 + $0x198] sm:$0xff]   ;;  %v56_v27 = vsub.s32 5, %v1172_v26 }
  0x1b   :  { %732 = vmatprep.mubr.bf16.mxu1 %v143_v8 }
  0x1c   :  { %928 = vmatpush3.bf16.msra.mxu0 %v1029_v28  ;;  %v1055_v28 = vld [vmem:[%s1343_s1 + $0x150] sm:$0xff]   ;;  %v57_v37 = vrot.slane %v1205_v39, %v56_v27  ;;  %v107_v43 = vrot.slane %v1210_v40, %v56_v27 }
  0x1d   :  { %950 = vmatpush3.bf16.msra.mxu1 %v1030_v29  ;;  %929 = vmatprep.subr.bf16.mxu0 %v1031_v30  ;;  %v64_v29 = vsub.s32 7, %v1172_v26  ;;  %v1056_v30 = vld [vmem:[%s1343_s1 + $0x1d0] sm:$0xff]  }
  0x1e   :  { %951 = vmatprep.subr.bf16.mxu1 %v1032_v32  ;;  %v1057_v32 = vld [vmem:[%s1343_s1 + $0x110] sm:$0xff]  }
  0x1f   :  { %v65_v26 = vrot.slane %v1205_v39, %v64_v29  ;;  %v115_v45 = vrot.slane %v1210_v40, %v64_v29  ;;  %v1061_v39 = vld [vmem:[%s1343_s1 + $0x108] sm:$0xff]  }
  0x20   :  { %930 = vmatpush3.bf16.msra.mxu0 %v1033_v34  ;;  %v1058_v34 = vld [vmem:[%s1343_s1 + $0x190] sm:$0xff]  }
  0x21   :  { %952 = vmatpush3.bf16.msra.mxu1 %v1034_v36  ;;  %959 = vmatprep.subr.bf16.mxu0 %v1035_v50  ;;  %v1060_v36 = vld [vmem:[%s1343_s1 + $0x1c8] sm:$0xff]   ;;  %v31_v50 = vunpack.c.l.bf16 %v23_v44  ;;  %v81_v56 = vmul.f32 %v65_v26, %v32_v51 }
  0x22   :  { %981 = vmatprep.subr.bf16.mxu1 %v1036_v55  ;;  %v79_v55 = vmul.f32 %v57_v37, %v30_v49 }
  0x23   :  { %693 = vmatmul.mubr.bf16.vlgmr.msra.gmra.mxu0 %v140_v9  ;;  %v80_v58 = vmul.f32 %v61_v41, %v31_v50  ;;  %v131_v62 = vadd.f32 %v115_v45, %v81_v56 }
  0x24   :  { %733 = vmatmul.mubr.bf16.vlgmr.msra.gmra.mxu1 %v142_v10  ;;  %960 = vmatpush3.bf16.msra.mxu0 %v1037_v2  ;;  %v129_v61 = vadd.f32 %v107_v43, %v79_v55  ;;  %v136_v2 = vmax.f32 %v128_v63, 0.0 }
  0x25   :  { %982 = vmatpush3.bf16.msra.mxu1 %v1038_v6  ;;  %961 = vmatprep.subr.bf16.mxu0 %v1039_v7  ;;  %v130_v40 = vadd.f32 %v111_v54, %v80_v58  ;;  %v139_v1 = vmax.f32 %v131_v62, 0.0 }
  0x26   :  { %983 = vmatprep.subr.bf16.mxu1 %v1040_v11  ;;  %v137_v0 = vmax.f32 %v129_v61, 0.0  ;;  %v144_v6 = vpack.c.bf16 %v136_v2, %v136_v2 }
  0x27   :  { %v138_v3 = vmax.f32 %v130_v40, 0.0  ;;  %v147_v5 = vpack.c.bf16 %v139_v1, %v139_v1 }
  0x28   :  { %962 = vmatpush3.bf16.msra.mxu0 %v1041_v12  ;;  %v145_v4 = vpack.c.bf16 %v137_v0, %v137_v0 }
  0x29   :  { %984 = vmatpush3.bf16.msra.mxu1 %v1042_v13  ;;  %963 = vmatprep.subr.bf16.mxu0 %v1043_v14  ;;  %v146_v7 = vpack.c.bf16 %v138_v3, %v138_v3 }
  0x2a   :  { %985 = vmatprep.subr.bf16.mxu1 %v1044_v15  ;;  %772 = vmatprep.mubr.bf16.mxu0 %v145_v4 }
  0x2b   :  { %812 = vmatprep.mubr.bf16.mxu1 %v147_v5 }
  0x2c   :  { %964 = vmatpush3.bf16.msra.mxu0 %v1045_v16 }
  0x2d   :  { %986 = vmatpush3.bf16.msra.mxu1 %v1046_v17  ;;  %965 = vmatprep.subr.bf16.mxu0 %v1047_v18 }
  0x2e   :  { %987 = vmatprep.subr.bf16.mxu1 %v1048_v19 }
  0x30   :  { %966 = vmatpush3.bf16.msra.mxu0 %v1049_v20 }
  0x31   :  { %988 = vmatpush3.bf16.msra.mxu1 %v1050_v21  ;;  %967 = vmatprep.subr.bf16.mxu0 %v1051_v22 }
  0x32   :  { %989 = vmatprep.subr.bf16.mxu1 %v1052_v23 }
  0x34   :  { %968 = vmatpush3.bf16.msra.mxu0 %v1053_v24 }
  0x35   :  { %990 = vmatpush3.bf16.msra.mxu1 %v1054_v25  ;;  %969 = vmatprep.subr.bf16.mxu0 %v1055_v28 }
  0x36   :  { %991 = vmatprep.subr.bf16.mxu1 %v1056_v30 }
  0x38   :  { %970 = vmatpush3.bf16.msra.mxu0 %v1057_v32 }
  0x39   :  { %992 = vmatpush3.bf16.msra.mxu1 %v1058_v34  ;;  %971 = vmatprep.subr.bf16.mxu0 %v1059_v35 }
  0x3a   :  { %993 = vmatprep.subr.bf16.mxu1 %v1060_v36 }
  0x3c   :  { %972 = vmatpush3.bf16.msra.mxu0 %v1061_v39 }
  0x3d   :  { %994 = vmatpush3.bf16.msra.mxu1 %v1062_v47  ;;  %973 = vmatprep.subr.bf16.mxu0 %v1063_v52 }
  0x3e   :  { %995 = vmatprep.subr.bf16.mxu1 %v1064_v53 }
  0x40   :  { %974 = vmatpush3.bf16.msra.mxu0 %v1065_v59 }
  0x41   :  { %996 = vmatpush3.bf16.msra.mxu1 %v1066_v60 }
  0x43   :  { %773 = vmatmul.mubr.bf16.vlgmr.msra.gmra.mxu0 %v144_v6 }
  0x44   :  { %813 = vmatmul.mubr.bf16.vlgmr.msra.gmra.mxu1 %v146_v7 }
  0xe3   :  { %v931_v8 = vpop.f32.mrf.mxu0 }
  0xe4   :  { %v953_v9 = vpop.f32.mrf.mxu1 }
  0xe5   :  { %v932_v10 = vpop.f32.mrf.mxu0 }
  0xe6   :  { %v954_v11 = vpop.f32.mrf.mxu1  ;;  %v933_v16 = vadd.f32 %v932_v10, %v931_v8 }
  0xe7   :  { %v934_v12 = vpop.f32.mrf.mxu0  ;;  %v955_v17 = vadd.f32 %v954_v11, %v953_v9 }
  0xe8   :  { %v956_v13 = vpop.f32.mrf.mxu1 }
  0xe9   :  { %v935_v14 = vpop.f32.mrf.mxu0  ;;  %v735_v22 = vadd.f32 %v955_v17, %v933_v16 }
  0xea   :  { %v957_v15 = vpop.f32.mrf.mxu1 }
 0x103   :  { %v975_v18 = vpop.f32.mrf.mxu0 }
 0x104   :  { %v997_v19 = vpop.f32.mrf.mxu1 }
 0x105   :  { %v976_v20 = vpop.f32.mrf.mxu0 }
 0x106   :  { %v998_v21 = vpop.f32.mrf.mxu1  ;;  %v977_v23 = vadd.f32 %v976_v20, %v975_v18 }
 0x107   :  { %v978_v24 = vpop.f32.mrf.mxu0  ;;  %v999_v28 = vadd.f32 %v998_v21, %v997_v19 }
 0x108   :  { %v1000_v25 = vpop.f32.mrf.mxu1  ;;  %v775_v27 = vadd.f32 %v977_v23, %v735_v22 }
 0x109   :  { %v979_v29 = vpop.f32.mrf.mxu0 }
 0x10a   :  { %v1001_v30 = vpop.f32.mrf.mxu1  ;;  %v815_v31 = vadd.f32 %v999_v28, %v775_v27 }
 0x10c   :  { %v820_v32 = vpack.c.bf16 %v815_v31, %v815_v31  ;;  %v824_v33 = vsel %vm823_vm0, %v815_v31, 0.0  ;;  %v831_v34 = vmul.f32 %v815_v31, %v815_v31 }
 0x10d   :  { %v825_v35 = vrot.slane %v824_v33, 4 }
 0x10e   :  { %822 = vst.msk [vmem:[%s1347_s4] sm:$0xf] %vm821_vm1, %v820_v32  ;;  %v832_v36 = vsel %vm823_vm0, %v831_v34, 0.0 }
 0x10f   :  { %v826_v37 = vadd.f32 %v825_v35, %v824_v33  ;;  %v833_v26 = vrot.slane %v832_v36, 4 }
 0x111   :  { %v827_v38 = vrot.slane %v826_v37, 2  ;;  %v834_v41 = vadd.f32 %v833_v26, %v832_v36 }
 0x113   :  { %v828_v42 = vadd.f32 %v827_v38, %v826_v37  ;;  %v835_v43 = vrot.slane %v834_v41, 2 }
 0x115   :  { %v829_v44 = vrot.slane %v828_v42, 1  ;;  %v836_v45 = vadd.f32 %v835_v43, %v834_v41 }
 0x117   :  { %v837_v46 = vrot.slane %v836_v45, 1  ;;  %v830_v39 = vadd.f32 %v829_v44, %v828_v42 }
 0x119   :  { %v838_v47 = vadd.f32 %v837_v46, %v836_v45 }
 0x11b   :  { %v840_v48 = vsel %vm839_vm2, %v830_v39, %v838_v47 }
 0x11c   :  { %842 = vst.msk [vmem:[%s1348_s5] sm:$0x3] %vm841_vm3, %v840_v48 }

// kernel: vae_forward.14
= control target key start
LH: loop header
LB: loop body
LE: loop exit
PB: predicated region body
PF: predicated region fallthrough
CT: control target
= control target key end

     0   :  { %v25_v5 = vlaneseq  ;;  %v314_v9 = vmov 1983009808   ;;  %vm252_vm0 = vcmask 517120   ;;  %s408_s1 = inlined_call_operand.vmem [shape: bf16[256,64], index: 1, kind: input, shape index: {}]   ;;  %s409_s0 = inlined_call_operand.vmem [shape: bf16[2,256], index: 0, kind: input, shape index: {}]   ;;  %s410_s2 = inlined_call_operand.vmem [shape: f32[1,256], index: 2, kind: input, shape index: {}]   ;;  %s411_s3 = inlined_call_operand.vmem [shape: f32[1,256], index: 3, kind: input, shape index: {}]   ;;  %s412_s4 = inlined_call_operand.vmem [shape: f32[1,64], index: 4, kind: input, shape index: {}]   ;;  %s413_s5 = inlined_call_operand.vmem [shape: f32[2,64], index: 5, kind: output, shape index: {}]  }
   0x1   :  { %v298_v0 = vld [vmem:[%s408_s1 + $0x78] sm:$0xff]   ;;  %v300_v2 = vld [vmem:[%s408_s1 + $0x70] sm:$0xff]   ;;  %v302_v4 = vld [vmem:[%s408_s1 + $0x68] sm:$0xff]   ;;  %v35_v10 = vunpack.c.l.s4 %v314_v9 }
   0x2   :  { %v299_v1 = vld [vmem:[%s408_s1 + $0x38] sm:$0xff]   ;;  %275 = vmatprep.subr.bf16.mxu0 %v298_v0  ;;  %v301_v3 = vld [vmem:[%s408_s1 + $0x30] sm:$0xff]   ;;  %v303_v6 = vld [vmem:[%s408_s1 + $0x28] sm:$0xff]   ;;  %v26_v8 = vshrl.u32 %v25_v5, 7 }
   0x3   :  { %276 = vmatpush3.bf16.msra.mxu0 %v299_v1  ;;  %v304_v7 = vld [vmem:[%s408_s1 + $0x60] sm:$0xff]   ;;  %v306_v12 = vld [vmem:[%s408_s1 + $0x58] sm:$0xff]   ;;  %v36_v15 = vunpack.c.0.s8 %v35_v10  ;;  %v308_v17 = vld [vmem:[%s408_s1 + $0x50] sm:$0xff]  }
   0x4   :  { %277 = vmatprep.subr.bf16.mxu0 %v300_v2  ;;  %v305_v11 = vld [vmem:[%s408_s1 + $0x20] sm:$0xff]   ;;  %v27_v13 = vsub.s32 0, %v26_v8  ;;  %v31_v14 = vsub.s32 1, %v26_v8  ;;  %v307_v16 = vld [vmem:[%s408_s1 + $0x18] sm:$0xff]   ;;  %v309_v26 = vld [vmem:[%s408_s1 + $0x10] sm:$0xff]  }
   0x5   :  { %v21_v18 = vld [vmem:[%s409_s0] sm:$0x3]  ;;  %v39_v23 = vsub.s32 %v36_v15, %v26_v8  ;;  %v310_v29 = vld [vmem:[%s408_s1 + $0x48] sm:$0xff]  }
   0x6   :  { %v22_v19 = vld [vmem:[%s410_s2] sm:$0x3]  ;;  %v23_v27 = vunpack.c.l.bf16 %v21_v18  ;;  %v311_v33 = vld [vmem:[%s408_s1 + $0x8] sm:$0xff]  }
   0x7   :  { %278 = vmatpush3.bf16.msra.mxu0 %v301_v3  ;;  %v43_v20 = vld [vmem:[%s411_s3] sm:$0x3]  ;;  %v28_v21 = vrot.slane %v22_v19, %v27_v13  ;;  %v32_v22 = vrot.slane %v22_v19, %v31_v14 }
   0x8   :  { %279 = vmatprep.subr.bf16.mxu0 %v302_v4  ;;  %v48_v24 = vrot.slane %v43_v20, %v27_v13  ;;  %v52_v25 = vrot.slane %v43_v20, %v31_v14  ;;  %v312_v35 = vld [vmem:[%s408_s1 + $0x40] sm:$0xff]  }
   0x9   :  { %v33_v28 = vcombine.low %v28_v21, %v32_v22  ;;  %v313_v37 = vld [vmem:[%s408_s1] sm:$0xff]  }
   0xa   :  { %v53_v30 = vcombine.low %v48_v24, %v52_v25  ;;  %v258_v44 = vld [vmem:[%s412_s4] ss:$0 sm:$0xff] }
   0xb   :  { %280 = vmatpush3.bf16.msra.mxu0 %v303_v6  ;;  %v40_v31 = vrot.slane %v33_v28, %v39_v23 }
   0xc   :  { %281 = vmatprep.subr.bf16.mxu0 %v304_v7  ;;  %v60_v32 = vrot.slane %v53_v30, %v39_v23 }
   0xd   :  { %v42_v34 = vmul.f32 %v40_v31, %v23_v27 }
   0xf   :  { %282 = vmatpush3.bf16.msra.mxu0 %v305_v11  ;;  %v62_v36 = vadd.f32 %v60_v32, %v42_v34 }
  0x10   :  { %283 = vmatprep.subr.bf16.mxu0 %v306_v12 }
  0x11   :  { %v63_v38 = vmax.f32 %v62_v36, 0.0 }
  0x13   :  { %284 = vmatpush3.bf16.msra.mxu0 %v307_v16  ;;  %v71_v39 = vrot.slane %v63_v38, %v39_v23 }
  0x14   :  { %285 = vmatprep.subr.bf16.mxu0 %v308_v17 }
  0x15   :  { %v72_v40 = vcombine.high %v71_v39, %v71_v39  ;;  %v75_v41 = vpack.c.bf16 %v71_v39, %v71_v39 }
  0x17   :  { %286 = vmatpush3.bf16.msra.mxu0 %v309_v26  ;;  %v76_v42 = vpack.c.bf16 %v72_v40, %v72_v40 }
  0x18   :  { %287 = vmatprep.subr.bf16.mxu0 %v310_v29 }
  0x19   :  { %244 = vmatprep.mubr.bf16.mxu0 %v76_v42 }
  0x1b   :  { %288 = vmatpush3.bf16.msra.mxu0 %v311_v33 }
  0x1c   :  { %289 = vmatprep.subr.bf16.mxu0 %v312_v35 }
  0x1f   :  { %290 = vmatpush3.bf16.msra.mxu0 %v313_v37 }
  0x22   :  { %245 = vmatmul.mubr.bf16.vlgmr.msra.gmra.mxu0 %v75_v41 }
  0xe2   :  { %v291_v43 = vpop.f32.mrf.mxu0 }
  0xe4   :  { %v292_v45 = vpop.f32.mrf.mxu0 }
  0xe5   :  { %v293_v46 = vadd.f32 %v292_v45, %v291_v43 }
  0xe6   :  { %v294_v47 = vpop.f32.mrf.mxu0 }
  0xe7   :  { %v247_v48 = vadd.f32 %v293_v46, %v258_v44 }
  0xe8   :  { %v295_v49 = vpop.f32.mrf.mxu0 }
  0xe9   :  { %253 = vst.msk [vmem:[%s413_s5] sm:$0x3] %vm252_vm0, %v247_v48 }

// kernel: vae_forward.15
= control target key start
LH: loop header
LB: loop body
LE: loop exit
PB: predicated region body
PF: predicated region fallthrough
CT: control target
= control target key end

     0   :  { %v127_v1 = vmov 0   ;;  %vm53_vm0 = vcmask 261120   ;;  %v23_v7 = vlaneseq  ;;  %s169_s1 = inlined_call_operand.vmem [shape: bf16[32,256], index: 1, kind: input, shape index: {}]   ;;  %s170_s0 = inlined_call_operand.vmem [shape: f32[2,32], index: 0, kind: input, shape index: {}]   ;;  %s171_s2 = inlined_call_operand.vmem [shape: f32[1,256], index: 2, kind: input, shape index: {}]   ;;  %s172_s3 = inlined_call_operand.vmem [shape: f32[2,256], index: 3, kind: output, shape index: {}]  }
   0x1   :  { %v121_v0 = vld [vmem:[%s169_s1 + $0x14] ss:$8 sps:$4 sm:$0xff]   ;;  %89 = vmatprep.mubr.bf16.mxu0 %v127_v1  ;;  %v123_v2 = vld [vmem:[%s169_s1 + $0x10] ss:$8 sps:$4 sm:$0xff]   ;;  %v124_v3 = vld [vmem:[%s169_s1 + $0x4] ss:$8 sps:$4 sm:$0xff]  }
   0x2   :  { %69 = vmatprep.subr.bf16.mxu0 %v121_v0  ;;  %v126_v4 = vld [vmem:[%s169_s1] ss:$8 sps:$4 sm:$0xff]   ;;  %v24_v8 = vshrl.u32 %v23_v7, 7 }
   0x3   :  { %70 = vmatpush1.bf16.msra.mxu0 %v123_v2  ;;  %v15_v5 = vld [vmem:[%s170_s0] sm:$0x3] }
   0x4   :  { %71 = vmatprep.subr.bf16.mxu0 %v124_v3  ;;  %v16_v6 = vpack.c.bf16 %v15_v5, %v15_v5  ;;  %v25_v9 = vsub.s32 0, %v24_v8  ;;  %v29_v10 = vsub.s32 1, %v24_v8  ;;  %v21_v11 = vld [vmem:[%s171_s2] sm:$0x3] }
   0x6   :  { %v26_v12 = vrot.slane %v21_v11, %v25_v9  ;;  %v30_v13 = vrot.slane %v21_v11, %v29_v10 }
   0x7   :  { %72 = vmatpush1.bf16.msra.mxu0 %v126_v4 }
   0xa   :  { %118 = vmatmul.mubr.msk.bf16.vlgmr.msra.gmra.mxu0 %vm53_vm0, %v16_v6 }
  0xca   :  { %v91_v14 = vpop.f32.mrf.mxu0 }
  0xcb   :  { %v92_v16 = vadd.f32 %v91_v14, %v26_v12 }
  0xcc   :  { %v93_v15 = vpop.f32.mrf.mxu0 }
  0xcd   :  { %v94_v17 = vadd.f32 %v93_v15, %v30_v13 }
  0xce   :  { %v95_v18 = vpop.f32.mrf.mxu0 }
  0xcf   :  { %v100_v19 = vcombine.low %v92_v16, %v94_v17 }
  0xd0   :  { %v96_v20 = vpop.f32.mrf.mxu0 }
  0xd1   :  { %119 = vst.sshfl [vmem:[%s172_s3] sm:$0x33 pattern:$0x76325410] %v100_v19 }

// kernel: vae_forward.16
= control target key start
LH: loop header
LB: loop body
LE: loop exit
PB: predicated region body
PF: predicated region fallthrough
CT: control target
= control target key end

     0   :  { %v423_v3 = vmov 0   ;;  %vm206_vm0 = vcmask 523264   ;;  %s570_s1 = inlined_call_operand.vmem [shape: bf16[64,1024], index: 1, kind: input, shape index: {}]   ;;  %s571_s0 = inlined_call_operand.vmem [shape: f32[8,64], index: 0, kind: input, shape index: {}]   ;;  %s572_s2 = inlined_call_operand.vmem [shape: f32[8,1024], index: 2, kind: output, shape index: {}]  }
   0x1   :  { %v38_v0 = vld [vmem:[%s570_s1 + $0xc0] sm:$0xff]  ;;  %v39_v2 = vld [vmem:[%s570_s1 + $0xc8] sm:$0xff]  ;;  %242 = vmatprep.mubr.bf16.mxu0 %v423_v3  ;;  %283 = vmatprep.mubr.bf16.mxu1 %v423_v3  ;;  %v40_v31 = vld [vmem:[%s570_s1 + $0xd0] sm:$0xff] }
   0x2   :  { %v42_v1 = vld [vmem:[%s570_s1 + $0xe0] sm:$0xff]  ;;  %v43_v5 = vld [vmem:[%s570_s1 + $0xe8] sm:$0xff]  ;;  %v44_v32 = vld [vmem:[%s570_s1 + $0xf0] sm:$0xff] }
   0x3   :  { %v411_v4 = vcombine.high %v38_v0, %v42_v1  ;;  %v410_v6 = vcombine.low %v38_v0, %v42_v1  ;;  %v30_v7 = vld [vmem:[%s570_s1 + $0x80] sm:$0xff]  ;;  %v413_v9 = vcombine.high %v39_v2, %v43_v5  ;;  %v412_v10 = vcombine.low %v39_v2, %v43_v5  ;;  %v31_v12 = vld [vmem:[%s570_s1 + $0x88] sm:$0xff]  ;;  %v41_v33 = vld [vmem:[%s570_s1 + $0xd8] sm:$0xff] }
   0x4   :  { %v34_v8 = vld [vmem:[%s570_s1 + $0xa0] sm:$0xff]  ;;  %v35_v13 = vld [vmem:[%s570_s1 + $0xa8] sm:$0xff]  ;;  %v45_v34 = vld [vmem:[%s570_s1 + $0xf8] sm:$0xff]  ;;  %v415_v38 = vcombine.high %v40_v31, %v44_v32  ;;  %v414_v45 = vcombine.low %v40_v31, %v44_v32 }
   0x5   :  { %v403_v11 = vcombine.high %v30_v7, %v34_v8  ;;  %v22_v14 = vld [vmem:[%s570_s1 + $0x40] sm:$0xff]  ;;  %218 = vmatprep.subr.bf16.mxu0 %v411_v4  ;;  %v405_v15 = vcombine.high %v31_v12, %v35_v13  ;;  %v23_v17 = vld [vmem:[%s570_s1 + $0x48] sm:$0xff]  ;;  %259 = vmatprep.subr.bf16.mxu1 %v413_v9  ;;  %v402_v19 = vcombine.low %v30_v7, %v34_v8  ;;  %v32_v40 = vld [vmem:[%s570_s1 + $0x90] sm:$0xff] }
   0x6   :  { %v26_v16 = vld [vmem:[%s570_s1 + $0x60] sm:$0xff]  ;;  %v27_v18 = vld [vmem:[%s570_s1 + $0x68] sm:$0xff]  ;;  %219 = vmatpush1.bf16.msra.mxu0 %v410_v6  ;;  %260 = vmatpush1.bf16.msra.mxu1 %v412_v10  ;;  %v404_v20 = vcombine.low %v31_v12, %v35_v13  ;;  %v417_v39 = vcombine.high %v41_v33, %v45_v34  ;;  %v36_v41 = vld [vmem:[%s570_s1 + $0xb0] sm:$0xff]  ;;  %v416_v46 = vcombine.low %v41_v33, %v45_v34 }
   0x7   :  { %220 = vmatprep.subr.bf16.mxu0 %v403_v11  ;;  %v395_v21 = vcombine.high %v22_v14, %v26_v16  ;;  %261 = vmatprep.subr.bf16.mxu1 %v405_v15  ;;  %v397_v22 = vcombine.high %v23_v17, %v27_v18  ;;  %v14_v23 = vld [vmem:[%s570_s1] sm:$0xff]  ;;  %v15_v25 = vld [vmem:[%s570_s1 + $0x8] sm:$0xff]  ;;  %v394_v27 = vcombine.low %v22_v14, %v26_v16  ;;  %v33_v43 = vld [vmem:[%s570_s1 + $0x98] sm:$0xff] }
   0x8   :  { %v18_v24 = vld [vmem:[%s570_s1 + $0x20] sm:$0xff]  ;;  %v19_v26 = vld [vmem:[%s570_s1 + $0x28] sm:$0xff]  ;;  %v396_v28 = vcombine.low %v23_v17, %v27_v18  ;;  %v37_v44 = vld [vmem:[%s570_s1 + $0xb8] sm:$0xff]  ;;  %v407_v47 = vcombine.high %v32_v40, %v36_v41  ;;  %v406_v53 = vcombine.low %v32_v40, %v36_v41 }
   0x9   :  { %v387_v29 = vcombine.high %v14_v23, %v18_v24  ;;  %v389_v30 = vcombine.high %v15_v25, %v19_v26  ;;  %v386_v35 = vcombine.low %v14_v23, %v18_v24  ;;  %v12_v36 = vld [vmem:[%s571_s0] sm:$0xff]  ;;  %v388_v37 = vcombine.low %v15_v25, %v19_v26  ;;  %v24_v49 = vld [vmem:[%s570_s1 + $0x50] sm:$0xff]  ;;  %v25_v51 = vld [vmem:[%s570_s1 + $0x58] sm:$0xff] }
   0xa   :  { %221 = vmatpush1.bf16.msra.mxu0 %v402_v19  ;;  %262 = vmatpush1.bf16.msra.mxu1 %v404_v20  ;;  %v13_v42 = vpack.c.bf16 %v12_v36, %v12_v36  ;;  %v409_v48 = vcombine.high %v33_v43, %v37_v44  ;;  %v28_v50 = vld [vmem:[%s570_s1 + $0x70] sm:$0xff]  ;;  %v29_v52 = vld [vmem:[%s570_s1 + $0x78] sm:$0xff]  ;;  %v408_v54 = vcombine.low %v33_v43, %v37_v44 }
   0xb   :  { %222 = vmatprep.subr.bf16.mxu0 %v395_v21  ;;  %263 = vmatprep.subr.bf16.mxu1 %v397_v22  ;;  %v399_v55 = vcombine.high %v24_v49, %v28_v50  ;;  %v401_v56 = vcombine.high %v25_v51, %v29_v52  ;;  %v16_v57 = vld [vmem:[%s570_s1 + $0x10] sm:$0xff]  ;;  %v17_v59 = vld [vmem:[%s570_s1 + $0x18] sm:$0xff]  ;;  %v398_v61 = vcombine.low %v24_v49, %v28_v50 }
   0xc   :  { %v20_v58 = vld [vmem:[%s570_s1 + $0x30] sm:$0xff]  ;;  %v21_v60 = vld [vmem:[%s570_s1 + $0x38] sm:$0xff]  ;;  %v400_v62 = vcombine.low %v25_v51, %v29_v52 }
   0xd   :  { %v391_v63 = vcombine.high %v16_v57, %v20_v58  ;;  %v393_v0 = vcombine.high %v17_v59, %v21_v60  ;;  %v390_v1 = vcombine.low %v16_v57, %v20_v58  ;;  %v392_v2 = vcombine.low %v17_v59, %v21_v60 }
   0xe   :  { %223 = vmatpush1.bf16.msra.mxu0 %v394_v27  ;;  %264 = vmatpush1.bf16.msra.mxu1 %v396_v28 }
   0xf   :  { %224 = vmatprep.subr.bf16.mxu0 %v387_v29  ;;  %265 = vmatprep.subr.bf16.mxu1 %v389_v30 }
  0x12   :  { %225 = vmatpush1.bf16.msra.mxu0 %v386_v35  ;;  %266 = vmatpush1.bf16.msra.mxu1 %v388_v37 }
  0x13   :  { %300 = vmatprep.subr.bf16.mxu0 %v415_v38  ;;  %341 = vmatprep.subr.bf16.mxu1 %v417_v39 }
  0x15   :  { %418 = vmatmul.mubr.msk.bf16.vlgmr.msra.gmra.mxu0 %vm206_vm0, %v13_v42  ;;  %419 = vmatmul.mubr.msk.bf16.vlgmr.msra.gmra.mxu1 %vm206_vm0, %v13_v42 }
  0x16   :  { %301 = vmatpush1.bf16.msra.mxu0 %v414_v45  ;;  %342 = vmatpush1.bf16.msra.mxu1 %v416_v46 }
  0x17   :  { %302 = vmatprep.subr.bf16.mxu0 %v407_v47  ;;  %343 = vmatprep.subr.bf16.mxu1 %v409_v48 }
  0x18   :  { %324 = vmatprep.mubr.bf16.mxu0 %v423_v3  ;;  %365 = vmatprep.mubr.bf16.mxu1 %v423_v3 }
  0x1a   :  { %303 = vmatpush1.bf16.msra.mxu0 %v406_v53  ;;  %344 = vmatpush1.bf16.msra.mxu1 %v408_v54 }
  0x1b   :  { %304 = vmatprep.subr.bf16.mxu0 %v399_v55  ;;  %345 = vmatprep.subr.bf16.mxu1 %v401_v56 }
  0x1e   :  { %305 = vmatpush1.bf16.msra.mxu0 %v398_v61  ;;  %346 = vmatpush1.bf16.msra.mxu1 %v400_v62 }
  0x1f   :  { %306 = vmatprep.subr.bf16.mxu0 %v391_v63  ;;  %347 = vmatprep.subr.bf16.mxu1 %v393_v0 }
  0x22   :  { %307 = vmatpush1.bf16.msra.mxu0 %v390_v1  ;;  %348 = vmatpush1.bf16.msra.mxu1 %v392_v2 }
  0x25   :  { %420 = vmatmul.mubr.msk.bf16.vlgmr.msra.gmra.mxu0 %vm206_vm0, %v13_v42  ;;  %421 = vmatmul.mubr.msk.bf16.vlgmr.msra.gmra.mxu1 %vm206_vm0, %v13_v42 }
  0xd5   :  { %v244_v3 = vpop.f32.mrf.mxu0  ;;  %v285_v4 = vpop.f32.mrf.mxu1 }
  0xd6   :  { %374 = vst [vmem:[%s572_s2] sm:$0xff] %v244_v3  ;;  %376 = vst [vmem:[%s572_s2 + $0x10] sm:$0xff] %v285_v4 }
  0xd7   :  { %v246_v5 = vpop.f32.mrf.mxu0  ;;  %v287_v6 = vpop.f32.mrf.mxu1 }
  0xd8   :  { %375 = vst [vmem:[%s572_s2 + $0x8] sm:$0xff] %v246_v5  ;;  %377 = vst [vmem:[%s572_s2 + $0x18] sm:$0xff] %v287_v6 }
  0xd9   :  { %v248_v7 = vpop.f32.mrf.mxu0  ;;  %v289_v8 = vpop.f32.mrf.mxu1 }
  0xdb   :  { %v249_v9 = vpop.f32.mrf.mxu0  ;;  %v290_v10 = vpop.f32.mrf.mxu1 }
  0xe5   :  { %v326_v11 = vpop.f32.mrf.mxu0  ;;  %v367_v12 = vpop.f32.mrf.mxu1 }
  0xe6   :  { %378 = vst [vmem:[%s572_s2 + $0x20] sm:$0xff] %v326_v11  ;;  %380 = vst [vmem:[%s572_s2 + $0x30] sm:$0xff] %v367_v12 }
  0xe7   :  { %v328_v13 = vpop.f32.mrf.mxu0  ;;  %v369_v14 = vpop.f32.mrf.mxu1 }
  0xe8   :  { %379 = vst [vmem:[%s572_s2 + $0x28] sm:$0xff] %v328_v13  ;;  %381 = vst [vmem:[%s572_s2 + $0x38] sm:$0xff] %v369_v14 }
  0xe9   :  { %v330_v15 = vpop.f32.mrf.mxu0  ;;  %v371_v16 = vpop.f32.mrf.mxu1 }
  0xeb   :  { %v331_v17 = vpop.f32.mrf.mxu0  ;;  %v372_v18 = vpop.f32.mrf.mxu1 }

// kernel: vae_forward.17
= control target key start
LH: loop header
LB: loop body
LE: loop exit
PB: predicated region body
PF: predicated region fallthrough
CT: control target
= control target key end

     0   :  { %v440_v1 = vmov 0   ;;  %vm169_vm0 = vcmask 523264   ;;  %s675_s1 = inlined_call_operand.vmem [shape: bf16[64,512], index: 1, kind: input, shape index: {}]   ;;  %s676_s0 = inlined_call_operand.vmem [shape: f32[72,64], index: 0, kind: input, shape index: {}]   ;;  %s677_s2 = inlined_call_operand.vmem [shape: f32[1,64], index: 2, kind: input, shape index: {}]   ;;  %s678_s3 = inlined_call_operand.vmem [shape: f32[1,64], index: 3, kind: input, shape index: {}]   ;;  %s679_s4 = inlined_call_operand.vmem [shape: f32[72,512], index: 4, kind: output, shape index: {}]  }
   0x1   :  { %v416_v0 = vld [vmem:[%s675_s1 + $0x64] ss:$16 sps:$4 sm:$0xff]   ;;  %217 = vmatprep.mubr.bf16.mxu0 %v440_v1  ;;  %298 = vmatprep.mubr.bf16.mxu1 %v440_v1  ;;  %v418_v2 = vld [vmem:[%s675_s1 + $0x6c] ss:$16 sps:$4 sm:$0xff]   ;;  %v420_v3 = vld [vmem:[%s675_s1 + $0x60] ss:$16 sps:$4 sm:$0xff]  }
   0x2   :  { %193 = vmatprep.subr.bf16.mxu0 %v416_v0  ;;  %v421_v4 = vld [vmem:[%s675_s1 + $0x68] ss:$16 sps:$4 sm:$0xff]   ;;  %274 = vmatprep.subr.bf16.mxu1 %v418_v2  ;;  %v422_v5 = vld [vmem:[%s675_s1 + $0x44] ss:$16 sps:$4 sm:$0xff]   ;;  %v424_v6 = vld [vmem:[%s675_s1 + $0x4c] ss:$16 sps:$4 sm:$0xff]  }
   0x3   :  { %194 = vmatpush1.bf16.msra.mxu0 %v420_v3  ;;  %275 = vmatpush1.bf16.msra.mxu1 %v421_v4  ;;  %v426_v7 = vld [vmem:[%s675_s1 + $0x40] ss:$16 sps:$4 sm:$0xff]   ;;  %v427_v8 = vld [vmem:[%s675_s1 + $0x48] ss:$16 sps:$4 sm:$0xff]   ;;  %v428_v9 = vld [vmem:[%s675_s1 + $0x24] ss:$16 sps:$4 sm:$0xff]  }
   0x4   :  { %195 = vmatprep.subr.bf16.mxu0 %v422_v5  ;;  %276 = vmatprep.subr.bf16.mxu1 %v424_v6  ;;  %v430_v10 = vld [vmem:[%s675_s1 + $0x2c] ss:$16 sps:$4 sm:$0xff]   ;;  %v432_v11 = vld [vmem:[%s675_s1 + $0x20] ss:$16 sps:$4 sm:$0xff]   ;;  %v433_v12 = vld [vmem:[%s675_s1 + $0x28] ss:$16 sps:$4 sm:$0xff]  }
   0x5   :  { %v434_v13 = vld [vmem:[%s675_s1 + $0x4] ss:$16 sps:$4 sm:$0xff]   ;;  %v436_v14 = vld [vmem:[%s675_s1 + $0xc] ss:$16 sps:$4 sm:$0xff]   ;;  %v438_v15 = vld [vmem:[%s675_s1] ss:$16 sps:$4 sm:$0xff]  }
   0x6   :  { %v18_v16 = vld [vmem:[%s676_s0] sm:$0xff]  ;;  %v19_v17 = vld [vmem:[%s676_s0 + $0x8] sm:$0xff]  ;;  %v20_v23 = vld [vmem:[%s676_s0 + $0x10] sm:$0xff] }
   0x7   :  { %196 = vmatpush1.bf16.msra.mxu0 %v426_v7  ;;  %277 = vmatpush1.bf16.msra.mxu1 %v427_v8  ;;  %v387_v18 = vld [vmem:[%s677_s2] ss:$0 sm:$0xff]  ;;  %v439_v20 = vld [vmem:[%s675_s1 + $0x8] ss:$16 sps:$4 sm:$0xff]   ;;  %v24_v43 = vld [vmem:[%s676_s0 + $0x30] sm:$0xff] }
   0x8   :  { %197 = vmatprep.subr.bf16.mxu0 %v428_v9  ;;  %278 = vmatprep.subr.bf16.mxu1 %v430_v10  ;;  %v388_v19 = vld [vmem:[%s678_s3] ss:$0 sm:$0xff]  ;;  %v34_v21 = vmul.f32 %v387_v18, %v18_v16  ;;  %v35_v22 = vmul.f32 %v387_v18, %v19_v17  ;;  %v21_v24 = vld [vmem:[%s676_s0 + $0x18] sm:$0xff]  ;;  %v36_v25 = vmul.f32 %v387_v18, %v20_v23  ;;  %v23_v34 = vld [vmem:[%s676_s0 + $0x28] sm:$0xff] }
   0x9   :  { %v37_v26 = vmul.f32 %v387_v18, %v21_v24  ;;  %v22_v33 = vld [vmem:[%s676_s0 + $0x20] sm:$0xff]  ;;  %v39_v39 = vmul.f32 %v387_v18, %v23_v34  ;;  %v25_v44 = vld [vmem:[%s676_s0 + $0x38] sm:$0xff]  ;;  %v40_v47 = vmul.f32 %v387_v18, %v24_v43 }
   0xa   :  { %v50_v27 = vadd.f32 %v388_v19, %v34_v21  ;;  %v51_v28 = vadd.f32 %v388_v19, %v35_v22  ;;  %v52_v31 = vadd.f32 %v388_v19, %v36_v25  ;;  %v38_v38 = vmul.f32 %v387_v18, %v22_v33  ;;  %v26_v52 = vld [vmem:[%s676_s0 + $0x40] sm:$0xff] }
   0xb   :  { %198 = vmatpush1.bf16.msra.mxu0 %v432_v11  ;;  %279 = vmatpush1.bf16.msra.mxu1 %v433_v12  ;;  %v53_v32 = vadd.f32 %v388_v19, %v37_v26  ;;  %v55_v42 = vadd.f32 %v388_v19, %v39_v39  ;;  %v41_v48 = vmul.f32 %v387_v18, %v25_v44 }
   0xc   :  { %199 = vmatprep.subr.bf16.mxu0 %v434_v13  ;;  %280 = vmatprep.subr.bf16.mxu1 %v436_v14  ;;  %v59_v29 = vmax.f32 %v50_v27, 0.0  ;;  %v60_v30 = vmax.f32 %v51_v28, 0.0  ;;  %v61_v36 = vmax.f32 %v52_v31, 0.0  ;;  %v54_v41 = vadd.f32 %v388_v19, %v38_v38 }
   0xd   :  { %v62_v37 = vmax.f32 %v53_v32, 0.0  ;;  %v64_v46 = vmax.f32 %v55_v42, 0.0  ;;  %v56_v50 = vadd.f32 %v388_v19, %v40_v47  ;;  %v57_v51 = vadd.f32 %v388_v19, %v41_v48 }
   0xe   :  { %v68_v35 = vpack.c.bf16 %v60_v30, %v59_v29  ;;  %v63_v45 = vmax.f32 %v54_v41, 0.0  ;;  %v42_v55 = vmul.f32 %v387_v18, %v26_v52 }
   0xf   :  { %200 = vmatpush1.bf16.msra.mxu0 %v438_v15  ;;  %281 = vmatpush1.bf16.msra.mxu1 %v439_v20  ;;  %v69_v40 = vpack.c.bf16 %v62_v37, %v61_v36  ;;  %v65_v53 = vmax.f32 %v56_v50, 0.0  ;;  %v66_v54 = vmax.f32 %v57_v51, 0.0 }
  0x10   :  { %v70_v49 = vpack.c.bf16 %v64_v46, %v63_v45  ;;  %v58_v57 = vadd.f32 %v388_v19, %v42_v55 }
  0x11   :  { %v71_v56 = vpack.c.bf16 %v66_v54, %v65_v53 }
  0x12   :  { %405 = vmatmul.mubr.msk.bf16.vlgmr.msra.gmra.mxu0 %vm169_vm0, %v68_v35  ;;  %410 = vmatmul.mubr.msk.bf16.vlgmr.msra.gmra.mxu1 %vm169_vm0, %v68_v35  ;;  %v67_v58 = vmax.f32 %v58_v57, 0.0 }
  0x13   :  { %227 = vmatprep.mubr.bf16.mxu0 %v440_v1  ;;  %308 = vmatprep.mubr.bf16.mxu1 %v440_v1 }
  0x14   :  { %v72_v59 = vpack.c.bf16 %v67_v58, %v67_v58 }
  0x1a   :  { %406 = vmatmul.mubr.msk.bf16.gmra.mxu0 %vm169_vm0, %v69_v40  ;;  %411 = vmatmul.mubr.msk.bf16.gmra.mxu1 %vm169_vm0, %v69_v40 }
  0x1b   :  { %237 = vmatprep.mubr.bf16.mxu0 %v440_v1  ;;  %318 = vmatprep.mubr.bf16.mxu1 %v440_v1 }
  0x22   :  { %407 = vmatmul.mubr.msk.bf16.gmra.mxu0 %vm169_vm0, %v70_v49  ;;  %412 = vmatmul.mubr.msk.bf16.gmra.mxu1 %vm169_vm0, %v70_v49 }
  0x23   :  { %247 = vmatprep.mubr.bf16.mxu0 %v440_v1  ;;  %328 = vmatprep.mubr.bf16.mxu1 %v440_v1 }
  0x2a   :  { %408 = vmatmul.mubr.msk.bf16.gmra.mxu0 %vm169_vm0, %v71_v56  ;;  %413 = vmatmul.mubr.msk.bf16.gmra.mxu1 %vm169_vm0, %v71_v56 }
  0x2b   :  { %257 = vmatprep.mubr.bf16.mxu0 %v440_v1  ;;  %338 = vmatprep.mubr.bf16.mxu1 %v440_v1 }
  0x32   :  { %409 = vmatmul.mubr.msk.bf16.gmra.mxu0 %vm169_vm0, %v72_v59  ;;  %414 = vmatmul.mubr.msk.bf16.gmra.mxu1 %vm169_vm0, %v72_v59 }
  0xd2   :  { %v219_v60 = vpop.f32.mrf.mxu0  ;;  %v300_v61 = vpop.f32.mrf.mxu1 }
  0xd3   :  { %347 = vst [vmem:[%s679_s4] sm:$0xff] %v219_v60  ;;  %349 = vst [vmem:[%s679_s4 + $0x10] sm:$0xff] %v300_v61 }
  0xd4   :  { %v221_v62 = vpop.f32.mrf.mxu0  ;;  %v302_v63 = vpop.f32.mrf.mxu1 }
  0xd5   :  { %348 = vst [vmem:[%s679_s4 + $0x8] sm:$0xff] %v221_v62  ;;  %350 = vst [vmem:[%s679_s4 + $0x18] sm:$0xff] %v302_v63 }
  0xd6   :  { %v223_v0 = vpop.f32.mrf.mxu0  ;;  %v304_v1 = vpop.f32.mrf.mxu1 }
  0xd7   :  { %351 = vst [vmem:[%s679_s4 + $0x20] sm:$0xff] %v223_v0  ;;  %353 = vst [vmem:[%s679_s4 + $0x30] sm:$0xff] %v304_v1 }
  0xd8   :  { %v225_v2 = vpop.f32.mrf.mxu0  ;;  %v306_v3 = vpop.f32.mrf.mxu1 }
  0xd9   :  { %352 = vst [vmem:[%s679_s4 + $0x28] sm:$0xff] %v225_v2  ;;  %354 = vst [vmem:[%s679_s4 + $0x38] sm:$0xff] %v306_v3 }
  0xda   :  { %v229_v4 = vpop.f32.mrf.mxu0  ;;  %v310_v5 = vpop.f32.mrf.mxu1 }
  0xdb   :  { %355 = vst [vmem:[%s679_s4 + $0x40] sm:$0xff] %v229_v4  ;;  %357 = vst [vmem:[%s679_s4 + $0x50] sm:$0xff] %v310_v5 }
  0xdc   :  { %v231_v6 = vpop.f32.mrf.mxu0  ;;  %v312_v7 = vpop.f32.mrf.mxu1 }
  0xdd   :  { %356 = vst [vmem:[%s679_s4 + $0x48] sm:$0xff] %v231_v6  ;;  %358 = vst [vmem:[%s679_s4 + $0x58] sm:$0xff] %v312_v7 }
  0xde   :  { %v233_v8 = vpop.f32.mrf.mxu0  ;;  %v314_v9 = vpop.f32.mrf.mxu1 }
  0xdf   :  { %359 = vst [vmem:[%s679_s4 + $0x60] sm:$0xff] %v233_v8  ;;  %361 = vst [vmem:[%s679_s4 + $0x70] sm:$0xff] %v314_v9 }
  0xe0   :  { %v235_v10 = vpop.f32.mrf.mxu0  ;;  %v316_v11 = vpop.f32.mrf.mxu1 }
  0xe1   :  { %360 = vst [vmem:[%s679_s4 + $0x68] sm:$0xff] %v235_v10  ;;  %362 = vst [vmem:[%s679_s4 + $0x78] sm:$0xff] %v316_v11 }
  0xe2   :  { %v239_v12 = vpop.f32.mrf.mxu0  ;;  %v320_v13 = vpop.f32.mrf.mxu1 }
  0xe3   :  { %363 = vst [vmem:[%s679_s4 + $0x80] sm:$0xff] %v239_v12  ;;  %365 = vst [vmem:[%s679_s4 + $0x90] sm:$0xff] %v320_v13 }
  0xe4   :  { %v241_v14 = vpop.f32.mrf.mxu0  ;;  %v322_v15 = vpop.f32.mrf.mxu1 }
  0xe5   :  { %364 = vst [vmem:[%s679_s4 + $0x88] sm:$0xff] %v241_v14  ;;  %366 = vst [vmem:[%s679_s4 + $0x98] sm:$0xff] %v322_v15 }
  0xe6   :  { %v243_v16 = vpop.f32.mrf.mxu0  ;;  %v324_v17 = vpop.f32.mrf.mxu1 }
  0xe7   :  { %367 = vst [vmem:[%s679_s4 + $0xa0] sm:$0xff] %v243_v16  ;;  %369 = vst [vmem:[%s679_s4 + $0xb0] sm:$0xff] %v324_v17 }
  0xe8   :  { %v245_v18 = vpop.f32.mrf.mxu0  ;;  %v326_v19 = vpop.f32.mrf.mxu1 }
  0xe9   :  { %368 = vst [vmem:[%s679_s4 + $0xa8] sm:$0xff] %v245_v18  ;;  %370 = vst [vmem:[%s679_s4 + $0xb8] sm:$0xff] %v326_v19 }
  0xea   :  { %v249_v20 = vpop.f32.mrf.mxu0  ;;  %v330_v21 = vpop.f32.mrf.mxu1 }
  0xeb   :  { %371 = vst [vmem:[%s679_s4 + $0xc0] sm:$0xff] %v249_v20  ;;  %373 = vst [vmem:[%s679_s4 + $0xd0] sm:$0xff] %v330_v21 }
  0xec   :  { %v251_v22 = vpop.f32.mrf.mxu0  ;;  %v332_v23 = vpop.f32.mrf.mxu1 }
  0xed   :  { %372 = vst [vmem:[%s679_s4 + $0xc8] sm:$0xff] %v251_v22  ;;  %374 = vst [vmem:[%s679_s4 + $0xd8] sm:$0xff] %v332_v23 }
  0xee   :  { %v253_v24 = vpop.f32.mrf.mxu0  ;;  %v334_v25 = vpop.f32.mrf.mxu1 }
  0xef   :  { %375 = vst [vmem:[%s679_s4 + $0xe0] sm:$0xff] %v253_v24  ;;  %377 = vst [vmem:[%s679_s4 + $0xf0] sm:$0xff] %v334_v25 }
  0xf0   :  { %v255_v26 = vpop.f32.mrf.mxu0  ;;  %v336_v27 = vpop.f32.mrf.mxu1 }
  0xf1   :  { %376 = vst [vmem:[%s679_s4 + $0xe8] sm:$0xff] %v255_v26  ;;  %378 = vst [vmem:[%s679_s4 + $0xf8] sm:$0xff] %v336_v27 }
  0xf2   :  { %v259_v28 = vpop.f32.mrf.mxu0  ;;  %v340_v29 = vpop.f32.mrf.mxu1 }
  0xf3   :  { %379 = vst [vmem:[%s679_s4 + $0x100] sm:$0xff] %v259_v28  ;;  %381 = vst [vmem:[%s679_s4 + $0x110] sm:$0xff] %v340_v29 }
  0xf4   :  { %v261_v30 = vpop.f32.mrf.mxu0  ;;  %v342_v31 = vpop.f32.mrf.mxu1 }
  0xf5   :  { %380 = vst [vmem:[%s679_s4 + $0x108] sm:$0xff] %v261_v30  ;;  %382 = vst [vmem:[%s679_s4 + $0x118] sm:$0xff] %v342_v31 }
  0xf6   :  { %v263_v32 = vpop.f32.mrf.mxu0  ;;  %v344_v33 = vpop.f32.mrf.mxu1 }
  0xf8   :  { %v264_v34 = vpop.f32.mrf.mxu0  ;;  %v345_v35 = vpop.f32.mrf.mxu1 }

// kernel: vae_forward.18
= control target key start
LH: loop header
LB: loop body
LE: loop exit
PB: predicated region body
PF: predicated region fallthrough
CT: control target
= control target key end

     0   :  { %s1001_s15 = smov 0   ;;  %s1306_s0 = inlined_call_operand.vmem [shape: f32[400,32], index: 0, kind: input, shape index: {}]   ;;  %s1307_s1 = inlined_call_operand.vmem [shape: bf16[32,512], index: 1, kind: input, shape index: {}]   ;;  %s1308_s2 = inlined_call_operand.vmem [shape: f32[1,32], index: 2, kind: input, shape index: {}]   ;;  %s1309_s3 = inlined_call_operand.vmem [shape: f32[1,32], index: 3, kind: input, shape index: {}]   ;;  %s1310_s4 = inlined_call_operand.vmem [shape: f32[400,512], index: 4, kind: output, shape index: {}]  }
   0x1 LB: > { %s899_s16 = sadd.s32 4294967295, %s973_s15   ;;  %p903_p0 = scmp.ge.s32.totalorder %s973_s15, 1  ;;  %s973_s15 = sphi %s1001_s15, %s14_s15  }
   0x2   : > { %p163_p1 = scmp.lt.s32.totalorder %s973_s15, 3 }
   0x4   : > { %p164_p2 = pnand %p903_p0, %p163_p1 }
   0x5   : > { %s190_s19 = smul.u32 (!%p164_p2), 25, %s899_s16 }
   0x6   : > { %167 = sbr.rel (%p164_p2) target bundleno = 320 (0x140), region = 36 }
   0x7   : > { %p191_p3 = scmp.lt.s32.totalorder (!%p164_p2), %s190_s19, 49 }
   0xb   : > { %v955_v0 = vld [vmem:[%s1307_s1 + $0x24] ss:$16 sps:$4 sm:$0xff]   ;;  %v957_v1 = vld [vmem:[%s1307_s1 + $0x2c] ss:$16 sps:$4 sm:$0xff]   ;;  %v975_v2 = vmov 0   ;;  %s1312_s19 = smov (!%p191_p3, %s190_s19), 49 }
   0xc   : > { %451 = vmatprep.mubr.bf16.mxu0 %v975_v2  ;;  %612 = vmatprep.mubr.bf16.mxu1 %v975_v2  ;;  %v959_v3 = vld [vmem:[%s1307_s1 + $0x20] ss:$16 sps:$4 sm:$0xff]   ;;  %v960_v4 = vld [vmem:[%s1307_s1 + $0x28] ss:$16 sps:$4 sm:$0xff]   ;;  %v961_v5 = vld [vmem:[%s1307_s1 + $0x4] ss:$16 sps:$4 sm:$0xff]  }
   0xd   : > { %431 = vmatprep.subr.bf16.mxu0 %v955_v0  ;;  %592 = vmatprep.subr.bf16.mxu1 %v957_v1  ;;  %v963_v6 = vld [vmem:[%s1307_s1 + $0xc] ss:$16 sps:$4 sm:$0xff]   ;;  %v965_v7 = vld [vmem:[%s1307_s1] ss:$16 sps:$4 sm:$0xff]   ;;  %v966_v8 = vld [vmem:[%s1307_s1 + $0x8] ss:$16 sps:$4 sm:$0xff]  }
   0xe   : > { %432 = vmatpush1.bf16.msra.mxu0 %v959_v3  ;;  %593 = vmatpush1.bf16.msra.mxu1 %v960_v4  ;;  %s904_s8 = sshll.u32 %s1312_s19, 3  ;;  %v1041_v9 = vld [vmem:[%s1308_s2] ss:$0 sm:$0xff]  ;;  %vm379_vm0 = vcmask 261120   ;;  %s945_s17 = sshll.u32 %s1312_s19, 5 }
   0xf   : > { %433 = vmatprep.subr.bf16.mxu0 %v961_v5  ;;  %594 = vmatprep.subr.bf16.mxu1 %v963_v6  ;;  %s1046_s13 = scalar_lea.vmem %s1306_s0, %s904_s8  ;;  %v1051_v10 = vld [vmem:[%s1309_s3] ss:$0 sm:$0xff]  ;;  %s1201_s21 = scalar_lea.vmem %s1310_s4, %s945_s17 }
  0x10   : > { %v204_v11 = vld [vmem:[%s1046_s13] sm:$0xff]  ;;  %v205_v12 = vld [vmem:[%s1046_s13 + $0x8] sm:$0xff]  ;;  %v206_v13 = vld [vmem:[%s1046_s13 + $0x10] sm:$0xff] }
  0x11   : > { %v236_v14 = vmul.f32 %v1041_v9, %v204_v11  ;;  %v237_v15 = vmul.f32 %v1041_v9, %v205_v12  ;;  %v207_v16 = vld [vmem:[%s1046_s13 + $0x18] sm:$0xff]  ;;  %v238_v17 = vmul.f32 %v1041_v9, %v206_v13  ;;  %v208_v25 = vld [vmem:[%s1046_s13 + $0x20] sm:$0xff]  ;;  %v209_v26 = vld [vmem:[%s1046_s13 + $0x28] sm:$0xff] }
  0x12   : > { %434 = vmatpush1.bf16.msra.mxu0 %v965_v7  ;;  %595 = vmatpush1.bf16.msra.mxu1 %v966_v8  ;;  %v239_v18 = vmul.f32 %v1041_v9, %v207_v16  ;;  %v240_v28 = vmul.f32 %v1041_v9, %v208_v25  ;;  %v241_v31 = vmul.f32 %v1041_v9, %v209_v26  ;;  %v210_v32 = vld [vmem:[%s1046_s13 + $0x30] sm:$0xff]  ;;  %v220_v33 = vld [vmem:[%s1046_s13 + $0x80] sm:$0xff]  ;;  %v211_v34 = vld [vmem:[%s1046_s13 + $0x38] sm:$0xff] }
  0x13   : > { %v268_v19 = vadd.f32 %v1051_v10, %v236_v14  ;;  %v269_v20 = vadd.f32 %v1051_v10, %v237_v15  ;;  %v270_v23 = vadd.f32 %v1051_v10, %v238_v17  ;;  %v221_v35 = vld [vmem:[%s1046_s13 + $0x88] sm:$0xff]  ;;  %v242_v37 = vmul.f32 %v1041_v9, %v210_v32  ;;  %v222_v38 = vld [vmem:[%s1046_s13 + $0x90] sm:$0xff]  ;;  %v223_v42 = vld [vmem:[%s1046_s13 + $0x98] sm:$0xff] }
  0x14   : > { %v271_v24 = vadd.f32 %v1051_v10, %v239_v18  ;;  %v272_v36 = vadd.f32 %v1051_v10, %v240_v28  ;;  %v273_v40 = vadd.f32 %v1051_v10, %v241_v31  ;;  %v252_v41 = vmul.f32 %v1041_v9, %v220_v33  ;;  %v224_v45 = vld [vmem:[%s1046_s13 + $0xa0] sm:$0xff]  ;;  %v225_v48 = vld [vmem:[%s1046_s13 + $0xa8] sm:$0xff]  ;;  %v226_v53 = vld [vmem:[%s1046_s13 + $0xb0] sm:$0xff] }
  0x15   : > { %v293_v21 = vmax.f32 %v268_v19, 0.0  ;;  %v294_v22 = vmax.f32 %v269_v20, 0.0  ;;  %v295_v29 = vmax.f32 %v270_v23, 0.0  ;;  %v243_v43 = vmul.f32 %v1041_v9, %v211_v34  ;;  %v227_v54 = vld [vmem:[%s1046_s13 + $0xb8] sm:$0xff]  ;;  %v228_v59 = vld [vmem:[%s1046_s13 + $0xc0] sm:$0xff]  ;;  %v213_v16 = vld [vmem:[%s1046_s13 + $0x48] sm:$0xff] }
  0x16   : > { %v296_v30 = vmax.f32 %v271_v24, 0.0  ;;  %v253_v44 = vmul.f32 %v1041_v9, %v221_v35  ;;  %v284_v46 = vadd.f32 %v1051_v10, %v252_v41  ;;  %v254_v47 = vmul.f32 %v1041_v9, %v222_v38  ;;  %v212_v15 = vld [vmem:[%s1046_s13 + $0x40] sm:$0xff]  ;;  %v214_v31 = vld [vmem:[%s1046_s13 + $0x50] sm:$0xff]  ;;  %v215_v32 = vld [vmem:[%s1046_s13 + $0x58] sm:$0xff] }
  0x17   : > { %v318_v27 = vpack.c.bf16 %v294_v22, %v293_v21  ;;  %v297_v49 = vmax.f32 %v272_v36, 0.0  ;;  %v274_v50 = vadd.f32 %v1051_v10, %v242_v37  ;;  %v255_v52 = vmul.f32 %v1041_v9, %v223_v42  ;;  %v217_v41 = vld [vmem:[%s1046_s13 + $0x68] sm:$0xff] }
  0x18   : > { %v319_v39 = vpack.c.bf16 %v296_v30, %v295_v29  ;;  %v285_v51 = vadd.f32 %v1051_v10, %v253_v44  ;;  %v298_v55 = vmax.f32 %v273_v40, 0.0  ;;  %v309_v56 = vmax.f32 %v284_v46, 0.0  ;;  %v216_v40 = vld [vmem:[%s1046_s13 + $0x60] sm:$0xff] }
  0x19   : > { %917 = vmatmul.mubr.msk.bf16.vlgmr.msra.gmra.mxu0 %vm379_vm0, %v318_v27  ;;  %930 = vmatmul.mubr.msk.bf16.vlgmr.msra.gmra.mxu1 %vm379_vm0, %v318_v27  ;;  %v286_v57 = vadd.f32 %v1051_v10, %v254_v47  ;;  %v256_v58 = vmul.f32 %v1041_v9, %v224_v45  ;;  %v275_v60 = vadd.f32 %v1051_v10, %v243_v43  ;;  %v299_v22 = vmax.f32 %v274_v50, 0.0  ;;  %v219_v50 = vld [vmem:[%s1046_s13 + $0x78] sm:$0xff] }
  0x1a   : > { %461 = vmatprep.mubr.bf16.mxu0 %v975_v2  ;;  %622 = vmatprep.mubr.bf16.mxu1 %v975_v2  ;;  %v310_v61 = vmax.f32 %v285_v51, 0.0  ;;  %v287_v62 = vadd.f32 %v1051_v10, %v255_v52  ;;  %v257_v63 = vmul.f32 %v1041_v9, %v225_v48  ;;  %v258_v3 = vmul.f32 %v1041_v9, %v226_v53 }
  0x1b   : > { %v311_v0 = vmax.f32 %v286_v57, 0.0  ;;  %v288_v1 = vadd.f32 %v1051_v10, %v256_v58  ;;  %v259_v4 = vmul.f32 %v1041_v9, %v227_v54  ;;  %v260_v8 = vmul.f32 %v1041_v9, %v228_v59 }
  0x1c   : > { %v1107_v5 = vpack.c.bf16 %v310_v61, %v309_v56  ;;  %v312_v6 = vmax.f32 %v287_v62, 0.0  ;;  %v289_v7 = vadd.f32 %v1051_v10, %v257_v63  ;;  %v320_v11 = vpack.c.bf16 %v298_v55, %v297_v49  ;;  %v218_v49 = vld [vmem:[%s1046_s13 + $0x70] sm:$0xff] }
  0x1d   : > { %v313_v12 = vmax.f32 %v288_v1, 0.0  ;;  %v290_v13 = vadd.f32 %v1051_v10, %v258_v3  ;;  %v291_v14 = vadd.f32 %v1051_v10, %v259_v4  ;;  %v1118_v19 = vadd.f32 %v1051_v10, %v260_v8 }
  0x1e   : > { %v1115_v17 = vpack.c.bf16 %v312_v6, %v311_v0  ;;  %v314_v18 = vmax.f32 %v289_v7, 0.0  ;;  %v300_v24 = vmax.f32 %v275_v60, 0.0  ;;  %v244_v25 = vmul.f32 %v1041_v9, %v212_v15 }
  0x1f   : > { %v315_v20 = vmax.f32 %v290_v13, 0.0  ;;  %v316_v21 = vmax.f32 %v291_v14, 0.0  ;;  %v245_v26 = vmul.f32 %v1041_v9, %v213_v16  ;;  %v246_v35 = vmul.f32 %v1041_v9, %v214_v31 }
  0x20   : > { %v1120_v23 = vpack.c.bf16 %v314_v18, %v313_v12  ;;  %v321_v28 = vpack.c.bf16 %v300_v24, %v299_v22  ;;  %v276_v29 = vadd.f32 %v1051_v10, %v244_v25  ;;  %v247_v36 = vmul.f32 %v1041_v9, %v215_v32 }
  0x21   : > { %918 = vmatmul.mubr.msk.bf16.gmra.mxu0 %vm379_vm0, %v319_v39  ;;  %931 = vmatmul.mubr.msk.bf16.gmra.mxu1 %vm379_vm0, %v319_v39  ;;  %v1126_v27 = vpack.c.bf16 %v316_v21, %v315_v20  ;;  %v277_v30 = vadd.f32 %v1051_v10, %v245_v26  ;;  %v278_v38 = vadd.f32 %v1051_v10, %v246_v35 }
  0x22   : > { %471 = vmatprep.mubr.bf16.mxu0 %v975_v2  ;;  %632 = vmatprep.mubr.bf16.mxu1 %v975_v2  ;;  %v301_v33 = vmax.f32 %v276_v29, 0.0  ;;  %v279_v39 = vadd.f32 %v1051_v10, %v247_v36  ;;  %v248_v44 = vmul.f32 %v1041_v9, %v216_v40  ;;  %v249_v45 = vmul.f32 %v1041_v9, %v217_v41 }
  0x23   : > { %v302_v34 = vmax.f32 %v277_v30, 0.0  ;;  %v303_v42 = vmax.f32 %v278_v38, 0.0  ;;  %v250_v53 = vmul.f32 %v1041_v9, %v218_v49  ;;  %v251_v54 = vmul.f32 %v1041_v9, %v219_v50 }
  0x24   : > { %v304_v43 = vmax.f32 %v279_v39, 0.0  ;;  %v280_v47 = vadd.f32 %v1051_v10, %v248_v44  ;;  %v281_v48 = vadd.f32 %v1051_v10, %v249_v45 }
  0x25   : > { %v322_v37 = vpack.c.bf16 %v302_v34, %v301_v33  ;;  %v282_v56 = vadd.f32 %v1051_v10, %v250_v53  ;;  %v283_v57 = vadd.f32 %v1051_v10, %v251_v54  ;;  %v317_v10 = vmax.f32 %v1118_v19, 0.0 }
  0x26   : > { %v323_v46 = vpack.c.bf16 %v304_v43, %v303_v42  ;;  %v305_v51 = vmax.f32 %v280_v47, 0.0  ;;  %v306_v52 = vmax.f32 %v281_v48, 0.0 }
  0x27   : > { %v307_v58 = vmax.f32 %v282_v56, 0.0  ;;  %v308_v59 = vmax.f32 %v283_v57, 0.0  ;;  %v330_v60 = vpack.c.bf16 %v317_v10, %v317_v10 }
  0x28   : > { %v324_v55 = vpack.c.bf16 %v306_v52, %v305_v51 }
  0x29   : > { %919 = vmatmul.mubr.msk.bf16.gmra.mxu0 %vm379_vm0, %v320_v11  ;;  %932 = vmatmul.mubr.msk.bf16.gmra.mxu1 %vm379_vm0, %v320_v11  ;;  %v325_v9 = vpack.c.bf16 %v308_v59, %v307_v58 }
  0x2a   : > { %481 = vmatprep.mubr.bf16.mxu0 %v975_v2  ;;  %642 = vmatprep.mubr.bf16.mxu1 %v975_v2 }
  0x31   : > { %920 = vmatmul.mubr.msk.bf16.gmra.mxu0 %vm379_vm0, %v321_v28  ;;  %933 = vmatmul.mubr.msk.bf16.gmra.mxu1 %vm379_vm0, %v321_v28 }
  0x32   : > { %491 = vmatprep.mubr.bf16.mxu0 %v975_v2  ;;  %652 = vmatprep.mubr.bf16.mxu1 %v975_v2 }
  0x39   : > { %921 = vmatmul.mubr.msk.bf16.gmra.mxu0 %vm379_vm0, %v322_v37  ;;  %934 = vmatmul.mubr.msk.bf16.gmra.mxu1 %vm379_vm0, %v322_v37 }
  0x3a   : > { %501 = vmatprep.mubr.bf16.mxu0 %v975_v2  ;;  %662 = vmatprep.mubr.bf16.mxu1 %v975_v2 }
  0x41   : > { %922 = vmatmul.mubr.msk.bf16.gmra.mxu0 %vm379_vm0, %v323_v46  ;;  %935 = vmatmul.mubr.msk.bf16.gmra.mxu1 %vm379_vm0, %v323_v46 }
  0x42   : > { %511 = vmatprep.mubr.bf16.mxu0 %v975_v2  ;;  %672 = vmatprep.mubr.bf16.mxu1 %v975_v2 }
  0x49   : > { %923 = vmatmul.mubr.msk.bf16.gmra.mxu0 %vm379_vm0, %v324_v55  ;;  %936 = vmatmul.mubr.msk.bf16.gmra.mxu1 %vm379_vm0, %v324_v55 }
  0x4a   : > { %521 = vmatprep.mubr.bf16.mxu0 %v975_v2  ;;  %682 = vmatprep.mubr.bf16.mxu1 %v975_v2 }
  0x51   : > { %924 = vmatmul.mubr.msk.bf16.gmra.mxu0 %vm379_vm0, %v325_v9  ;;  %937 = vmatmul.mubr.msk.bf16.gmra.mxu1 %vm379_vm0, %v325_v9 }
  0x52   : > { %531 = vmatprep.mubr.bf16.mxu0 %v975_v2  ;;  %692 = vmatprep.mubr.bf16.mxu1 %v975_v2 }
  0x59   : > { %925 = vmatmul.mubr.msk.bf16.gmra.mxu0 %vm379_vm0, %v1107_v5  ;;  %938 = vmatmul.mubr.msk.bf16.gmra.mxu1 %vm379_vm0, %v1107_v5 }
  0x5a   : > { %541 = vmatprep.mubr.bf16.mxu0 %v975_v2  ;;  %702 = vmatprep.mubr.bf16.mxu1 %v975_v2 }
  0x61   : > { %926 = vmatmul.mubr.msk.bf16.gmra.mxu0 %vm379_vm0, %v1115_v17  ;;  %939 = vmatmul.mubr.msk.bf16.gmra.mxu1 %vm379_vm0, %v1115_v17 }
  0x62   : > { %551 = vmatprep.mubr.bf16.mxu0 %v975_v2  ;;  %712 = vmatprep.mubr.bf16.mxu1 %v975_v2 }
  0x69   : > { %927 = vmatmul.mubr.msk.bf16.gmra.mxu0 %vm379_vm0, %v1120_v23  ;;  %940 = vmatmul.mubr.msk.bf16.gmra.mxu1 %vm379_vm0, %v1120_v23 }
  0x6a   : > { %561 = vmatprep.mubr.bf16.mxu0 %v975_v2  ;;  %722 = vmatprep.mubr.bf16.mxu1 %v975_v2 }
  0x71   : > { %928 = vmatmul.mubr.msk.bf16.gmra.mxu0 %vm379_vm0, %v1126_v27  ;;  %941 = vmatmul.mubr.msk.bf16.gmra.mxu1 %vm379_vm0, %v1126_v27 }
  0x72   : > { %571 = vmatprep.mubr.bf16.mxu0 %v975_v2  ;;  %732 = vmatprep.mubr.bf16.mxu1 %v975_v2 }
  0x79   : > { %929 = vmatmul.mubr.msk.bf16.gmra.mxu0 %vm379_vm0, %v330_v60  ;;  %942 = vmatmul.mubr.msk.bf16.gmra.mxu1 %vm379_vm0, %v330_v60 }
  0xd9   : > { %v453_v2 = vpop.f32.mrf.mxu0  ;;  %v614_v61 = vpop.f32.mrf.mxu1 }
  0xda   : > { %741 = vst [vmem:[%s1201_s21] sm:$0xff] %v453_v2  ;;  %743 = vst [vmem:[%s1201_s21 + $0x10] sm:$0xff] %v614_v61 }
  0xdb   : > { %v455_v62 = vpop.f32.mrf.mxu0  ;;  %v616_v63 = vpop.f32.mrf.mxu1 }
  0xdc   : > { %742 = vst [vmem:[%s1201_s21 + $0x8] sm:$0xff] %v455_v62  ;;  %744 = vst [vmem:[%s1201_s21 + $0x18] sm:$0xff] %v616_v63 }
  0xdd   : > { %v457_v0 = vpop.f32.mrf.mxu0  ;;  %v618_v1 = vpop.f32.mrf.mxu1 }
  0xde   : > { %745 = vst [vmem:[%s1201_s21 + $0x20] sm:$0xff] %v457_v0  ;;  %747 = vst [vmem:[%s1201_s21 + $0x30] sm:$0xff] %v618_v1 }
  0xdf   : > { %v459_v3 = vpop.f32.mrf.mxu0  ;;  %v620_v4 = vpop.f32.mrf.mxu1 }
  0xe0   : > { %746 = vst [vmem:[%s1201_s21 + $0x28] sm:$0xff] %v459_v3  ;;  %748 = vst [vmem:[%s1201_s21 + $0x38] sm:$0xff] %v620_v4 }
  0xe1   : > { %v463_v5 = vpop.f32.mrf.mxu0  ;;  %v624_v6 = vpop.f32.mrf.mxu1 }
  0xe2   : > { %749 = vst [vmem:[%s1201_s21 + $0x40] sm:$0xff] %v463_v5  ;;  %751 = vst [vmem:[%s1201_s21 + $0x50] sm:$0xff] %v624_v6 }
  0xe3   : > { %v465_v7 = vpop.f32.mrf.mxu0  ;;  %v626_v8 = vpop.f32.mrf.mxu1 }
  0xe4   : > { %750 = vst [vmem:[%s1201_s21 + $0x48] sm:$0xff] %v465_v7  ;;  %752 = vst [vmem:[%s1201_s21 + $0x58] sm:$0xff] %v626_v8 }
  0xe5   : > { %v467_v11 = vpop.f32.mrf.mxu0  ;;  %v628_v12 = vpop.f32.mrf.mxu1 }
  0xe6   : > { %753 = vst [vmem:[%s1201_s21 + $0x60] sm:$0xff] %v467_v11  ;;  %755 = vst [vmem:[%s1201_s21 + $0x70] sm:$0xff] %v628_v12 }
  0xe7   : > { %v469_v13 = vpop.f32.mrf.mxu0  ;;  %v630_v14 = vpop.f32.mrf.mxu1 }
  0xe8   : > { %754 = vst [vmem:[%s1201_s21 + $0x68] sm:$0xff] %v469_v13  ;;  %756 = vst [vmem:[%s1201_s21 + $0x78] sm:$0xff] %v630_v14 }
  0xe9   : > { %v473_v15 = vpop.f32.mrf.mxu0  ;;  %v634_v16 = vpop.f32.mrf.mxu1 }
  0xea   : > { %757 = vst [vmem:[%s1201_s21 + $0x80] sm:$0xff] %v473_v15  ;;  %759 = vst [vmem:[%s1201_s21 + $0x90] sm:$0xff] %v634_v16 }
  0xeb   : > { %v475_v17 = vpop.f32.mrf.mxu0  ;;  %v636_v18 = vpop.f32.mrf.mxu1 }
  0xec   : > { %758 = vst [vmem:[%s1201_s21 + $0x88] sm:$0xff] %v475_v17  ;;  %760 = vst [vmem:[%s1201_s21 + $0x98] sm:$0xff] %v636_v18 }
  0xed   : > { %v477_v19 = vpop.f32.mrf.mxu0  ;;  %v638_v20 = vpop.f32.mrf.mxu1 }
  0xee   : > { %761 = vst [vmem:[%s1201_s21 + $0xa0] sm:$0xff] %v477_v19  ;;  %763 = vst [vmem:[%s1201_s21 + $0xb0] sm:$0xff] %v638_v20 }
  0xef   : > { %v479_v21 = vpop.f32.mrf.mxu0  ;;  %v640_v22 = vpop.f32.mrf.mxu1 }
  0xf0   : > { %762 = vst [vmem:[%s1201_s21 + $0xa8] sm:$0xff] %v479_v21  ;;  %764 = vst [vmem:[%s1201_s21 + $0xb8] sm:$0xff] %v640_v22 }
  0xf1   : > { %v483_v23 = vpop.f32.mrf.mxu0  ;;  %v644_v24 = vpop.f32.mrf.mxu1 }
  0xf2   : > { %765 = vst [vmem:[%s1201_s21 + $0xc0] sm:$0xff] %v483_v23  ;;  %767 = vst [vmem:[%s1201_s21 + $0xd0] sm:$0xff] %v644_v24 }
  0xf3   : > { %v485_v25 = vpop.f32.mrf.mxu0  ;;  %v646_v26 = vpop.f32.mrf.mxu1 }
  0xf4   : > { %766 = vst [vmem:[%s1201_s21 + $0xc8] sm:$0xff] %v485_v25  ;;  %768 = vst [vmem:[%s1201_s21 + $0xd8] sm:$0xff] %v646_v26 }
  0xf5   : > { %v487_v27 = vpop.f32.mrf.mxu0  ;;  %v648_v28 = vpop.f32.mrf.mxu1 }
  0xf6   : > { %769 = vst [vmem:[%s1201_s21 + $0xe0] sm:$0xff] %v487_v27  ;;  %771 = vst [vmem:[%s1201_s21 + $0xf0] sm:$0xff] %v648_v28 }
  0xf7   : > { %v489_v29 = vpop.f32.mrf.mxu0  ;;  %v650_v30 = vpop.f32.mrf.mxu1 }
  0xf8   : > { %770 = vst [vmem:[%s1201_s21 + $0xe8] sm:$0xff] %v489_v29  ;;  %772 = vst [vmem:[%s1201_s21 + $0xf8] sm:$0xff] %v650_v30 }
  0xf9   : > { %v493_v31 = vpop.f32.mrf.mxu0  ;;  %v654_v32 = vpop.f32.mrf.mxu1 }
  0xfa   : > { %773 = vst [vmem:[%s1201_s21 + $0x100] sm:$0xff] %v493_v31  ;;  %775 = vst [vmem:[%s1201_s21 + $0x110] sm:$0xff] %v654_v32 }
  0xfb   : > { %v495_v33 = vpop.f32.mrf.mxu0  ;;  %v656_v34 = vpop.f32.mrf.mxu1 }
  0xfc   : > { %774 = vst [vmem:[%s1201_s21 + $0x108] sm:$0xff] %v495_v33  ;;  %776 = vst [vmem:[%s1201_s21 + $0x118] sm:$0xff] %v656_v34 }
  0xfd   : > { %v497_v35 = vpop.f32.mrf.mxu0  ;;  %v658_v36 = vpop.f32.mrf.mxu1 }
  0xfe   : > { %777 = vst [vmem:[%s1201_s21 + $0x120] sm:$0xff] %v497_v35  ;;  %779 = vst [vmem:[%s1201_s21 + $0x130] sm:$0xff] %v658_v36 }
  0xff   : > { %v499_v37 = vpop.f32.mrf.mxu0  ;;  %v660_v38 = vpop.f32.mrf.mxu1 }
 0x100   : > { %778 = vst [vmem:[%s1201_s21 + $0x128] sm:$0xff] %v499_v37  ;;  %780 = vst [vmem:[%s1201_s21 + $0x138] sm:$0xff] %v660_v38 }
 0x101   : > { %v503_v39 = vpop.f32.mrf.mxu0  ;;  %v664_v40 = vpop.f32.mrf.mxu1 }
 0x102   : > { %781 = vst [vmem:[%s1201_s21 + $0x140] sm:$0xff] %v503_v39  ;;  %783 = vst [vmem:[%s1201_s21 + $0x150] sm:$0xff] %v664_v40 }
 0x103   : > { %v505_v41 = vpop.f32.mrf.mxu0  ;;  %v666_v42 = vpop.f32.mrf.mxu1 }
 0x104   : > { %782 = vst [vmem:[%s1201_s21 + $0x148] sm:$0xff] %v505_v41  ;;  %784 = vst [vmem:[%s1201_s21 + $0x158] sm:$0xff] %v666_v42 }
 0x105   : > { %v507_v43 = vpop.f32.mrf.mxu0  ;;  %v668_v44 = vpop.f32.mrf.mxu1 }
 0x106   : > { %785 = vst [vmem:[%s1201_s21 + $0x160] sm:$0xff] %v507_v43  ;;  %787 = vst [vmem:[%s1201_s21 + $0x170] sm:$0xff] %v668_v44 }
 0x107   : > { %v509_v45 = vpop.f32.mrf.mxu0  ;;  %v670_v46 = vpop.f32.mrf.mxu1 }
 0x108   : > { %786 = vst [vmem:[%s1201_s21 + $0x168] sm:$0xff] %v509_v45  ;;  %788 = vst [vmem:[%s1201_s21 + $0x178] sm:$0xff] %v670_v46 }
 0x109   : > { %v513_v47 = vpop.f32.mrf.mxu0  ;;  %v674_v48 = vpop.f32.mrf.mxu1 }
 0x10a   : > { %789 = vst [vmem:[%s1201_s21 + $0x180] sm:$0xff] %v513_v47  ;;  %791 = vst [vmem:[%s1201_s21 + $0x190] sm:$0xff] %v674_v48 }
 0x10b   : > { %v515_v49 = vpop.f32.mrf.mxu0  ;;  %v676_v50 = vpop.f32.mrf.mxu1 }
 0x10c   : > { %790 = vst [vmem:[%s1201_s21 + $0x188] sm:$0xff] %v515_v49  ;;  %792 = vst [vmem:[%s1201_s21 + $0x198] sm:$0xff] %v676_v50 }
 0x10d   : > { %v517_v51 = vpop.f32.mrf.mxu0  ;;  %v678_v52 = vpop.f32.mrf.mxu1 }
 0x10e   : > { %793 = vst [vmem:[%s1201_s21 + $0x1a0] sm:$0xff] %v517_v51  ;;  %795 = vst [vmem:[%s1201_s21 + $0x1b0] sm:$0xff] %v678_v52 }
 0x10f   : > { %v519_v53 = vpop.f32.mrf.mxu0  ;;  %v680_v54 = vpop.f32.mrf.mxu1 }
 0x110   : > { %794 = vst [vmem:[%s1201_s21 + $0x1a8] sm:$0xff] %v519_v53  ;;  %796 = vst [vmem:[%s1201_s21 + $0x1b8] sm:$0xff] %v680_v54 }
 0x111   : > { %v523_v55 = vpop.f32.mrf.mxu0  ;;  %v684_v56 = vpop.f32.mrf.mxu1 }
 0x112   : > { %797 = vst [vmem:[%s1201_s21 + $0x1c0] sm:$0xff] %v523_v55  ;;  %799 = vst [vmem:[%s1201_s21 + $0x1d0] sm:$0xff] %v684_v56 }
 0x113   : > { %v525_v57 = vpop.f32.mrf.mxu0  ;;  %v686_v58 = vpop.f32.mrf.mxu1 }
 0x114   : > { %798 = vst [vmem:[%s1201_s21 + $0x1c8] sm:$0xff] %v525_v57  ;;  %800 = vst [vmem:[%s1201_s21 + $0x1d8] sm:$0xff] %v686_v58 }
 0x115   : > { %v527_v59 = vpop.f32.mrf.mxu0  ;;  %v688_v9 = vpop.f32.mrf.mxu1 }
 0x116   : > { %801 = vst [vmem:[%s1201_s21 + $0x1e0] sm:$0xff] %v527_v59  ;;  %803 = vst [vmem:[%s1201_s21 + $0x1f0] sm:$0xff] %v688_v9 }
 0x117   : > { %v529_v10 = vpop.f32.mrf.mxu0  ;;  %v690_v60 = vpop.f32.mrf.mxu1 }
 0x118   : > { %802 = vst [vmem:[%s1201_s21 + $0x1e8] sm:$0xff] %v529_v10  ;;  %804 = vst [vmem:[%s1201_s21 + $0x1f8] sm:$0xff] %v690_v60 }
 0x119   : > { %v533_v2 = vpop.f32.mrf.mxu0  ;;  %v694_v61 = vpop.f32.mrf.mxu1 }
 0x11a   : > { %805 = vst [vmem:[%s1201_s21 + $0x200] sm:$0xff] %v533_v2  ;;  %807 = vst [vmem:[%s1201_s21 + $0x210] sm:$0xff] %v694_v61 }
 0x11b   : > { %v535_v62 = vpop.f32.mrf.mxu0  ;;  %v696_v63 = vpop.f32.mrf.mxu1 }
 0x11c   : > { %806 = vst [vmem:[%s1201_s21 + $0x208] sm:$0xff] %v535_v62  ;;  %808 = vst [vmem:[%s1201_s21 + $0x218] sm:$0xff] %v696_v63 }
 0x11d   : > { %v537_v0 = vpop.f32.mrf.mxu0  ;;  %v698_v1 = vpop.f32.mrf.mxu1 }
 0x11e   : > { %809 = vst [vmem:[%s1201_s21 + $0x220] sm:$0xff] %v537_v0  ;;  %811 = vst [vmem:[%s1201_s21 + $0x230] sm:$0xff] %v698_v1 }
 0x11f   : > { %v539_v3 = vpop.f32.mrf.mxu0  ;;  %v700_v4 = vpop.f32.mrf.mxu1 }
 0x120   : > { %810 = vst [vmem:[%s1201_s21 + $0x228] sm:$0xff] %v539_v3  ;;  %812 = vst [vmem:[%s1201_s21 + $0x238] sm:$0xff] %v700_v4 }
 0x121   : > { %v543_v5 = vpop.f32.mrf.mxu0  ;;  %v704_v6 = vpop.f32.mrf.mxu1 }
 0x122   : > { %813 = vst [vmem:[%s1201_s21 + $0x240] sm:$0xff] %v543_v5  ;;  %815 = vst [vmem:[%s1201_s21 + $0x250] sm:$0xff] %v704_v6 }
 0x123   : > { %v545_v7 = vpop.f32.mrf.mxu0  ;;  %v706_v8 = vpop.f32.mrf.mxu1 }
 0x124   : > { %814 = vst [vmem:[%s1201_s21 + $0x248] sm:$0xff] %v545_v7  ;;  %816 = vst [vmem:[%s1201_s21 + $0x258] sm:$0xff] %v706_v8 }
 0x125   : > { %v547_v11 = vpop.f32.mrf.mxu0  ;;  %v708_v12 = vpop.f32.mrf.mxu1 }
 0x126   : > { %817 = vst [vmem:[%s1201_s21 + $0x260] sm:$0xff] %v547_v11  ;;  %819 = vst [vmem:[%s1201_s21 + $0x270] sm:$0xff] %v708_v12 }
 0x127   : > { %v549_v13 = vpop.f32.mrf.mxu0  ;;  %v710_v14 = vpop.f32.mrf.mxu1 }
 0x128   : > { %818 = vst [vmem:[%s1201_s21 + $0x268] sm:$0xff] %v549_v13  ;;  %820 = vst [vmem:[%s1201_s21 + $0x278] sm:$0xff] %v710_v14 }
 0x129   : > { %v553_v15 = vpop.f32.mrf.mxu0  ;;  %v714_v16 = vpop.f32.mrf.mxu1 }
 0x12a   : > { %821 = vst [vmem:[%s1201_s21 + $0x280] sm:$0xff] %v553_v15  ;;  %823 = vst [vmem:[%s1201_s21 + $0x290] sm:$0xff] %v714_v16 }
 0x12b   : > { %v555_v17 = vpop.f32.mrf.mxu0  ;;  %v716_v18 = vpop.f32.mrf.mxu1 }
 0x12c   : > { %822 = vst [vmem:[%s1201_s21 + $0x288] sm:$0xff] %v555_v17  ;;  %824 = vst [vmem:[%s1201_s21 + $0x298] sm:$0xff] %v716_v18 }
 0x12d   : > { %v557_v19 = vpop.f32.mrf.mxu0  ;;  %v718_v20 = vpop.f32.mrf.mxu1 }
 0x12e   : > { %825 = vst [vmem:[%s1201_s21 + $0x2a0] sm:$0xff] %v557_v19  ;;  %827 = vst [vmem:[%s1201_s21 + $0x2b0] sm:$0xff] %v718_v20 }
 0x12f   : > { %v559_v21 = vpop.f32.mrf.mxu0  ;;  %v720_v22 = vpop.f32.mrf.mxu1 }
 0x130   : > { %826 = vst [vmem:[%s1201_s21 + $0x2a8] sm:$0xff] %v559_v21  ;;  %828 = vst [vmem:[%s1201_s21 + $0x2b8] sm:$0xff] %v720_v22 }
 0x131   : > { %v563_v23 = vpop.f32.mrf.mxu0  ;;  %v724_v24 = vpop.f32.mrf.mxu1 }
 0x132   : > { %829 = vst [vmem:[%s1201_s21 + $0x2c0] sm:$0xff] %v563_v23  ;;  %831 = vst [vmem:[%s1201_s21 + $0x2d0] sm:$0xff] %v724_v24 }
 0x133   : > { %v565_v25 = vpop.f32.mrf.mxu0  ;;  %v726_v26 = vpop.f32.mrf.mxu1 }
 0x134   : > { %830 = vst [vmem:[%s1201_s21 + $0x2c8] sm:$0xff] %v565_v25  ;;  %832 = vst [vmem:[%s1201_s21 + $0x2d8] sm:$0xff] %v726_v26 }
 0x135   : > { %v567_v27 = vpop.f32.mrf.mxu0  ;;  %v728_v28 = vpop.f32.mrf.mxu1 }
 0x136   : > { %833 = vst [vmem:[%s1201_s21 + $0x2e0] sm:$0xff] %v567_v27  ;;  %835 = vst [vmem:[%s1201_s21 + $0x2f0] sm:$0xff] %v728_v28 }
 0x137   : > { %v569_v29 = vpop.f32.mrf.mxu0  ;;  %v730_v30 = vpop.f32.mrf.mxu1 }
 0x138   : > { %834 = vst [vmem:[%s1201_s21 + $0x2e8] sm:$0xff] %v569_v29  ;;  %836 = vst [vmem:[%s1201_s21 + $0x2f8] sm:$0xff] %v730_v30 }
 0x139   : > { %v573_v31 = vpop.f32.mrf.mxu0  ;;  %v734_v32 = vpop.f32.mrf.mxu1 }
 0x13a   : > { %837 = vst [vmem:[%s1201_s21 + $0x300] sm:$0xff] %v573_v31  ;;  %839 = vst [vmem:[%s1201_s21 + $0x310] sm:$0xff] %v734_v32 }
 0x13b   : > { %v575_v33 = vpop.f32.mrf.mxu0  ;;  %v736_v34 = vpop.f32.mrf.mxu1 }
 0x13c   : > { %838 = vst [vmem:[%s1201_s21 + $0x308] sm:$0xff] %v575_v33  ;;  %840 = vst [vmem:[%s1201_s21 + $0x318] sm:$0xff] %v736_v34 }
 0x13d   : > { %v577_v35 = vpop.f32.mrf.mxu0  ;;  %v738_v36 = vpop.f32.mrf.mxu1 }
 0x13f   : > { %v578_v37 = vpop.f32.mrf.mxu0  ;;  %v739_v38 = vpop.f32.mrf.mxu1 }
 0x140 PF: > { %s14_s15 = sadd.s32 1, %s973_s15  }
 0x141   : > { %p11_p4 = scmp.ge.s32.totalorder %s14_s15, 4  }
 0x143   :  { %13 = sbr.rel (!%p11_p4) target bundleno = 1 (0x1), region = 66 }

// kernel: vae_forward.19
= control target key start
LH: loop header
LB: loop body
LE: loop exit
PB: predicated region body
PF: predicated region fallthrough
CT: control target
= control target key end

     0   :  { %s1223_s15 = smov 0   ;;  %s1619_s0 = inlined_call_operand.vmem [shape: f32[2048,32], index: 0, kind: input, shape index: {}]   ;;  %s1620_s1 = inlined_call_operand.vmem [shape: bf16[32,48], index: 1, kind: input, shape index: {}]   ;;  %s1621_s2 = inlined_call_operand.vmem [shape: f32[1,32], index: 2, kind: input, shape index: {}]   ;;  %s1622_s3 = inlined_call_operand.vmem [shape: f32[1,32], index: 3, kind: input, shape index: {}]   ;;  %s1623_s4 = inlined_call_operand.vmem [shape: f32[2048,48], index: 4, kind: output, shape index: {}]  }
   0x1 LB: > { %s1027_s16 = sadd.s32 4294967295, %s1196_s15   ;;  %p1031_p0 = scmp.ge.s32.totalorder %s1196_s15, 1  ;;  %s1196_s15 = sphi %s1223_s15, %s14_s15  }
   0x2   : > { %p163_p1 = scmp.lt.s32.totalorder %s1196_s15, 5 }
   0x4   : > { %p164_p2 = pnand %p1031_p0, %p163_p1 }
   0x5   : > { %s1032_s19 = sshll.u32 (!%p164_p2), %s1027_s16, 6 }
   0x6   : > { %167 = sbr.rel (%p164_p2) target bundleno = 283 (0x11b), region = 36  ;;  %p190_p3 = scmp.lt.s32.totalorder (!%p164_p2), %s1032_s19, 255 }
   0xb   : > { %v1188_v0 = vld [vmem:[%s1620_s1 + $0x8] sm:$0xff]   ;;  %v1189_v1 = vld [vmem:[%s1620_s1] sm:$0xff]   ;;  %s1625_s19 = smov (!%p190_p3, %s1032_s19), 255  ;;  %vm520_vm0 = vcmask 261120   ;;  %vm906_vm1 = vcmask 392192  }
   0xc   : > { %1108 = vmatprep.subr.bf16.mxu0 %v1188_v0  ;;  %1176 = vmatprep.subr.bf16.mxu1 %v1188_v0  ;;  %s1033_s22 = sshll.u32 %s1625_s19, 3  ;;  %v1243_v2 = vld [vmem:[%s1621_s2] ss:$0 sm:$0xff] }
   0xd   : > { %1109 = vmatpush3.bf16.msra.mxu0 %v1188_v0  ;;  %1178 = vmatpush3.bf16.msra.mxu1 %v1188_v0  ;;  %s1250_s27 = scalar_lea.vmem %s1619_s0, %s1033_s22  ;;  %v1255_v3 = vld [vmem:[%s1622_s3] ss:$0 sm:$0xff]  ;;  %s1486_s6 = scalar_lea.vmem %s1623_s4, %s1033_s22 }
   0xe   : > { %1110 = vmatprep.subr.bf16.mxu0 %v1189_v1  ;;  %1177 = vmatprep.subr.bf16.mxu1 %v1189_v1  ;;  %v202_v4 = vld [vmem:[%s1250_s27] sm:$0xff]  ;;  %v203_v5 = vld [vmem:[%s1250_s27 + $0x8] sm:$0xff]  ;;  %v204_v11 = vld [vmem:[%s1250_s27 + $0x10] sm:$0xff] }
   0xf   : > { %v234_v6 = vld [vmem:[%s1250_s27 + $0x100] sm:$0xff]  ;;  %v273_v7 = vmul.f32 %v1243_v2, %v202_v4  ;;  %v274_v8 = vmul.f32 %v1243_v2, %v203_v5  ;;  %v235_v9 = vld [vmem:[%s1250_s27 + $0x108] sm:$0xff]  ;;  %v205_v12 = vld [vmem:[%s1250_s27 + $0x18] sm:$0xff]  ;;  %v275_v14 = vmul.f32 %v1243_v2, %v204_v11 }
  0x10   : > { %v305_v10 = vmul.f32 %v1243_v2, %v234_v6  ;;  %v306_v13 = vmul.f32 %v1243_v2, %v235_v9  ;;  %v276_v15 = vmul.f32 %v1243_v2, %v205_v12  ;;  %v236_v16 = vld [vmem:[%s1250_s27 + $0x110] sm:$0xff]  ;;  %v237_v17 = vld [vmem:[%s1250_s27 + $0x118] sm:$0xff]  ;;  %v206_v26 = vld [vmem:[%s1250_s27 + $0x20] sm:$0xff] }
  0x11   : > { %1111 = vmatpush3.bf16.msra.mxu0 %v1189_v1  ;;  %1179 = vmatpush3.bf16.msra.mxu1 %v1189_v1  ;;  %v344_v18 = vadd.f32 %v1255_v3, %v273_v7  ;;  %v345_v19 = vadd.f32 %v1255_v3, %v274_v8  ;;  %v307_v21 = vmul.f32 %v1243_v2, %v236_v16  ;;  %v207_v27 = vld [vmem:[%s1250_s27 + $0x28] sm:$0xff]  ;;  %v238_v32 = vld [vmem:[%s1250_s27 + $0x120] sm:$0xff]  ;;  %v208_v38 = vld [vmem:[%s1250_s27 + $0x30] sm:$0xff] }
  0x12   : > { %v376_v20 = vadd.f32 %v1255_v3, %v305_v10  ;;  %v377_v22 = vadd.f32 %v1255_v3, %v306_v13  ;;  %v346_v23 = vadd.f32 %v1255_v3, %v275_v14  ;;  %v347_v24 = vadd.f32 %v1255_v3, %v276_v15  ;;  %v239_v37 = vld [vmem:[%s1250_s27 + $0x128] sm:$0xff]  ;;  %v209_v43 = vld [vmem:[%s1250_s27 + $0x38] sm:$0xff]  ;;  %v240_v52 = vld [vmem:[%s1250_s27 + $0x130] sm:$0xff] }
  0x13   : > { %v308_v25 = vmul.f32 %v1243_v2, %v237_v17  ;;  %v408_v28 = vmax.f32 %v344_v18, 0.0  ;;  %v409_v29 = vmax.f32 %v345_v19, 0.0  ;;  %v378_v31 = vadd.f32 %v1255_v3, %v307_v21  ;;  %v241_v53 = vld [vmem:[%s1250_s27 + $0x138] sm:$0xff]  ;;  %v210_v57 = vld [vmem:[%s1250_s27 + $0x40] sm:$0xff]  ;;  %v211_v62 = vld [vmem:[%s1250_s27 + $0x48] sm:$0xff] }
  0x14   : > { %v440_v30 = vmax.f32 %v376_v20, 0.0  ;;  %v441_v33 = vmax.f32 %v377_v22, 0.0  ;;  %v410_v34 = vmax.f32 %v346_v23, 0.0  ;;  %v411_v35 = vmax.f32 %v347_v24, 0.0  ;;  %v242_v5 = vld [vmem:[%s1250_s27 + $0x140] sm:$0xff]  ;;  %v243_v6 = vld [vmem:[%s1250_s27 + $0x148] sm:$0xff] }
  0x15   : > { %v379_v36 = vadd.f32 %v1255_v3, %v308_v25  ;;  %v472_v39 = vpack.c.bf16 %v409_v29, %v408_v28  ;;  %v442_v40 = vmax.f32 %v378_v31, 0.0  ;;  %v277_v41 = vmul.f32 %v1243_v2, %v206_v26  ;;  %v212_v15 = vld [vmem:[%s1250_s27 + $0x50] sm:$0xff]  ;;  %v213_v20 = vld [vmem:[%s1250_s27 + $0x58] sm:$0xff]  ;;  %v214_v31 = vld [vmem:[%s1250_s27 + $0x60] sm:$0xff] }
  0x16   : > { %v278_v42 = vmul.f32 %v1243_v2, %v207_v27  ;;  %v488_v44 = vpack.c.bf16 %v441_v33, %v440_v30  ;;  %v473_v45 = vpack.c.bf16 %v411_v35, %v410_v34  ;;  %v309_v47 = vmul.f32 %v1243_v2, %v238_v32  ;;  %v244_v21 = vld [vmem:[%s1250_s27 + $0x150] sm:$0xff]  ;;  %v245_v26 = vld [vmem:[%s1250_s27 + $0x158] sm:$0xff] }
  0x17   : > { %v443_v46 = vmax.f32 %v379_v36, 0.0  ;;  %1112 = vmatprep.mubr.msk.bf16.mxu0 %vm520_vm0, %v472_v39  ;;  %v348_v48 = vadd.f32 %v1255_v3, %v277_v41  ;;  %v310_v50 = vmul.f32 %v1243_v2, %v239_v37  ;;  %v279_v51 = vmul.f32 %v1243_v2, %v208_v38  ;;  %v215_v36 = vld [vmem:[%s1250_s27 + $0x68] sm:$0xff]  ;;  %v246_v41 = vld [vmem:[%s1250_s27 + $0x160] sm:$0xff] }
  0x18   : > { %v349_v49 = vadd.f32 %v1255_v3, %v278_v42  ;;  %1144 = vmatprep.mubr.msk.bf16.mxu1 %vm520_vm0, %v488_v44  ;;  %1113 = vmatmul.mubr.msk.bf16.vlgmr.msra.gmra.mxu0 %vm520_vm0, %v473_v45  ;;  %v380_v55 = vadd.f32 %v1255_v3, %v309_v47  ;;  %v280_v56 = vmul.f32 %v1243_v2, %v209_v43  ;;  %v216_v47 = vld [vmem:[%s1250_s27 + $0x70] sm:$0xff] }
  0x19   : > { %v489_v54 = vpack.c.bf16 %v443_v46, %v442_v40  ;;  %v412_v58 = vmax.f32 %v348_v48, 0.0  ;;  %v381_v60 = vadd.f32 %v1255_v3, %v310_v50  ;;  %v350_v61 = vadd.f32 %v1255_v3, %v279_v51  ;;  %v247_v46 = vld [vmem:[%s1250_s27 + $0x168] sm:$0xff] }
  0x1a   : > { %v413_v59 = vmax.f32 %v349_v49, 0.0  ;;  %v444_v63 = vmax.f32 %v380_v55, 0.0  ;;  %v351_v0 = vadd.f32 %v1255_v3, %v280_v56  ;;  %v311_v1 = vmul.f32 %v1243_v2, %v240_v52  ;;  %v217_v52 = vld [vmem:[%s1250_s27 + $0x78] sm:$0xff] }
  0x1b   : > { %1145 = vmatmul.mubr.msk.bf16.vlgmr.msra.gmra.mxu1 %vm520_vm0, %v489_v54  ;;  %v312_v4 = vmul.f32 %v1243_v2, %v241_v53  ;;  %v445_v8 = vmax.f32 %v381_v60, 0.0  ;;  %v414_v9 = vmax.f32 %v350_v61, 0.0  ;;  %v281_v10 = vmul.f32 %v1243_v2, %v210_v57  ;;  %v248_v61 = vld [vmem:[%s1250_s27 + $0x170] sm:$0xff] }
  0x1c   : > { %v474_v7 = vpack.c.bf16 %v413_v59, %v412_v58  ;;  %v415_v11 = vmax.f32 %v351_v0, 0.0  ;;  %v382_v12 = vadd.f32 %v1255_v3, %v311_v1  ;;  %v282_v14 = vmul.f32 %v1243_v2, %v211_v62  ;;  %v249_v62 = vld [vmem:[%s1250_s27 + $0x178] sm:$0xff] }
  0x1d   : > { %v383_v13 = vadd.f32 %v1255_v3, %v312_v4  ;;  %v490_v16 = vpack.c.bf16 %v445_v8, %v444_v63  ;;  %v352_v17 = vadd.f32 %v1255_v3, %v281_v10  ;;  %v313_v18 = vmul.f32 %v1243_v2, %v242_v5  ;;  %v218_v5 = vld [vmem:[%s1250_s27 + $0x80] sm:$0xff]  ;;  %v219_v10 = vld [vmem:[%s1250_s27 + $0x88] sm:$0xff] }
  0x1e   : > { %1116 = vmatprep.mubr.msk.bf16.mxu0 %vm520_vm0, %v474_v7  ;;  %v314_v19 = vmul.f32 %v1243_v2, %v243_v6  ;;  %v475_v22 = vpack.c.bf16 %v415_v11, %v414_v9  ;;  %v446_v23 = vmax.f32 %v382_v12, 0.0  ;;  %v353_v25 = vadd.f32 %v1255_v3, %v282_v14 }
  0x1f   : > { %v447_v24 = vmax.f32 %v383_v13, 0.0  ;;  %1148 = vmatprep.mubr.msk.bf16.mxu1 %vm520_vm0, %v490_v16  ;;  %v416_v27 = vmax.f32 %v352_v17, 0.0  ;;  %v384_v28 = vadd.f32 %v1255_v3, %v313_v18  ;;  %v283_v30 = vmul.f32 %v1243_v2, %v212_v15  ;;  %v250_v15 = vld [vmem:[%s1250_s27 + $0x180] sm:$0xff]  ;;  %v251_v16 = vld [vmem:[%s1250_s27 + $0x188] sm:$0xff] }
  0x20   : > { %v385_v29 = vadd.f32 %v1255_v3, %v314_v19  ;;  %1117 = vmatmul.mubr.msk.bf16.gmra.mxu0 %vm520_vm0, %v475_v22  ;;  %v417_v33 = vmax.f32 %v353_v25, 0.0  ;;  %v284_v34 = vmul.f32 %v1243_v2, %v213_v20  ;;  %v315_v35 = vmul.f32 %v1243_v2, %v244_v21  ;;  %v220_v25 = vld [vmem:[%s1250_s27 + $0x90] sm:$0xff] }
  0x21   : > { %v491_v32 = vpack.c.bf16 %v447_v24, %v446_v23  ;;  %v448_v37 = vmax.f32 %v384_v28, 0.0  ;;  %v354_v39 = vadd.f32 %v1255_v3, %v283_v30  ;;  %v316_v40 = vmul.f32 %v1243_v2, %v245_v26  ;;  %v221_v30 = vld [vmem:[%s1250_s27 + $0x98] sm:$0xff] }
  0x22   : > { %v449_v38 = vmax.f32 %v385_v29, 0.0  ;;  %v476_v42 = vpack.c.bf16 %v417_v33, %v416_v27  ;;  %v355_v43 = vadd.f32 %v1255_v3, %v284_v34  ;;  %v386_v44 = vadd.f32 %v1255_v3, %v315_v35 }
  0x23   : > { %1149 = vmatmul.mubr.msk.bf16.gmra.mxu1 %vm520_vm0, %v491_v32  ;;  %v285_v45 = vmul.f32 %v1243_v2, %v214_v31  ;;  %v418_v49 = vmax.f32 %v354_v39, 0.0  ;;  %v387_v50 = vadd.f32 %v1255_v3, %v316_v40  ;;  %v286_v51 = vmul.f32 %v1243_v2, %v215_v36  ;;  %v252_v31 = vld [vmem:[%s1250_s27 + $0x190] sm:$0xff]  ;;  %v253_v36 = vld [vmem:[%s1250_s27 + $0x198] sm:$0xff] }
  0x24   : > { %v492_v48 = vpack.c.bf16 %v449_v38, %v448_v37  ;;  %1120 = vmatprep.mubr.msk.bf16.mxu0 %vm520_vm0, %v476_v42  ;;  %v419_v53 = vmax.f32 %v355_v43, 0.0  ;;  %v450_v54 = vmax.f32 %v386_v44, 0.0  ;;  %v317_v56 = vmul.f32 %v1243_v2, %v246_v41  ;;  %v222_v41 = vld [vmem:[%s1250_s27 + $0xa0] sm:$0xff] }
  0x25   : > { %v356_v55 = vadd.f32 %v1255_v3, %v285_v45  ;;  %v451_v57 = vmax.f32 %v387_v50, 0.0  ;;  %v357_v58 = vadd.f32 %v1255_v3, %v286_v51  ;;  %v318_v59 = vmul.f32 %v1243_v2, %v247_v46  ;;  %v223_v46 = vld [vmem:[%s1250_s27 + $0xa8] sm:$0xff]  ;;  %v254_v51 = vld [vmem:[%s1250_s27 + $0x1a0] sm:$0xff] }
  0x26   : > { %1152 = vmatprep.mubr.msk.bf16.mxu1 %vm520_vm0, %v492_v48  ;;  %v287_v60 = vmul.f32 %v1243_v2, %v216_v47  ;;  %v477_v63 = vpack.c.bf16 %v419_v53, %v418_v49  ;;  %v388_v1 = vadd.f32 %v1255_v3, %v317_v56  ;;  %v288_v4 = vmul.f32 %v1243_v2, %v217_v52  ;;  %v255_v56 = vld [vmem:[%s1250_s27 + $0x1a8] sm:$0xff] }
  0x27   : > { %v420_v0 = vmax.f32 %v356_v55, 0.0  ;;  %v493_v6 = vpack.c.bf16 %v451_v57, %v450_v54  ;;  %v421_v7 = vmax.f32 %v357_v58, 0.0  ;;  %v389_v8 = vadd.f32 %v1255_v3, %v318_v59  ;;  %v224_v57 = vld [vmem:[%s1250_s27 + $0xb0] sm:$0xff] }
  0x28   : > { %v358_v9 = vadd.f32 %v1255_v3, %v287_v60  ;;  %1121 = vmatmul.mubr.msk.bf16.gmra.mxu0 %vm520_vm0, %v477_v63  ;;  %v452_v11 = vmax.f32 %v388_v1, 0.0  ;;  %v359_v12 = vadd.f32 %v1255_v3, %v288_v4  ;;  %v319_v13 = vmul.f32 %v1243_v2, %v248_v61 }
  0x29   : > { %v320_v14 = vmul.f32 %v1243_v2, %v249_v62  ;;  %v478_v17 = vpack.c.bf16 %v421_v7, %v420_v0  ;;  %v453_v18 = vmax.f32 %v389_v8, 0.0  ;;  %v289_v20 = vmul.f32 %v1243_v2, %v218_v5  ;;  %v225_v62 = vld [vmem:[%s1250_s27 + $0xb8] sm:$0xff] }
  0x2a   : > { %v422_v19 = vmax.f32 %v358_v9, 0.0  ;;  %v423_v21 = vmax.f32 %v359_v12, 0.0  ;;  %v390_v22 = vadd.f32 %v1255_v3, %v319_v13  ;;  %v290_v24 = vmul.f32 %v1243_v2, %v219_v10  ;;  %v256_v9 = vld [vmem:[%s1250_s27 + $0x1b0] sm:$0xff]  ;;  %v257_v10 = vld [vmem:[%s1250_s27 + $0x1b8] sm:$0xff] }
  0x2b   : > { %1153 = vmatmul.mubr.msk.bf16.gmra.mxu1 %vm520_vm0, %v493_v6  ;;  %v391_v23 = vadd.f32 %v1255_v3, %v320_v14  ;;  %1124 = vmatprep.mubr.msk.bf16.mxu0 %vm520_vm0, %v478_v17  ;;  %v494_v26 = vpack.c.bf16 %v453_v18, %v452_v11  ;;  %v360_v27 = vadd.f32 %v1255_v3, %v289_v20  ;;  %v227_v20 = vld [vmem:[%s1250_s27 + $0xc8] sm:$0xff] }
  0x2c   : > { %v321_v28 = vmul.f32 %v1243_v2, %v250_v15  ;;  %v322_v29 = vmul.f32 %v1243_v2, %v251_v16  ;;  %v479_v32 = vpack.c.bf16 %v423_v21, %v422_v19  ;;  %v454_v33 = vmax.f32 %v390_v22, 0.0  ;;  %v226_v15 = vld [vmem:[%s1250_s27 + $0xc0] sm:$0xff] }
  0x2d   : > { %v455_v34 = vmax.f32 %v391_v23, 0.0  ;;  %v361_v35 = vadd.f32 %v1255_v3, %v290_v24  ;;  %1156 = vmatprep.mubr.msk.bf16.mxu1 %vm520_vm0, %v494_v26  ;;  %v424_v37 = vmax.f32 %v360_v27, 0.0  ;;  %v291_v40 = vmul.f32 %v1243_v2, %v220_v25  ;;  %v258_v25 = vld [vmem:[%s1250_s27 + $0x1c0] sm:$0xff]  ;;  %v259_v26 = vld [vmem:[%s1250_s27 + $0x1c8] sm:$0xff] }
  0x2e   : > { %v392_v38 = vadd.f32 %v1255_v3, %v321_v28  ;;  %v393_v39 = vadd.f32 %v1255_v3, %v322_v29  ;;  %v292_v44 = vmul.f32 %v1243_v2, %v221_v30  ;;  %v323_v45 = vmul.f32 %v1243_v2, %v252_v31 }
  0x2f   : > { %v495_v42 = vpack.c.bf16 %v455_v34, %v454_v33  ;;  %v425_v43 = vmax.f32 %v361_v35, 0.0  ;;  %v362_v49 = vadd.f32 %v1255_v3, %v291_v40  ;;  %v324_v50 = vmul.f32 %v1243_v2, %v253_v36  ;;  %v228_v35 = vld [vmem:[%s1250_s27 + $0xd0] sm:$0xff]  ;;  %v229_v40 = vld [vmem:[%s1250_s27 + $0xd8] sm:$0xff] }
  0x30   : > { %v456_v47 = vmax.f32 %v392_v38, 0.0  ;;  %v457_v48 = vmax.f32 %v393_v39, 0.0  ;;  %1125 = vmatmul.mubr.msk.bf16.gmra.mxu0 %vm520_vm0, %v479_v32  ;;  %v363_v53 = vadd.f32 %v1255_v3, %v292_v44  ;;  %v394_v54 = vadd.f32 %v1255_v3, %v323_v45 }
  0x31   : > { %v480_v52 = vpack.c.bf16 %v425_v43, %v424_v37  ;;  %v293_v55 = vmul.f32 %v1243_v2, %v222_v41  ;;  %v426_v59 = vmax.f32 %v362_v49, 0.0  ;;  %v395_v60 = vadd.f32 %v1255_v3, %v324_v50  ;;  %v260_v41 = vld [vmem:[%s1250_s27 + $0x1d0] sm:$0xff] }
  0x32   : > { %v496_v58 = vpack.c.bf16 %v457_v48, %v456_v47  ;;  %v294_v61 = vmul.f32 %v1243_v2, %v223_v46  ;;  %v427_v63 = vmax.f32 %v363_v53, 0.0  ;;  %v458_v0 = vmax.f32 %v394_v54, 0.0  ;;  %v261_v46 = vld [vmem:[%s1250_s27 + $0x1d8] sm:$0xff] }
  0x33   : > { %1157 = vmatmul.mubr.msk.bf16.gmra.mxu1 %vm520_vm0, %v495_v42  ;;  %1128 = vmatprep.mubr.msk.bf16.mxu0 %vm520_vm0, %v480_v52  ;;  %v364_v1 = vadd.f32 %v1255_v3, %v293_v55  ;;  %v325_v4 = vmul.f32 %v1243_v2, %v254_v51  ;;  %v459_v5 = vmax.f32 %v395_v60, 0.0  ;;  %v326_v7 = vmul.f32 %v1243_v2, %v255_v56  ;;  %v230_v51 = vld [vmem:[%s1250_s27 + $0xe0] sm:$0xff]  ;;  %v231_v56 = vld [vmem:[%s1250_s27 + $0xe8] sm:$0xff] }
  0x34   : > { %1160 = vmatprep.mubr.msk.bf16.mxu1 %vm520_vm0, %v496_v58  ;;  %v365_v6 = vadd.f32 %v1255_v3, %v294_v61  ;;  %v295_v8 = vmul.f32 %v1243_v2, %v224_v57  ;;  %v481_v11 = vpack.c.bf16 %v427_v63, %v426_v59  ;;  %v296_v14 = vmul.f32 %v1243_v2, %v225_v62  ;;  %v262_v61 = vld [vmem:[%s1250_s27 + $0x1e0] sm:$0xff] }
  0x35   : > { %v428_v12 = vmax.f32 %v364_v1, 0.0  ;;  %v396_v13 = vadd.f32 %v1255_v3, %v325_v4  ;;  %v497_v16 = vpack.c.bf16 %v459_v5, %v458_v0  ;;  %v397_v18 = vadd.f32 %v1255_v3, %v326_v7  ;;  %v263_v4 = vld [vmem:[%s1250_s27 + $0x1e8] sm:$0xff]  ;;  %v232_v5 = vld [vmem:[%s1250_s27 + $0xf0] sm:$0xff] }
  0x36   : > { %v429_v17 = vmax.f32 %v365_v6, 0.0  ;;  %v366_v19 = vadd.f32 %v1255_v3, %v295_v8  ;;  %v367_v22 = vadd.f32 %v1255_v3, %v296_v14  ;;  %v327_v23 = vmul.f32 %v1243_v2, %v256_v9 }
  0x37   : > { %v460_v21 = vmax.f32 %v396_v13, 0.0  ;;  %v328_v24 = vmul.f32 %v1243_v2, %v257_v10  ;;  %v461_v28 = vmax.f32 %v397_v18, 0.0  ;;  %v297_v30 = vmul.f32 %v1243_v2, %v226_v15  ;;  %v233_v10 = vld [vmem:[%s1250_s27 + $0xf8] sm:$0xff]  ;;  %v264_v18 = vld [vmem:[%s1250_s27 + $0x1f0] sm:$0xff] }
  0x38   : > { %v482_v27 = vpack.c.bf16 %v429_v17, %v428_v12  ;;  %v430_v29 = vmax.f32 %v366_v19, 0.0  ;;  %1129 = vmatmul.mubr.msk.bf16.gmra.mxu0 %vm520_vm0, %v481_v11  ;;  %v431_v31 = vmax.f32 %v367_v22, 0.0  ;;  %v398_v32 = vadd.f32 %v1255_v3, %v327_v23  ;;  %v265_v19 = vld [vmem:[%s1250_s27 + $0x1f8] sm:$0xff] }
  0x39   : > { %v399_v33 = vadd.f32 %v1255_v3, %v328_v24  ;;  %v298_v34 = vmul.f32 %v1243_v2, %v227_v20  ;;  %v498_v36 = vpack.c.bf16 %v461_v28, %v460_v21  ;;  %v368_v37 = vadd.f32 %v1255_v3, %v297_v30 }
  0x3a   : > { %1132 = vmatprep.mubr.msk.bf16.mxu0 %vm520_vm0, %v482_v27  ;;  %v329_v38 = vmul.f32 %v1243_v2, %v258_v25  ;;  %v330_v39 = vmul.f32 %v1243_v2, %v259_v26  ;;  %v483_v42 = vpack.c.bf16 %v431_v31, %v430_v29  ;;  %v462_v43 = vmax.f32 %v398_v32, 0.0 }
  0x3b   : > { %1161 = vmatmul.mubr.msk.bf16.gmra.mxu1 %vm520_vm0, %v497_v16  ;;  %v463_v44 = vmax.f32 %v399_v33, 0.0  ;;  %v369_v45 = vadd.f32 %v1255_v3, %v298_v34  ;;  %v432_v47 = vmax.f32 %v368_v37, 0.0  ;;  %v299_v50 = vmul.f32 %v1243_v2, %v228_v35 }
  0x3c   : > { %1164 = vmatprep.mubr.msk.bf16.mxu1 %vm520_vm0, %v498_v36  ;;  %v400_v48 = vadd.f32 %v1255_v3, %v329_v38  ;;  %v401_v49 = vadd.f32 %v1255_v3, %v330_v39  ;;  %v300_v54 = vmul.f32 %v1243_v2, %v229_v40  ;;  %v331_v55 = vmul.f32 %v1243_v2, %v260_v41 }
  0x3d   : > { %v499_v52 = vpack.c.bf16 %v463_v44, %v462_v43  ;;  %v433_v53 = vmax.f32 %v369_v45, 0.0  ;;  %v370_v59 = vadd.f32 %v1255_v3, %v299_v50  ;;  %v332_v60 = vmul.f32 %v1243_v2, %v261_v46 }
  0x3e   : > { %v464_v57 = vmax.f32 %v400_v48, 0.0  ;;  %v465_v58 = vmax.f32 %v401_v49, 0.0  ;;  %v371_v63 = vadd.f32 %v1255_v3, %v300_v54  ;;  %v402_v0 = vadd.f32 %v1255_v3, %v331_v55 }
  0x3f   : > { %v484_v62 = vpack.c.bf16 %v433_v53, %v432_v47  ;;  %v301_v1 = vmul.f32 %v1243_v2, %v230_v51  ;;  %v434_v7 = vmax.f32 %v370_v59, 0.0  ;;  %v403_v8 = vadd.f32 %v1255_v3, %v332_v60 }
  0x40   : > { %v500_v6 = vpack.c.bf16 %v465_v58, %v464_v57  ;;  %v302_v9 = vmul.f32 %v1243_v2, %v231_v56  ;;  %1133 = vmatmul.mubr.msk.bf16.gmra.mxu0 %vm520_vm0, %v483_v42  ;;  %v435_v11 = vmax.f32 %v371_v63, 0.0  ;;  %v333_v13 = vmul.f32 %v1243_v2, %v262_v61 }
  0x41   : > { %v372_v12 = vadd.f32 %v1255_v3, %v301_v1  ;;  %1136 = vmatprep.mubr.msk.bf16.mxu0 %vm520_vm0, %v484_v62  ;;  %v466_v14 = vmax.f32 %v402_v0, 0.0  ;;  %v334_v16 = vmul.f32 %v1243_v2, %v263_v4  ;;  %v303_v17 = vmul.f32 %v1243_v2, %v232_v5 }
  0x42   : > { %v373_v15 = vadd.f32 %v1255_v3, %v302_v9  ;;  %v467_v20 = vmax.f32 %v403_v8, 0.0  ;;  %v404_v22 = vadd.f32 %v1255_v3, %v333_v13  ;;  %v304_v23 = vmul.f32 %v1243_v2, %v233_v10 }
  0x43   : > { %1165 = vmatmul.mubr.msk.bf16.gmra.mxu1 %vm520_vm0, %v499_v52  ;;  %v436_v21 = vmax.f32 %v372_v12, 0.0  ;;  %v485_v24 = vpack.c.bf16 %v435_v11, %v434_v7  ;;  %v405_v26 = vadd.f32 %v1255_v3, %v334_v16  ;;  %v374_v27 = vadd.f32 %v1255_v3, %v303_v17 }
  0x44   : > { %1168 = vmatprep.mubr.msk.bf16.mxu1 %vm520_vm0, %v500_v6  ;;  %v437_v25 = vmax.f32 %v373_v15, 0.0  ;;  %v468_v28 = vmax.f32 %v404_v22, 0.0  ;;  %v375_v29 = vadd.f32 %v1255_v3, %v304_v23  ;;  %v335_v30 = vmul.f32 %v1243_v2, %v264_v18 }
  0x45   : > { %v336_v31 = vmul.f32 %v1243_v2, %v265_v19  ;;  %v469_v33 = vmax.f32 %v405_v26, 0.0  ;;  %v501_v34 = vpack.c.bf16 %v467_v20, %v466_v14  ;;  %v438_v38 = vmax.f32 %v374_v27, 0.0 }
  0x46   : > { %v486_v32 = vpack.c.bf16 %v437_v25, %v436_v21  ;;  %v406_v35 = vadd.f32 %v1255_v3, %v335_v30  ;;  %v439_v39 = vmax.f32 %v375_v29, 0.0 }
  0x47   : > { %v407_v36 = vadd.f32 %v1255_v3, %v336_v31  ;;  %v502_v37 = vpack.c.bf16 %v469_v33, %v468_v28 }
  0x48   : > { %1137 = vmatmul.mubr.msk.bf16.gmra.mxu0 %vm520_vm0, %v485_v24  ;;  %v470_v40 = vmax.f32 %v406_v35, 0.0  ;;  %v487_v2 = vpack.c.bf16 %v439_v39, %v438_v38 }
  0x49   : > { %1140 = vmatprep.mubr.msk.bf16.mxu0 %vm520_vm0, %v486_v32  ;;  %v471_v41 = vmax.f32 %v407_v36, 0.0 }
  0x4b   : > { %1169 = vmatmul.mubr.msk.bf16.gmra.mxu1 %vm520_vm0, %v501_v34  ;;  %v503_v42 = vpack.c.bf16 %v471_v41, %v470_v40 }
  0x4c   : > { %1172 = vmatprep.mubr.msk.bf16.mxu1 %vm520_vm0, %v502_v37 }
  0x50   : > { %1141 = vmatmul.mubr.msk.bf16.gmra.mxu0 %vm520_vm0, %v487_v2 }
  0x53   : > { %1173 = vmatmul.mubr.msk.bf16.gmra.mxu1 %vm520_vm0, %v503_v42 }
  0xd8   : > { %v1114_v3 = vpop.f32.mrf.mxu0 }
  0xd9   : > { %909 = vst.msk [vmem:[%s1486_s6 + $0x10] sm:$0xff] %vm906_vm1, %v1114_v3 }
  0xda   : > { %v651_v44 = vpop.f32.mrf.mxu0 }
  0xdb   : > { %v1146_v43 = vpop.f32.mrf.mxu1  ;;  %907 = vst.msk [vmem:[%s1486_s6] sm:$0xff] %vm906_vm1, %v651_v44 }
  0xdc   : > { %941 = vst.msk [vmem:[%s1486_s6 + $0x110] sm:$0xff] %vm906_vm1, %v1146_v43  ;;  %v1115_v46 = vpop.f32.mrf.mxu0 }
  0xdd   : > { %v779_v45 = vpop.f32.mrf.mxu1  ;;  %910 = vst.msk [vmem:[%s1486_s6 + $0x18] sm:$0xff] %vm906_vm1, %v1115_v46 }
  0xde   : > { %939 = vst.msk [vmem:[%s1486_s6 + $0x100] sm:$0xff] %vm906_vm1, %v779_v45  ;;  %v654_v48 = vpop.f32.mrf.mxu0 }
  0xdf   : > { %v1147_v47 = vpop.f32.mrf.mxu1  ;;  %908 = vst.msk [vmem:[%s1486_s6 + $0x8] sm:$0xff] %vm906_vm1, %v654_v48 }
  0xe0   : > { %942 = vst.msk [vmem:[%s1486_s6 + $0x118] sm:$0xff] %vm906_vm1, %v1147_v47  ;;  %v1118_v50 = vpop.f32.mrf.mxu0 }
  0xe1   : > { %v782_v49 = vpop.f32.mrf.mxu1  ;;  %913 = vst.msk [vmem:[%s1486_s6 + $0x30] sm:$0xff] %vm906_vm1, %v1118_v50 }
  0xe2   : > { %940 = vst.msk [vmem:[%s1486_s6 + $0x108] sm:$0xff] %vm906_vm1, %v782_v49  ;;  %v667_v52 = vpop.f32.mrf.mxu0 }
  0xe3   : > { %v1150_v51 = vpop.f32.mrf.mxu1  ;;  %911 = vst.msk [vmem:[%s1486_s6 + $0x20] sm:$0xff] %vm906_vm1, %v667_v52 }
  0xe4   : > { %945 = vst.msk [vmem:[%s1486_s6 + $0x130] sm:$0xff] %vm906_vm1, %v1150_v51  ;;  %v1119_v54 = vpop.f32.mrf.mxu0 }
  0xe5   : > { %v795_v53 = vpop.f32.mrf.mxu1  ;;  %914 = vst.msk [vmem:[%s1486_s6 + $0x38] sm:$0xff] %vm906_vm1, %v1119_v54 }
  0xe6   : > { %943 = vst.msk [vmem:[%s1486_s6 + $0x120] sm:$0xff] %vm906_vm1, %v795_v53  ;;  %v670_v56 = vpop.f32.mrf.mxu0 }
  0xe7   : > { %v1151_v55 = vpop.f32.mrf.mxu1  ;;  %912 = vst.msk [vmem:[%s1486_s6 + $0x28] sm:$0xff] %vm906_vm1, %v670_v56 }
  0xe8   : > { %946 = vst.msk [vmem:[%s1486_s6 + $0x138] sm:$0xff] %vm906_vm1, %v1151_v55  ;;  %v1122_v58 = vpop.f32.mrf.mxu0 }
  0xe9   : > { %v798_v57 = vpop.f32.mrf.mxu1  ;;  %917 = vst.msk [vmem:[%s1486_s6 + $0x50] sm:$0xff] %vm906_vm1, %v1122_v58 }
  0xea   : > { %944 = vst.msk [vmem:[%s1486_s6 + $0x128] sm:$0xff] %vm906_vm1, %v798_v57  ;;  %v683_v60 = vpop.f32.mrf.mxu0 }
  0xeb   : > { %v1154_v59 = vpop.f32.mrf.mxu1  ;;  %915 = vst.msk [vmem:[%s1486_s6 + $0x40] sm:$0xff] %vm906_vm1, %v683_v60 }
  0xec   : > { %949 = vst.msk [vmem:[%s1486_s6 + $0x150] sm:$0xff] %vm906_vm1, %v1154_v59  ;;  %v1123_v62 = vpop.f32.mrf.mxu0 }
  0xed   : > { %v811_v61 = vpop.f32.mrf.mxu1  ;;  %918 = vst.msk [vmem:[%s1486_s6 + $0x58] sm:$0xff] %vm906_vm1, %v1123_v62 }
  0xee   : > { %947 = vst.msk [vmem:[%s1486_s6 + $0x140] sm:$0xff] %vm906_vm1, %v811_v61  ;;  %v686_v0 = vpop.f32.mrf.mxu0 }
  0xef   : > { %v1155_v63 = vpop.f32.mrf.mxu1  ;;  %916 = vst.msk [vmem:[%s1486_s6 + $0x48] sm:$0xff] %vm906_vm1, %v686_v0 }
  0xf0   : > { %950 = vst.msk [vmem:[%s1486_s6 + $0x158] sm:$0xff] %vm906_vm1, %v1155_v63  ;;  %v1126_v4 = vpop.f32.mrf.mxu0 }
  0xf1   : > { %v814_v1 = vpop.f32.mrf.mxu1  ;;  %921 = vst.msk [vmem:[%s1486_s6 + $0x70] sm:$0xff] %vm906_vm1, %v1126_v4 }
  0xf2   : > { %948 = vst.msk [vmem:[%s1486_s6 + $0x148] sm:$0xff] %vm906_vm1, %v814_v1  ;;  %v699_v6 = vpop.f32.mrf.mxu0 }
  0xf3   : > { %v1158_v5 = vpop.f32.mrf.mxu1  ;;  %919 = vst.msk [vmem:[%s1486_s6 + $0x60] sm:$0xff] %vm906_vm1, %v699_v6 }
  0xf4   : > { %953 = vst.msk [vmem:[%s1486_s6 + $0x170] sm:$0xff] %vm906_vm1, %v1158_v5  ;;  %v1127_v8 = vpop.f32.mrf.mxu0 }
  0xf5   : > { %v827_v7 = vpop.f32.mrf.mxu1  ;;  %922 = vst.msk [vmem:[%s1486_s6 + $0x78] sm:$0xff] %vm906_vm1, %v1127_v8 }
  0xf6   : > { %951 = vst.msk [vmem:[%s1486_s6 + $0x160] sm:$0xff] %vm906_vm1, %v827_v7  ;;  %v702_v10 = vpop.f32.mrf.mxu0 }
  0xf7   : > { %v1159_v9 = vpop.f32.mrf.mxu1  ;;  %920 = vst.msk [vmem:[%s1486_s6 + $0x68] sm:$0xff] %vm906_vm1, %v702_v10 }
  0xf8   : > { %954 = vst.msk [vmem:[%s1486_s6 + $0x178] sm:$0xff] %vm906_vm1, %v1159_v9  ;;  %v1130_v12 = vpop.f32.mrf.mxu0 }
  0xf9   : > { %v830_v11 = vpop.f32.mrf.mxu1  ;;  %925 = vst.msk [vmem:[%s1486_s6 + $0x90] sm:$0xff] %vm906_vm1, %v1130_v12 }
  0xfa   : > { %952 = vst.msk [vmem:[%s1486_s6 + $0x168] sm:$0xff] %vm906_vm1, %v830_v11  ;;  %v715_v14 = vpop.f32.mrf.mxu0 }
  0xfb   : > { %v1162_v13 = vpop.f32.mrf.mxu1  ;;  %923 = vst.msk [vmem:[%s1486_s6 + $0x80] sm:$0xff] %vm906_vm1, %v715_v14 }
  0xfc   : > { %957 = vst.msk [vmem:[%s1486_s6 + $0x190] sm:$0xff] %vm906_vm1, %v1162_v13  ;;  %v1131_v16 = vpop.f32.mrf.mxu0 }
  0xfd   : > { %v843_v15 = vpop.f32.mrf.mxu1  ;;  %926 = vst.msk [vmem:[%s1486_s6 + $0x98] sm:$0xff] %vm906_vm1, %v1131_v16 }
  0xfe   : > { %955 = vst.msk [vmem:[%s1486_s6 + $0x180] sm:$0xff] %vm906_vm1, %v843_v15  ;;  %v718_v18 = vpop.f32.mrf.mxu0 }
  0xff   : > { %v1163_v17 = vpop.f32.mrf.mxu1  ;;  %924 = vst.msk [vmem:[%s1486_s6 + $0x88] sm:$0xff] %vm906_vm1, %v718_v18 }
 0x100   : > { %958 = vst.msk [vmem:[%s1486_s6 + $0x198] sm:$0xff] %vm906_vm1, %v1163_v17  ;;  %v1134_v20 = vpop.f32.mrf.mxu0 }
 0x101   : > { %v846_v19 = vpop.f32.mrf.mxu1  ;;  %929 = vst.msk [vmem:[%s1486_s6 + $0xb0] sm:$0xff] %vm906_vm1, %v1134_v20 }
 0x102   : > { %956 = vst.msk [vmem:[%s1486_s6 + $0x188] sm:$0xff] %vm906_vm1, %v846_v19  ;;  %v731_v22 = vpop.f32.mrf.mxu0 }
 0x103   : > { %v1166_v21 = vpop.f32.mrf.mxu1  ;;  %927 = vst.msk [vmem:[%s1486_s6 + $0xa0] sm:$0xff] %vm906_vm1, %v731_v22 }
 0x104   : > { %961 = vst.msk [vmem:[%s1486_s6 + $0x1b0] sm:$0xff] %vm906_vm1, %v1166_v21  ;;  %v1135_v24 = vpop.f32.mrf.mxu0 }
 0x105   : > { %v859_v23 = vpop.f32.mrf.mxu1  ;;  %930 = vst.msk [vmem:[%s1486_s6 + $0xb8] sm:$0xff] %vm906_vm1, %v1135_v24 }
 0x106   : > { %959 = vst.msk [vmem:[%s1486_s6 + $0x1a0] sm:$0xff] %vm906_vm1, %v859_v23  ;;  %v734_v26 = vpop.f32.mrf.mxu0 }
 0x107   : > { %v1167_v25 = vpop.f32.mrf.mxu1  ;;  %928 = vst.msk [vmem:[%s1486_s6 + $0xa8] sm:$0xff] %vm906_vm1, %v734_v26 }
 0x108   : > { %962 = vst.msk [vmem:[%s1486_s6 + $0x1b8] sm:$0xff] %vm906_vm1, %v1167_v25  ;;  %v1138_v28 = vpop.f32.mrf.mxu0 }
 0x109   : > { %v862_v27 = vpop.f32.mrf.mxu1  ;;  %933 = vst.msk [vmem:[%s1486_s6 + $0xd0] sm:$0xff] %vm906_vm1, %v1138_v28 }
 0x10a   : > { %960 = vst.msk [vmem:[%s1486_s6 + $0x1a8] sm:$0xff] %vm906_vm1, %v862_v27  ;;  %v747_v30 = vpop.f32.mrf.mxu0 }
 0x10b   : > { %v1170_v29 = vpop.f32.mrf.mxu1  ;;  %931 = vst.msk [vmem:[%s1486_s6 + $0xc0] sm:$0xff] %vm906_vm1, %v747_v30 }
 0x10c   : > { %965 = vst.msk [vmem:[%s1486_s6 + $0x1d0] sm:$0xff] %vm906_vm1, %v1170_v29  ;;  %v1139_v32 = vpop.f32.mrf.mxu0 }
 0x10d   : > { %v875_v31 = vpop.f32.mrf.mxu1  ;;  %934 = vst.msk [vmem:[%s1486_s6 + $0xd8] sm:$0xff] %vm906_vm1, %v1139_v32 }
 0x10e   : > { %963 = vst.msk [vmem:[%s1486_s6 + $0x1c0] sm:$0xff] %vm906_vm1, %v875_v31  ;;  %v750_v34 = vpop.f32.mrf.mxu0 }
 0x10f   : > { %v1171_v33 = vpop.f32.mrf.mxu1  ;;  %932 = vst.msk [vmem:[%s1486_s6 + $0xc8] sm:$0xff] %vm906_vm1, %v750_v34 }
 0x110   : > { %966 = vst.msk [vmem:[%s1486_s6 + $0x1d8] sm:$0xff] %vm906_vm1, %v1171_v33  ;;  %v1142_v36 = vpop.f32.mrf.mxu0 }
 0x111   : > { %v878_v35 = vpop.f32.mrf.mxu1  ;;  %937 = vst.msk [vmem:[%s1486_s6 + $0xf0] sm:$0xff] %vm906_vm1, %v1142_v36 }
 0x112   : > { %964 = vst.msk [vmem:[%s1486_s6 + $0x1c8] sm:$0xff] %vm906_vm1, %v878_v35  ;;  %v763_v38 = vpop.f32.mrf.mxu0 }
 0x113   : > { %v1174_v37 = vpop.f32.mrf.mxu1  ;;  %935 = vst.msk [vmem:[%s1486_s6 + $0xe0] sm:$0xff] %vm906_vm1, %v763_v38 }
 0x114   : > { %969 = vst.msk [vmem:[%s1486_s6 + $0x1f0] sm:$0xff] %vm906_vm1, %v1174_v37  ;;  %v1143_v40 = vpop.f32.mrf.mxu0 }
 0x115   : > { %v891_v39 = vpop.f32.mrf.mxu1  ;;  %938 = vst.msk [vmem:[%s1486_s6 + $0xf8] sm:$0xff] %vm906_vm1, %v1143_v40 }
 0x116   : > { %967 = vst.msk [vmem:[%s1486_s6 + $0x1e0] sm:$0xff] %vm906_vm1, %v891_v39  ;;  %v766_v2 = vpop.f32.mrf.mxu0 }
 0x117   : > { %v1175_v41 = vpop.f32.mrf.mxu1  ;;  %936 = vst.msk [vmem:[%s1486_s6 + $0xe8] sm:$0xff] %vm906_vm1, %v766_v2 }
 0x118   : > { %970 = vst.msk [vmem:[%s1486_s6 + $0x1f8] sm:$0xff] %vm906_vm1, %v1175_v41 }
 0x119   : > { %v894_v42 = vpop.f32.mrf.mxu1 }
 0x11a   : > { %968 = vst.msk [vmem:[%s1486_s6 + $0x1e8] sm:$0xff] %vm906_vm1, %v894_v42 }
 0x11b PF: > { %s14_s15 = sadd.s32 1, %s1196_s15  }
 0x11c   : > { %p11_p4 = scmp.ge.s32.totalorder %s14_s15, 6  }
 0x11e   :  { %13 = sbr.rel (!%p11_p4) target bundleno = 1 (0x1), region = 66 }

</bundles_post_ra>
